<compile_context>
chip_gen: v5e
topology: v5e:2x2
jax: 0.10.0
libtpu: 0.0.40
codegen_flags: <defaults>
</compile_context>

<pallas_src>
import functools

import jax
import jax.numpy as jnp
from jax import lax
from jax.experimental import pallas as pl
from jax.experimental.pallas import tpu as pltpu

LRELU_SLOPE = 0.01   # nn.LeakyReLU() default
C_PAD = 128          # lane-dense channel width used inside the kernel


def _backbone_kernel(x_ref, w_ref, b_ref, o_ref, *pad_refs, sizes, batch):
    """Fused 4-block backbone for one batch block.

    x_ref : (B, H, W, C_PAD)        bf16 input tile (NHWC, channel-padded)
    w_ref : (4, 9*C_PAD, C_PAD)     im2col weights, bf16, channel-padded
    b_ref : (4, C_PAD)              biases, f32, channel-padded
    o_ref : (B, hf*wf, C_PAD)       f32 output tile
    pad_refs[l] : (B, H_l+2, W_l+2, C_PAD) bf16 scratch (halo + activation)
    """
    B = batch
    act = x_ref[...]                                     # (B, H, W, C_PAD) bf16

    for l in range(4):
        H, W = sizes[l]
        pad = pad_refs[l]

        # Zero ONLY the 1-wide halo (every grid step -> megacore safe); the
        # interior is fully overwritten below.
        zrow = jnp.zeros((B, 1, W + 2, C_PAD), jnp.bfloat16)
        pad[:, 0:1, :, :] = zrow
        pad[:, H + 1:H + 2, :, :] = zrow
        zcol = jnp.zeros((B, H, 1, C_PAD), jnp.bfloat16)
        pad[:, 1:H + 1, 0:1, :] = zcol
        pad[:, 1:H + 1, W + 1:W + 2, :] = zcol

        # Single bf16 cast per element, written once into the padded buffer.
        pad[:, 1:H + 1, 1:W + 1, :] = act.astype(jnp.bfloat16)

        # 3x3 conv as 9 accumulating K=128 matmuls straight off the scratch
        # ref (no patch materialization).  f32 accumulation on the MXU.
        acc = None
        for dh in range(3):
            for dw in range(3):
                lhs = pad[:, dh:dh + H, dw:dw + W, :].reshape(B * H * W, C_PAD)
                k0 = (dh * 3 + dw) * C_PAD
                rhs = w_ref[l, k0:k0 + C_PAD, :]
                p = jnp.dot(lhs, rhs, preferred_element_type=jnp.float32)
                acc = p if acc is None else acc + p      # (B*H*W, C_PAD) f32

        # MaxPool2d(2), then bias (commutes with max), then LeakyReLU, in f32.
        Hh, Wh = H // 2, W // 2
        y = acc.reshape(B * Hh, 2, Wh, 2, C_PAD)
        y = jnp.max(y, axis=(1, 3))                      # (B*Hh, Wh, C_PAD)
        y = y + b_ref[l:l + 1, :].reshape(1, 1, C_PAD)
        y = jnp.where(y > 0, y, LRELU_SLOPE * y)
        act = y.reshape(B, Hh, Wh, C_PAD)                # f32

    hf, wf = sizes[3][0] // 2, sizes[3][1] // 2
    o_ref[...] = act.reshape(B, hf * wf, C_PAD).astype(o_ref.dtype)


def _pack_params(params):
    """(3,3,Cin,Cout) HWIO weights -> stacked, channel-padded im2col form."""
    ws, bs = [], []
    for (w, b) in params:
        cin, cout = w.shape[2], w.shape[3]
        w_p = jnp.zeros((3, 3, C_PAD, C_PAD), jnp.float32)
        w_p = w_p.at[:, :, :cin, :cout].set(w)
        b_p = jnp.zeros((C_PAD,), jnp.float32).at[:cout].set(b)
        # K index = (dh*3 + dw)*C_PAD + c, matching the kernel's window order.
        ws.append(w_p.reshape(9 * C_PAD, C_PAD))
        bs.append(b_p)
    return jnp.stack(ws).astype(jnp.bfloat16), jnp.stack(bs)


def _pick_batch_block(n):
    # Fold batch into the matmul M dim, but keep >= 2 grid steps when possible
    # so megacore ("parallel") and input-DMA double-buffering have work.
    for cand in (8, 4, 2):
        if n % cand == 0 and n // cand >= 2:
            return cand
    return 1


def backbone_forward(state_nchw, params, *, batch_block=None):
    """Pallas implementation of Backbone.forward. state_nchw: (N, 12, H, W)."""
    N, C, H, W = state_nchw.shape
    assert H % 16 == 0 and W % 16 == 0, "4 pool-by-2 stages need H, W % 16 == 0"
    sizes = tuple((H >> l, W >> l) for l in range(4))
    hf, wf = H // 16, W // 16

    if batch_block is None:
        batch_block = _pick_batch_block(N)
    assert N % batch_block == 0
    B = batch_block

    # NCHW -> NHWC, zero-pad channels to the 128-lane width, cast once to
    # bf16: lane-dense input DMA and a dense layer-0 interior store.
    x = jnp.transpose(state_nchw, (0, 2, 3, 1))
    x = jnp.pad(x, ((0, 0), (0, 0), (0, 0), (0, C_PAD - C)))
    x = x.astype(jnp.bfloat16)

    w_stack, b_stack = _pack_params(params)

    kernel = functools.partial(_backbone_kernel, sizes=sizes, batch=B)

    flops = 2 * N * sum(h * w for h, w in sizes) * (9 * C_PAD) * C_PAD
    bytes_accessed = (x.size * 2 + w_stack.size * 2 + b_stack.size * 4
                      + N * hf * wf * C_PAD * 4)

    out = pl.pallas_call(
        kernel,
        out_shape=jax.ShapeDtypeStruct((N, hf * wf, C_PAD), jnp.float32),
        grid_spec=pltpu.PrefetchScalarGridSpec(
            num_scalar_prefetch=0,
            grid=(N // B,),
            in_specs=[
                pl.BlockSpec((B, H, W, C_PAD), lambda n: (n, 0, 0, 0)),
                pl.BlockSpec((4, 9 * C_PAD, C_PAD), lambda n: (0, 0, 0)),
                pl.BlockSpec((4, C_PAD), lambda n: (0, 0)),
            ],
            out_specs=pl.BlockSpec((B, hf * wf, C_PAD), lambda n: (n, 0, 0)),
            scratch_shapes=[
                pltpu.VMEM((B, h + 2, w + 2, C_PAD), jnp.bfloat16)
                for (h, w) in sizes
            ],
        ),
        compiler_params=pltpu.CompilerParams(
            dimension_semantics=("parallel",)),
        cost_estimate=pl.CostEstimate(
            flops=flops, transcendentals=0, bytes_accessed=bytes_accessed),
    )(x, w_stack, b_stack)

    # Drop zero-padded channels (real Cout=4), back to NCHW, flatten(1, -1).
    out = out.reshape(N, hf, wf, C_PAD)[..., :4]
    out = jnp.transpose(out, (0, 3, 1, 2))
    return out.reshape(N, -1)


def init_params(key):
    """Deterministic init matching the module's shapes (HWIO weights)."""
    channels = [12, 128, 128, 128, 4]
    params = []
    for i in range(len(channels) - 1):
        cin, cout = channels[i], channels[i + 1]
        key, kw, kb = jax.random.split(key, 3)
        fan_in = cin * 3 * 3
        bound = 1.0 / jnp.sqrt(fan_in)
        w = jax.random.uniform(kw, (3, 3, cin, cout), jnp.float32, -bound, bound)
        b = jax.random.uniform(kb, (cout,), jnp.float32, -bound, bound)
        params.append((w, b))
    return params


def backbone_reference(state_nchw, params):
    """Pure-JAX f32 reference (mirrors the PyTorch conv stack) for validation."""
    x = state_nchw
    for (w, b) in params:
        y = lax.conv_general_dilated(
            x, w, window_strides=(1, 1), padding="SAME",
            dimension_numbers=("NCHW", "HWIO", "NCHW"))
        y = y + b.reshape(1, -1, 1, 1)
        y = lax.reduce_window(y, -jnp.inf, lax.max,
                              (1, 1, 2, 2), (1, 1, 2, 2), "VALID")
        x = jnp.where(y > 0, y, LRELU_SLOPE * y)
    return x.reshape(x.shape[0], -1)


if __name__ == "__main__":
    key = jax.random.PRNGKey(0)
    kparams, kx = jax.random.split(key)

    params = init_params(kparams)

    # 12 input channels, 16x16 spatial: 4 pool-by-2 stages -> 1x1 spatial,
    # flat output (N, 4).
    N, C, H, W = 2, 12, 16, 16
    state = jax.random.normal(kx, (N, C, H, W), jnp.float32)

    out = jax.block_until_ready(backbone_forward(state, params))
    ref = jax.block_until_ready(backbone_reference(state, params))

    assert out.shape == (N, 4), out.shape
    # bf16 MXU operands (f32 accumulation) -> compare with a looser tolerance
    # than a pure-f32 implementation.
    assert jnp.allclose(out, ref, atol=5e-2, rtol=5e-2), (
        "mismatch vs reference: max abs diff "
        f"{float(jnp.max(jnp.abs(out - ref)))}")

    print("KERNEL_OK")
</pallas_src>

<mosaic_0001>
module attributes {stable_mosaic.version = 11 : i64} {
  func.func @_backbone_kernel(%arg0: i32, %arg1: memref<1x16x16x128xbf16, #tpu.memory_space<vmem>>, %arg2: memref<4x1152x128xbf16, #tpu.memory_space<vmem>>, %arg3: memref<4x128xf32, #tpu.memory_space<vmem>>, %arg4: memref<1x1x128xf32, #tpu.memory_space<vmem>>, %arg5: memref<1x18x18x128xbf16, #tpu.memory_space<vmem>>, %arg6: memref<1x10x10x128xbf16, #tpu.memory_space<vmem>>, %arg7: memref<1x6x6x128xbf16, #tpu.memory_space<vmem>>, %arg8: memref<1x4x4x128xbf16, #tpu.memory_space<vmem>>) attributes {dimension_semantics = [#tpu.dimension_semantics<parallel>], iteration_bounds = array<i64: 2>, scalar_prefetch = 0 : i64, scratch_operands = 4 : i64, tpu.core_type = #tpu.core_type<tc>, window_params = [{transform_indices = @transform_0, window_bounds = array<i64: 1, 16, 16, 128>}, {pipeline_mode = #tpu.pipeline_mode<synchronous>, transform_indices = @transform_1, window_bounds = array<i64: 4, 1152, 128>}, {pipeline_mode = #tpu.pipeline_mode<synchronous>, transform_indices = @transform_2, window_bounds = array<i64: 4, 128>}, {transform_indices = @transform_3, window_bounds = array<i64: 1, 1, 128>}]} {
    %c0 = arith.constant 0 : index
    %c0_0 = arith.constant 0 : index
    %c0_1 = arith.constant 0 : index
    %c0_2 = arith.constant 0 : index
    %0 = vector.load %arg1[%c0, %c0_0, %c0_1, %c0_2] : memref<1x16x16x128xbf16, #tpu.memory_space<vmem>>, vector<1x16x16x128xbf16>
    %cst = arith.constant 0.000000e+00 : bf16
    %1 = vector.broadcast %cst : bf16 to vector<1x1x18x128xbf16>
    %c0_3 = arith.constant 0 : index
    %c0_4 = arith.constant 0 : index
    %c0_5 = arith.constant 0 : index
    %c0_6 = arith.constant 0 : index
    %2 = vector.load %arg5[%c0_3, %c0_4, %c0_5, %c0_6] : memref<1x18x18x128xbf16, #tpu.memory_space<vmem>>, vector<1x1x18x128xbf16>
    tpu.vector_store %arg5[%c0_3, %c0_4, %c0_5, %c0_6], %1 {strides = array<i32>} : memref<1x18x18x128xbf16, #tpu.memory_space<vmem>>, vector<1x1x18x128xbf16>,
    %c0_7 = arith.constant 0 : index
    %c17 = arith.constant 17 : index
    %c0_8 = arith.constant 0 : index
    %c0_9 = arith.constant 0 : index
    %3 = vector.load %arg5[%c0_7, %c17, %c0_8, %c0_9] : memref<1x18x18x128xbf16, #tpu.memory_space<vmem>>, vector<1x1x18x128xbf16>
    tpu.vector_store %arg5[%c0_7, %c17, %c0_8, %c0_9], %1 {strides = array<i32>} : memref<1x18x18x128xbf16, #tpu.memory_space<vmem>>, vector<1x1x18x128xbf16>,
    %cst_10 = arith.constant 0.000000e+00 : bf16
    %4 = vector.broadcast %cst_10 : bf16 to vector<1x16x1x128xbf16>
    %c0_11 = arith.constant 0 : index
    %c1 = arith.constant 1 : index
    %c0_12 = arith.constant 0 : index
    %c0_13 = arith.constant 0 : index
    %5 = vector.load %arg5[%c0_11, %c1, %c0_12, %c0_13] : memref<1x18x18x128xbf16, #tpu.memory_space<vmem>>, vector<1x16x1x128xbf16>
    tpu.vector_store %arg5[%c0_11, %c1, %c0_12, %c0_13], %4 {strides = array<i32>} : memref<1x18x18x128xbf16, #tpu.memory_space<vmem>>, vector<1x16x1x128xbf16>,
    %c0_14 = arith.constant 0 : index
    %c1_15 = arith.constant 1 : index
    %c17_16 = arith.constant 17 : index
    %c0_17 = arith.constant 0 : index
    %6 = vector.load %arg5[%c0_14, %c1_15, %c17_16, %c0_17] : memref<1x18x18x128xbf16, #tpu.memory_space<vmem>>, vector<1x16x1x128xbf16>
    tpu.vector_store %arg5[%c0_14, %c1_15, %c17_16, %c0_17], %4 {strides = array<i32>} : memref<1x18x18x128xbf16, #tpu.memory_space<vmem>>, vector<1x16x1x128xbf16>,
    %c0_18 = arith.constant 0 : index
    %c1_19 = arith.constant 1 : index
    %c1_20 = arith.constant 1 : index
    %c0_21 = arith.constant 0 : index
    %7 = vector.load %arg5[%c0_18, %c1_19, %c1_20, %c0_21] : memref<1x18x18x128xbf16, #tpu.memory_space<vmem>>, vector<1x16x16x128xbf16>
    tpu.vector_store %arg5[%c0_18, %c1_19, %c1_20, %c0_21], %0 {strides = array<i32>} : memref<1x18x18x128xbf16, #tpu.memory_space<vmem>>, vector<1x16x16x128xbf16>,
    %c0_22 = arith.constant 0 : index
    %c0_23 = arith.constant 0 : index
    %c0_24 = arith.constant 0 : index
    %c0_25 = arith.constant 0 : index
    %8 = vector.load %arg5[%c0_22, %c0_23, %c0_24, %c0_25] : memref<1x18x18x128xbf16, #tpu.memory_space<vmem>>, vector<1x16x16x128xbf16>
    %9 = vector.shape_cast %8 : vector<1x16x16x128xbf16> to vector<256x128xbf16>
    %c0_26 = arith.constant 0 : index
    %c0_27 = arith.constant 0 : index
    %c0_28 = arith.constant 0 : index
    %10 = vector.load %arg2[%c0_26, %c0_27, %c0_28] : memref<4x1152x128xbf16, #tpu.memory_space<vmem>>, vector<1x128x128xbf16>
    %11 = vector.shape_cast %10 : vector<1x128x128xbf16> to vector<128x128xbf16>
    %cst_29 = arith.constant dense<0.000000e+00> : vector<256x128xf32>
    %12 = tpu.matmul %9, %11, %cst_29 {dimension_numbers = #tpu.dot_dimension_numbers<[1], [0], [0], [1], [0, 0, 1, 1], [], []>} : vector<256x128xbf16>, vector<128x128xbf16>, vector<256x128xf32> -> vector<256x128xf32>
    %c0_30 = arith.constant 0 : index
    %c0_31 = arith.constant 0 : index
    %c1_32 = arith.constant 1 : index
    %c0_33 = arith.constant 0 : index
    %13 = vector.load %arg5[%c0_30, %c0_31, %c1_32, %c0_33] : memref<1x18x18x128xbf16, #tpu.memory_space<vmem>>, vector<1x16x16x128xbf16>
    %14 = vector.shape_cast %13 : vector<1x16x16x128xbf16> to vector<256x128xbf16>
    %c0_34 = arith.constant 0 : index
    %c128 = arith.constant 128 : index
    %c0_35 = arith.constant 0 : index
    %15 = vector.load %arg2[%c0_34, %c128, %c0_35] : memref<4x1152x128xbf16, #tpu.memory_space<vmem>>, vector<1x128x128xbf16>
    %16 = vector.shape_cast %15 : vector<1x128x128xbf16> to vector<128x128xbf16>
    %cst_36 = arith.constant dense<0.000000e+00> : vector<256x128xf32>
    %17 = tpu.matmul %14, %16, %cst_36 {dimension_numbers = #tpu.dot_dimension_numbers<[1], [0], [0], [1], [0, 0, 1, 1], [], []>} : vector<256x128xbf16>, vector<128x128xbf16>, vector<256x128xf32> -> vector<256x128xf32>
    %18 = arith.addf %12, %17 : vector<256x128xf32>
    %c0_37 = arith.constant 0 : index
    %c0_38 = arith.constant 0 : index
    %c2 = arith.constant 2 : index
    %c0_39 = arith.constant 0 : index
    %19 = vector.load %arg5[%c0_37, %c0_38, %c2, %c0_39] : memref<1x18x18x128xbf16, #tpu.memory_space<vmem>>, vector<1x16x16x128xbf16>
    %20 = vector.shape_cast %19 : vector<1x16x16x128xbf16> to vector<256x128xbf16>
    %c0_40 = arith.constant 0 : index
    %c256 = arith.constant 256 : index
    %c0_41 = arith.constant 0 : index
    %21 = vector.load %arg2[%c0_40, %c256, %c0_41] : memref<4x1152x128xbf16, #tpu.memory_space<vmem>>, vector<1x128x128xbf16>
    %22 = vector.shape_cast %21 : vector<1x128x128xbf16> to vector<128x128xbf16>
    %cst_42 = arith.constant dense<0.000000e+00> : vector<256x128xf32>
    %23 = tpu.matmul %20, %22, %cst_42 {dimension_numbers = #tpu.dot_dimension_numbers<[1], [0], [0], [1], [0, 0, 1, 1], [], []>} : vector<256x128xbf16>, vector<128x128xbf16>, vector<256x128xf32> -> vector<256x128xf32>
    %24 = arith.addf %18, %23 : vector<256x128xf32>
    %c0_43 = arith.constant 0 : index
    %c1_44 = arith.constant 1 : index
    %c0_45 = arith.constant 0 : index
    %c0_46 = arith.constant 0 : index
    %25 = vector.load %arg5[%c0_43, %c1_44, %c0_45, %c0_46] : memref<1x18x18x128xbf16, #tpu.memory_space<vmem>>, vector<1x16x16x128xbf16>
    %26 = vector.shape_cast %25 : vector<1x16x16x128xbf16> to vector<256x128xbf16>
    %c0_47 = arith.constant 0 : index
    %c384 = arith.constant 384 : index
    %c0_48 = arith.constant 0 : index
    %27 = vector.load %arg2[%c0_47, %c384, %c0_48] : memref<4x1152x128xbf16, #tpu.memory_space<vmem>>, vector<1x128x128xbf16>
    %28 = vector.shape_cast %27 : vector<1x128x128xbf16> to vector<128x128xbf16>
    %cst_49 = arith.constant dense<0.000000e+00> : vector<256x128xf32>
    %29 = tpu.matmul %26, %28, %cst_49 {dimension_numbers = #tpu.dot_dimension_numbers<[1], [0], [0], [1], [0, 0, 1, 1], [], []>} : vector<256x128xbf16>, vector<128x128xbf16>, vector<256x128xf32> -> vector<256x128xf32>
    %30 = arith.addf %24, %29 : vector<256x128xf32>
    %c0_50 = arith.constant 0 : index
    %c1_51 = arith.constant 1 : index
    %c1_52 = arith.constant 1 : index
    %c0_53 = arith.constant 0 : index
    %31 = vector.load %arg5[%c0_50, %c1_51, %c1_52, %c0_53] : memref<1x18x18x128xbf16, #tpu.memory_space<vmem>>, vector<1x16x16x128xbf16>
    %32 = vector.shape_cast %31 : vector<1x16x16x128xbf16> to vector<256x128xbf16>
    %c0_54 = arith.constant 0 : index
    %c512 = arith.constant 512 : index
    %c0_55 = arith.constant 0 : index
    %33 = vector.load %arg2[%c0_54, %c512, %c0_55] : memref<4x1152x128xbf16, #tpu.memory_space<vmem>>, vector<1x128x128xbf16>
    %34 = vector.shape_cast %33 : vector<1x128x128xbf16> to vector<128x128xbf16>
    %cst_56 = arith.constant dense<0.000000e+00> : vector<256x128xf32>
    %35 = tpu.matmul %32, %34, %cst_56 {dimension_numbers = #tpu.dot_dimension_numbers<[1], [0], [0], [1], [0, 0, 1, 1], [], []>} : vector<256x128xbf16>, vector<128x128xbf16>, vector<256x128xf32> -> vector<256x128xf32>
    %36 = arith.addf %30, %35 : vector<256x128xf32>
    %c0_57 = arith.constant 0 : index
    %c1_58 = arith.constant 1 : index
    %c2_59 = arith.constant 2 : index
    %c0_60 = arith.constant 0 : index
    %37 = vector.load %arg5[%c0_57, %c1_58, %c2_59, %c0_60] : memref<1x18x18x128xbf16, #tpu.memory_space<vmem>>, vector<1x16x16x128xbf16>
    %38 = vector.shape_cast %37 : vector<1x16x16x128xbf16> to vector<256x128xbf16>
    %c0_61 = arith.constant 0 : index
    %c640 = arith.constant 640 : index
    %c0_62 = arith.constant 0 : index
    %39 = vector.load %arg2[%c0_61, %c640, %c0_62] : memref<4x1152x128xbf16, #tpu.memory_space<vmem>>, vector<1x128x128xbf16>
    %40 = vector.shape_cast %39 : vector<1x128x128xbf16> to vector<128x128xbf16>
    %cst_63 = arith.constant dense<0.000000e+00> : vector<256x128xf32>
    %41 = tpu.matmul %38, %40, %cst_63 {dimension_numbers = #tpu.dot_dimension_numbers<[1], [0], [0], [1], [0, 0, 1, 1], [], []>} : vector<256x128xbf16>, vector<128x128xbf16>, vector<256x128xf32> -> vector<256x128xf32>
    %42 = arith.addf %36, %41 : vector<256x128xf32>
    %c0_64 = arith.constant 0 : index
    %c2_65 = arith.constant 2 : index
    %c0_66 = arith.constant 0 : index
    %c0_67 = arith.constant 0 : index
    %43 = vector.load %arg5[%c0_64, %c2_65, %c0_66, %c0_67] : memref<1x18x18x128xbf16, #tpu.memory_space<vmem>>, vector<1x16x16x128xbf16>
    %44 = vector.shape_cast %43 : vector<1x16x16x128xbf16> to vector<256x128xbf16>
    %c0_68 = arith.constant 0 : index
    %c768 = arith.constant 768 : index
    %c0_69 = arith.constant 0 : index
    %45 = vector.load %arg2[%c0_68, %c768, %c0_69] : memref<4x1152x128xbf16, #tpu.memory_space<vmem>>, vector<1x128x128xbf16>
    %46 = vector.shape_cast %45 : vector<1x128x128xbf16> to vector<128x128xbf16>
    %cst_70 = arith.constant dense<0.000000e+00> : vector<256x128xf32>
    %47 = tpu.matmul %44, %46, %cst_70 {dimension_numbers = #tpu.dot_dimension_numbers<[1], [0], [0], [1], [0, 0, 1, 1], [], []>} : vector<256x128xbf16>, vector<128x128xbf16>, vector<256x128xf32> -> vector<256x128xf32>
    %48 = arith.addf %42, %47 : vector<256x128xf32>
    %c0_71 = arith.constant 0 : index
    %c2_72 = arith.constant 2 : index
    %c1_73 = arith.constant 1 : index
    %c0_74 = arith.constant 0 : index
    %49 = vector.load %arg5[%c0_71, %c2_72, %c1_73, %c0_74] : memref<1x18x18x128xbf16, #tpu.memory_space<vmem>>, vector<1x16x16x128xbf16>
    %50 = vector.shape_cast %49 : vector<1x16x16x128xbf16> to vector<256x128xbf16>
    %c0_75 = arith.constant 0 : index
    %c896 = arith.constant 896 : index
    %c0_76 = arith.constant 0 : index
    %51 = vector.load %arg2[%c0_75, %c896, %c0_76] : memref<4x1152x128xbf16, #tpu.memory_space<vmem>>, vector<1x128x128xbf16>
    %52 = vector.shape_cast %51 : vector<1x128x128xbf16> to vector<128x128xbf16>
    %cst_77 = arith.constant dense<0.000000e+00> : vector<256x128xf32>
    %53 = tpu.matmul %50, %52, %cst_77 {dimension_numbers = #tpu.dot_dimension_numbers<[1], [0], [0], [1], [0, 0, 1, 1], [], []>} : vector<256x128xbf16>, vector<128x128xbf16>, vector<256x128xf32> -> vector<256x128xf32>
    %54 = arith.addf %48, %53 : vector<256x128xf32>
    %c0_78 = arith.constant 0 : index
    %c2_79 = arith.constant 2 : index
    %c2_80 = arith.constant 2 : index
    %c0_81 = arith.constant 0 : index
    %55 = vector.load %arg5[%c0_78, %c2_79, %c2_80, %c0_81] : memref<1x18x18x128xbf16, #tpu.memory_space<vmem>>, vector<1x16x16x128xbf16>
    %56 = vector.shape_cast %55 : vector<1x16x16x128xbf16> to vector<256x128xbf16>
    %c0_82 = arith.constant 0 : index
    %c1024 = arith.constant 1024 : index
    %c0_83 = arith.constant 0 : index
    %57 = vector.load %arg2[%c0_82, %c1024, %c0_83] : memref<4x1152x128xbf16, #tpu.memory_space<vmem>>, vector<1x128x128xbf16>
    %58 = vector.shape_cast %57 : vector<1x128x128xbf16> to vector<128x128xbf16>
    %cst_84 = arith.constant dense<0.000000e+00> : vector<256x128xf32>
    %59 = tpu.matmul %56, %58, %cst_84 {dimension_numbers = #tpu.dot_dimension_numbers<[1], [0], [0], [1], [0, 0, 1, 1], [], []>} : vector<256x128xbf16>, vector<128x128xbf16>, vector<256x128xf32> -> vector<256x128xf32>
    %60 = arith.addf %54, %59 : vector<256x128xf32>
    %61 = vector.shape_cast %60 : vector<256x128xf32> to vector<8x2x8x2x128xf32>
    %cst_85 = arith.constant dense<0xFF800000> : vector<8x8x128xf32>
    %62 = vector.multi_reduction <maximumf>, %61, %cst_85 [1, 3] : vector<8x2x8x2x128xf32> to vector<8x8x128xf32>
    %c0_86 = arith.constant 0 : index
    %c0_87 = arith.constant 0 : index
    %63 = vector.load %arg3[%c0_86, %c0_87] : memref<4x128xf32, #tpu.memory_space<vmem>>, vector<1x128xf32>
    %64 = vector.shape_cast %63 : vector<1x128xf32> to vector<1x1x128xf32>
    %65 = vector.broadcast %64 : vector<1x1x128xf32> to vector<8x8x128xf32>
    %66 = arith.addf %62, %65 : vector<8x8x128xf32>
    %cst_88 = arith.constant 0.000000e+00 : f32
    %67 = vector.broadcast %cst_88 : f32 to vector<8x8x128xf32>
    %68 = arith.cmpf ogt, %66, %67 : vector<8x8x128xf32>
    %cst_89 = arith.constant 0.00999999977 : f32
    %69 = vector.broadcast %cst_89 : f32 to vector<8x8x128xf32>
    %70 = arith.mulf %69, %66 : vector<8x8x128xf32>
    %71 = arith.select %68, %66, %70 : vector<8x8x128xi1>, vector<8x8x128xf32>
    %72 = vector.shape_cast %71 : vector<8x8x128xf32> to vector<1x8x8x128xf32>
    %cst_90 = arith.constant 0.000000e+00 : bf16
    %73 = vector.broadcast %cst_90 : bf16 to vector<1x1x10x128xbf16>
    %c0_91 = arith.constant 0 : index
    %c0_92 = arith.constant 0 : index
    %c0_93 = arith.constant 0 : index
    %c0_94 = arith.constant 0 : index
    %74 = vector.load %arg6[%c0_91, %c0_92, %c0_93, %c0_94] : memref<1x10x10x128xbf16, #tpu.memory_space<vmem>>, vector<1x1x10x128xbf16>
    tpu.vector_store %arg6[%c0_91, %c0_92, %c0_93, %c0_94], %73 {strides = array<i32>} : memref<1x10x10x128xbf16, #tpu.memory_space<vmem>>, vector<1x1x10x128xbf16>,
    %c0_95 = arith.constant 0 : index
    %c9 = arith.constant 9 : index
    %c0_96 = arith.constant 0 : index
    %c0_97 = arith.constant 0 : index
    %75 = vector.load %arg6[%c0_95, %c9, %c0_96, %c0_97] : memref<1x10x10x128xbf16, #tpu.memory_space<vmem>>, vector<1x1x10x128xbf16>
    tpu.vector_store %arg6[%c0_95, %c9, %c0_96, %c0_97], %73 {strides = array<i32>} : memref<1x10x10x128xbf16, #tpu.memory_space<vmem>>, vector<1x1x10x128xbf16>,
    %cst_98 = arith.constant 0.000000e+00 : bf16
    %76 = vector.broadcast %cst_98 : bf16 to vector<1x8x1x128xbf16>
    %c0_99 = arith.constant 0 : index
    %c1_100 = arith.constant 1 : index
    %c0_101 = arith.constant 0 : index
    %c0_102 = arith.constant 0 : index
    %77 = vector.load %arg6[%c0_99, %c1_100, %c0_101, %c0_102] : memref<1x10x10x128xbf16, #tpu.memory_space<vmem>>, vector<1x8x1x128xbf16>
    tpu.vector_store %arg6[%c0_99, %c1_100, %c0_101, %c0_102], %76 {strides = array<i32>} : memref<1x10x10x128xbf16, #tpu.memory_space<vmem>>, vector<1x8x1x128xbf16>,
    %c0_103 = arith.constant 0 : index
    %c1_104 = arith.constant 1 : index
    %c9_105 = arith.constant 9 : index
    %c0_106 = arith.constant 0 : index
    %78 = vector.load %arg6[%c0_103, %c1_104, %c9_105, %c0_106] : memref<1x10x10x128xbf16, #tpu.memory_space<vmem>>, vector<1x8x1x128xbf16>
    tpu.vector_store %arg6[%c0_103, %c1_104, %c9_105, %c0_106], %76 {strides = array<i32>} : memref<1x10x10x128xbf16, #tpu.memory_space<vmem>>, vector<1x8x1x128xbf16>,
    %79 = arith.truncf %72 : vector<1x8x8x128xf32> to vector<1x8x8x128xbf16>
    %c0_107 = arith.constant 0 : index
    %c1_108 = arith.constant 1 : index
    %c1_109 = arith.constant 1 : index
    %c0_110 = arith.constant 0 : index
    %80 = vector.load %arg6[%c0_107, %c1_108, %c1_109, %c0_110] : memref<1x10x10x128xbf16, #tpu.memory_space<vmem>>, vector<1x8x8x128xbf16>
    tpu.vector_store %arg6[%c0_107, %c1_108, %c1_109, %c0_110], %79 {strides = array<i32>} : memref<1x10x10x128xbf16, #tpu.memory_space<vmem>>, vector<1x8x8x128xbf16>,
    %c0_111 = arith.constant 0 : index
    %c0_112 = arith.constant 0 : index
    %c0_113 = arith.constant 0 : index
    %c0_114 = arith.constant 0 : index
    %81 = vector.load %arg6[%c0_111, %c0_112, %c0_113, %c0_114] : memref<1x10x10x128xbf16, #tpu.memory_space<vmem>>, vector<1x8x8x128xbf16>
    %82 = vector.shape_cast %81 : vector<1x8x8x128xbf16> to vector<64x128xbf16>
    %c1_115 = arith.constant 1 : index
    %c0_116 = arith.constant 0 : index
    %c0_117 = arith.constant 0 : index
    %83 = vector.load %arg2[%c1_115, %c0_116, %c0_117] : memref<4x1152x128xbf16, #tpu.memory_space<vmem>>, vector<1x128x128xbf16>
    %84 = vector.shape_cast %83 : vector<1x128x128xbf16> to vector<128x128xbf16>
    %cst_118 = arith.constant dense<0.000000e+00> : vector<64x128xf32>
    %85 = tpu.matmul %82, %84, %cst_118 {dimension_numbers = #tpu.dot_dimension_numbers<[1], [0], [0], [1], [0, 0, 1, 1], [], []>} : vector<64x128xbf16>, vector<128x128xbf16>, vector<64x128xf32> -> vector<64x128xf32>
    %c0_119 = arith.constant 0 : index
    %c0_120 = arith.constant 0 : index
    %c1_121 = arith.constant 1 : index
    %c0_122 = arith.constant 0 : index
    %86 = vector.load %arg6[%c0_119, %c0_120, %c1_121, %c0_122] : memref<1x10x10x128xbf16, #tpu.memory_space<vmem>>, vector<1x8x8x128xbf16>
    %87 = vector.shape_cast %86 : vector<1x8x8x128xbf16> to vector<64x128xbf16>
    %c1_123 = arith.constant 1 : index
    %c128_124 = arith.constant 128 : index
    %c0_125 = arith.constant 0 : index
    %88 = vector.load %arg2[%c1_123, %c128_124, %c0_125] : memref<4x1152x128xbf16, #tpu.memory_space<vmem>>, vector<1x128x128xbf16>
    %89 = vector.shape_cast %88 : vector<1x128x128xbf16> to vector<128x128xbf16>
    %cst_126 = arith.constant dense<0.000000e+00> : vector<64x128xf32>
    %90 = tpu.matmul %87, %89, %cst_126 {dimension_numbers = #tpu.dot_dimension_numbers<[1], [0], [0], [1], [0, 0, 1, 1], [], []>} : vector<64x128xbf16>, vector<128x128xbf16>, vector<64x128xf32> -> vector<64x128xf32>
    %91 = arith.addf %85, %90 : vector<64x128xf32>
    %c0_127 = arith.constant 0 : index
    %c0_128 = arith.constant 0 : index
    %c2_129 = arith.constant 2 : index
    %c0_130 = arith.constant 0 : index
    %92 = vector.load %arg6[%c0_127, %c0_128, %c2_129, %c0_130] : memref<1x10x10x128xbf16, #tpu.memory_space<vmem>>, vector<1x8x8x128xbf16>
    %93 = vector.shape_cast %92 : vector<1x8x8x128xbf16> to vector<64x128xbf16>
    %c1_131 = arith.constant 1 : index
    %c256_132 = arith.constant 256 : index
    %c0_133 = arith.constant 0 : index
    %94 = vector.load %arg2[%c1_131, %c256_132, %c0_133] : memref<4x1152x128xbf16, #tpu.memory_space<vmem>>, vector<1x128x128xbf16>
    %95 = vector.shape_cast %94 : vector<1x128x128xbf16> to vector<128x128xbf16>
    %cst_134 = arith.constant dense<0.000000e+00> : vector<64x128xf32>
    %96 = tpu.matmul %93, %95, %cst_134 {dimension_numbers = #tpu.dot_dimension_numbers<[1], [0], [0], [1], [0, 0, 1, 1], [], []>} : vector<64x128xbf16>, vector<128x128xbf16>, vector<64x128xf32> -> vector<64x128xf32>
    %97 = arith.addf %91, %96 : vector<64x128xf32>
    %c0_135 = arith.constant 0 : index
    %c1_136 = arith.constant 1 : index
    %c0_137 = arith.constant 0 : index
    %c0_138 = arith.constant 0 : index
    %98 = vector.load %arg6[%c0_135, %c1_136, %c0_137, %c0_138] : memref<1x10x10x128xbf16, #tpu.memory_space<vmem>>, vector<1x8x8x128xbf16>
    %99 = vector.shape_cast %98 : vector<1x8x8x128xbf16> to vector<64x128xbf16>
    %c1_139 = arith.constant 1 : index
    %c384_140 = arith.constant 384 : index
    %c0_141 = arith.constant 0 : index
    %100 = vector.load %arg2[%c1_139, %c384_140, %c0_141] : memref<4x1152x128xbf16, #tpu.memory_space<vmem>>, vector<1x128x128xbf16>
    %101 = vector.shape_cast %100 : vector<1x128x128xbf16> to vector<128x128xbf16>
    %cst_142 = arith.constant dense<0.000000e+00> : vector<64x128xf32>
    %102 = tpu.matmul %99, %101, %cst_142 {dimension_numbers = #tpu.dot_dimension_numbers<[1], [0], [0], [1], [0, 0, 1, 1], [], []>} : vector<64x128xbf16>, vector<128x128xbf16>, vector<64x128xf32> -> vector<64x128xf32>
    %103 = arith.addf %97, %102 : vector<64x128xf32>
    %c0_143 = arith.constant 0 : index
    %c1_144 = arith.constant 1 : index
    %c1_145 = arith.constant 1 : index
    %c0_146 = arith.constant 0 : index
    %104 = vector.load %arg6[%c0_143, %c1_144, %c1_145, %c0_146] : memref<1x10x10x128xbf16, #tpu.memory_space<vmem>>, vector<1x8x8x128xbf16>
    %105 = vector.shape_cast %104 : vector<1x8x8x128xbf16> to vector<64x128xbf16>
    %c1_147 = arith.constant 1 : index
    %c512_148 = arith.constant 512 : index
    %c0_149 = arith.constant 0 : index
    %106 = vector.load %arg2[%c1_147, %c512_148, %c0_149] : memref<4x1152x128xbf16, #tpu.memory_space<vmem>>, vector<1x128x128xbf16>
    %107 = vector.shape_cast %106 : vector<1x128x128xbf16> to vector<128x128xbf16>
    %cst_150 = arith.constant dense<0.000000e+00> : vector<64x128xf32>
    %108 = tpu.matmul %105, %107, %cst_150 {dimension_numbers = #tpu.dot_dimension_numbers<[1], [0], [0], [1], [0, 0, 1, 1], [], []>} : vector<64x128xbf16>, vector<128x128xbf16>, vector<64x128xf32> -> vector<64x128xf32>
    %109 = arith.addf %103, %108 : vector<64x128xf32>
    %c0_151 = arith.constant 0 : index
    %c1_152 = arith.constant 1 : index
    %c2_153 = arith.constant 2 : index
    %c0_154 = arith.constant 0 : index
    %110 = vector.load %arg6[%c0_151, %c1_152, %c2_153, %c0_154] : memref<1x10x10x128xbf16, #tpu.memory_space<vmem>>, vector<1x8x8x128xbf16>
    %111 = vector.shape_cast %110 : vector<1x8x8x128xbf16> to vector<64x128xbf16>
    %c1_155 = arith.constant 1 : index
    %c640_156 = arith.constant 640 : index
    %c0_157 = arith.constant 0 : index
    %112 = vector.load %arg2[%c1_155, %c640_156, %c0_157] : memref<4x1152x128xbf16, #tpu.memory_space<vmem>>, vector<1x128x128xbf16>
    %113 = vector.shape_cast %112 : vector<1x128x128xbf16> to vector<128x128xbf16>
    %cst_158 = arith.constant dense<0.000000e+00> : vector<64x128xf32>
    %114 = tpu.matmul %111, %113, %cst_158 {dimension_numbers = #tpu.dot_dimension_numbers<[1], [0], [0], [1], [0, 0, 1, 1], [], []>} : vector<64x128xbf16>, vector<128x128xbf16>, vector<64x128xf32> -> vector<64x128xf32>
    %115 = arith.addf %109, %114 : vector<64x128xf32>
    %c0_159 = arith.constant 0 : index
    %c2_160 = arith.constant 2 : index
    %c0_161 = arith.constant 0 : index
    %c0_162 = arith.constant 0 : index
    %116 = vector.load %arg6[%c0_159, %c2_160, %c0_161, %c0_162] : memref<1x10x10x128xbf16, #tpu.memory_space<vmem>>, vector<1x8x8x128xbf16>
    %117 = vector.shape_cast %116 : vector<1x8x8x128xbf16> to vector<64x128xbf16>
    %c1_163 = arith.constant 1 : index
    %c768_164 = arith.constant 768 : index
    %c0_165 = arith.constant 0 : index
    %118 = vector.load %arg2[%c1_163, %c768_164, %c0_165] : memref<4x1152x128xbf16, #tpu.memory_space<vmem>>, vector<1x128x128xbf16>
    %119 = vector.shape_cast %118 : vector<1x128x128xbf16> to vector<128x128xbf16>
    %cst_166 = arith.constant dense<0.000000e+00> : vector<64x128xf32>
    %120 = tpu.matmul %117, %119, %cst_166 {dimension_numbers = #tpu.dot_dimension_numbers<[1], [0], [0], [1], [0, 0, 1, 1], [], []>} : vector<64x128xbf16>, vector<128x128xbf16>, vector<64x128xf32> -> vector<64x128xf32>
    %121 = arith.addf %115, %120 : vector<64x128xf32>
    %c0_167 = arith.constant 0 : index
    %c2_168 = arith.constant 2 : index
    %c1_169 = arith.constant 1 : index
    %c0_170 = arith.constant 0 : index
    %122 = vector.load %arg6[%c0_167, %c2_168, %c1_169, %c0_170] : memref<1x10x10x128xbf16, #tpu.memory_space<vmem>>, vector<1x8x8x128xbf16>
    %123 = vector.shape_cast %122 : vector<1x8x8x128xbf16> to vector<64x128xbf16>
    %c1_171 = arith.constant 1 : index
    %c896_172 = arith.constant 896 : index
    %c0_173 = arith.constant 0 : index
    %124 = vector.load %arg2[%c1_171, %c896_172, %c0_173] : memref<4x1152x128xbf16, #tpu.memory_space<vmem>>, vector<1x128x128xbf16>
    %125 = vector.shape_cast %124 : vector<1x128x128xbf16> to vector<128x128xbf16>
    %cst_174 = arith.constant dense<0.000000e+00> : vector<64x128xf32>
    %126 = tpu.matmul %123, %125, %cst_174 {dimension_numbers = #tpu.dot_dimension_numbers<[1], [0], [0], [1], [0, 0, 1, 1], [], []>} : vector<64x128xbf16>, vector<128x128xbf16>, vector<64x128xf32> -> vector<64x128xf32>
    %127 = arith.addf %121, %126 : vector<64x128xf32>
    %c0_175 = arith.constant 0 : index
    %c2_176 = arith.constant 2 : index
    %c2_177 = arith.constant 2 : index
    %c0_178 = arith.constant 0 : index
    %128 = vector.load %arg6[%c0_175, %c2_176, %c2_177, %c0_178] : memref<1x10x10x128xbf16, #tpu.memory_space<vmem>>, vector<1x8x8x128xbf16>
    %129 = vector.shape_cast %128 : vector<1x8x8x128xbf16> to vector<64x128xbf16>
    %c1_179 = arith.constant 1 : index
    %c1024_180 = arith.constant 1024 : index
    %c0_181 = arith.constant 0 : index
    %130 = vector.load %arg2[%c1_179, %c1024_180, %c0_181] : memref<4x1152x128xbf16, #tpu.memory_space<vmem>>, vector<1x128x128xbf16>
    %131 = vector.shape_cast %130 : vector<1x128x128xbf16> to vector<128x128xbf16>
    %cst_182 = arith.constant dense<0.000000e+00> : vector<64x128xf32>
    %132 = tpu.matmul %129, %131, %cst_182 {dimension_numbers = #tpu.dot_dimension_numbers<[1], [0], [0], [1], [0, 0, 1, 1], [], []>} : vector<64x128xbf16>, vector<128x128xbf16>, vector<64x128xf32> -> vector<64x128xf32>
    %133 = arith.addf %127, %132 : vector<64x128xf32>
    %134 = vector.shape_cast %133 : vector<64x128xf32> to vector<4x2x4x2x128xf32>
    %cst_183 = arith.constant dense<0xFF800000> : vector<4x4x128xf32>
    %135 = vector.multi_reduction <maximumf>, %134, %cst_183 [1, 3] : vector<4x2x4x2x128xf32> to vector<4x4x128xf32>
    %c1_184 = arith.constant 1 : index
    %c0_185 = arith.constant 0 : index
    %136 = vector.load %arg3[%c1_184, %c0_185] : memref<4x128xf32, #tpu.memory_space<vmem>>, vector<1x128xf32>
    %137 = vector.shape_cast %136 : vector<1x128xf32> to vector<1x1x128xf32>
    %138 = vector.broadcast %137 : vector<1x1x128xf32> to vector<4x4x128xf32>
    %139 = arith.addf %135, %138 : vector<4x4x128xf32>
    %cst_186 = arith.constant 0.000000e+00 : f32
    %140 = vector.broadcast %cst_186 : f32 to vector<4x4x128xf32>
    %141 = arith.cmpf ogt, %139, %140 : vector<4x4x128xf32>
    %cst_187 = arith.constant 0.00999999977 : f32
    %142 = vector.broadcast %cst_187 : f32 to vector<4x4x128xf32>
    %143 = arith.mulf %142, %139 : vector<4x4x128xf32>
    %144 = arith.select %141, %139, %143 : vector<4x4x128xi1>, vector<4x4x128xf32>
    %145 = vector.shape_cast %144 : vector<4x4x128xf32> to vector<1x4x4x128xf32>
    %cst_188 = arith.constant 0.000000e+00 : bf16
    %146 = vector.broadcast %cst_188 : bf16 to vector<1x1x6x128xbf16>
    %c0_189 = arith.constant 0 : index
    %c0_190 = arith.constant 0 : index
    %c0_191 = arith.constant 0 : index
    %c0_192 = arith.constant 0 : index
    %147 = vector.load %arg7[%c0_189, %c0_190, %c0_191, %c0_192] : memref<1x6x6x128xbf16, #tpu.memory_space<vmem>>, vector<1x1x6x128xbf16>
    tpu.vector_store %arg7[%c0_189, %c0_190, %c0_191, %c0_192], %146 {strides = array<i32>} : memref<1x6x6x128xbf16, #tpu.memory_space<vmem>>, vector<1x1x6x128xbf16>,
    %c0_193 = arith.constant 0 : index
    %c5 = arith.constant 5 : index
    %c0_194 = arith.constant 0 : index
    %c0_195 = arith.constant 0 : index
    %148 = vector.load %arg7[%c0_193, %c5, %c0_194, %c0_195] : memref<1x6x6x128xbf16, #tpu.memory_space<vmem>>, vector<1x1x6x128xbf16>
    tpu.vector_store %arg7[%c0_193, %c5, %c0_194, %c0_195], %146 {strides = array<i32>} : memref<1x6x6x128xbf16, #tpu.memory_space<vmem>>, vector<1x1x6x128xbf16>,
    %cst_196 = arith.constant 0.000000e+00 : bf16
    %149 = vector.broadcast %cst_196 : bf16 to vector<1x4x1x128xbf16>
    %c0_197 = arith.constant 0 : index
    %c1_198 = arith.constant 1 : index
    %c0_199 = arith.constant 0 : index
    %c0_200 = arith.constant 0 : index
    %150 = vector.load %arg7[%c0_197, %c1_198, %c0_199, %c0_200] : memref<1x6x6x128xbf16, #tpu.memory_space<vmem>>, vector<1x4x1x128xbf16>
    tpu.vector_store %arg7[%c0_197, %c1_198, %c0_199, %c0_200], %149 {strides = array<i32>} : memref<1x6x6x128xbf16, #tpu.memory_space<vmem>>, vector<1x4x1x128xbf16>,
    %c0_201 = arith.constant 0 : index
    %c1_202 = arith.constant 1 : index
    %c5_203 = arith.constant 5 : index
    %c0_204 = arith.constant 0 : index
    %151 = vector.load %arg7[%c0_201, %c1_202, %c5_203, %c0_204] : memref<1x6x6x128xbf16, #tpu.memory_space<vmem>>, vector<1x4x1x128xbf16>
    tpu.vector_store %arg7[%c0_201, %c1_202, %c5_203, %c0_204], %149 {strides = array<i32>} : memref<1x6x6x128xbf16, #tpu.memory_space<vmem>>, vector<1x4x1x128xbf16>,
    %152 = arith.truncf %145 : vector<1x4x4x128xf32> to vector<1x4x4x128xbf16>
    %c0_205 = arith.constant 0 : index
    %c1_206 = arith.constant 1 : index
    %c1_207 = arith.constant 1 : index
    %c0_208 = arith.constant 0 : index
    %153 = vector.load %arg7[%c0_205, %c1_206, %c1_207, %c0_208] : memref<1x6x6x128xbf16, #tpu.memory_space<vmem>>, vector<1x4x4x128xbf16>
    tpu.vector_store %arg7[%c0_205, %c1_206, %c1_207, %c0_208], %152 {strides = array<i32>} : memref<1x6x6x128xbf16, #tpu.memory_space<vmem>>, vector<1x4x4x128xbf16>,
    %c0_209 = arith.constant 0 : index
    %c0_210 = arith.constant 0 : index
    %c0_211 = arith.constant 0 : index
    %c0_212 = arith.constant 0 : index
    %154 = vector.load %arg7[%c0_209, %c0_210, %c0_211, %c0_212] : memref<1x6x6x128xbf16, #tpu.memory_space<vmem>>, vector<1x4x4x128xbf16>
    %155 = vector.shape_cast %154 : vector<1x4x4x128xbf16> to vector<16x128xbf16>
    %c2_213 = arith.constant 2 : index
    %c0_214 = arith.constant 0 : index
    %c0_215 = arith.constant 0 : index
    %156 = vector.load %arg2[%c2_213, %c0_214, %c0_215] : memref<4x1152x128xbf16, #tpu.memory_space<vmem>>, vector<1x128x128xbf16>
    %157 = vector.shape_cast %156 : vector<1x128x128xbf16> to vector<128x128xbf16>
    %cst_216 = arith.constant dense<0.000000e+00> : vector<16x128xf32>
    %158 = tpu.matmul %155, %157, %cst_216 {dimension_numbers = #tpu.dot_dimension_numbers<[1], [0], [0], [1], [0, 0, 1, 1], [], []>} : vector<16x128xbf16>, vector<128x128xbf16>, vector<16x128xf32> -> vector<16x128xf32>
    %c0_217 = arith.constant 0 : index
    %c0_218 = arith.constant 0 : index
    %c1_219 = arith.constant 1 : index
    %c0_220 = arith.constant 0 : index
    %159 = vector.load %arg7[%c0_217, %c0_218, %c1_219, %c0_220] : memref<1x6x6x128xbf16, #tpu.memory_space<vmem>>, vector<1x4x4x128xbf16>
    %160 = vector.shape_cast %159 : vector<1x4x4x128xbf16> to vector<16x128xbf16>
    %c2_221 = arith.constant 2 : index
    %c128_222 = arith.constant 128 : index
    %c0_223 = arith.constant 0 : index
    %161 = vector.load %arg2[%c2_221, %c128_222, %c0_223] : memref<4x1152x128xbf16, #tpu.memory_space<vmem>>, vector<1x128x128xbf16>
    %162 = vector.shape_cast %161 : vector<1x128x128xbf16> to vector<128x128xbf16>
    %cst_224 = arith.constant dense<0.000000e+00> : vector<16x128xf32>
    %163 = tpu.matmul %160, %162, %cst_224 {dimension_numbers = #tpu.dot_dimension_numbers<[1], [0], [0], [1], [0, 0, 1, 1], [], []>} : vector<16x128xbf16>, vector<128x128xbf16>, vector<16x128xf32> -> vector<16x128xf32>
    %164 = arith.addf %158, %163 : vector<16x128xf32>
    %c0_225 = arith.constant 0 : index
    %c0_226 = arith.constant 0 : index
    %c2_227 = arith.constant 2 : index
    %c0_228 = arith.constant 0 : index
    %165 = vector.load %arg7[%c0_225, %c0_226, %c2_227, %c0_228] : memref<1x6x6x128xbf16, #tpu.memory_space<vmem>>, vector<1x4x4x128xbf16>
    %166 = vector.shape_cast %165 : vector<1x4x4x128xbf16> to vector<16x128xbf16>
    %c2_229 = arith.constant 2 : index
    %c256_230 = arith.constant 256 : index
    %c0_231 = arith.constant 0 : index
    %167 = vector.load %arg2[%c2_229, %c256_230, %c0_231] : memref<4x1152x128xbf16, #tpu.memory_space<vmem>>, vector<1x128x128xbf16>
    %168 = vector.shape_cast %167 : vector<1x128x128xbf16> to vector<128x128xbf16>
    %cst_232 = arith.constant dense<0.000000e+00> : vector<16x128xf32>
    %169 = tpu.matmul %166, %168, %cst_232 {dimension_numbers = #tpu.dot_dimension_numbers<[1], [0], [0], [1], [0, 0, 1, 1], [], []>} : vector<16x128xbf16>, vector<128x128xbf16>, vector<16x128xf32> -> vector<16x128xf32>
    %170 = arith.addf %164, %169 : vector<16x128xf32>
    %c0_233 = arith.constant 0 : index
    %c1_234 = arith.constant 1 : index
    %c0_235 = arith.constant 0 : index
    %c0_236 = arith.constant 0 : index
    %171 = vector.load %arg7[%c0_233, %c1_234, %c0_235, %c0_236] : memref<1x6x6x128xbf16, #tpu.memory_space<vmem>>, vector<1x4x4x128xbf16>
    %172 = vector.shape_cast %171 : vector<1x4x4x128xbf16> to vector<16x128xbf16>
    %c2_237 = arith.constant 2 : index
    %c384_238 = arith.constant 384 : index
    %c0_239 = arith.constant 0 : index
    %173 = vector.load %arg2[%c2_237, %c384_238, %c0_239] : memref<4x1152x128xbf16, #tpu.memory_space<vmem>>, vector<1x128x128xbf16>
    %174 = vector.shape_cast %173 : vector<1x128x128xbf16> to vector<128x128xbf16>
    %cst_240 = arith.constant dense<0.000000e+00> : vector<16x128xf32>
    %175 = tpu.matmul %172, %174, %cst_240 {dimension_numbers = #tpu.dot_dimension_numbers<[1], [0], [0], [1], [0, 0, 1, 1], [], []>} : vector<16x128xbf16>, vector<128x128xbf16>, vector<16x128xf32> -> vector<16x128xf32>
    %176 = arith.addf %170, %175 : vector<16x128xf32>
    %c0_241 = arith.constant 0 : index
    %c1_242 = arith.constant 1 : index
    %c1_243 = arith.constant 1 : index
    %c0_244 = arith.constant 0 : index
    %177 = vector.load %arg7[%c0_241, %c1_242, %c1_243, %c0_244] : memref<1x6x6x128xbf16, #tpu.memory_space<vmem>>, vector<1x4x4x128xbf16>
    %178 = vector.shape_cast %177 : vector<1x4x4x128xbf16> to vector<16x128xbf16>
    %c2_245 = arith.constant 2 : index
    %c512_246 = arith.constant 512 : index
    %c0_247 = arith.constant 0 : index
    %179 = vector.load %arg2[%c2_245, %c512_246, %c0_247] : memref<4x1152x128xbf16, #tpu.memory_space<vmem>>, vector<1x128x128xbf16>
    %180 = vector.shape_cast %179 : vector<1x128x128xbf16> to vector<128x128xbf16>
    %cst_248 = arith.constant dense<0.000000e+00> : vector<16x128xf32>
    %181 = tpu.matmul %178, %180, %cst_248 {dimension_numbers = #tpu.dot_dimension_numbers<[1], [0], [0], [1], [0, 0, 1, 1], [], []>} : vector<16x128xbf16>, vector<128x128xbf16>, vector<16x128xf32> -> vector<16x128xf32>
    %182 = arith.addf %176, %181 : vector<16x128xf32>
    %c0_249 = arith.constant 0 : index
    %c1_250 = arith.constant 1 : index
    %c2_251 = arith.constant 2 : index
    %c0_252 = arith.constant 0 : index
    %183 = vector.load %arg7[%c0_249, %c1_250, %c2_251, %c0_252] : memref<1x6x6x128xbf16, #tpu.memory_space<vmem>>, vector<1x4x4x128xbf16>
    %184 = vector.shape_cast %183 : vector<1x4x4x128xbf16> to vector<16x128xbf16>
    %c2_253 = arith.constant 2 : index
    %c640_254 = arith.constant 640 : index
    %c0_255 = arith.constant 0 : index
    %185 = vector.load %arg2[%c2_253, %c640_254, %c0_255] : memref<4x1152x128xbf16, #tpu.memory_space<vmem>>, vector<1x128x128xbf16>
    %186 = vector.shape_cast %185 : vector<1x128x128xbf16> to vector<128x128xbf16>
    %cst_256 = arith.constant dense<0.000000e+00> : vector<16x128xf32>
    %187 = tpu.matmul %184, %186, %cst_256 {dimension_numbers = #tpu.dot_dimension_numbers<[1], [0], [0], [1], [0, 0, 1, 1], [], []>} : vector<16x128xbf16>, vector<128x128xbf16>, vector<16x128xf32> -> vector<16x128xf32>
    %188 = arith.addf %182, %187 : vector<16x128xf32>
    %c0_257 = arith.constant 0 : index
    %c2_258 = arith.constant 2 : index
    %c0_259 = arith.constant 0 : index
    %c0_260 = arith.constant 0 : index
    %189 = vector.load %arg7[%c0_257, %c2_258, %c0_259, %c0_260] : memref<1x6x6x128xbf16, #tpu.memory_space<vmem>>, vector<1x4x4x128xbf16>
    %190 = vector.shape_cast %189 : vector<1x4x4x128xbf16> to vector<16x128xbf16>
    %c2_261 = arith.constant 2 : index
    %c768_262 = arith.constant 768 : index
    %c0_263 = arith.constant 0 : index
    %191 = vector.load %arg2[%c2_261, %c768_262, %c0_263] : memref<4x1152x128xbf16, #tpu.memory_space<vmem>>, vector<1x128x128xbf16>
    %192 = vector.shape_cast %191 : vector<1x128x128xbf16> to vector<128x128xbf16>
    %cst_264 = arith.constant dense<0.000000e+00> : vector<16x128xf32>
    %193 = tpu.matmul %190, %192, %cst_264 {dimension_numbers = #tpu.dot_dimension_numbers<[1], [0], [0], [1], [0, 0, 1, 1], [], []>} : vector<16x128xbf16>, vector<128x128xbf16>, vector<16x128xf32> -> vector<16x128xf32>
    %194 = arith.addf %188, %193 : vector<16x128xf32>
    %c0_265 = arith.constant 0 : index
    %c2_266 = arith.constant 2 : index
    %c1_267 = arith.constant 1 : index
    %c0_268 = arith.constant 0 : index
    %195 = vector.load %arg7[%c0_265, %c2_266, %c1_267, %c0_268] : memref<1x6x6x128xbf16, #tpu.memory_space<vmem>>, vector<1x4x4x128xbf16>
    %196 = vector.shape_cast %195 : vector<1x4x4x128xbf16> to vector<16x128xbf16>
    %c2_269 = arith.constant 2 : index
    %c896_270 = arith.constant 896 : index
    %c0_271 = arith.constant 0 : index
    %197 = vector.load %arg2[%c2_269, %c896_270, %c0_271] : memref<4x1152x128xbf16, #tpu.memory_space<vmem>>, vector<1x128x128xbf16>
    %198 = vector.shape_cast %197 : vector<1x128x128xbf16> to vector<128x128xbf16>
    %cst_272 = arith.constant dense<0.000000e+00> : vector<16x128xf32>
    %199 = tpu.matmul %196, %198, %cst_272 {dimension_numbers = #tpu.dot_dimension_numbers<[1], [0], [0], [1], [0, 0, 1, 1], [], []>} : vector<16x128xbf16>, vector<128x128xbf16>, vector<16x128xf32> -> vector<16x128xf32>
    %200 = arith.addf %194, %199 : vector<16x128xf32>
    %c0_273 = arith.constant 0 : index
    %c2_274 = arith.constant 2 : index
    %c2_275 = arith.constant 2 : index
    %c0_276 = arith.constant 0 : index
    %201 = vector.load %arg7[%c0_273, %c2_274, %c2_275, %c0_276] : memref<1x6x6x128xbf16, #tpu.memory_space<vmem>>, vector<1x4x4x128xbf16>
    %202 = vector.shape_cast %201 : vector<1x4x4x128xbf16> to vector<16x128xbf16>
    %c2_277 = arith.constant 2 : index
    %c1024_278 = arith.constant 1024 : index
    %c0_279 = arith.constant 0 : index
    %203 = vector.load %arg2[%c2_277, %c1024_278, %c0_279] : memref<4x1152x128xbf16, #tpu.memory_space<vmem>>, vector<1x128x128xbf16>
    %204 = vector.shape_cast %203 : vector<1x128x128xbf16> to vector<128x128xbf16>
    %cst_280 = arith.constant dense<0.000000e+00> : vector<16x128xf32>
    %205 = tpu.matmul %202, %204, %cst_280 {dimension_numbers = #tpu.dot_dimension_numbers<[1], [0], [0], [1], [0, 0, 1, 1], [], []>} : vector<16x128xbf16>, vector<128x128xbf16>, vector<16x128xf32> -> vector<16x128xf32>
    %206 = arith.addf %200, %205 : vector<16x128xf32>
    %207 = vector.shape_cast %206 : vector<16x128xf32> to vector<2x2x2x2x128xf32>
    %cst_281 = arith.constant dense<0xFF800000> : vector<2x2x128xf32>
    %208 = vector.multi_reduction <maximumf>, %207, %cst_281 [1, 3] : vector<2x2x2x2x128xf32> to vector<2x2x128xf32>
    %c2_282 = arith.constant 2 : index
    %c0_283 = arith.constant 0 : index
    %209 = vector.load %arg3[%c2_282, %c0_283] : memref<4x128xf32, #tpu.memory_space<vmem>>, vector<1x128xf32>
    %210 = vector.shape_cast %209 : vector<1x128xf32> to vector<1x1x128xf32>
    %211 = vector.broadcast %210 : vector<1x1x128xf32> to vector<2x2x128xf32>
    %212 = arith.addf %208, %211 : vector<2x2x128xf32>
    %cst_284 = arith.constant 0.000000e+00 : f32
    %213 = vector.broadcast %cst_284 : f32 to vector<2x2x128xf32>
    %214 = arith.cmpf ogt, %212, %213 : vector<2x2x128xf32>
    %cst_285 = arith.constant 0.00999999977 : f32
    %215 = vector.broadcast %cst_285 : f32 to vector<2x2x128xf32>
    %216 = arith.mulf %215, %212 : vector<2x2x128xf32>
    %217 = arith.select %214, %212, %216 : vector<2x2x128xi1>, vector<2x2x128xf32>
    %218 = vector.shape_cast %217 : vector<2x2x128xf32> to vector<1x2x2x128xf32>
    %cst_286 = arith.constant 0.000000e+00 : bf16
    %219 = vector.broadcast %cst_286 : bf16 to vector<1x1x4x128xbf16>
    %c0_287 = arith.constant 0 : index
    %c0_288 = arith.constant 0 : index
    %c0_289 = arith.constant 0 : index
    %c0_290 = arith.constant 0 : index
    %220 = vector.load %arg8[%c0_287, %c0_288, %c0_289, %c0_290] : memref<1x4x4x128xbf16, #tpu.memory_space<vmem>>, vector<1x1x4x128xbf16>
    tpu.vector_store %arg8[%c0_287, %c0_288, %c0_289, %c0_290], %219 {strides = array<i32>} : memref<1x4x4x128xbf16, #tpu.memory_space<vmem>>, vector<1x1x4x128xbf16>,
    %c0_291 = arith.constant 0 : index
    %c3 = arith.constant 3 : index
    %c0_292 = arith.constant 0 : index
    %c0_293 = arith.constant 0 : index
    %221 = vector.load %arg8[%c0_291, %c3, %c0_292, %c0_293] : memref<1x4x4x128xbf16, #tpu.memory_space<vmem>>, vector<1x1x4x128xbf16>
    tpu.vector_store %arg8[%c0_291, %c3, %c0_292, %c0_293], %219 {strides = array<i32>} : memref<1x4x4x128xbf16, #tpu.memory_space<vmem>>, vector<1x1x4x128xbf16>,
    %cst_294 = arith.constant 0.000000e+00 : bf16
    %222 = vector.broadcast %cst_294 : bf16 to vector<1x2x1x128xbf16>
    %c0_295 = arith.constant 0 : index
    %c1_296 = arith.constant 1 : index
    %c0_297 = arith.constant 0 : index
    %c0_298 = arith.constant 0 : index
    %223 = vector.load %arg8[%c0_295, %c1_296, %c0_297, %c0_298] : memref<1x4x4x128xbf16, #tpu.memory_space<vmem>>, vector<1x2x1x128xbf16>
    tpu.vector_store %arg8[%c0_295, %c1_296, %c0_297, %c0_298], %222 {strides = array<i32>} : memref<1x4x4x128xbf16, #tpu.memory_space<vmem>>, vector<1x2x1x128xbf16>,
    %c0_299 = arith.constant 0 : index
    %c1_300 = arith.constant 1 : index
    %c3_301 = arith.constant 3 : index
    %c0_302 = arith.constant 0 : index
    %224 = vector.load %arg8[%c0_299, %c1_300, %c3_301, %c0_302] : memref<1x4x4x128xbf16, #tpu.memory_space<vmem>>, vector<1x2x1x128xbf16>
    tpu.vector_store %arg8[%c0_299, %c1_300, %c3_301, %c0_302], %222 {strides = array<i32>} : memref<1x4x4x128xbf16, #tpu.memory_space<vmem>>, vector<1x2x1x128xbf16>,
    %225 = arith.truncf %218 : vector<1x2x2x128xf32> to vector<1x2x2x128xbf16>
    %c0_303 = arith.constant 0 : index
    %c1_304 = arith.constant 1 : index
    %c1_305 = arith.constant 1 : index
    %c0_306 = arith.constant 0 : index
    %226 = vector.load %arg8[%c0_303, %c1_304, %c1_305, %c0_306] : memref<1x4x4x128xbf16, #tpu.memory_space<vmem>>, vector<1x2x2x128xbf16>
    tpu.vector_store %arg8[%c0_303, %c1_304, %c1_305, %c0_306], %225 {strides = array<i32>} : memref<1x4x4x128xbf16, #tpu.memory_space<vmem>>, vector<1x2x2x128xbf16>,
    %c0_307 = arith.constant 0 : index
    %c0_308 = arith.constant 0 : index
    %c0_309 = arith.constant 0 : index
    %c0_310 = arith.constant 0 : index
    %227 = vector.load %arg8[%c0_307, %c0_308, %c0_309, %c0_310] : memref<1x4x4x128xbf16, #tpu.memory_space<vmem>>, vector<1x2x2x128xbf16>
    %228 = vector.shape_cast %227 : vector<1x2x2x128xbf16> to vector<4x128xbf16>
    %c3_311 = arith.constant 3 : index
    %c0_312 = arith.constant 0 : index
    %c0_313 = arith.constant 0 : index
    %229 = vector.load %arg2[%c3_311, %c0_312, %c0_313] : memref<4x1152x128xbf16, #tpu.memory_space<vmem>>, vector<1x128x128xbf16>
    %230 = vector.shape_cast %229 : vector<1x128x128xbf16> to vector<128x128xbf16>
    %cst_314 = arith.constant dense<0.000000e+00> : vector<4x128xf32>
    %231 = tpu.matmul %228, %230, %cst_314 {dimension_numbers = #tpu.dot_dimension_numbers<[1], [0], [0], [1], [0, 0, 1, 1], [], []>} : vector<4x128xbf16>, vector<128x128xbf16>, vector<4x128xf32> -> vector<4x128xf32>
    %c0_315 = arith.constant 0 : index
    %c0_316 = arith.constant 0 : index
    %c1_317 = arith.constant 1 : index
    %c0_318 = arith.constant 0 : index
    %232 = vector.load %arg8[%c0_315, %c0_316, %c1_317, %c0_318] : memref<1x4x4x128xbf16, #tpu.memory_space<vmem>>, vector<1x2x2x128xbf16>
    %233 = vector.shape_cast %232 : vector<1x2x2x128xbf16> to vector<4x128xbf16>
    %c3_319 = arith.constant 3 : index
    %c128_320 = arith.constant 128 : index
    %c0_321 = arith.constant 0 : index
    %234 = vector.load %arg2[%c3_319, %c128_320, %c0_321] : memref<4x1152x128xbf16, #tpu.memory_space<vmem>>, vector<1x128x128xbf16>
    %235 = vector.shape_cast %234 : vector<1x128x128xbf16> to vector<128x128xbf16>
    %cst_322 = arith.constant dense<0.000000e+00> : vector<4x128xf32>
    %236 = tpu.matmul %233, %235, %cst_322 {dimension_numbers = #tpu.dot_dimension_numbers<[1], [0], [0], [1], [0, 0, 1, 1], [], []>} : vector<4x128xbf16>, vector<128x128xbf16>, vector<4x128xf32> -> vector<4x128xf32>
    %237 = arith.addf %231, %236 : vector<4x128xf32>
    %c0_323 = arith.constant 0 : index
    %c0_324 = arith.constant 0 : index
    %c2_325 = arith.constant 2 : index
    %c0_326 = arith.constant 0 : index
    %238 = vector.load %arg8[%c0_323, %c0_324, %c2_325, %c0_326] : memref<1x4x4x128xbf16, #tpu.memory_space<vmem>>, vector<1x2x2x128xbf16>
    %239 = vector.shape_cast %238 : vector<1x2x2x128xbf16> to vector<4x128xbf16>
    %c3_327 = arith.constant 3 : index
    %c256_328 = arith.constant 256 : index
    %c0_329 = arith.constant 0 : index
    %240 = vector.load %arg2[%c3_327, %c256_328, %c0_329] : memref<4x1152x128xbf16, #tpu.memory_space<vmem>>, vector<1x128x128xbf16>
    %241 = vector.shape_cast %240 : vector<1x128x128xbf16> to vector<128x128xbf16>
    %cst_330 = arith.constant dense<0.000000e+00> : vector<4x128xf32>
    %242 = tpu.matmul %239, %241, %cst_330 {dimension_numbers = #tpu.dot_dimension_numbers<[1], [0], [0], [1], [0, 0, 1, 1], [], []>} : vector<4x128xbf16>, vector<128x128xbf16>, vector<4x128xf32> -> vector<4x128xf32>
    %243 = arith.addf %237, %242 : vector<4x128xf32>
    %c0_331 = arith.constant 0 : index
    %c1_332 = arith.constant 1 : index
    %c0_333 = arith.constant 0 : index
    %c0_334 = arith.constant 0 : index
    %244 = vector.load %arg8[%c0_331, %c1_332, %c0_333, %c0_334] : memref<1x4x4x128xbf16, #tpu.memory_space<vmem>>, vector<1x2x2x128xbf16>
    %245 = vector.shape_cast %244 : vector<1x2x2x128xbf16> to vector<4x128xbf16>
    %c3_335 = arith.constant 3 : index
    %c384_336 = arith.constant 384 : index
    %c0_337 = arith.constant 0 : index
    %246 = vector.load %arg2[%c3_335, %c384_336, %c0_337] : memref<4x1152x128xbf16, #tpu.memory_space<vmem>>, vector<1x128x128xbf16>
    %247 = vector.shape_cast %246 : vector<1x128x128xbf16> to vector<128x128xbf16>
    %cst_338 = arith.constant dense<0.000000e+00> : vector<4x128xf32>
    %248 = tpu.matmul %245, %247, %cst_338 {dimension_numbers = #tpu.dot_dimension_numbers<[1], [0], [0], [1], [0, 0, 1, 1], [], []>} : vector<4x128xbf16>, vector<128x128xbf16>, vector<4x128xf32> -> vector<4x128xf32>
    %249 = arith.addf %243, %248 : vector<4x128xf32>
    %c0_339 = arith.constant 0 : index
    %c1_340 = arith.constant 1 : index
    %c1_341 = arith.constant 1 : index
    %c0_342 = arith.constant 0 : index
    %250 = vector.load %arg8[%c0_339, %c1_340, %c1_341, %c0_342] : memref<1x4x4x128xbf16, #tpu.memory_space<vmem>>, vector<1x2x2x128xbf16>
    %251 = vector.shape_cast %250 : vector<1x2x2x128xbf16> to vector<4x128xbf16>
    %c3_343 = arith.constant 3 : index
    %c512_344 = arith.constant 512 : index
    %c0_345 = arith.constant 0 : index
    %252 = vector.load %arg2[%c3_343, %c512_344, %c0_345] : memref<4x1152x128xbf16, #tpu.memory_space<vmem>>, vector<1x128x128xbf16>
    %253 = vector.shape_cast %252 : vector<1x128x128xbf16> to vector<128x128xbf16>
    %cst_346 = arith.constant dense<0.000000e+00> : vector<4x128xf32>
    %254 = tpu.matmul %251, %253, %cst_346 {dimension_numbers = #tpu.dot_dimension_numbers<[1], [0], [0], [1], [0, 0, 1, 1], [], []>} : vector<4x128xbf16>, vector<128x128xbf16>, vector<4x128xf32> -> vector<4x128xf32>
    %255 = arith.addf %249, %254 : vector<4x128xf32>
    %c0_347 = arith.constant 0 : index
    %c1_348 = arith.constant 1 : index
    %c2_349 = arith.constant 2 : index
    %c0_350 = arith.constant 0 : index
    %256 = vector.load %arg8[%c0_347, %c1_348, %c2_349, %c0_350] : memref<1x4x4x128xbf16, #tpu.memory_space<vmem>>, vector<1x2x2x128xbf16>
    %257 = vector.shape_cast %256 : vector<1x2x2x128xbf16> to vector<4x128xbf16>
    %c3_351 = arith.constant 3 : index
    %c640_352 = arith.constant 640 : index
    %c0_353 = arith.constant 0 : index
    %258 = vector.load %arg2[%c3_351, %c640_352, %c0_353] : memref<4x1152x128xbf16, #tpu.memory_space<vmem>>, vector<1x128x128xbf16>
    %259 = vector.shape_cast %258 : vector<1x128x128xbf16> to vector<128x128xbf16>
    %cst_354 = arith.constant dense<0.000000e+00> : vector<4x128xf32>
    %260 = tpu.matmul %257, %259, %cst_354 {dimension_numbers = #tpu.dot_dimension_numbers<[1], [0], [0], [1], [0, 0, 1, 1], [], []>} : vector<4x128xbf16>, vector<128x128xbf16>, vector<4x128xf32> -> vector<4x128xf32>
    %261 = arith.addf %255, %260 : vector<4x128xf32>
    %c0_355 = arith.constant 0 : index
    %c2_356 = arith.constant 2 : index
    %c0_357 = arith.constant 0 : index
    %c0_358 = arith.constant 0 : index
    %262 = vector.load %arg8[%c0_355, %c2_356, %c0_357, %c0_358] : memref<1x4x4x128xbf16, #tpu.memory_space<vmem>>, vector<1x2x2x128xbf16>
    %263 = vector.shape_cast %262 : vector<1x2x2x128xbf16> to vector<4x128xbf16>
    %c3_359 = arith.constant 3 : index
    %c768_360 = arith.constant 768 : index
    %c0_361 = arith.constant 0 : index
    %264 = vector.load %arg2[%c3_359, %c768_360, %c0_361] : memref<4x1152x128xbf16, #tpu.memory_space<vmem>>, vector<1x128x128xbf16>
    %265 = vector.shape_cast %264 : vector<1x128x128xbf16> to vector<128x128xbf16>
    %cst_362 = arith.constant dense<0.000000e+00> : vector<4x128xf32>
    %266 = tpu.matmul %263, %265, %cst_362 {dimension_numbers = #tpu.dot_dimension_numbers<[1], [0], [0], [1], [0, 0, 1, 1], [], []>} : vector<4x128xbf16>, vector<128x128xbf16>, vector<4x128xf32> -> vector<4x128xf32>
    %267 = arith.addf %261, %266 : vector<4x128xf32>
    %c0_363 = arith.constant 0 : index
    %c2_364 = arith.constant 2 : index
    %c1_365 = arith.constant 1 : index
    %c0_366 = arith.constant 0 : index
    %268 = vector.load %arg8[%c0_363, %c2_364, %c1_365, %c0_366] : memref<1x4x4x128xbf16, #tpu.memory_space<vmem>>, vector<1x2x2x128xbf16>
    %269 = vector.shape_cast %268 : vector<1x2x2x128xbf16> to vector<4x128xbf16>
    %c3_367 = arith.constant 3 : index
    %c896_368 = arith.constant 896 : index
    %c0_369 = arith.constant 0 : index
    %270 = vector.load %arg2[%c3_367, %c896_368, %c0_369] : memref<4x1152x128xbf16, #tpu.memory_space<vmem>>, vector<1x128x128xbf16>
    %271 = vector.shape_cast %270 : vector<1x128x128xbf16> to vector<128x128xbf16>
    %cst_370 = arith.constant dense<0.000000e+00> : vector<4x128xf32>
    %272 = tpu.matmul %269, %271, %cst_370 {dimension_numbers = #tpu.dot_dimension_numbers<[1], [0], [0], [1], [0, 0, 1, 1], [], []>} : vector<4x128xbf16>, vector<128x128xbf16>, vector<4x128xf32> -> vector<4x128xf32>
    %273 = arith.addf %267, %272 : vector<4x128xf32>
    %c0_371 = arith.constant 0 : index
    %c2_372 = arith.constant 2 : index
    %c2_373 = arith.constant 2 : index
    %c0_374 = arith.constant 0 : index
    %274 = vector.load %arg8[%c0_371, %c2_372, %c2_373, %c0_374] : memref<1x4x4x128xbf16, #tpu.memory_space<vmem>>, vector<1x2x2x128xbf16>
    %275 = vector.shape_cast %274 : vector<1x2x2x128xbf16> to vector<4x128xbf16>
    %c3_375 = arith.constant 3 : index
    %c1024_376 = arith.constant 1024 : index
    %c0_377 = arith.constant 0 : index
    %276 = vector.load %arg2[%c3_375, %c1024_376, %c0_377] : memref<4x1152x128xbf16, #tpu.memory_space<vmem>>, vector<1x128x128xbf16>
    %277 = vector.shape_cast %276 : vector<1x128x128xbf16> to vector<128x128xbf16>
    %cst_378 = arith.constant dense<0.000000e+00> : vector<4x128xf32>
    %278 = tpu.matmul %275, %277, %cst_378 {dimension_numbers = #tpu.dot_dimension_numbers<[1], [0], [0], [1], [0, 0, 1, 1], [], []>} : vector<4x128xbf16>, vector<128x128xbf16>, vector<4x128xf32> -> vector<4x128xf32>
    %279 = arith.addf %273, %278 : vector<4x128xf32>
    %280 = vector.shape_cast %279 : vector<4x128xf32> to vector<1x2x1x2x128xf32>
    %cst_379 = arith.constant dense<0xFF800000> : vector<1x1x128xf32>
    %281 = vector.multi_reduction <maximumf>, %280, %cst_379 [1, 3] : vector<1x2x1x2x128xf32> to vector<1x1x128xf32>
    %c3_380 = arith.constant 3 : index
    %c0_381 = arith.constant 0 : index
    %282 = vector.load %arg3[%c3_380, %c0_381] : memref<4x128xf32, #tpu.memory_space<vmem>>, vector<1x128xf32>
    %283 = vector.shape_cast %282 : vector<1x128xf32> to vector<1x1x128xf32>
    %284 = arith.addf %281, %283 : vector<1x1x128xf32>
    %cst_382 = arith.constant 0.000000e+00 : f32
    %285 = vector.broadcast %cst_382 : f32 to vector<1x1x128xf32>
    %286 = arith.cmpf ogt, %284, %285 : vector<1x1x128xf32>
    %cst_383 = arith.constant 0.00999999977 : f32
    %287 = vector.broadcast %cst_383 : f32 to vector<1x1x128xf32>
    %288 = arith.mulf %287, %284 : vector<1x1x128xf32>
    %289 = arith.select %286, %284, %288 : vector<1x1x128xi1>, vector<1x1x128xf32>
    %290 = vector.shape_cast %289 : vector<1x1x128xf32> to vector<1x1x1x128xf32>
    %291 = vector.shape_cast %290 : vector<1x1x1x128xf32> to vector<1x1x128xf32>
    %c0_384 = arith.constant 0 : index
    %c0_385 = arith.constant 0 : index
    %c0_386 = arith.constant 0 : index
    %292 = vector.load %arg4[%c0_384, %c0_385, %c0_386] : memref<1x1x128xf32, #tpu.memory_space<vmem>>, vector<1x1x128xf32>
    tpu.vector_store %arg4[%c0_384, %c0_385, %c0_386], %291 {strides = array<i32>} : memref<1x1x128xf32, #tpu.memory_space<vmem>>, vector<1x1x128xf32>,
    return
  }
  func.func @transform_0(%arg0: i32) -> (i32, i32, i32, i32) {
    %c0_i32 = arith.constant 0 : i32
    %c0_i32_0 = arith.constant 0 : i32
    %c0_i32_1 = arith.constant 0 : i32
    %c0_i32_2 = arith.constant 0 : i32
    return %arg0, %c0_i32, %c0_i32_0, %c0_i32_1 : i32, i32, i32, i32
  }
  func.func @transform_1(%arg0: i32) -> (i32, i32, i32) {
    %c0_i32 = arith.constant 0 : i32
    %c0_i32_0 = arith.constant 0 : i32
    %c0_i32_1 = arith.constant 0 : i32
    %c0_i32_2 = arith.constant 0 : i32
    return %c0_i32, %c0_i32_0, %c0_i32_1 : i32, i32, i32
  }
  func.func @transform_2(%arg0: i32) -> (i32, i32) {
    %c0_i32 = arith.constant 0 : i32
    %c0_i32_0 = arith.constant 0 : i32
    %c0_i32_1 = arith.constant 0 : i32
    return %c0_i32, %c0_i32_0 : i32, i32
  }
  func.func @transform_3(%arg0: i32) -> (i32, i32, i32) {
    %c0_i32 = arith.constant 0 : i32
    %c0_i32_0 = arith.constant 0 : i32
    %c0_i32_1 = arith.constant 0 : i32
    return %arg0, %c0_i32, %c0_i32_0 : i32, i32, i32
  }
}

</mosaic_0001>

<bundles_post_ra>
// kernel: tpu_custom_call.1
= control target key start
LH: loop header
LB: loop body
LE: loop exit
PB: predicated region body
PF: predicated region fallthrough
CT: control target
= control target key end

     0   :  { %8 = vsyncpa [#allocation7], 0  ;;  %s15760_s0 = inlined_call_operand.hbm [shape: bf16[2,16,16,128], index: 0, kind: input, shape index: {}]   ;;  %s15761_s1 = inlined_call_operand.hbm [shape: bf16[4,1152,128], index: 1, kind: input, shape index: {}]   ;;  %s15762_s2 = inlined_call_operand.hbm [shape: f32[4,128], index: 2, kind: input, shape index: {}]   ;;  %s15763_s3 = inlined_call_operand.hbm [shape: f32[2,1,128], index: 3, kind: output, shape index: {}]  }
   0x1   :  { %10 = vsyncpa [#allocation7 + $0x1], 0 }
   0x2   :  { %11 = vsyncpa [#allocation10], 0 }
   0x3   :  { %12 = vsyncpa [#allocation8], 0 }
   0x4   :  { %14 = vsyncpa [#allocation8 + $0x1], 0  ;;  %s13150_s12 = smov 0   ;;  %s13152_s13 = smov 0  }
   0x5   :  { %s13154_s14 = smov 0   ;;  %s13156_s15 = smov 0  }
   0x6 LB: > { %s13171_s16 = sadd.s32 4294967295, %s13123_s15   ;;  %s10998_s17 = sadd.s32 4294967294, %s13123_s15   ;;  %s13123_s15 = sphi %s13156_s15, %s16001_s15   ;;  %s13119_s14 = sphi %s13154_s14, %s16000_s14   ;;  %s13115_s13 = sphi %s13152_s13, %s15999_s13   ;;  %s13111_s12 = sphi %s13150_s12, %s15998_s12  }
   0x7   : > { %p40_p0 = scmp.ne.s32.totalorder %s13115_s13, %s13111_s12  ;;  %p41_p1 = scmp.eq.s32.totalorder %s13171_s16, 0 }
   0x8   : > { %p106_p2 = scmp.eq.s32.totalorder %s13171_s16, 1  ;;  %p112_p3 = scmp.eq.s32.totalorder %s10998_s17, 1 }
   0x9   : > { %p13180_p4 = por %p41_p1, %p40_p0  ;;  %p10999_p5 = scmp.ge.s32.totalorder %s13123_s15, 1 }
   0xa   : > { %p13185_p6 = por %p112_p3, %p40_p0  ;;  %p119_p7 = scmp.lt.s32.totalorder %s13123_s15, 3 }
   0xb   : > { %s130_s22 = sshll.u32 %s15761_s1, 4  ;;  %s13125_s24 = smov [#allocation9]   ;;  %s131_s22 = int_to_ptr.hbm [resolvable:$true] %s130_s22 }
   0xc   : > { %p13193_p8 = pnand %p10999_p5, %p119_p7  ;;  %s132_s25 = sshll.u32 %s13125_s24, 4  ;;  %s133_s25 = int_to_ptr.vmem [resolvable:$true] %s132_s25 }
   0xd   : > { %s145_s28 = sshll.u32 %s15762_s2, 4  ;;  %s13126_s29 = smov 64   ;;  %s146_s28 = int_to_ptr.hbm [resolvable:$true] %s145_s28 }
   0xe   : > { %p12867_p9 = pneg %p13193_p8  ;;  %s13127_s30 = smov 4  }
   0xf   : > { %s13128_s4 = smov [#allocation11]   ;;  %s13209_s6 = sadd.s32 1, %s13123_s15  }
  0x10   : > { %p12868_p10 = pnand %p12867_p9, %p41_p1  ;;  %s147_s5 = sshll.u32 %s13128_s4, 4  ;;  %s148_s5 = int_to_ptr.vmem [resolvable:$true] %s147_s5 }
  0x11   : > { %s27_s7 = sadd.s32 1, %s13119_s14  ;;  %s24_s8 = ssub.s32 %s13123_s15, %s13209_s6 }
  0x12   : > { %12870 = dma.hbm_to_vmem [thread:$0]  (!%p12868_p10), %s131_s22, 36864, %s133_s25, [#allocation10], %s13126_s29, %s13126_s29, %s13127_s30  }
  0x13   : > { %12873 = dma.hbm_to_vmem [thread:$0]  (!%p12868_p10), %s146_s28, 64, %s148_s5, [#allocation10]  }
  0x14   : > { %p34_p12 = scmp.ne.s32.totalorder %s13119_s14, %s13115_s13  ;;  %p25_p13 = scmp.eq.s32.totalorder %s24_s8, 0 }
  0x15   : > { %p35_p0 = scmp.eq.s32.totalorder %s13123_s15, 0  ;;  %p12884_p5 = scmp.lt.s32.totalorder %s13123_s15, 2 }
  0x16   : > { %p13219_p3 = por %p106_p2, %p34_p12  ;;  %s158_s11 = sand.u32 1, %s13119_s14  }
  0x17   : > { %s13225_s10 = scalar_select %p25_p13, %s13119_s14, %s27_s7  }
  0x18   : > { %p36_p7 = por %p35_p0, %p34_p12  ;;  %s11003_s17 = sshll.u32 %s158_s11, 7 }
  0x19   : > { %s12506_s20 = sshll.u32 %s13123_s15, 7  ;;  %s162_s25 = scalar_lea.vmem [#allocation6], %s11003_s17 }
  0x1a   : > { %s167_s24 = scalar_lea.hbm %s15760_s0, %s12506_s20  ;;  %s170_s26 = sshll.u32 %s162_s25, 4  ;;  %s171_s26 = int_to_ptr.vmem [resolvable:$true] %s170_s26 }
  0x1b   : > { %s168_s27 = sshll.u32 %s167_s24, 4  ;;  %p13232_p2 = pnand %p12884_p5, %p36_p7  ;;  %s169_s27 = int_to_ptr.hbm [resolvable:$true] %s168_s27 }
  0x1c   : > { %s159_s4 = scalar_lea.sflag [#allocation7], %s158_s11  ;;  %s13023_s5 = sshra.s32 %s169_s27, 4  ;;  %s13024_s5 = int_to_ptr.hbm [resolvable:$true] %s13023_s5 }
  0x1d   : > { %s13025_s7 = scalar_lea.hbm %s13024_s5, 128  ;;  %p13027_p10 = pneg %p13232_p2 }
  0x1e   : > { %p13026_p9 = scmp.ne.s32.totalorder %s13024_s5, %s13025_s7  ;;  %s13030_s20 = scalar_lea.hbm %s15760_s0, 256 }
  0x1f   : > { %p13031_p0 = scmp.lt.s32.totalorder %s13024_s5, %s15760_s0  ;;  %p13032_p5 = scmp.lt.s32.totalorder %s13030_s20, %s13025_s7 }
  0x20   : > { %p13028_p12 = pnand %p13027_p10, %p13026_p9 }
  0x21   : > { %p13033_p7 = por %p13032_p5, %p13031_p0 }
  0x22   : > { %p13029_p13 = pneg %p13028_p12 }
  0x24   : > { %p13034_p11 = pnand %p13033_p7, %p13029_p13 }
  0x26   : > { %13037 = shalt.err (!%p13034_p11)
}
  0x27   : > { %12877 = dma.hbm_to_vmem [thread:$0]  (!%p13232_p2), %s169_s27, 2048, %s171_s26, %s159_s4, %s13126_s29, %s13126_s29, %s13127_s30  }
  0x28   : > { %182 = sbr.rel (%p13193_p8) target bundleno = 2029 (0x7ed), region = 32 }
  0x2d   : > { %s13252_s11 = sand.u32 1, %s13115_s13  }
  0x2e   : > { %s11007_s24 = sshll.u32 %s13252_s11, 7  ;;  %s185_s25 = scalar_lea.sflag [#allocation7], %s13252_s11 }
  0x2f   : > { %s13256_s5 = scalar_lea.vmem [#allocation6], %s11007_s24 }
  0x30   : > { %13098 = dma.done.wait (%p13180_p4), %s185_s25, 2048  }
  0x31   : > { %13100 = vsyncadd (%p13180_p4), %s185_s25, 4294965248 }
  0x32   : > { %13102 = dma.done.wait (%p41_p1), [#allocation10], 36928  }
  0x33   : > { %13104 = vsyncadd (%p41_p1), [#allocation10], 4294930368  ;;  %v13129_v0 = vmov 0   ;;  %v12538_v1 = vld [vmem:[#allocation9 + $0x78] sm:$0xff]  ;;  %v12537_v5 = vld [vmem:[#allocation9 + $0x70] sm:$0xff]  ;;  %vm15773_vm0 = vcmask 1040384   ;;  %s10909_s29 = scalar_lea.hbm %s15763_s3, %s13171_s16 }
  0x34   : > { %254 = vst [vmem:[#allocation2] sm:$0xf] %v13129_v0  ;;  %v12530_v2 = vld [vmem:[#allocation9 + $0x38] sm:$0xff]  ;;  %1378 = vmatpush.bf16.msra.mxu0 %v12538_v1  ;;  %v12529_v6 = vld [vmem:[#allocation9 + $0x30] sm:$0xff]  ;;  %v12536_v9 = vld [vmem:[#allocation9 + $0x68] sm:$0xff]  ;;  %v15786_v15 = vmov 0 }
  0x35   : > { %255 = vst [vmem:[#allocation2 + $0x4] sm:$0xf] %v13129_v0  ;;  %v12546_v3 = vld [vmem:[#allocation9 + $0xb8] sm:$0xff]  ;;  %1611 = vmatpush.bf16.msra.mxu1 %v12530_v2  ;;  %v12545_v7 = vld [vmem:[#allocation9 + $0xb0] sm:$0xff]  ;;  %v12528_v10 = vld [vmem:[#allocation9 + $0x28] sm:$0xff]  ;;  %vm15774_vm12 = vcmask 1042432  }
  0x36   : > { %256 = vst [vmem:[#allocation2 + $0x8] sm:$0x1] %v13129_v0  ;;  %v12570_v4 = vld [vmem:[#allocation9 + $0xf8] sm:$0xff]  ;;  %1991 = vmatpush.bf16.msra.mxu2 %v12546_v3  ;;  %v12569_v8 = vld [vmem:[#allocation9 + $0xf0] sm:$0xff]  ;;  %vm263_vm1 = vsmask.f32 256 }
  0x37   : > { %8343 = vst [vmem:[#allocation4] sm:$0x7] %v13129_v0  ;;  %2304 = vmatpush.bf16.msra.mxu3 %v12570_v4  ;;  %v12544_v11 = vld [vmem:[#allocation9 + $0xa8] sm:$0xff]  ;;  %vm313_vm2 = vsmask.f32 7938  ;;  %v12535_v13 = vld [vmem:[#allocation9 + $0x60] sm:$0xff]  ;;  %vm13268_vm7 = vmand %vm15773_vm0, %vm263_vm1 }
  0x38   : > { %8345 = vst [vmem:[#allocation4 + $0x14] sm:$0x7] %v13129_v0  ;;  %1379 = vmatpush.bf16.msra.mxu0 %v12537_v5  ;;  %v12568_v12 = vld [vmem:[#allocation9 + $0xe8] sm:$0xff]  ;;  %vm863_vm3 = vsmask.f32 3328  ;;  %v12527_v14 = vld [vmem:[#allocation9 + $0x20] sm:$0xff] }
  0x39   : > { %9832 = vst [vmem:[#allocation5] sm:$0x3] %v13129_v0  ;;  %1612 = vmatpush.bf16.msra.mxu1 %v12529_v6  ;;  %vm363_vm4 = vsmask.f32 4368  ;;  %vm9977_vm5 = vsmask.f32 1284 }
  0x3a   : > { %258 = vst [vmem:[#allocation2 + $0xcc] sm:$0xf] %v13129_v0  ;;  %1992 = vmatpush.bf16.msra.mxu2 %v12545_v7  ;;  %vm864_vm6 = vsmask.f32 7440  ;;  %v15787_v15 = vsel %vm13268_vm7, 4294967295, %v15786_v15  ;;  %v12543_v16 = vld [vmem:[#allocation9 + $0xa0] sm:$0xff]  ;;  %vm9978_vm10 = vmor %vm263_vm1, %vm9977_vm5 }
  0x3b   : > { %259 = vst [vmem:[#allocation2 + $0xd0] sm:$0xf] %v13129_v0  ;;  %2305 = vmatpush.bf16.msra.mxu3 %v12569_v8  ;;  %vm9979_vm8 = vsmask.f32 2312  ;;  %v12567_v17 = vld [vmem:[#allocation9 + $0xe0] sm:$0xff]  ;;  %v12534_v23 = vld [vmem:[#allocation9 + $0x58] sm:$0xff]  ;;  %vm13295_vm5 = vmand %vm15773_vm0, %vm313_vm2 }
  0x3c   : > { %260 = vst [vmem:[#allocation2 + $0xd4] sm:$0x1] %v13129_v0  ;;  %1380 = vmatpush.bf16.msra.mxu0 %v12536_v9  ;;  %v799_v18 = vld [vmem:[#allocation2] sm:$0xf]  ;;  %vm9981_vm9 = vsmask.f32 3340  ;;  %vm9980_vm11 = vmor %vm9978_vm10, %vm9979_vm8 }
  0x3d   : > { %6010 = vst [vmem:[#allocation3] sm:$0xf] %v13129_v0  ;;  %1613 = vmatpush.bf16.msra.mxu1 %v12528_v10  ;;  %v13272_v19 = vld [vmem:[#allocation2 + $0x4] sm:$0xf]  ;;  %v13274_v20 = vld [vmem:[#allocation2 + $0x8] sm:$0x1]  ;;  %vm9982_vm14 = vmor %vm9980_vm11, %vm9981_vm9 }
  0x3e   : > { %6011 = vst [vmem:[#allocation3 + $0x4] sm:$0x1] %v13129_v0  ;;  %1993 = vmatpush.bf16.msra.mxu2 %v12544_v11  ;;  %v867_v21 = vshrl.u32 %v799_v18, 16  ;;  %v870_v22 = vshll.u32 %v799_v18, 16  ;;  %v12526_v24 = vld [vmem:[#allocation9 + $0x18] sm:$0xff]  ;;  %v876_v25 = vshll.u32 %v13272_v19, 16  ;;  %vm13287_vm15 = vmor %vm9982_vm14, %vm363_vm4 }
  0x3f   : > { %6013 = vst [vmem:[#allocation3 + $0x48] sm:$0xf] %v13129_v0  ;;  %2306 = vmatpush.bf16.msra.mxu3 %v12568_v12  ;;  %v880_v26 = vshrl.u32 %v13272_v19, 16  ;;  %v886_v27 = vshll.u32 %v13274_v20, 16  ;;  %v12542_v28 = vld [vmem:[#allocation9 + $0x98] sm:$0xff]  ;;  %vm1749_vm13 = vcmask 1046532   ;;  %vm13301_vm8 = vmor %vm863_vm3, %vm864_vm6 }
  0x40   : > { %6014 = vst [vmem:[#allocation3 + $0x4c] sm:$0x1] %v13129_v0  ;;  %v12566_v29 = vld [vmem:[#allocation9 + $0xd8] sm:$0xff]  ;;  %v869_v30 = vrot.slane %v867_v21, 4  ;;  %v872_v31 = vrot.slane %v870_v22, 5  ;;  %1381 = vmatpush.bf16.msra.mxu0 %v12535_v13  ;;  %v13283_v32 = vrot.slane %v876_v25, 5  ;;  %vm13310_vm10 = vmor %vm15774_vm12, %vm1749_vm13 }
  0x41   : > { %9834 = vst [vmem:[#allocation5 + $0x6] sm:$0x3] %v13129_v0  ;;  %1614 = vmatpush.bf16.msra.mxu1 %v12527_v14  ;;  %v882_v33 = vrot.slane %v880_v26, 4  ;;  %v1700_v34 = vld [vmem:[#allocation2] sm:$0xe]  ;;  %v15789_v36 = vmov 0  ;;  %vm13316_vm3 = vmor %vm263_vm1, %vm363_vm4 }
  0x42   : > { %15788 = vst [vmem:[#allocation16_spill] sm:$0xff] %v15787_v15  ;;  %v222_v35 = vld [vmem:[%s13256_s5] sm:$0xf]  ;;  %v15790_v36 = vsel %vm13287_vm15, 4294967295, %v15789_v36  ;;  %1994 = vmatpush.bf16.msra.mxu2 %v12543_v16  ;;  %v873_v37 = vor.u32 %v872_v31, %v869_v30  ;;  %v1753_v38 = vrot.slane %v13272_v19, 5  ;;  %v15792_v41 = vmov 0 }
  0x43   : > { %15791 = vst [vmem:[#allocation17_spill] sm:$0xff] %v15790_v36  ;;  %2307 = vmatpush.bf16.msra.mxu3 %v12567_v17  ;;  %v223_v39 = vld [vmem:[%s13256_s5 + $0x4] sm:$0xf]  ;;  %v15793_v41 = vsel %vm13295_vm5, 4294967295, %v15792_v41  ;;  %v366_v42 = vshrl.u32 %v222_v35, 16  ;;  %v15795_v43 = vmov 0  ;;  %v883_v44 = vor.u32 %v882_v33, %v13283_v32 }
  0x44   : > { %v265_v40 = vld [vmem:[#allocation2 + $0xc] sm:$0x1]  ;;  %15794 = vst [vmem:[#allocation18_spill] sm:$0xff] %v15793_v41  ;;  %v15796_v43 = vsel %vm13301_vm8, 4294967295, %v15795_v43  ;;  %v888_v45 = vrot.slane %v886_v27, 5  ;;  %vm685_vm9 = vcmask 1043456   ;;  %1382 = vmatpush.bf16.msra.mxu0 %v12534_v23 }
  0x45   : > { %15797 = vst [vmem:[#allocation19_spill] sm:$0xff] %v15796_v43  ;;  %v266_v46 = vsel %vm13268_vm7, 0, %v265_v40  ;;  %v874_v47 = vrot.slane %v873_v37, 4  ;;  %v368_v49 = vrot.slane %v366_v42, 7  ;;  %v369_v50 = vshll.u32 %v222_v35, 16  ;;  %1615 = vmatpush.bf16.msra.mxu1 %v12526_v24  ;;  %v12533_v52 = vld [vmem:[#allocation9 + $0x50] sm:$0xff]  ;;  %vm13325_vm6 = vmand %vm685_vm9, %vm313_vm2 }
  0x46   : > { %267 = vst [vmem:[#allocation2 + $0xc] sm:$0x1] %v266_v46  ;;  %v374_v51 = vshrl.u32 %v223_v39, 16  ;;  %v12525_v53 = vld [vmem:[#allocation9 + $0x10] sm:$0xff]  ;;  %v884_v54 = vrot.slane %v883_v44, 4  ;;  %v11138_v55 = vrot.slane %v1700_v34, 9  ;;  %1995 = vmatpush.bf16.msra.mxu2 %v12542_v28 }
  0x47   : > { %v377_v57 = vshll.u32 %v223_v39, 16  ;;  %2308 = vmatpush.bf16.msra.mxu3 %v12566_v29  ;;  %v12541_v58 = vld [vmem:[#allocation9 + $0x90] sm:$0xff]  ;;  %v1755_v60 = vrot.slane %v1753_v38, 4  ;;  %v1756_v61 = vrot.slane %v13274_v20, 5  ;;  %v372_v62 = vrot.slane %v368_v49, 4  ;;  %v12532_v1 = vld [vmem:[#allocation9 + $0x48] sm:$0xff] }
  0x48   : > { %v12565_v59 = vld [vmem:[#allocation9 + $0xd0] sm:$0xff]  ;;  %v13321_v63 = vrot.slane %v374_v51, 7  ;;  %v15802_v0 = vmov 0  ;;  %v12524_v2 = vld [vmem:[#allocation9 + $0x8] sm:$0xff]  ;;  %v879_v6 = vsel %vm13301_vm8, %v874_v47, %v13283_v32  ;;  %v889_v7 = vsel %vm13301_vm8, %v884_v54, %v888_v45  ;;  %1383 = vmatpush.bf16.msra.mxu0 %v12533_v52  ;;  %v318_v14 = vld [vmem:[#allocation2 + $0x20] sm:$0x1] }
  0x49   : > { %v15803_v0 = vsel %vm13325_vm6, 4294967295, %v15802_v0  ;;  %v315_v3 = vld [vmem:[#allocation2 + $0x14] sm:$0x1]  ;;  %v371_v8 = vor.u32 %v369_v50, %v368_v49  ;;  %v13336_v10 = vld [vmem:[%s13256_s5 + $0x8] sm:$0xf]  ;;  %1616 = vmatpush.bf16.msra.mxu1 %v12525_v53  ;;  %v1754_v13 = vsel %vm13310_vm10, %v11138_v55, %v1753_v38  ;;  %v1757_v17 = vsel %vm13310_vm10, %v1755_v60, %v1756_v61  ;;  %v12531_v21 = vld [vmem:[#allocation9 + $0x40] sm:$0xff] }
  0x4a   : > { %15804 = vst [vmem:[#allocation20_spill] sm:$0xff] %v15803_v0  ;;  %v12540_v4 = vld [vmem:[#allocation9 + $0x88] sm:$0xff]  ;;  %v379_v9 = vor.u32 %v377_v57, %v13321_v63  ;;  %v268_v12 = vld [vmem:[#allocation2 + $0x18] sm:$0x1]  ;;  %1996 = vmatpush.bf16.msra.mxu2 %v12541_v58  ;;  %v13349_v19 = vld [vmem:[%s13256_s5 + $0x14] sm:$0xf]  ;;  %v1266_v23 = vunpack.c.l.b16 %v879_v6  ;;  %v1267_v24 = vunpack.c.l.b16 %v889_v7  ;;  %v1879_v29 = vunpack.c.l.b16 %v1754_v13 }
  0x4b   : > { %v12564_v5 = vld [vmem:[#allocation9 + $0xc8] sm:$0xff]  ;;  %v13342_v16 = vld [vmem:[%s13256_s5 + $0x10] sm:$0xf]  ;;  %2309 = vmatpush.bf16.msra.mxu3 %v12565_v59  ;;  %v271_v20 = vld [vmem:[#allocation2 + $0x24] sm:$0x1]  ;;  %v316_v26 = vsel %vm13295_vm5, 0, %v315_v3  ;;  %v1880_v33 = vunpack.c.l.b16 %v1757_v17 }
  0x4c   : > { %v225_v11 = vld [vmem:[%s13256_s5 + $0xc] sm:$0xf]  ;;  %v380_v18 = vsel %vm13316_vm3, %v372_v62, %v379_v9  ;;  %v12523_v22 = vld [vmem:[#allocation9] sm:$0xff]  ;;  %v269_v27 = vsel %vm13268_vm7, 0, %v268_v12  ;;  %317 = vst [vmem:[#allocation2 + $0x14] sm:$0x1] %v316_v26  ;;  %1384 = vmatpush.bf16.msra.mxu0 %v12532_v1  ;;  %v1298_v45 = vpack.c.b16 %v1267_v24, %v1266_v23 }
  0x4d   : > { %v687_v25 = vld [vmem:[#allocation2 + $0xc] sm:$0xf]  ;;  %690 = vst [vmem:[#allocation2 + $0x10] sm:$0xf] %v380_v18  ;;  %v383_v31 = vshrl.u32 %v13336_v10, 16  ;;  %1617 = vmatpush.bf16.msra.mxu1 %v12524_v2  ;;  %v386_v34 = vshll.u32 %v13336_v10, 16  ;;  %v1911_v55 = vpack.c.b16 %v1880_v33, %v1879_v29 }
  0x4e   : > { %v12539_v28 = vld [vmem:[#allocation9 + $0x80] sm:$0xff]  ;;  %v688_v30 = vsel %vm13325_vm6, %v371_v8, %v687_v25  ;;  %v391_v35 = vshrl.u32 %v225_v11, 16  ;;  %v394_v37 = vshll.u32 %v225_v11, 16  ;;  %1997 = vmatpush.bf16.msra.mxu2 %v12540_v4  ;;  %v12507_v38 = vld [vmem:[#allocation2] sm:$0xff]  ;;  %270 = vst [vmem:[#allocation2 + $0x18] sm:$0x1] %v269_v27 }
  0x4f   : > { %v12563_v32 = vld [vmem:[#allocation9 + $0xc0] sm:$0xff]  ;;  %689 = vst [vmem:[#allocation2 + $0xc] sm:$0xf] %v688_v30  ;;  %2310 = vmatpush.bf16.msra.mxu3 %v12564_v5  ;;  %v385_v39 = vrot.slane %v383_v31, 7  ;;  %v319_v40 = vsel %vm13295_vm5, 0, %v318_v14  ;;  %v272_v42 = vsel %vm13268_vm7, 0, %v271_v20 }
  0x50   : > { %v400_v44 = vshrl.u32 %v13342_v16, 16  ;;  %v12578_v46 = vld [vmem:[#allocation9 + $0x138] sm:$0xff]  ;;  %v381_v47 = vrot.slane %v13321_v63, 4  ;;  %v393_v49 = vrot.slane %v391_v35, 7  ;;  %320 = vst [vmem:[#allocation2 + $0x20] sm:$0x1] %v319_v40  ;;  %1385 = vmatpush.bf16.msra.mxu0 %v12531_v21 }
  0x51   : > { %v408_v50 = vshrl.u32 %v13349_v19, 16  ;;  %v389_v51 = vrot.slane %v385_v39, 4  ;;  %273 = vst [vmem:[#allocation2 + $0x24] sm:$0x1] %v272_v42  ;;  %v403_v53 = vshll.u32 %v13342_v16, 16  ;;  %v411_v54 = vshll.u32 %v13349_v19, 16  ;;  %1618 = vmatpush.bf16.msra.mxu1 %v12523_v22 }
  0x52   : > { %v402_v52 = vrot.slane %v400_v44, 7  ;;  %v396_v57 = vor.u32 %v394_v37, %v393_v49  ;;  %1998 = vmatpush.bf16.msra.mxu2 %v12539_v28  ;;  %v388_v60 = vor.u32 %v386_v34, %v385_v39  ;;  %v398_v3 = vrot.slane %v393_v49, 4  ;;  %v321_v13 = vld [vmem:[#allocation2 + $0x2c] sm:$0x1]  ;;  %v12577_v18 = vld [vmem:[#allocation9 + $0x130] sm:$0xff]  ;;  %v12614_v56 = vld [vmem:[#allocation9 + $0x1d8] sm:$0xff] }
  0x53   : > { %v13368_v58 = vrot.slane %v408_v50, 7  ;;  %2311 = vmatpush.bf16.msra.mxu3 %v12563_v32  ;;  %v691_v62 = vld [vmem:[#allocation2 + $0x14] sm:$0x1]  ;;  %1386 = vmatmul.bf16.vlgmr.msra.gmra.mxu0 %v1298_v45  ;;  %v322_v31 = vsel %vm13295_vm5, 0, %v321_v13  ;;  %v274_v32 = vld [vmem:[#allocation2 + $0x30] sm:$0x1] }
  0x54   : > { %v802_v59 = vld [vmem:[#allocation2 + $0x10] sm:$0xf]  ;;  %v406_v61 = vrot.slane %v402_v52, 4  ;;  %2985 = vmatpush.bf16.msrb.mxu0 %v12578_v46  ;;  %v397_v2 = vsel %vm13316_vm3, %v389_v51, %v396_v57  ;;  %1619 = vmatmul.bf16.vlgmr.msra.gmra.mxu1 %v12507_v38  ;;  %v692_v5 = vsel %vm13268_vm7, %v381_v47, %v691_v62  ;;  %v405_v7 = vor.u32 %v403_v53, %v402_v52  ;;  %v228_v47 = vld [vmem:[%s13256_s5 + $0x18] sm:$0xf]  ;;  %s220_s30 = scalar_lea.vmem [#allocation12], %s13252_s11 }
  0x55   : > { %v900_v63 = vshll.u32 %v802_v59, 16  ;;  %v904_v1 = vshrl.u32 %v802_v59, 16  ;;  %697 = vst [vmem:[#allocation2 + $0x1c] sm:$0xf] %v397_v2  ;;  %v413_v8 = vor.u32 %v411_v54, %v13368_v58  ;;  %1999 = vmatmul.bf16.vlgmr.msra.gmra.mxu2 %v1911_v55  ;;  %v1760_v16 = vrot.slane %v802_v59, 5  ;;  %s10911_s26 = sshll.u32 %s220_s30, 4  ;;  %s10912_s26 = int_to_ptr.vmem [resolvable:$true] %s10911_s26 }
  0x56   : > { %v12547_v4 = vld [vmem:[#allocation2 + $0xc] sm:$0xff]  ;;  %693 = vst [vmem:[#allocation2 + $0x14] sm:$0x1] %v692_v5  ;;  %v694_v17 = vld [vmem:[#allocation2 + $0x18] sm:$0xf]  ;;  %v275_v37 = vsel %vm13268_vm7, 0, %v274_v32 }
  0x57   : > { %v801_v6 = vld [vmem:[#allocation2 + $0xc] sm:$0xf]  ;;  %v902_v11 = vrot.slane %v900_v63, 5  ;;  %v906_v12 = vrot.slane %v904_v1, 4  ;;  %2312 = vmatmul.bf16.vlgmr.msra.gmra.mxu3 %v12547_v4  ;;  %v414_v19 = vsel %vm13316_vm3, %v406_v61, %v413_v8  ;;  %v698_v23 = vld [vmem:[#allocation2 + $0x20] sm:$0x1]  ;;  %v695_v25 = vsel %vm13325_vm6, %v388_v60, %v694_v17 }
  0x58   : > { %v891_v9 = vshrl.u32 %v801_v6, 16  ;;  %v894_v10 = vshll.u32 %v801_v6, 16  ;;  %v1701_v14 = vld [vmem:[#allocation2 + $0xc] sm:$0xe]  ;;  %v699_v26 = vsel %vm13268_vm7, %v398_v3, %v698_v23  ;;  %2986 = vmatpush.bf16.msrb.mxu0 %v12577_v18  ;;  %v701_v27 = vld [vmem:[#allocation2 + $0x24] sm:$0xf] }
  0x59   : > { %v11139_v22 = vrot.slane %v1701_v14, 9  ;;  %v907_v24 = vor.u32 %v906_v12, %v902_v11  ;;  %704 = vst [vmem:[#allocation2 + $0x28] sm:$0xf] %v414_v19  ;;  %v702_v29 = vsel %vm13325_vm6, %v405_v7, %v701_v27  ;;  %v1762_v30 = vrot.slane %v1760_v16, 4  ;;  %v12508_v57 = vld [vmem:[#allocation2 + $0xc] sm:$0xff]  ;;  %s10913_s27 = sshll.u32 %s10909_s29, 4  ;;  %s10914_s27 = int_to_ptr.hbm [resolvable:$true] %s10913_s27 }
  0x5a   : > { %v893_v20 = vrot.slane %v891_v9, 4  ;;  %v896_v21 = vrot.slane %v894_v10, 5  ;;  %696 = vst [vmem:[#allocation2 + $0x18] sm:$0xf] %v695_v25  ;;  %v415_v54 = vrot.slane %v13368_v58, 4  ;;  %v417_v62 = vshrl.u32 %v228_v47, 16 }
  0x5b   : > { %700 = vst [vmem:[#allocation2 + $0x20] sm:$0x1] %v699_v26  ;;  %v1761_v34 = vsel %vm13310_vm10, %v11139_v22, %v1760_v16  ;;  %v908_v39 = vrot.slane %v907_v24, 4  ;;  %v229_v9 = vld [vmem:[%s13256_s5 + $0x1c] sm:$0xf]  ;;  %v420_v13 = vshll.u32 %v228_v47, 16 }
  0x5c   : > { %v897_v28 = vor.u32 %v896_v21, %v893_v20  ;;  %v804_v35 = vld [vmem:[#allocation2 + $0x1c] sm:$0xf]  ;;  %703 = vst [vmem:[#allocation2 + $0x24] sm:$0xf] %v702_v29  ;;  %v1881_v49 = vunpack.c.l.b16 %v1761_v34  ;;  %v419_v19 = vrot.slane %v417_v62, 7  ;;  %v425_v23 = vshrl.u32 %v229_v9, 16 }
  0x5d   : > { %v848_v38 = vld [vmem:[#allocation2 + $0x14] sm:$0x1]  ;;  %v924_v40 = vshll.u32 %v804_v35, 16  ;;  %v928_v42 = vshrl.u32 %v804_v35, 16  ;;  %323 = vst [vmem:[#allocation2 + $0x2c] sm:$0x1] %v322_v31 }
  0x5e   : > { %v898_v33 = vrot.slane %v897_v28, 4  ;;  %v910_v45 = vshll.u32 %v848_v38, 16  ;;  %v1763_v46 = vrot.slane %v848_v38, 5  ;;  %276 = vst [vmem:[#allocation2 + $0x30] sm:$0x1] %v275_v37  ;;  %v1767_v61 = vrot.slane %v804_v35, 5 }
  0x5f   : > { %v13392_v50 = vrot.slane %v924_v40, 5  ;;  %v930_v51 = vrot.slane %v928_v42, 4  ;;  %v422_v32 = vor.u32 %v420_v13, %v419_v19  ;;  %v324_v35 = vld [vmem:[#allocation2 + $0x38] sm:$0x1]  ;;  %v230_v42 = vld [vmem:[%s13256_s5 + $0x20] sm:$0xf] }
  0x60   : > { %v903_v44 = vsel %vm13301_vm8, %v898_v33, %v902_v11  ;;  %v912_v52 = vrot.slane %v910_v45, 5  ;;  %v1764_v53 = vsel %vm13310_vm10, %v1762_v30, %v1763_v46  ;;  %v1769_v16 = vrot.slane %v1767_v61, 4  ;;  %v13405_v28 = vld [vmem:[#allocation2 + $0x28] sm:$0xf]  ;;  %s10901_s28 = scalar_lea.sflag [#allocation8], %s13252_s11  ;;  %s13067_s4 = sshra.s32 %s10914_s27, 4  ;;  %s13068_s4 = int_to_ptr.hbm [resolvable:$true] %s13067_s4 }
  0x61   : > { %v1268_v55 = vunpack.c.l.b16 %v903_v44  ;;  %v1882_v59 = vunpack.c.l.b16 %v1764_v53  ;;  %v803_v60 = vld [vmem:[#allocation2 + $0x18] sm:$0xf]  ;;  %v931_v8 = vor.u32 %v930_v51, %v13392_v50  ;;  %v13409_v33 = vrot.slane %v425_v23, 7  ;;  %v277_v44 = vld [vmem:[#allocation2 + $0x3c] sm:$0x1]  ;;  %s13069_s7 = scalar_lea.hbm %s13068_s4, 1  ;;  %p13074_p11 = scmp.lt.s32.totalorder %s13068_s4, %s15763_s3 }
  0x62   : > { %v913_v63 = vsel %vm13301_vm8, %v908_v39, %v912_v52  ;;  %v849_v1 = vld [vmem:[#allocation2 + $0x20] sm:$0x1]  ;;  %v915_v2 = vshrl.u32 %v803_v60, 16  ;;  %v918_v3 = vshll.u32 %v803_v60, 16  ;;  %v1702_v4 = vld [vmem:[#allocation2 + $0x18] sm:$0xe]  ;;  %p13070_p1 = scmp.ne.s32.totalorder %s13068_s4, %s13069_s7 }
  0x63   : > { %v1269_v5 = vunpack.c.l.b16 %v913_v63  ;;  %v1912_v6 = vpack.c.b16 %v1882_v59, %v1881_v49  ;;  %v12548_v7 = vld [vmem:[#allocation2 + $0x18] sm:$0xff]  ;;  %v934_v58 = vshll.u32 %v849_v1, 16  ;;  %v11140_v12 = vrot.slane %v1702_v4, 9  ;;  %v805_v22 = vld [vmem:[#allocation2 + $0x24] sm:$0xf]  ;;  %s13073_s17 = scalar_lea.hbm %s15763_s3, 2 }
  0x64   : > { %v917_v10 = vrot.slane %v915_v2, 4  ;;  %v920_v11 = vrot.slane %v918_v3, 5  ;;  %1624 = vmatmul.bf16.gmra.mxu1 %v12508_v57  ;;  %v1770_v17 = vrot.slane %v849_v1, 5  ;;  %v705_v18 = vld [vmem:[#allocation2 + $0x2c] sm:$0x1]  ;;  %v932_v24 = vrot.slane %v931_v8, 4  ;;  %p13071_p4 = pnand %p13070_p1, %p13219_p3  ;;  %p13075_p2 = scmp.lt.s32.totalorder %s13073_s17, %s13069_s7 }
  0x65   : > { %v1299_v14 = vpack.c.b16 %v1269_v5, %v1268_v55  ;;  %2004 = vmatmul.bf16.gmra.mxu2 %v1912_v6  ;;  %v706_v21 = vsel %vm13268_vm7, %v415_v54, %v705_v18  ;;  %v936_v25 = vrot.slane %v934_v58, 5  ;;  %v1768_v27 = vsel %vm13310_vm10, %v11140_v12, %v1767_v61  ;;  %v708_v34 = vld [vmem:[#allocation2 + $0x30] sm:$0xf]  ;;  %v231_v55 = vld [vmem:[%s13256_s5 + $0x24] sm:$0xf]  ;;  %v12509_v3 = vld [vmem:[#allocation2 + $0x18] sm:$0xff] }
  0x66   : > { %v921_v20 = vor.u32 %v920_v11, %v917_v10  ;;  %707 = vst [vmem:[#allocation2 + $0x2c] sm:$0x1] %v706_v21  ;;  %v1771_v29 = vsel %vm13310_vm10, %v1769_v16, %v1770_v17  ;;  %v939_v30 = vshrl.u32 %v805_v22, 16  ;;  %v942_v31 = vshll.u32 %v805_v22, 16  ;;  %v327_v61 = vld [vmem:[#allocation2 + $0x44] sm:$0x1]  ;;  %p13072_p8 = pneg %p13071_p4  ;;  %p13076_p9 = por %p13075_p2, %p13074_p11 }
  0x67   : > { %1391 = vmatmul.bf16.gmra.mxu0 %v1299_v14  ;;  %2317 = vmatmul.bf16.gmra.mxu3 %v12548_v7  ;;  %v937_v37 = vsel %vm13301_vm8, %v932_v24, %v936_v25  ;;  %v1883_v38 = vunpack.c.l.b16 %v1768_v27  ;;  %v948_v39 = vshll.u32 %v13405_v28, 16  ;;  %v952_v40 = vshrl.u32 %v13405_v28, 16  ;;  %v1703_v11 = vld [vmem:[#allocation2 + $0x24] sm:$0xe]  ;;  %v280_v27 = vld [vmem:[#allocation2 + $0x48] sm:$0x1] }
  0x68   : > { %v922_v26 = vrot.slane %v921_v20, 4  ;;  %v1884_v46 = vunpack.c.l.b16 %v1771_v29  ;;  %v423_v47 = vrot.slane %v419_v19, 4  ;;  %v428_v49 = vshll.u32 %v229_v9, 16  ;;  %v12549_v14 = vld [vmem:[#allocation2 + $0x24] sm:$0xff]  ;;  %p13077_p10 = pnand %p13076_p9, %p13072_p8 }
  0x69   : > { %v941_v51 = vrot.slane %v939_v30, 4  ;;  %v944_v52 = vrot.slane %v942_v31, 5  ;;  %v709_v53 = vsel %vm13325_vm6, %v422_v32, %v708_v34  ;;  %v325_v54 = vsel %vm13295_vm5, 0, %v324_v35  ;;  %v12576_v32 = vld [vmem:[#allocation9 + $0x128] sm:$0xff] }
  0x6a   : > { %v927_v45 = vsel %vm13301_vm8, %v922_v26, %v13392_v50  ;;  %v1271_v57 = vunpack.c.l.b16 %v937_v37  ;;  %v430_v59 = vor.u32 %v428_v49, %v13409_v33  ;;  %710 = vst [vmem:[#allocation2 + $0x30] sm:$0xf] %v709_v53  ;;  %v278_v60 = vsel %vm13268_vm7, 0, %v277_v44  ;;  %2987 = vmatpush.bf16.msrb.mxu0 %v12576_v32  ;;  %v233_v53 = vld [vmem:[%s13256_s5 + $0x2c] sm:$0xf] }
  0x6b   : > { %v434_v50 = vshrl.u32 %v230_v42, 16  ;;  %v1270_v62 = vunpack.c.l.b16 %v927_v45  ;;  %v13427_v63 = vrot.slane %v948_v39, 5  ;;  %v954_v1 = vrot.slane %v952_v40, 4  ;;  %326 = vst [vmem:[#allocation2 + $0x38] sm:$0x1] %v325_v54 }
  0x6c   : > { %v437_v2 = vshll.u32 %v230_v42, 16  ;;  %v431_v4 = vsel %vm13316_vm3, %v423_v47, %v430_v59  ;;  %279 = vst [vmem:[#allocation2 + $0x3c] sm:$0x1] %v278_v60  ;;  %v442_v6 = vshrl.u32 %v231_v55, 16  ;;  %v445_v7 = vshll.u32 %v231_v55, 16 }
  0x6d   : > { %v436_v5 = vrot.slane %v434_v50, 7  ;;  %v850_v8 = vld [vmem:[#allocation2 + $0x2c] sm:$0x1]  ;;  %v1774_v58 = vrot.slane %v13405_v28, 5  ;;  %711 = vst [vmem:[#allocation2 + $0x34] sm:$0xf] %v431_v4  ;;  %v1913_v10 = vpack.c.b16 %v1884_v46, %v1883_v38  ;;  %v1300_v13 = vpack.c.b16 %v1271_v57, %v1270_v62 }
  0x6e   : > { %v328_v9 = vsel %vm13295_vm5, 0, %v327_v61  ;;  %v444_v12 = vrot.slane %v442_v6, 7  ;;  %v945_v16 = vor.u32 %v944_v52, %v941_v51  ;;  %v955_v17 = vor.u32 %v954_v1, %v13427_v63  ;;  %v232_v47 = vld [vmem:[%s13256_s5 + $0x28] sm:$0xf] }
  0x6f   : > { %329 = vst [vmem:[#allocation2 + $0x44] sm:$0x1] %v328_v9  ;;  %v432_v18 = vrot.slane %v13409_v33, 4  ;;  %v958_v19 = vshll.u32 %v850_v8, 16  ;;  %v439_v20 = vor.u32 %v437_v2, %v436_v5  ;;  %v440_v21 = vrot.slane %v436_v5, 4 }
  0x70   : > { %v447_v22 = vor.u32 %v445_v7, %v444_v12  ;;  %v11141_v23 = vrot.slane %v1703_v11, 9  ;;  %v1776_v24 = vrot.slane %v1774_v58, 4  ;;  %v946_v28 = vrot.slane %v945_v16, 4  ;;  %v330_v60 = vld [vmem:[#allocation2 + $0x50] sm:$0x1] }
  0x71   : > { %v807_v26 = vld [vmem:[#allocation2 + $0x30] sm:$0xf]  ;;  %v956_v29 = vrot.slane %v955_v17, 4  ;;  %v1777_v30 = vrot.slane %v850_v8, 5  ;;  %v960_v34 = vrot.slane %v958_v19, 5  ;;  %v449_v38 = vrot.slane %v444_v12, 4 }
  0x72   : > { %v712_v25 = vld [vmem:[#allocation2 + $0x38] sm:$0x1]  ;;  %v448_v37 = vsel %vm13316_vm3, %v440_v21, %v447_v22  ;;  %v963_v40 = vshrl.u32 %v807_v26, 16  ;;  %v966_v42 = vshll.u32 %v807_v26, 16  ;;  %v281_v44 = vsel %vm13268_vm7, 0, %v280_v27 }
  0x73   : > { %v713_v31 = vsel %vm13268_vm7, %v432_v18, %v712_v25  ;;  %v715_v33 = vld [vmem:[#allocation2 + $0x3c] sm:$0xf]  ;;  %v1775_v45 = vsel %vm13310_vm10, %v11141_v23, %v1774_v58  ;;  %v1778_v49 = vsel %vm13310_vm10, %v1776_v24, %v1777_v30  ;;  %718 = vst [vmem:[#allocation2 + $0x40] sm:$0xf] %v448_v37  ;;  %v951_v54 = vsel %vm13301_vm8, %v946_v28, %v13427_v63  ;;  %v283_v30 = vld [vmem:[#allocation2 + $0x54] sm:$0x1] }
  0x74   : > { %1629 = vmatmul.bf16.gmra.mxu1 %v12509_v3  ;;  %714 = vst [vmem:[#allocation2 + $0x38] sm:$0x1] %v713_v31  ;;  %v13438_v35 = vld [vmem:[#allocation2 + $0x34] sm:$0xf]  ;;  %v716_v39 = vsel %vm13325_vm6, %v439_v20, %v715_v33  ;;  %v961_v55 = vsel %vm13301_vm8, %v956_v29, %v960_v34  ;;  %v451_v59 = vshrl.u32 %v232_v47, 16  ;;  %v1885_v50 = vunpack.c.l.b16 %v1775_v45 }
  0x75   : > { %2009 = vmatmul.bf16.gmra.mxu2 %v1913_v10  ;;  %717 = vst [vmem:[#allocation2 + $0x3c] sm:$0xf] %v716_v39  ;;  %v972_v51 = vshll.u32 %v13438_v35, 16  ;;  %v976_v52 = vshrl.u32 %v13438_v35, 16  ;;  %v459_v61 = vshrl.u32 %v233_v53, 16  ;;  %v1886_v62 = vunpack.c.l.b16 %v1778_v49  ;;  %v12510_v10 = vld [vmem:[#allocation2 + $0x24] sm:$0xff] }
  0x76   : > { %v719_v46 = vld [vmem:[#allocation2 + $0x44] sm:$0x1]  ;;  %282 = vst [vmem:[#allocation2 + $0x48] sm:$0x1] %v281_v44  ;;  %v965_v1 = vrot.slane %v963_v40, 4  ;;  %v968_v2 = vrot.slane %v966_v42, 5  ;;  %v1272_v4 = vunpack.c.l.b16 %v951_v54  ;;  %v1273_v63 = vunpack.c.l.b16 %v961_v55 }
  0x77   : > { %1396 = vmatmul.bf16.gmra.mxu0 %v1300_v13  ;;  %2322 = vmatmul.bf16.gmra.mxu3 %v12549_v14  ;;  %v720_v57 = vsel %vm13268_vm7, %v449_v38, %v719_v46  ;;  %v331_v3 = vsel %vm13295_vm5, 0, %v330_v60  ;;  %v13463_v5 = vrot.slane %v972_v51, 5  ;;  %v978_v6 = vrot.slane %v976_v52, 4  ;;  %v1704_v14 = vld [vmem:[#allocation2 + $0x30] sm:$0xe] }
  0x78   : > { %721 = vst [vmem:[#allocation2 + $0x44] sm:$0x1] %v720_v57  ;;  %v453_v8 = vrot.slane %v451_v59, 7  ;;  %v461_v58 = vrot.slane %v459_v61, 7  ;;  %v462_v9 = vshll.u32 %v233_v53, 16  ;;  %v454_v11 = vshll.u32 %v232_v47, 16 }
  0x79   : > { %332 = vst [vmem:[#allocation2 + $0x50] sm:$0x1] %v331_v3  ;;  %v1914_v12 = vpack.c.b16 %v1886_v62, %v1885_v50  ;;  %v969_v13 = vor.u32 %v968_v2, %v965_v1  ;;  %v1781_v16 = vrot.slane %v13438_v35, 5  ;;  %v1301_v17 = vpack.c.b16 %v1273_v63, %v1272_v4  ;;  %v12550_v18 = vld [vmem:[#allocation2 + $0x30] sm:$0xff]  ;;  %v234_v42 = vld [vmem:[%s13256_s5 + $0x30] sm:$0xf] }
  0x7a   : > { %v979_v19 = vor.u32 %v978_v6, %v13463_v5  ;;  %v457_v22 = vrot.slane %v453_v8, 4  ;;  %v464_v23 = vor.u32 %v462_v9, %v461_v58  ;;  %v11142_v24 = vrot.slane %v1704_v14, 9  ;;  %v13467_v25 = vld [vmem:[#allocation2 + $0x40] sm:$0xf]  ;;  %v235_v46 = vld [vmem:[%s13256_s5 + $0x34] sm:$0xf] }
  0x7b   : > { %v851_v7 = vld [vmem:[#allocation2 + $0x38] sm:$0x1]  ;;  %v456_v26 = vor.u32 %v454_v11, %v453_v8  ;;  %v970_v27 = vrot.slane %v969_v13, 4  ;;  %v1783_v28 = vrot.slane %v1781_v16, 4  ;;  %v996_v38 = vshll.u32 %v13467_v25, 16 }
  0x7c   : > { %v982_v20 = vshll.u32 %v851_v7, 16  ;;  %v809_v21 = vld [vmem:[#allocation2 + $0x3c] sm:$0xf]  ;;  %v980_v31 = vrot.slane %v979_v19, 4  ;;  %v1784_v33 = vrot.slane %v851_v7, 5  ;;  %v465_v39 = vsel %vm13316_vm3, %v457_v22, %v464_v23 }
  0x7d   : > { %v722_v29 = vld [vmem:[#allocation2 + $0x48] sm:$0xf]  ;;  %v987_v34 = vshrl.u32 %v809_v21, 16  ;;  %v990_v37 = vshll.u32 %v809_v21, 16  ;;  %v466_v40 = vrot.slane %v461_v58, 4  ;;  %v1000_v44 = vshrl.u32 %v13467_v25, 16 }
  0x7e   : > { %v984_v32 = vrot.slane %v982_v20, 5  ;;  %v723_v45 = vsel %vm13325_vm6, %v456_v26, %v722_v29  ;;  %725 = vst [vmem:[#allocation2 + $0x4c] sm:$0xf] %v465_v39  ;;  %v284_v47 = vsel %vm13268_vm7, 0, %v283_v30  ;;  %v1782_v49 = vsel %vm13310_vm10, %v11142_v24, %v1781_v16  ;;  %v333_v59 = vld [vmem:[#allocation2 + $0x5c] sm:$0x1] }
  0x7f   : > { %724 = vst [vmem:[#allocation2 + $0x48] sm:$0xf] %v723_v45  ;;  %v468_v52 = vshrl.u32 %v234_v42, 16  ;;  %v975_v53 = vsel %vm13301_vm8, %v970_v27, %v13463_v5  ;;  %v1785_v55 = vsel %vm13310_vm10, %v1783_v28, %v1784_v33  ;;  %v476_v57 = vshrl.u32 %v235_v46, 16  ;;  %v852_v6 = vld [vmem:[#allocation2 + $0x44] sm:$0x1] }
  0x80   : > { %v726_v35 = vld [vmem:[#allocation2 + $0x50] sm:$0x1]  ;;  %v985_v54 = vsel %vm13301_vm8, %v980_v31, %v984_v32  ;;  %v989_v60 = vrot.slane %v987_v34, 4  ;;  %v992_v50 = vrot.slane %v990_v37, 5  ;;  %285 = vst [vmem:[#allocation2 + $0x54] sm:$0x1] %v284_v47  ;;  %v1887_v63 = vunpack.c.l.b16 %v1782_v49 }
  0x81   : > { %v727_v51 = vsel %vm13268_vm7, %v466_v40, %v726_v35  ;;  %v470_v61 = vrot.slane %v468_v52, 7  ;;  %v479_v62 = vshll.u32 %v235_v46, 16  ;;  %v13490_v1 = vrot.slane %v996_v38, 5  ;;  %v12551_v22 = vld [vmem:[#allocation2 + $0x3c] sm:$0xff]  ;;  %v12575_v37 = vld [vmem:[#allocation9 + $0x120] sm:$0xff] }
  0x82   : > { %728 = vst [vmem:[#allocation2 + $0x50] sm:$0x1] %v727_v51  ;;  %v1002_v2 = vrot.slane %v1000_v44, 4  ;;  %v478_v3 = vrot.slane %v476_v57, 7  ;;  %v334_v4 = vsel %vm13295_vm5, 0, %v333_v59  ;;  %v1888_v5 = vunpack.c.l.b16 %v1785_v55  ;;  %2988 = vmatpush.bf16.msrb.mxu0 %v12575_v37 }
  0x83   : > { %v471_v7 = vshll.u32 %v234_v42, 16  ;;  %v474_v8 = vrot.slane %v470_v61, 4  ;;  %335 = vst [vmem:[#allocation2 + $0x5c] sm:$0x1] %v334_v4  ;;  %v1274_v58 = vunpack.c.l.b16 %v975_v53  ;;  %v1275_v9 = vunpack.c.l.b16 %v985_v54  ;;  %v286_v34 = vld [vmem:[#allocation2 + $0x60] sm:$0x1] }
  0x84   : > { %1634 = vmatmul.bf16.gmra.mxu1 %v12510_v10  ;;  %v481_v10 = vor.u32 %v479_v62, %v478_v3  ;;  %v1788_v11 = vrot.slane %v13467_v25, 5  ;;  %v993_v13 = vor.u32 %v992_v50, %v989_v60  ;;  %v1003_v14 = vor.u32 %v1002_v2, %v13490_v1  ;;  %v236_v42 = vld [vmem:[%s13256_s5 + $0x38] sm:$0xf]  ;;  %v237_v47 = vld [vmem:[%s13256_s5 + $0x3c] sm:$0xf] }
  0x85   : > { %2014 = vmatmul.bf16.gmra.mxu2 %v1914_v12  ;;  %v12511_v12 = vld [vmem:[#allocation2 + $0x30] sm:$0xff]  ;;  %v1006_v16 = vshll.u32 %v852_v6, 16  ;;  %v1915_v19 = vpack.c.b16 %v1888_v5, %v1887_v63  ;;  %v473_v20 = vor.u32 %v471_v7, %v470_v61  ;;  %v1302_v21 = vpack.c.b16 %v1275_v9, %v1274_v58  ;;  %v13498_v32 = vld [vmem:[#allocation2 + $0x4c] sm:$0xf]  ;;  %v336_v61 = vld [vmem:[#allocation2 + $0x68] sm:$0x1] }
  0x86   : > { %v1790_v26 = vrot.slane %v1788_v11, 4  ;;  %v1791_v27 = vrot.slane %v852_v6, 5  ;;  %v994_v25 = vrot.slane %v993_v13, 4  ;;  %v1004_v28 = vrot.slane %v1003_v14, 4  ;;  %v811_v35 = vld [vmem:[#allocation2 + $0x48] sm:$0xf] }
  0x87   : > { %1401 = vmatmul.bf16.gmra.mxu0 %v1301_v17  ;;  %2327 = vmatmul.bf16.gmra.mxu3 %v12550_v18  ;;  %v1705_v17 = vld [vmem:[#allocation2 + $0x3c] sm:$0xe]  ;;  %v482_v18 = vsel %vm13316_vm3, %v474_v8, %v481_v10  ;;  %v729_v23 = vld [vmem:[#allocation2 + $0x54] sm:$0xf]  ;;  %v1008_v29 = vrot.slane %v1006_v16, 5  ;;  %v483_v30 = vrot.slane %v478_v3, 4 }
  0x88   : > { %v11143_v24 = vrot.slane %v1705_v17, 9  ;;  %732 = vst [vmem:[#allocation2 + $0x58] sm:$0xf] %v482_v18  ;;  %v730_v33 = vsel %vm13325_vm6, %v473_v20, %v729_v23  ;;  %v287_v39 = vsel %vm13268_vm7, 0, %v286_v34  ;;  %v999_v44 = vsel %vm13301_vm8, %v994_v25, %v13490_v1  ;;  %v12512_v13 = vld [vmem:[#allocation2 + $0x3c] sm:$0xff] }
  0x89   : > { %731 = vst [vmem:[#allocation2 + $0x54] sm:$0xf] %v730_v33  ;;  %v1009_v45 = vsel %vm13301_vm8, %v1004_v28, %v1008_v29  ;;  %v1792_v46 = vsel %vm13310_vm10, %v1790_v26, %v1791_v27  ;;  %v485_v49 = vshrl.u32 %v236_v42, 16  ;;  %v1011_v51 = vshrl.u32 %v811_v35, 16  ;;  %v853_v7 = vld [vmem:[#allocation2 + $0x50] sm:$0x1] }
  0x8a   : > { %v733_v31 = vld [vmem:[#allocation2 + $0x5c] sm:$0x1]  ;;  %v1789_v40 = vsel %vm13310_vm10, %v11143_v24, %v1788_v11  ;;  %288 = vst [vmem:[#allocation2 + $0x60] sm:$0x1] %v287_v39  ;;  %v1020_v52 = vshll.u32 %v13498_v32, 16  ;;  %v1024_v53 = vshrl.u32 %v13498_v32, 16  ;;  %v1276_v62 = vunpack.c.l.b16 %v999_v44 }
  0x8b   : > { %v734_v38 = vsel %vm13268_vm7, %v483_v30, %v733_v31  ;;  %v493_v54 = vshrl.u32 %v237_v47, 16  ;;  %v1014_v55 = vshll.u32 %v811_v35, 16  ;;  %v487_v57 = vrot.slane %v485_v49, 7  ;;  %v1706_v14 = vld [vmem:[#allocation2 + $0x48] sm:$0xe] }
  0x8c   : > { %735 = vst [vmem:[#allocation2 + $0x5c] sm:$0x1] %v734_v38  ;;  %v488_v59 = vshll.u32 %v236_v42, 16  ;;  %v496_v60 = vshll.u32 %v237_v47, 16  ;;  %v1889_v1 = vunpack.c.l.b16 %v1789_v40  ;;  %v1890_v2 = vunpack.c.l.b16 %v1792_v46  ;;  %v289_v29 = vld [vmem:[#allocation2 + $0x6c] sm:$0x1] }
  0x8d   : > { %v495_v50 = vrot.slane %v493_v54, 7  ;;  %v491_v3 = vrot.slane %v487_v57, 4  ;;  %v1277_v4 = vunpack.c.l.b16 %v1009_v45  ;;  %v337_v6 = vsel %vm13295_vm5, 0, %v336_v61  ;;  %v238_v42 = vld [vmem:[%s13256_s5 + $0x40] sm:$0xf] }
  0x8e   : > { %v490_v63 = vor.u32 %v488_v59, %v487_v57  ;;  %v1013_v8 = vrot.slane %v1011_v51, 4  ;;  %v1016_v58 = vrot.slane %v1014_v55, 5  ;;  %v13521_v9 = vrot.slane %v1020_v52, 5  ;;  %338 = vst [vmem:[#allocation2 + $0x68] sm:$0x1] %v337_v6 }
  0x8f   : > { %v498_v5 = vor.u32 %v496_v60, %v495_v50  ;;  %v1026_v10 = vrot.slane %v1024_v53, 4  ;;  %v1795_v11 = vrot.slane %v13498_v32, 5  ;;  %v1916_v17 = vpack.c.b16 %v1890_v2, %v1889_v1  ;;  %v13529_v25 = vld [vmem:[#allocation2 + $0x58] sm:$0xf]  ;;  %v239_v44 = vld [vmem:[%s13256_s5 + $0x44] sm:$0xf] }
  0x90   : > { %v1030_v18 = vshll.u32 %v853_v7, 16  ;;  %v1303_v20 = vpack.c.b16 %v1277_v4, %v1276_v62  ;;  %v11144_v24 = vrot.slane %v1706_v14, 9  ;;  %v1798_v27 = vrot.slane %v853_v7, 5  ;;  %v813_v31 = vld [vmem:[#allocation2 + $0x54] sm:$0xf] }
  0x91   : > { %v499_v16 = vsel %vm13316_vm3, %v491_v3, %v498_v5  ;;  %v1027_v23 = vor.u32 %v1026_v10, %v13521_v9  ;;  %v1797_v26 = vrot.slane %v1795_v11, 4  ;;  %v500_v28 = vrot.slane %v495_v50, 4  ;;  %v339_v57 = vld [vmem:[#allocation2 + $0x74] sm:$0x1] }
  0x92   : > { %739 = vst [vmem:[#allocation2 + $0x64] sm:$0xf] %v499_v16  ;;  %v1032_v30 = vrot.slane %v1030_v18, 5  ;;  %v290_v32 = vsel %vm13268_vm7, 0, %v289_v29  ;;  %v1044_v35 = vshll.u32 %v13529_v25, 16  ;;  %v1048_v37 = vshrl.u32 %v13529_v25, 16 }
  0x93   : > { %v1028_v34 = vrot.slane %v1027_v23, 4  ;;  %291 = vst [vmem:[#allocation2 + $0x6c] sm:$0x1] %v290_v32  ;;  %v1796_v38 = vsel %vm13310_vm10, %v11144_v24, %v1795_v11  ;;  %v1799_v39 = vsel %vm13310_vm10, %v1797_v26, %v1798_v27  ;;  %v1035_v45 = vshrl.u32 %v813_v31, 16  ;;  %v854_v10 = vld [vmem:[#allocation2 + $0x5c] sm:$0x1] }
  0x94   : > { %1639 = vmatmul.bf16.gmra.mxu1 %v12511_v12  ;;  %v736_v12 = vld [vmem:[#allocation2 + $0x60] sm:$0xf]  ;;  %v502_v47 = vshrl.u32 %v238_v42, 16  ;;  %v510_v49 = vshrl.u32 %v239_v44, 16  ;;  %v1038_v51 = vshll.u32 %v813_v31, 16  ;;  %v1891_v53 = vunpack.c.l.b16 %v1796_v38 }
  0x95   : > { %2019 = vmatmul.bf16.gmra.mxu2 %v1915_v19  ;;  %v737_v19 = vsel %vm13325_vm6, %v490_v63, %v736_v12  ;;  %v740_v40 = vld [vmem:[#allocation2 + $0x68] sm:$0x1]  ;;  %v1033_v52 = vsel %vm13301_vm8, %v1028_v34, %v1032_v30  ;;  %v1892_v54 = vunpack.c.l.b16 %v1799_v39  ;;  %v505_v60 = vshll.u32 %v238_v42, 16  ;;  %v292_v30 = vld [vmem:[#allocation2 + $0x78] sm:$0x1]  ;;  %v12574_v39 = vld [vmem:[#allocation9 + $0x118] sm:$0xff] }
  0x96   : > { %738 = vst [vmem:[#allocation2 + $0x60] sm:$0xf] %v737_v19  ;;  %v741_v46 = vsel %vm13268_vm7, %v500_v28, %v740_v40  ;;  %v504_v55 = vrot.slane %v502_v47, 7  ;;  %v512_v50 = vrot.slane %v510_v49, 7  ;;  %v513_v61 = vshll.u32 %v239_v44, 16  ;;  %v12513_v12 = vld [vmem:[#allocation2 + $0x48] sm:$0xff]  ;;  %2989 = vmatpush.bf16.msrb.mxu0 %v12574_v39 }
  0x97   : > { %1406 = vmatmul.bf16.gmra.mxu0 %v1302_v21  ;;  %2332 = vmatmul.bf16.gmra.mxu3 %v12551_v22  ;;  %v12552_v21 = vld [vmem:[#allocation2 + $0x48] sm:$0xff]  ;;  %v1017_v22 = vor.u32 %v1016_v58, %v1013_v8  ;;  %742 = vst [vmem:[#allocation2 + $0x68] sm:$0x1] %v741_v46  ;;  %v1037_v62 = vrot.slane %v1035_v45, 4  ;;  %v13548_v1 = vrot.slane %v1044_v35, 5  ;;  %v1050_v2 = vrot.slane %v1048_v37, 4 }
  0x98   : > { %v508_v3 = vrot.slane %v504_v55, 4  ;;  %v1040_v4 = vrot.slane %v1038_v51, 5  ;;  %v507_v63 = vor.u32 %v505_v60, %v504_v55  ;;  %v515_v5 = vor.u32 %v513_v61, %v512_v50  ;;  %v1707_v19 = vld [vmem:[#allocation2 + $0x54] sm:$0xe]  ;;  %v240_v42 = vld [vmem:[%s13256_s5 + $0x48] sm:$0xf] }
  0x99   : > { %v1018_v33 = vrot.slane %v1017_v22, 4  ;;  %v340_v7 = vsel %vm13295_vm5, 0, %v339_v57  ;;  %v1279_v58 = vunpack.c.l.b16 %v1033_v52  ;;  %v1802_v14 = vrot.slane %v13529_v25, 5  ;;  %v13558_v22 = vld [vmem:[#allocation2 + $0x64] sm:$0xf] }
  0x9a   : > { %v743_v6 = vld [vmem:[#allocation2 + $0x6c] sm:$0xf]  ;;  %341 = vst [vmem:[#allocation2 + $0x74] sm:$0x1] %v340_v7  ;;  %v1917_v16 = vpack.c.b16 %v1892_v54, %v1891_v53  ;;  %v1054_v18 = vshll.u32 %v854_v10, 16  ;;  %v517_v23 = vrot.slane %v512_v50, 4 }
  0x9b   : > { %v1023_v59 = vsel %vm13301_vm8, %v1018_v33, %v13521_v9  ;;  %v516_v9 = vsel %vm13316_vm3, %v508_v3, %v515_v5  ;;  %v744_v11 = vsel %vm13325_vm6, %v507_v63, %v743_v6  ;;  %v11145_v27 = vrot.slane %v1707_v19, 9  ;;  %v241_v44 = vld [vmem:[%s13256_s5 + $0x4c] sm:$0xf]  ;;  %v342_v57 = vld [vmem:[#allocation2 + $0x80] sm:$0x1] }
  0x9c   : > { %v1278_v8 = vunpack.c.l.b16 %v1023_v59  ;;  %745 = vst [vmem:[#allocation2 + $0x6c] sm:$0xf] %v744_v11  ;;  %v1804_v28 = vrot.slane %v1802_v14, 4  ;;  %v1805_v29 = vrot.slane %v854_v10, 5  ;;  %v1056_v31 = vrot.slane %v1054_v18, 5  ;;  %v12514_v11 = vld [vmem:[#allocation2 + $0x54] sm:$0xff] }
  0x9d   : > { %746 = vst [vmem:[#allocation2 + $0x70] sm:$0xf] %v516_v9  ;;  %v815_v24 = vld [vmem:[#allocation2 + $0x60] sm:$0xf]  ;;  %v1068_v32 = vshll.u32 %v13558_v22, 16  ;;  %v293_v34 = vsel %vm13268_vm7, 0, %v292_v30  ;;  %v1803_v49 = vsel %vm13310_vm10, %v11145_v27, %v1802_v14 }
  0x9e   : > { %v1059_v35 = vshrl.u32 %v815_v24, 16  ;;  %v1062_v37 = vshll.u32 %v815_v24, 16  ;;  %v1072_v38 = vshrl.u32 %v13558_v22, 16  ;;  %294 = vst [vmem:[#allocation2 + $0x78] sm:$0x1] %v293_v34  ;;  %v519_v45 = vshrl.u32 %v240_v42, 16 }
  0x9f   : > { %v1806_v51 = vsel %vm13310_vm10, %v1804_v28, %v1805_v29  ;;  %v522_v53 = vshll.u32 %v240_v42, 16  ;;  %v527_v54 = vshrl.u32 %v241_v44, 16  ;;  %v530_v55 = vshll.u32 %v241_v44, 16  ;;  %v1708_v14 = vld [vmem:[#allocation2 + $0x60] sm:$0xe] }
  0xa0   : > { %v521_v52 = vrot.slane %v519_v45, 7  ;;  %v1061_v59 = vrot.slane %v1059_v35, 4  ;;  %v1064_v60 = vrot.slane %v1062_v37, 5  ;;  %v13577_v50 = vrot.slane %v1068_v32, 5  ;;  %v295_v30 = vld [vmem:[#allocation2 + $0x84] sm:$0x1] }
  0xa1   : > { %v747_v33 = vld [vmem:[#allocation2 + $0x74] sm:$0x1]  ;;  %v1074_v61 = vrot.slane %v1072_v38, 4  ;;  %v343_v3 = vsel %vm13295_vm5, 0, %v342_v57  ;;  %v1894_v63 = vunpack.c.l.b16 %v1806_v51  ;;  %v1809_v9 = vrot.slane %v13558_v22, 5 }
  0xa2   : > { %v748_v40 = vsel %vm13268_vm7, %v517_v23, %v747_v33  ;;  %344 = vst [vmem:[#allocation2 + $0x80] sm:$0x1] %v343_v3  ;;  %v11146_v23 = vrot.slane %v1708_v14, 9  ;;  %v296_v33 = vsel %vm13268_vm7, 0, %v295_v30  ;;  %v242_v39 = vld [vmem:[%s13256_s5 + $0x50] sm:$0xf] }
  0xa3   : > { %749 = vst [vmem:[#allocation2 + $0x74] sm:$0x1] %v748_v40  ;;  %v1811_v24 = vrot.slane %v1809_v9, 4  ;;  %v243_v40 = vld [vmem:[%s13256_s5 + $0x54] sm:$0xf]  ;;  %v536_v42 = vshrl.u32 %v242_v39, 16 }
  0xa4   : > { %1644 = vmatmul.bf16.gmra.mxu1 %v12512_v13  ;;  %v1051_v13 = vor.u32 %v1050_v2, %v13548_v1  ;;  %v529_v2 = vrot.slane %v527_v54, 7  ;;  %v13587_v27 = vld [vmem:[#allocation2 + $0x70] sm:$0xf]  ;;  %297 = vst [vmem:[#allocation2 + $0x84] sm:$0x1] %v296_v33  ;;  %v539_v51 = vshll.u32 %v242_v39, 16 }
  0xa5   : > { %2024 = vmatmul.bf16.gmra.mxu2 %v1916_v17  ;;  %v1041_v17 = vor.u32 %v1040_v4, %v1037_v62  ;;  %v524_v62 = vor.u32 %v522_v53, %v521_v52  ;;  %v1893_v4 = vunpack.c.l.b16 %v1803_v49  ;;  %v750_v5 = vld [vmem:[#allocation2 + $0x78] sm:$0xf]  ;;  %v1092_v37 = vshll.u32 %v13587_v27, 16  ;;  %v345_v54 = vld [vmem:[#allocation2 + $0x8c] sm:$0x1] }
  0xa6   : > { %v1052_v26 = vrot.slane %v1051_v13, 4  ;;  %v1075_v13 = vor.u32 %v1074_v61, %v13577_v50  ;;  %v1096_v38 = vshrl.u32 %v13587_v27, 16  ;;  %v538_v49 = vrot.slane %v536_v42, 7  ;;  %v244_v42 = vld [vmem:[%s13256_s5 + $0x58] sm:$0xf] }
  0xa7   : > { %1411 = vmatmul.bf16.gmra.mxu0 %v1303_v20  ;;  %2337 = vmatmul.bf16.gmra.mxu3 %v12552_v21  ;;  %v1304_v20 = vpack.c.b16 %v1279_v58, %v1278_v8  ;;  %v12553_v21 = vld [vmem:[#allocation2 + $0x54] sm:$0xff]  ;;  %v1042_v25 = vrot.slane %v1041_v17, 4  ;;  %v855_v8 = vld [vmem:[#allocation2 + $0x68] sm:$0x1]  ;;  %v532_v58 = vor.u32 %v530_v55, %v529_v2  ;;  %v751_v10 = vsel %vm13325_vm6, %v524_v62, %v750_v5 }
  0xa8   : > { %v1057_v47 = vsel %vm13301_vm8, %v1052_v26, %v1056_v31  ;;  %752 = vst [vmem:[#allocation2 + $0x78] sm:$0xf] %v751_v10  ;;  %v1918_v17 = vpack.c.b16 %v1894_v63, %v1893_v4  ;;  %v1078_v18 = vshll.u32 %v855_v8, 16  ;;  %v817_v26 = vld [vmem:[#allocation2 + $0x6c] sm:$0xf]  ;;  %v1076_v28 = vrot.slane %v1075_v13, 4 }
  0xa9   : > { %v1047_v46 = vsel %vm13301_vm8, %v1042_v25, %v13548_v1  ;;  %v525_v1 = vrot.slane %v521_v52, 4  ;;  %v1281_v7 = vunpack.c.l.b16 %v1057_v47  ;;  %v754_v29 = vld [vmem:[#allocation2 + $0x80] sm:$0x1]  ;;  %v1812_v31 = vrot.slane %v855_v8, 5 }
  0xaa   : > { %v1280_v6 = vunpack.c.l.b16 %v1047_v46  ;;  %v1080_v25 = vrot.slane %v1078_v18, 5  ;;  %v1083_v34 = vshrl.u32 %v817_v26, 16  ;;  %v1086_v35 = vshll.u32 %v817_v26, 16  ;;  %v856_v5 = vld [vmem:[#allocation2 + $0x74] sm:$0x1]  ;;  %v12515_v10 = vld [vmem:[#allocation2 + $0x60] sm:$0xff] }
  0xab   : > { %v1810_v46 = vsel %vm13310_vm10, %v11146_v23, %v1809_v9  ;;  %v1813_v47 = vsel %vm13310_vm10, %v1811_v24, %v1812_v31  ;;  %v544_v52 = vshrl.u32 %v243_v40, 16  ;;  %v547_v53 = vshll.u32 %v243_v40, 16  ;;  %v1709_v9 = vld [vmem:[#allocation2 + $0x6c] sm:$0xe]  ;;  %v298_v31 = vld [vmem:[#allocation2 + $0x90] sm:$0x1] }
  0xac   : > { %v1305_v19 = vpack.c.b16 %v1281_v7, %v1280_v6  ;;  %v1081_v45 = vsel %vm13301_vm8, %v1076_v28, %v1080_v25  ;;  %v1085_v55 = vrot.slane %v1083_v34, 4  ;;  %v1088_v57 = vrot.slane %v1086_v35, 5  ;;  %v757_v7 = vld [vmem:[#allocation2 + $0x84] sm:$0xf]  ;;  %v12573_v40 = vld [vmem:[#allocation9 + $0x110] sm:$0xff] }
  0xad   : > { %v542_v61 = vrot.slane %v538_v49, 4  ;;  %v546_v62 = vrot.slane %v544_v52, 7  ;;  %v1896_v3 = vunpack.c.l.b16 %v1813_v47  ;;  %v1283_v63 = vunpack.c.l.b16 %v1081_v45  ;;  %2990 = vmatpush.bf16.msrb.mxu0 %v12573_v40 }
  0xae   : > { %v1089_v8 = vor.u32 %v1088_v57, %v1085_v55  ;;  %v1102_v18 = vshll.u32 %v856_v5, 16  ;;  %v1819_v30 = vrot.slane %v856_v5, 5  ;;  %v299_v35 = vsel %vm13268_vm7, 0, %v298_v31 }
  0xaf   : > { %v549_v6 = vor.u32 %v547_v53, %v546_v62  ;;  %v819_v23 = vld [vmem:[#allocation2 + $0x78] sm:$0xf]  ;;  %v551_v28 = vrot.slane %v546_v62, 4  ;;  %300 = vst [vmem:[#allocation2 + $0x90] sm:$0x1] %v299_v35  ;;  %v556_v5 = vshll.u32 %v244_v42, 16 }
  0xb0   : > { %v1090_v24 = vrot.slane %v1089_v8, 4  ;;  %v1107_v33 = vshrl.u32 %v819_v23, 16  ;;  %vm5175_vm1 = vcmask 1041408   ;;  %vm6258_vm2 = vcmask 1042434  }
  0xb1   : > { %vm15775_vm11 = vcmask 1043459   ;;  %vm6270_vm0 = vcmask 1046534   ;;  %vm15780_vm12 = vcmask 1047559  }
  0xb4   : > { %1649 = vmatmul.bf16.gmra.mxu1 %v12513_v12  ;;  %v1065_v12 = vor.u32 %v1064_v60, %v1061_v59  ;;  %v13606_v59 = vrot.slane %v1092_v37, 5  ;;  %v1098_v60 = vrot.slane %v1096_v38, 4  ;;  %v1110_v37 = vshll.u32 %v819_v23, 16 }
  0xb5   : > { %2029 = vmatmul.bf16.gmra.mxu2 %v1917_v16  ;;  %v533_v16 = vsel %vm13316_vm3, %v525_v1, %v532_v58  ;;  %v346_v1 = vsel %vm13295_vm5, 0, %v345_v54 }
  0xb6   : > { %753 = vst [vmem:[#allocation2 + $0x7c] sm:$0xf] %v533_v16  ;;  %v1066_v22 = vrot.slane %v1065_v12, 4  ;;  %v1099_v58 = vor.u32 %v1098_v60, %v13606_v59  ;;  %v550_v12 = vsel %vm13316_vm3, %v542_v61, %v549_v6  ;;  %v1109_v61 = vrot.slane %v1107_v33, 4 }
  0xb7   : > { %1416 = vmatmul.bf16.gmra.mxu0 %v1304_v20  ;;  %2342 = vmatmul.bf16.gmra.mxu3 %v12553_v21  ;;  %v12554_v20 = vld [vmem:[#allocation2 + $0x60] sm:$0xff]  ;;  %v534_v21 = vrot.slane %v529_v2, 4  ;;  %v1895_v2 = vunpack.c.l.b16 %v1810_v46  ;;  %347 = vst [vmem:[#allocation2 + $0x8c] sm:$0x1] %v346_v1  ;;  %v1095_v46 = vsel %vm13301_vm8, %v1090_v24, %v13606_v59  ;;  %v1112_v62 = vrot.slane %v1110_v37, 5 }
  0xb8   : > { %v1071_v44 = vsel %vm13301_vm8, %v1066_v22, %v13577_v50  ;;  %v541_v50 = vor.u32 %v539_v51, %v538_v49  ;;  %760 = vst [vmem:[#allocation2 + $0x88] sm:$0xf] %v550_v12  ;;  %v1100_v26 = vrot.slane %v1099_v58, 4  ;;  %v11147_v22 = vrot.slane %v1709_v9, 9  ;;  %v348_v59 = vld [vmem:[#allocation2 + $0x98] sm:$0x1] }
  0xb9   : > { %v755_v32 = vsel %vm13268_vm7, %v534_v21, %v754_v29  ;;  %v1282_v4 = vunpack.c.l.b16 %v1071_v44  ;;  %v12555_v21 = vld [vmem:[#allocation2 + $0x6c] sm:$0xff]  ;;  %v245_v44 = vld [vmem:[%s13256_s5 + $0x5c] sm:$0xf]  ;;  %v553_v49 = vshrl.u32 %v244_v42, 16  ;;  %v1113_v12 = vor.u32 %v1112_v62, %v1109_v61 }
  0xba   : > { %756 = vst [vmem:[#allocation2 + $0x80] sm:$0x1] %v755_v32  ;;  %v758_v13 = vsel %vm13325_vm6, %v541_v50, %v757_v7  ;;  %v1104_v32 = vrot.slane %v1102_v18, 5  ;;  %v561_v57 = vshrl.u32 %v245_v44, 16  ;;  %v564_v58 = vshll.u32 %v245_v44, 16 }
  0xbb   : > { %759 = vst [vmem:[#allocation2 + $0x84] sm:$0xf] %v758_v13  ;;  %v555_v1 = vrot.slane %v553_v49, 7 }
  0xbc   : > { %v1105_v54 = vsel %vm13301_vm8, %v1100_v26, %v1104_v32  ;;  %v563_v8 = vrot.slane %v561_v57, 7  ;;  %v1114_v32 = vrot.slane %v1113_v12, 4  ;;  %v246_v57 = vld [vmem:[%s13256_s5 + $0x60] sm:$0xf] }
  0xbd   : > { %v1285_v9 = vunpack.c.l.b16 %v1105_v54  ;;  %v558_v13 = vor.u32 %v556_v5, %v555_v1  ;;  %v12556_v31 = vld [vmem:[#allocation2 + $0x78] sm:$0xff] }
  0xbe   : > { %v761_v25 = vld [vmem:[#allocation2 + $0x8c] sm:$0x1] }
  0xbf   : > { %v762_v34 = vsel %vm13268_vm7, %v551_v28, %v761_v25  ;;  %v13649_v49 = vld [vmem:[#allocation2 + $0x88] sm:$0xf] }
  0xc0   : > { %763 = vst [vmem:[#allocation2 + $0x8c] sm:$0x1] %v762_v34  ;;  %v1140_v61 = vshll.u32 %v13649_v49, 16  ;;  %v1144_v62 = vshrl.u32 %v13649_v49, 16 }
  0xc2   : > { %v821_v37 = vld [vmem:[#allocation2 + $0x84] sm:$0xf] }
  0xc3   : > { %v1134_v54 = vshll.u32 %v821_v37, 16 }
  0xc4   : > { %1654 = vmatmul.bf16.gmra.mxu1 %v12514_v11  ;;  %v1816_v11 = vrot.slane %v13587_v27, 5  ;;  %v13616_v27 = vld [vmem:[#allocation2 + $0x7c] sm:$0xf] }
  0xc5   : > { %2034 = vmatmul.bf16.gmra.mxu2 %v1918_v17  ;;  %v1919_v17 = vpack.c.b16 %v1896_v3, %v1895_v2  ;;  %v1116_v38 = vshll.u32 %v13616_v27, 16  ;;  %v1120_v39 = vshrl.u32 %v13616_v27, 16 }
  0xc6   : > { %v1818_v29 = vrot.slane %v1816_v11, 4  ;;  %v1817_v47 = vsel %vm13310_vm10, %v11147_v22, %v1816_v11  ;;  %v857_v11 = vld [vmem:[#allocation2 + $0x80] sm:$0x1] }
  0xc7   : > { %1421 = vmatmul.bf16.gmra.mxu0 %v1305_v19  ;;  %2347 = vmatmul.bf16.gmra.mxu3 %v12554_v20  ;;  %v1306_v20 = vpack.c.b16 %v1283_v63, %v1282_v4  ;;  %v13637_v3 = vrot.slane %v1116_v38, 5  ;;  %v1122_v4 = vrot.slane %v1120_v39, 4  ;;  %v349_v63 = vsel %vm13295_vm5, 0, %v348_v59 }
  0xc8   : > { %v1820_v55 = vsel %vm13310_vm10, %v1818_v29, %v1819_v30  ;;  %350 = vst [vmem:[#allocation2 + $0x98] sm:$0x1] %v349_v63  ;;  %v1897_v6 = vunpack.c.l.b16 %v1817_v47  ;;  %v1126_v28 = vshll.u32 %v857_v11, 16  ;;  %v1710_v29 = vld [vmem:[#allocation2 + $0x78] sm:$0xe]  ;;  %v568_v38 = vrot.slane %v563_v8, 4 }
  0xc9   : > { %v1898_v7 = vunpack.c.l.b16 %v1820_v55  ;;  %v11148_v42 = vrot.slane %v1710_v29, 9  ;;  %v1826_v47 = vrot.slane %v857_v11, 5  ;;  %v1119_v55 = vsel %vm13301_vm8, %v1114_v32, %v13637_v3  ;;  %v351_v11 = vld [vmem:[#allocation2 + $0xa4] sm:$0x1] }
  0xca   : > { %v570_v59 = vshrl.u32 %v246_v57, 16 }
  0xcb   : > { %v1920_v22 = vpack.c.b16 %v1898_v7, %v1897_v6 }
  0xcf   : > { %v768_v39 = vld [vmem:[#allocation2 + $0x98] sm:$0x1] }
  0xd0   : > { %v1387_v14 = vpop.f32.mrf.mxu0 }
  0xd1   : > { %v1620_v16 = vpop.f32.mrf.mxu1 }
  0xd2   : > { %v1621_v19 = vadd.f32 %v1620_v16, %v1387_v14  ;;  %v764_v14 = vld [vmem:[#allocation2 + $0x90] sm:$0xf]  ;;  %v1123_v16 = vor.u32 %v1122_v4, %v13637_v3 }
  0xd3   : > { %v765_v23 = vsel %vm13325_vm6, %v558_v13, %v764_v14 }
  0xd4   : > { %1659 = vmatmul.bf16.gmra.mxu1 %v12515_v10  ;;  %v1284_v10 = vunpack.c.l.b16 %v1095_v46  ;;  %766 = vst [vmem:[#allocation2 + $0x90] sm:$0xf] %v765_v23  ;;  %v1124_v35 = vrot.slane %v1123_v16, 4  ;;  %v1128_v46 = vrot.slane %v1126_v28, 5  ;;  %v1136_v16 = vrot.slane %v1134_v54, 5 }
  0xd5   : > { %2039 = vmatmul.bf16.gmra.mxu2 %v1919_v17  ;;  %v559_v17 = vrot.slane %v555_v1, 4  ;;  %v1286_v28 = vunpack.c.l.b16 %v1119_v55 }
  0xd6   : > { %v1307_v25 = vpack.c.b16 %v1285_v9, %v1284_v10  ;;  %v1129_v5 = vsel %vm13301_vm8, %v1124_v35, %v1128_v46 }
  0xd7   : > { %1426 = vmatmul.bf16.gmra.mxu0 %v1306_v20  ;;  %2352 = vmatmul.bf16.gmra.mxu3 %v12555_v21  ;;  %v1823_v20 = vrot.slane %v13616_v27, 5  ;;  %v566_v21 = vor.u32 %v564_v58, %v563_v8  ;;  %v572_v8 = vrot.slane %v570_v59, 7  ;;  %v573_v58 = vshll.u32 %v246_v57, 16 }
  0xd8   : > { %v2000_v45 = vpop.f32.mrf.mxu2  ;;  %v1389_v52 = vpop.f32.mrf.mxu0  ;;  %v1287_v29 = vunpack.c.l.b16 %v1129_v5 }
  0xd9   : > { %v2080_v51 = vadd.f32 %v2000_v45, %v1621_v19  ;;  %v1622_v53 = vpop.f32.mrf.mxu1  ;;  %v12516_v19 = vld [vmem:[#allocation2 + $0x6c] sm:$0xff]  ;;  %v567_v27 = vsel %vm13316_vm3, %v559_v17, %v566_v21  ;;  %v1825_v44 = vrot.slane %v1823_v20, 4  ;;  %v301_v45 = vld [vmem:[#allocation2 + $0x9c] sm:$0x1]  ;;  %v1824_v6 = vsel %vm13310_vm10, %v11148_v42, %v1823_v20 }
  0xda   : > { %v1623_v60 = vadd.f32 %v1622_v53, %v1389_v52  ;;  %v2313_v50 = vpop.f32.mrf.mxu3  ;;  %767 = vst [vmem:[#allocation2 + $0x94] sm:$0xf] %v567_v27  ;;  %v302_v52 = vsel %vm13268_vm7, 0, %v301_v45  ;;  %v1131_v53 = vshrl.u32 %v821_v37, 16  ;;  %v352_v17 = vsel %vm13295_vm5, 0, %v351_v11 }
  0xdb   : > { %v13635_v2 = vadd.f32 %v2313_v50, %v2080_v51  ;;  %v769_v51 = vsel %vm13268_vm7, %v568_v38, %v768_v39  ;;  %303 = vst [vmem:[#allocation2 + $0x9c] sm:$0x1] %v302_v52  ;;  %v1827_v3 = vsel %vm13310_vm10, %v1825_v44, %v1826_v47  ;;  %v1146_v20 = vrot.slane %v1144_v62, 4  ;;  %v1711_v37 = vld [vmem:[#allocation2 + $0x84] sm:$0xe] }
  0xdc   : > { %770 = vst [vmem:[#allocation2 + $0x98] sm:$0x1] %v769_v51  ;;  %v1133_v14 = vrot.slane %v1131_v53, 4  ;;  %v575_v21 = vor.u32 %v573_v58, %v572_v8  ;;  %v1899_v23 = vunpack.c.l.b16 %v1824_v6  ;;  %v1830_v27 = vrot.slane %v13649_v49, 5  ;;  %v12557_v51 = vld [vmem:[#allocation2 + $0x84] sm:$0xff] }
  0xdd   : > { %353 = vst [vmem:[#allocation2 + $0xa4] sm:$0x1] %v352_v17  ;;  %v1308_v47 = vpack.c.b16 %v1287_v29, %v1286_v28  ;;  %v823_v52 = vld [vmem:[#allocation2 + $0x90] sm:$0xf]  ;;  %v11149_v55 = vrot.slane %v1711_v37, 9 }
  0xde   : > { %v1832_v62 = vrot.slane %v1830_v27, 4  ;;  %v248_v58 = vld [vmem:[%s13256_s5 + $0x68] sm:$0xf] }
  0xdf   : > { %v590_v28 = vshll.u32 %v248_v58, 16 }
  0xe0   : > { %v2002_v18 = vpop.f32.mrf.mxu2 }
  0xe1   : > { %v2081_v24 = vadd.f32 %v2002_v18, %v1623_v60  ;;  %v1625_v26 = vpop.f32.mrf.mxu1  ;;  %v247_v60 = vld [vmem:[%s13256_s5 + $0x64] sm:$0xf] }
  0xe2   : > { %v2315_v30 = vpop.f32.mrf.mxu3  ;;  %v578_v1 = vshrl.u32 %v247_v60, 16  ;;  %v581_v9 = vshll.u32 %v247_v60, 16 }
  0xe3   : > { %v13645_v34 = vadd.f32 %v2315_v30, %v2081_v24  ;;  %v1900_v24 = vunpack.c.l.b16 %v1827_v3  ;;  %v858_v30 = vld [vmem:[#allocation2 + $0x8c] sm:$0x1]  ;;  %v13686_v3 = vld [vmem:[#allocation2 + $0x94] sm:$0xf] }
  0xe4   : > { %v1392_v33 = vpop.f32.mrf.mxu0  ;;  %1664 = vmatmul.bf16.gmra.mxu1 %v12516_v19  ;;  %v580_v10 = vrot.slane %v578_v1, 7  ;;  %v13672_v19 = vrot.slane %v1140_v61, 5  ;;  %v1150_v45 = vshll.u32 %v858_v30, 16  ;;  %v775_v60 = vld [vmem:[#allocation2 + $0xa4] sm:$0x1]  ;;  %v1833_v59 = vrot.slane %v858_v30, 5 }
  0xe5   : > { %v1626_v40 = vadd.f32 %v1625_v26, %v1392_v33  ;;  %2044 = vmatmul.bf16.gmra.mxu2 %v1920_v22  ;;  %v576_v26 = vrot.slane %v572_v8, 4  ;;  %v12517_v33 = vld [vmem:[#allocation2 + $0x78] sm:$0xff]  ;;  %v1921_v44 = vpack.c.b16 %v1900_v24, %v1899_v23  ;;  %v304_v1 = vld [vmem:[#allocation2 + $0xa8] sm:$0x1]  ;;  %v12572_v8 = vld [vmem:[#allocation9 + $0x108] sm:$0xff] }
  0xe6   : > { %v583_v22 = vor.u32 %v581_v9, %v580_v10  ;;  %v1147_v35 = vor.u32 %v1146_v20, %v13672_v19  ;;  %v585_v57 = vrot.slane %v580_v10, 4  ;;  %v305_v6 = vsel %vm13268_vm7, 0, %v304_v1  ;;  %v249_v10 = vld [vmem:[%s13256_s5 + $0x6c] sm:$0xf]  ;;  %2991 = vmatpush.bf16.msrb.mxu0 %v12572_v8 }
  0xe7   : > { %1431 = vmatmul.bf16.gmra.mxu0 %v1307_v25  ;;  %2357 = vmatmul.bf16.gmra.mxu3 %v12556_v31  ;;  %v1137_v25 = vor.u32 %v1136_v16, %v1133_v14  ;;  %v771_v31 = vld [vmem:[#allocation2 + $0x9c] sm:$0xf]  ;;  %306 = vst [vmem:[#allocation2 + $0xa8] sm:$0x1] %v305_v6  ;;  %v587_v14 = vshrl.u32 %v248_v58, 16  ;;  %v595_v16 = vshrl.u32 %v249_v10, 16 }
  0xe8   : > { %v2005_v50 = vpop.f32.mrf.mxu2  ;;  %v584_v38 = vsel %vm13316_vm3, %v576_v26, %v583_v22  ;;  %v772_v39 = vsel %vm13325_vm6, %v575_v21, %v771_v31  ;;  %v1148_v61 = vrot.slane %v1147_v35, 4  ;;  %v776_v5 = vsel %vm13268_vm7, %v585_v57, %v775_v60  ;;  %v354_v31 = vld [vmem:[#allocation2 + $0xb0] sm:$0x1]  ;;  %v12518_v57 = vld [vmem:[#allocation2 + $0x84] sm:$0xff] }
  0xe9   : > { %v2082_v4 = vadd.f32 %v2005_v50, %v1626_v40  ;;  %v1627_v63 = vpop.f32.mrf.mxu1  ;;  %773 = vst [vmem:[#allocation2 + $0x9c] sm:$0xf] %v772_v39  ;;  %v1138_v49 = vrot.slane %v1137_v25, 4  ;;  %v1834_v21 = vsel %vm13310_vm10, %v1832_v62, %v1833_v59  ;;  %v1164_v22 = vshll.u32 %v13686_v3, 16 }
  0xea   : > { %v2318_v7 = vpop.f32.mrf.mxu3  ;;  %774 = vst [vmem:[#allocation2 + $0xa0] sm:$0xf] %v584_v38  ;;  %v1168_v25 = vshrl.u32 %v13686_v3, 16  ;;  %v597_v37 = vrot.slane %v595_v16, 7  ;;  %v1902_v39 = vunpack.c.l.b16 %v1834_v21  ;;  %v307_v16 = vld [vmem:[#allocation2 + $0xb4] sm:$0x1] }
  0xeb   : > { %v13668_v13 = vadd.f32 %v2318_v7, %v2082_v4  ;;  %v1152_v4 = vrot.slane %v1150_v45, 5  ;;  %v1158_v7 = vshll.u32 %v823_v52, 16  ;;  %777 = vst [vmem:[#allocation2 + $0xa4] sm:$0x1] %v776_v5  ;;  %v1143_v11 = vsel %vm13301_vm8, %v1138_v49, %v13672_v19  ;;  %v12558_v5 = vld [vmem:[#allocation2 + $0x90] sm:$0xff] }
  0xec   : > { %v1394_v12 = vpop.f32.mrf.mxu0  ;;  %v589_v19 = vrot.slane %v587_v14, 7  ;;  %v13703_v45 = vrot.slane %v1164_v22, 5 }
  0xed   : > { %v1628_v18 = vadd.f32 %v1627_v63, %v1394_v12  ;;  %v1155_v63 = vshrl.u32 %v823_v52, 16  ;;  %v1831_v12 = vsel %vm13310_vm10, %v11149_v55, %v1830_v27  ;;  %v1153_v20 = vsel %vm13301_vm8, %v1148_v61, %v1152_v4 }
  0xee   : > { %v1160_v26 = vrot.slane %v1158_v7, 5  ;;  %v592_v35 = vor.u32 %v590_v28, %v589_v19  ;;  %v1289_v27 = vunpack.c.l.b16 %v1153_v20  ;;  %v1901_v38 = vunpack.c.l.b16 %v1831_v12 }
  0xef   : > { %v1157_v23 = vrot.slane %v1155_v63, 4  ;;  %v1170_v52 = vrot.slane %v1168_v25, 4  ;;  %v593_v49 = vrot.slane %v589_v19, 4  ;;  %v602_v12 = vrot.slane %v597_v37, 4  ;;  %v251_v25 = vld [vmem:[%s13256_s5 + $0x74] sm:$0xf] }
  0xf0   : > { %v2007_v32 = vpop.f32.mrf.mxu2  ;;  %v1922_v1 = vpack.c.b16 %v1902_v39, %v1901_v38  ;;  %v308_v20 = vsel %vm13268_vm7, 0, %v307_v16 }
  0xf1   : > { %v2083_v40 = vadd.f32 %v2007_v32, %v1628_v18  ;;  %v1630_v42 = vpop.f32.mrf.mxu1  ;;  %309 = vst [vmem:[#allocation2 + $0xb4] sm:$0x1] %v308_v20 }
  0xf2   : > { %v2320_v46 = vpop.f32.mrf.mxu3 }
  0xf3   : > { %v13680_v54 = vadd.f32 %v2320_v46, %v2083_v40  ;;  %v859_v40 = vld [vmem:[#allocation2 + $0x98] sm:$0x1]  ;;  %v1837_v46 = vrot.slane %v13686_v3, 5 }
  0xf4   : > { %v1397_v53 = vpop.f32.mrf.mxu0  ;;  %1669 = vmatmul.bf16.gmra.mxu1 %v12517_v33  ;;  %v1288_v33 = vunpack.c.l.b16 %v1143_v11  ;;  %v1174_v4 = vshll.u32 %v859_v40, 16  ;;  %v1840_v8 = vrot.slane %v859_v40, 5 }
  0xf5   : > { %v1631_v50 = vadd.f32 %v1630_v42, %v1397_v53  ;;  %2049 = vmatmul.bf16.gmra.mxu2 %v1921_v44  ;;  %v598_v42 = vshll.u32 %v249_v10, 16  ;;  %v1161_v44 = vor.u32 %v1160_v26, %v1157_v23  ;;  %v1712_v53 = vld [vmem:[#allocation2 + $0x90] sm:$0xe]  ;;  %v1839_v7 = vrot.slane %v1837_v46, 4  ;;  %v13719_v23 = vld [vmem:[#allocation2 + $0xa0] sm:$0xf] }
  0xf6   : > { %v1309_v59 = vpack.c.b16 %v1289_v27, %v1288_v33  ;;  %v11150_v3 = vrot.slane %v1712_v53, 9  ;;  %v1188_v40 = vshll.u32 %v13719_v23, 16  ;;  %v1844_v16 = vrot.slane %v13719_v23, 5 }
  0xf7   : > { %1436 = vmatmul.bf16.gmra.mxu0 %v1308_v47  ;;  %2362 = vmatmul.bf16.gmra.mxu3 %v12557_v51  ;;  %v778_v47 = vld [vmem:[#allocation2 + $0xa8] sm:$0xf]  ;;  %v355_v51 = vsel %vm13295_vm5, 0, %v354_v31  ;;  %v600_v60 = vor.u32 %v598_v42, %v597_v37  ;;  %v1162_v6 = vrot.slane %v1161_v44, 4  ;;  %v1841_v19 = vsel %vm13310_vm10, %v1839_v7, %v1840_v8 }
  0xf8   : > { %v2010_v9 = vpop.f32.mrf.mxu2  ;;  %356 = vst [vmem:[#allocation2 + $0xb0] sm:$0x1] %v355_v51  ;;  %v1838_v21 = vsel %vm13310_vm10, %v11150_v3, %v1837_v46  ;;  %v612_v37 = vshrl.u32 %v251_v25, 16  ;;  %v1192_v42 = vshrl.u32 %v13719_v23, 16  ;;  %v615_v51 = vshll.u32 %v251_v25, 16 }
  0xf9   : > { %v2084_v17 = vadd.f32 %v2010_v9, %v1631_v50  ;;  %v1632_v18 = vpop.f32.mrf.mxu1  ;;  %v779_v50 = vsel %vm13325_vm6, %v592_v35, %v778_v47  ;;  %v1171_v9 = vor.u32 %v1170_v52, %v13703_v45  ;;  %v601_v11 = vsel %vm13316_vm3, %v593_v49, %v600_v60  ;;  %v357_v52 = vld [vmem:[#allocation2 + $0xbc] sm:$0x1] }
  0xfa   : > { %v2323_v24 = vpop.f32.mrf.mxu3  ;;  %780 = vst [vmem:[#allocation2 + $0xa8] sm:$0xf] %v779_v50  ;;  %v1167_v26 = vsel %vm13301_vm8, %v1162_v6, %v13703_v45  ;;  %v1903_v39 = vunpack.c.l.b16 %v1838_v21  ;;  %v614_v47 = vrot.slane %v612_v37, 7  ;;  %v358_v60 = vsel %vm13295_vm5, 0, %v357_v52  ;;  %v785_v6 = vld [vmem:[#allocation2 + $0xb4] sm:$0xf] }
  0xfb   : > { %v13700_v30 = vadd.f32 %v2323_v24, %v2084_v17  ;;  %781 = vst [vmem:[#allocation2 + $0xac] sm:$0xf] %v601_v11  ;;  %v1176_v17 = vrot.slane %v1174_v4, 5  ;;  %v1172_v22 = vrot.slane %v1171_v9, 4  ;;  %v1194_v4 = vrot.slane %v1192_v42, 4  ;;  %v12618_v52 = vld [vmem:[#allocation9 + $0x1f8] sm:$0xff] }
  0xfc   : > { %v1399_v29 = vpop.f32.mrf.mxu0  ;;  %359 = vst [vmem:[#allocation2 + $0xbc] sm:$0x1] %v358_v60  ;;  %v1290_v3 = vunpack.c.l.b16 %v1167_v26  ;;  %v1846_v37 = vrot.slane %v1844_v16, 4  ;;  %4405 = vmatpush.bf16.msrb.mxu3 %v12618_v52 }
  0xfd   : > { %v1633_v32 = vadd.f32 %v1632_v18, %v1399_v29  ;;  %v825_v18 = vld [vmem:[#allocation2 + $0x9c] sm:$0xf]  ;;  %v250_v29 = vld [vmem:[%s13256_s5 + $0x70] sm:$0xf] }
  0xfe   : > { %v1182_v33 = vshll.u32 %v825_v18, 16  ;;  %v604_v35 = vshrl.u32 %v250_v29, 16  ;;  %v607_v46 = vshll.u32 %v250_v29, 16 }
  0xff   : > { %v782_v24 = vld [vmem:[#allocation2 + $0xb0] sm:$0x1] }
 0x100   : > { %v2012_v55 = vpop.f32.mrf.mxu2  ;;  %v783_v28 = vsel %vm13268_vm7, %v602_v12, %v782_v24  ;;  %v606_v45 = vrot.slane %v604_v35, 7  ;;  %v12519_v12 = vld [vmem:[#allocation2 + $0x90] sm:$0xff]  ;;  %v1713_v24 = vld [vmem:[#allocation2 + $0x9c] sm:$0xe] }
 0x101   : > { %v2085_v61 = vadd.f32 %v2012_v55, %v1633_v32  ;;  %v1635_v62 = vpop.f32.mrf.mxu1  ;;  %v1179_v32 = vshrl.u32 %v825_v18, 16  ;;  %784 = vst [vmem:[#allocation2 + $0xb0] sm:$0x1] %v783_v28  ;;  %v1177_v55 = vsel %vm13301_vm8, %v1172_v22, %v1176_v17  ;;  %v11151_v35 = vrot.slane %v1713_v24, 9 }
 0x102   : > { %v2325_v63 = vpop.f32.mrf.mxu3  ;;  %v1291_v7 = vunpack.c.l.b16 %v1177_v55  ;;  %v13755_v60 = vld [vmem:[#allocation2 + $0xac] sm:$0xf] }
 0x103   : > { %v13710_v10 = vadd.f32 %v2325_v63, %v2085_v61  ;;  %v1181_v61 = vrot.slane %v1179_v32, 4  ;;  %v610_v63 = vrot.slane %v606_v45, 4  ;;  %v789_v32 = vld [vmem:[#allocation2 + $0xbc] sm:$0x1] }
 0x104   : > { %v1402_v58 = vpop.f32.mrf.mxu0  ;;  %1674 = vmatmul.bf16.gmra.mxu1 %v12518_v57  ;;  %v1904_v57 = vunpack.c.l.b16 %v1841_v19  ;;  %v1310_v22 = vpack.c.b16 %v1291_v7, %v1290_v3  ;;  %v12559_v19 = vld [vmem:[#allocation2 + $0x9c] sm:$0xff] }
 0x105   : > { %v1636_v14 = vadd.f32 %v1635_v62, %v1402_v58  ;;  %2054 = vmatmul.bf16.gmra.mxu2 %v1922_v1  ;;  %v1184_v62 = vrot.slane %v1182_v33, 5  ;;  %v13738_v1 = vrot.slane %v1188_v40, 5  ;;  %v860_v58 = vld [vmem:[#allocation2 + $0xa4] sm:$0x1] }
 0x106   : > { %v1923_v20 = vpack.c.b16 %v1904_v57, %v1903_v39  ;;  %v1198_v28 = vshll.u32 %v860_v58, 16  ;;  %v1847_v39 = vrot.slane %v860_v58, 5  ;;  %v12610_v40 = vld [vmem:[#allocation9 + $0x1b8] sm:$0xff]  ;;  %v1845_v57 = vsel %vm13310_vm10, %v11151_v35, %v1844_v16 }
 0x107   : > { %1441 = vmatmul.bf16.gmra.mxu0 %v1309_v59  ;;  %2367 = vmatmul.bf16.gmra.mxu3 %v12558_v5  ;;  %v609_v59 = vor.u32 %v607_v46, %v606_v45  ;;  %v617_v5 = vor.u32 %v615_v51, %v614_v47  ;;  %v1195_v21 = vor.u32 %v1194_v4, %v13738_v1  ;;  %v827_v46 = vld [vmem:[#allocation2 + $0xa8] sm:$0xf]  ;;  %v12586_v51 = vld [vmem:[#allocation9 + $0x178] sm:$0xff]  ;;  %v1212_v16 = vshll.u32 %v13755_v60, 16 }
 0x108   : > { %v2015_v31 = vpop.f32.mrf.mxu2  ;;  %v1200_v45 = vrot.slane %v1198_v28, 5  ;;  %3724 = vmatpush.bf16.msrb.mxu2 %v12610_v40  ;;  %v1203_v4 = vshrl.u32 %v827_v46, 16  ;;  %3410 = vmatpush.bf16.msrb.mxu1 %v12586_v51  ;;  %v1905_v24 = vunpack.c.l.b16 %v1845_v57 }
 0x109   : > { %v2086_v27 = vadd.f32 %v2015_v31, %v1636_v14  ;;  %v1637_v38 = vpop.f32.mrf.mxu1  ;;  %v786_v8 = vsel %vm13325_vm6, %v609_v59, %v785_v6  ;;  %v618_v9 = vsel %vm13316_vm3, %v610_v63, %v617_v5  ;;  %v1185_v14 = vor.u32 %v1184_v62, %v1181_v61  ;;  %v12609_v5 = vld [vmem:[#allocation9 + $0x1b0] sm:$0xff]  ;;  %v253_v6 = vld [vmem:[%s13256_s5 + $0x7c] sm:$0xf] }
 0x10a   : > { %v2328_v44 = vpop.f32.mrf.mxu3  ;;  %787 = vst [vmem:[#allocation2 + $0xb4] sm:$0xf] %v786_v8  ;;  %v619_v31 = vrot.slane %v614_v47, 4  ;;  %v12571_v47 = vld [vmem:[#allocation9 + $0x100] sm:$0xff]  ;;  %v1848_v59 = vsel %vm13310_vm10, %v1846_v37, %v1847_v39  ;;  %v1206_v63 = vshll.u32 %v827_v46, 16  ;;  %v13771_v35 = vrot.slane %v1212_v16, 5 }
 0x10b   : > { %v13732_v49 = vadd.f32 %v2328_v44, %v2086_v27  ;;  %788 = vst [vmem:[#allocation2 + $0xb8] sm:$0xf] %v618_v9  ;;  %v1186_v23 = vrot.slane %v1185_v14, 4  ;;  %v310_v27 = vld [vmem:[#allocation2 + $0xc0] sm:$0x1]  ;;  %2992 = vmatpush.bf16.msrb.mxu0 %v12571_v47  ;;  %v629_v9 = vshrl.u32 %v253_v6, 16 }
 0x10c   : > { %v1404_v53 = vpop.f32.mrf.mxu0  ;;  %v790_v42 = vsel %vm13268_vm7, %v619_v31, %v789_v32  ;;  %v311_v44 = vsel %vm13268_vm7, 0, %v310_v27  ;;  %3725 = vmatpush.bf16.msrb.mxu2 %v12609_v5  ;;  %v1208_v28 = vrot.slane %v1206_v63, 5  ;;  %v632_v31 = vshll.u32 %v253_v6, 16  ;;  %v12584_v27 = vld [vmem:[#allocation9 + $0x168] sm:$0xff]  ;;  %v1714_v6 = vld [vmem:[#allocation2 + $0xa8] sm:$0xe] }
 0x10d   : > { %v1638_v50 = vadd.f32 %v1637_v38, %v1404_v53  ;;  %v1196_v38 = vrot.slane %v1195_v21, 4  ;;  %791 = vst [vmem:[#allocation2 + $0xbc] sm:$0x1] %v790_v42  ;;  %v252_v53 = vld [vmem:[%s13256_s5 + $0x78] sm:$0xf]  ;;  %v1191_v7 = vsel %vm13301_vm8, %v1186_v23, %v13738_v1  ;;  %v12608_v1 = vld [vmem:[#allocation9 + $0x1a8] sm:$0xff] }
 0x10e   : > { %312 = vst [vmem:[#allocation2 + $0xc0] sm:$0x1] %v311_v44  ;;  %v624_v58 = vshll.u32 %v252_v53, 16  ;;  %v1292_v32 = vunpack.c.l.b16 %v1191_v7  ;;  %v12520_v42 = vld [vmem:[#allocation2 + $0x9c] sm:$0xff]  ;;  %v861_v44 = vld [vmem:[#allocation2 + $0xb0] sm:$0x1] }
 0x10f   : > { %v1201_v14 = vsel %vm13301_vm8, %v1196_v38, %v1200_v45  ;;  %v12616_v38 = vld [vmem:[#allocation9 + $0x1e8] sm:$0xff]  ;;  %v1222_v5 = vshll.u32 %v861_v44, 16  ;;  %v12615_v7 = vld [vmem:[#allocation9 + $0x1e0] sm:$0xff]  ;;  %v1854_v16 = vrot.slane %v861_v44, 5  ;;  %v12613_v44 = vld [vmem:[#allocation9 + $0x1d0] sm:$0xff] }
 0x110   : > { %v2017_v11 = vpop.f32.mrf.mxu2  ;;  %3726 = vmatpush.bf16.msrb.mxu2 %v12608_v1 }
 0x111   : > { %v2087_v17 = vadd.f32 %v2017_v11, %v1638_v50  ;;  %v1640_v18 = vpop.f32.mrf.mxu1  ;;  %v621_v50 = vshrl.u32 %v252_v53, 16 }
 0x112   : > { %v2330_v26 = vpop.f32.mrf.mxu3 }
 0x113   : > { %v13746_v25 = vadd.f32 %v2330_v26, %v2087_v17  ;;  %v623_v8 = vrot.slane %v621_v50, 7  ;;  %v1216_v17 = vshrl.u32 %v13755_v60, 16  ;;  %v1906_v26 = vunpack.c.l.b16 %v1848_v59 }
 0x114   : > { %v1407_v29 = vpop.f32.mrf.mxu0  ;;  %1679 = vmatmul.bf16.gmra.mxu1 %v12519_v12 }
 0x115   : > { %v1641_v33 = vadd.f32 %v1640_v18, %v1407_v29  ;;  %2059 = vmatmul.bf16.gmra.mxu2 %v1923_v20  ;;  %v12585_v18 = vld [vmem:[#allocation9 + $0x170] sm:$0xff]  ;;  %v13769_v29 = vrot.slane %v629_v9, 7  ;;  %v792_v23 = vld [vmem:[#allocation2 + $0xc0] sm:$0xf]  ;;  %v1218_v37 = vrot.slane %v1216_v17, 4  ;;  %v627_v39 = vrot.slane %v623_v8, 4 }
 0x116   : > { %v12617_v20 = vld [vmem:[#allocation9 + $0x1f0] sm:$0xff]  ;;  %3411 = vmatpush.bf16.msrb.mxu1 %v12585_v18  ;;  %v1924_v52 = vpack.c.b16 %v1906_v26, %v1905_v24  ;;  %v1224_v18 = vrot.slane %v1222_v5, 5  ;;  %v12521_v5 = vld [vmem:[#allocation2 + $0xa8] sm:$0xff] }
 0x117   : > { %1446 = vmatmul.bf16.gmra.mxu0 %v1310_v22  ;;  %2372 = vmatmul.bf16.gmra.mxu3 %v12559_v19  ;;  %v626_v22 = vor.u32 %v624_v58, %v623_v8  ;;  %v1205_v19 = vrot.slane %v1203_v4, 4  ;;  %v634_v45 = vor.u32 %v632_v31, %v13769_v29  ;;  %v1219_v63 = vor.u32 %v1218_v37, %v13771_v35  ;;  %v13782_v26 = vld [vmem:[#allocation2 + $0xb8] sm:$0xf] }
 0x118   : > { %v2020_v55 = vpop.f32.mrf.mxu2  ;;  %4406 = vmatpush.bf16.msrb.mxu3 %v12617_v20  ;;  %v829_v20 = vld [vmem:[#allocation2 + $0xb4] sm:$0xf] }
 0x119   : > { %v2088_v61 = vadd.f32 %v2020_v55, %v1641_v33  ;;  %v1642_v62 = vpop.f32.mrf.mxu1  ;;  %v1293_v33 = vunpack.c.l.b16 %v1201_v14  ;;  %v793_v46 = vsel %vm13325_vm6, %v626_v22, %v792_v23  ;;  %v1209_v53 = vor.u32 %v1208_v28, %v1205_v19  ;;  %v12607_v55 = vld [vmem:[#allocation9 + $0x1a0] sm:$0xff]  ;;  %v12605_v28 = vld [vmem:[#allocation9 + $0x190] sm:$0xff] }
 0x11a   : > { %v2333_v3 = vpop.f32.mrf.mxu3  ;;  %3412 = vmatpush.bf16.msrb.mxu1 %v12584_v27  ;;  %794 = vst [vmem:[#allocation2 + $0xc0] sm:$0xf] %v793_v46  ;;  %3727 = vmatpush.bf16.msrb.mxu2 %v12607_v55  ;;  %v635_v8 = vsel %vm13316_vm3, %v627_v39, %v634_v45  ;;  %v1220_v17 = vrot.slane %v1219_v63, 4  ;;  %v1227_v23 = vshrl.u32 %v829_v20, 16  ;;  %v1230_v37 = vshll.u32 %v829_v20, 16  ;;  %v12604_v46 = vld [vmem:[#allocation9 + $0x188] sm:$0xff] }
 0x11b   : > { %v13763_v12 = vadd.f32 %v2333_v3, %v2088_v61  ;;  %v1311_v50 = vpack.c.b16 %v1293_v33, %v1292_v32  ;;  %v12560_v61 = vld [vmem:[#allocation2 + $0xa8] sm:$0xff]  ;;  %795 = vst [vmem:[#allocation2 + $0xc4] sm:$0xf] %v635_v8  ;;  %v1210_v9 = vrot.slane %v1209_v53, 4  ;;  %vm15776_vm3 = vcmask 1044484  }
 0x11c   : > { %v1409_v11 = vpop.f32.mrf.mxu0  ;;  %4407 = vmatpush.bf16.msrb.mxu3 %v12616_v38  ;;  %v12583_v3 = vld [vmem:[#allocation9 + $0x160] sm:$0xff]  ;;  %v1225_v39 = vsel %vm13301_vm8, %v1220_v17, %v1224_v18  ;;  %v1229_v55 = vrot.slane %v1227_v23, 4  ;;  %v3845_v23 = vld [vmem:[#allocation2 + $0x18] sm:$0xf] }
 0x11d   : > { %v1643_v21 = vadd.f32 %v1642_v62, %v1409_v11  ;;  %v1851_v62 = vrot.slane %v13755_v60, 5  ;;  %v12606_v60 = vld [vmem:[#allocation9 + $0x198] sm:$0xff]  ;;  %v11152_v11 = vrot.slane %v1714_v6, 9  ;;  %v1215_v19 = vsel %vm13301_vm8, %v1210_v9, %v13771_v35  ;;  %v862_v6 = vld [vmem:[#allocation2 + $0xbc] sm:$0x1] }
 0x11e   : > { %3413 = vmatpush.bf16.msrb.mxu1 %v12583_v3  ;;  %3728 = vmatpush.bf16.msrb.mxu2 %v12606_v60  ;;  %v1240_v35 = vshrl.u32 %v13782_v26, 16  ;;  %v1295_v53 = vunpack.c.l.b16 %v1225_v39  ;;  %v1715_v3 = vld [vmem:[#allocation2 + $0xb4] sm:$0xe]  ;;  %v12603_v60 = vld [vmem:[#allocation9 + $0x180] sm:$0xff] }
 0x11f   : > { %v1853_v14 = vrot.slane %v1851_v62, 4  ;;  %v1852_v32 = vsel %vm13310_vm10, %v11152_v11, %v1851_v62  ;;  %v12580_v62 = vld [vmem:[#allocation9 + $0x148] sm:$0xff] }
 0x120   : > { %v2022_v40 = vpop.f32.mrf.mxu2  ;;  %4408 = vmatpush.bf16.msrb.mxu3 %v12615_v7  ;;  %v1858_v7 = vrot.slane %v13782_v26, 5 }
 0x121   : > { %v2089_v47 = vadd.f32 %v2022_v40, %v1643_v21  ;;  %v1645_v51 = vpop.f32.mrf.mxu1  ;;  %v12582_v21 = vld [vmem:[#allocation9 + $0x158] sm:$0xff]  ;;  %v1855_v33 = vsel %vm13310_vm10, %v1853_v14, %v1854_v16  ;;  %v1236_v40 = vshll.u32 %v13782_v26, 16  ;;  %v12561_v16 = vld [vmem:[#allocation2 + $0xb4] sm:$0xff]  ;;  %v12611_v26 = vld [vmem:[#allocation9 + $0x1c0] sm:$0xff] }
 0x122   : > { %v2335_v57 = vpop.f32.mrf.mxu3  ;;  %3414 = vmatpush.bf16.msrb.mxu1 %v12582_v21  ;;  %3729 = vmatpush.bf16.msrb.mxu2 %v12605_v28  ;;  %v1861_v28 = vrot.slane %v862_v6, 5 }
 0x123   : > { %v13777_v4 = vadd.f32 %v2335_v57, %v2089_v47  ;;  %v1907_v47 = vunpack.c.l.b16 %v1852_v32  ;;  %v1232_v57 = vrot.slane %v1230_v37, 5  ;;  %v13803_v32 = vld [vmem:[#allocation2 + $0x10] sm:$0xf] }
 0x124   : > { %v1412_v59 = vpop.f32.mrf.mxu0  ;;  %1684 = vmatmul.bf16.gmra.mxu1 %v12520_v42  ;;  %4409 = vmatpush.bf16.msrb.mxu3 %v12614_v56  ;;  %v12581_v42 = vld [vmem:[#allocation9 + $0x150] sm:$0xff]  ;;  %v1246_v56 = vshll.u32 %v862_v6, 16 }
 0x125   : > { %v1646_v58 = vadd.f32 %v1645_v51, %v1412_v59  ;;  %2064 = vmatmul.bf16.gmra.mxu2 %v1924_v52  ;;  %v1908_v51 = vunpack.c.l.b16 %v1855_v33  ;;  %v1294_v52 = vunpack.c.l.b16 %v1215_v19  ;;  %v12612_v59 = vld [vmem:[#allocation9 + $0x1c8] sm:$0xff]  ;;  %v1233_v17 = vor.u32 %v1232_v57, %v1229_v55  ;;  %v12626_v33 = vld [vmem:[#allocation9 + $0x238] sm:$0xff] }
 0x126   : > { %3415 = vmatpush.bf16.msrb.mxu1 %v12581_v42  ;;  %3730 = vmatpush.bf16.msrb.mxu2 %v12604_v46  ;;  %v1860_v19 = vrot.slane %v1858_v7, 4  ;;  %v1248_v39 = vrot.slane %v1246_v56, 5  ;;  %v3894_v55 = vshrl.u32 %v3845_v23, 16  ;;  %v3897_v57 = vshll.u32 %v3845_v23, 16  ;;  %v2427_v56 = vld [vmem:[#allocation2 + $0x14] sm:$0x1] }
 0x127   : > { %1451 = vmatmul.bf16.gmra.mxu0 %v1311_v50  ;;  %2377 = vmatmul.bf16.gmra.mxu3 %v12560_v61  ;;  %v13797_v50 = vrot.slane %v1236_v40, 5  ;;  %v1242_v61 = vrot.slane %v1240_v35, 4  ;;  %v1925_v9 = vpack.c.b16 %v1908_v51, %v1907_v47  ;;  %v1312_v14 = vpack.c.b16 %v1295_v53, %v1294_v52  ;;  %v3846_v35 = vld [vmem:[#allocation2 + $0x1c] sm:$0xf] }
 0x128   : > { %v2025_v24 = vpop.f32.mrf.mxu2  ;;  %4410 = vmatpush.bf16.msrb.mxu3 %v12613_v44  ;;  %v1234_v37 = vrot.slane %v1233_v17, 4  ;;  %v1862_v44 = vsel %vm13310_vm10, %v1860_v19, %v1861_v28  ;;  %v2483_v47 = vshll.u32 %v13803_v32, 16  ;;  %4830 = vmatpush.bf16.msra.mxu0 %v12626_v33  ;;  %v2487_v53 = vshrl.u32 %v13803_v32, 16  ;;  %v12522_v28 = vld [vmem:[#allocation2 + $0xb4] sm:$0xff] }
 0x129   : > { %v2090_v1 = vadd.f32 %v2025_v24, %v1646_v58  ;;  %v1647_v22 = vpop.f32.mrf.mxu1  ;;  %v1243_v21 = vor.u32 %v1242_v61, %v13797_v50  ;;  %v11153_v24 = vrot.slane %v1715_v3, 9  ;;  %v3899_v17 = vrot.slane %v3897_v57, 5 }
 0x12a   : > { %v2338_v31 = vpop.f32.mrf.mxu3  ;;  %3416 = vmatpush.bf16.msrb.mxu1 %v12580_v62  ;;  %3731 = vmatpush.bf16.msrb.mxu2 %v12603_v60  ;;  %v3903_v62 = vshll.u32 %v3846_v35, 16  ;;  %v1239_v6 = vsel %vm13301_vm8, %v1234_v37, %v13797_v50  ;;  %v3106_v50 = vld [vmem:[#allocation2 + $0xc] sm:$0xe] }
 0x12b   : > { %v13791_v38 = vadd.f32 %v2338_v31, %v2090_v1  ;;  %v12579_v1 = vld [vmem:[#allocation9 + $0x140] sm:$0xff]  ;;  %v1859_v40 = vsel %vm13310_vm10, %v11153_v24, %v1858_v7 }
 0x12c   : > { %v1414_v27 = vpop.f32.mrf.mxu0  ;;  %4411 = vmatpush.bf16.msrb.mxu3 %v12612_v59  ;;  %v2425_v31 = vld [vmem:[#allocation2 + $0xc] sm:$0xf]  ;;  %v3907_v59 = vshrl.u32 %v3846_v35, 16  ;;  %v1909_v7 = vunpack.c.l.b16 %v1859_v40  ;;  %v13820_v24 = vrot.slane %v3903_v62, 5 }
 0x12d   : > { %v1648_v45 = vadd.f32 %v1647_v22, %v1414_v27  ;;  %v1244_v27 = vrot.slane %v1243_v21, 4  ;;  %v2477_v46 = vshll.u32 %v2425_v31, 16 }
 0x12e   : > { %3417 = vmatpush.bf16.msrb.mxu1 %v12579_v1  ;;  %v3909_v1 = vrot.slane %v3907_v59, 4 }
 0x12f   : > { %v1249_v3 = vsel %vm13301_vm8, %v1244_v27, %v1248_v39  ;;  %v2479_v60 = vrot.slane %v2477_v46, 5  ;;  %v2493_v39 = vshll.u32 %v2427_v56, 16 }
 0x130   : > { %v2027_v63 = vpop.f32.mrf.mxu2  ;;  %4412 = vmatpush.bf16.msrb.mxu3 %v12611_v26  ;;  %v1297_v21 = vunpack.c.l.b16 %v1249_v3  ;;  %v3172_v26 = vrot.slane %v13803_v32, 5  ;;  %v3910_v46 = vor.u32 %v3909_v1, %v13820_v24 }
 0x131   : > { %v2091_v8 = vadd.f32 %v2027_v63, %v1648_v45  ;;  %v1650_v58 = vpop.f32.mrf.mxu1  ;;  %v2474_v45 = vshrl.u32 %v2425_v31, 16  ;;  %v2495_v59 = vrot.slane %v2493_v39, 5 }
 0x132   : > { %v2340_v11 = vpop.f32.mrf.mxu3 }
 0x133   : > { %v13800_v20 = vadd.f32 %v2340_v11, %v2091_v8  ;;  %v13818_v11 = vrot.slane %v2483_v47, 5 }
 0x134   : > { %v1417_v18 = vpop.f32.mrf.mxu0  ;;  %1689 = vmatmul.bf16.gmra.mxu1 %v12521_v5 }
 0x135   : > { %v1651_v22 = vadd.f32 %v1650_v58, %v1417_v18  ;;  %2069 = vmatmul.bf16.gmra.mxu2 %v1925_v9  ;;  %v1910_v58 = vunpack.c.l.b16 %v1862_v44  ;;  %v2476_v9 = vrot.slane %v2474_v45, 4  ;;  %v1296_v18 = vunpack.c.l.b16 %v1239_v6  ;;  %v12562_v44 = vld [vmem:[#allocation2 + $0xc0] sm:$0xff]  ;;  %v13827_v6 = vld [vmem:[#allocation2 + $0x1c] sm:$0xf] }
 0x136   : > { %v11314_v45 = vrot.slane %v3106_v50, 9 }
 0x137   : > { %1456 = vmatmul.bf16.gmra.mxu0 %v1312_v14  ;;  %2382 = vmatmul.bf16.gmra.mxu3 %v12561_v16  ;;  %v2489_v14 = vrot.slane %v2487_v53, 4  ;;  %v3896_v16 = vrot.slane %v3894_v55, 4  ;;  %v1926_v31 = vpack.c.b16 %v1910_v58, %v1909_v7  ;;  %v2480_v33 = vor.u32 %v2479_v60, %v2476_v9  ;;  %v3848_v60 = vld [vmem:[#allocation2 + $0x24] sm:$0xf] }
 0x138   : > { %v2030_v42 = vpop.f32.mrf.mxu2  ;;  %v3175_v53 = vrot.slane %v2427_v56, 5  ;;  %v3173_v3 = vsel %vm13310_vm10, %v11314_v45, %v3172_v26  ;;  %v3911_v7 = vrot.slane %v3910_v46, 4  ;;  %v3849_v56 = vld [vmem:[#allocation2 + $0x28] sm:$0xf] }
 0x139   : > { %v2092_v51 = vadd.f32 %v2030_v42, %v1651_v22  ;;  %v1652_v52 = vpop.f32.mrf.mxu1  ;;  %v3847_v22 = vld [vmem:[#allocation2 + $0x20] sm:$0x1]  ;;  %v2490_v27 = vor.u32 %v2489_v14, %v13818_v11  ;;  %v3900_v40 = vor.u32 %v3899_v17, %v3896_v16  ;;  %v1313_v42 = vpack.c.b16 %v1297_v21, %v1296_v18 }
 0x13a   : > { %v2343_v61 = vpop.f32.mrf.mxu3  ;;  %v3913_v47 = vshll.u32 %v3847_v22, 16  ;;  %v2481_v57 = vrot.slane %v2480_v33, 4  ;;  %v2507_v18 = vshll.u32 %v13827_v6, 16  ;;  %v2511_v21 = vshrl.u32 %v13827_v6, 16 }
 0x13b   : > { %v13811_v5 = vadd.f32 %v2343_v61, %v2092_v51  ;;  %v2428_v61 = vld [vmem:[#allocation2 + $0x18] sm:$0xf]  ;;  %v2491_v62 = vrot.slane %v2490_v27, 4  ;;  %v3298_v22 = vunpack.c.l.b16 %v3173_v3  ;;  %v3918_v33 = vshrl.u32 %v3848_v60, 16 }
 0x13c   : > { %v1419_v63 = vpop.f32.mrf.mxu0  ;;  %v2498_v9 = vshrl.u32 %v2428_v61, 16  ;;  %v2486_v16 = vsel %vm13301_vm8, %v2481_v57, %v13818_v11  ;;  %v2501_v17 = vshll.u32 %v2428_v61, 16  ;;  %v13847_v45 = vrot.slane %v2507_v18, 5  ;;  %v3107_v61 = vld [vmem:[#allocation2 + $0x18] sm:$0xe] }
 0x13d   : > { %v1653_v8 = vadd.f32 %v1652_v52, %v1419_v63  ;;  %v3174_v52 = vrot.slane %v3172_v26, 4  ;;  %v3901_v63 = vrot.slane %v3900_v40, 4  ;;  %v2496_v26 = vsel %vm13301_vm8, %v2491_v62, %v2495_v59 }
 0x13e   : > { %v2500_v39 = vrot.slane %v2498_v9, 4  ;;  %v3927_v40 = vshll.u32 %v3849_v56, 16  ;;  %v2513_v46 = vrot.slane %v2511_v21, 4  ;;  %v3850_v9 = vld [vmem:[#allocation2 + $0x2c] sm:$0x1] }
 0x13f   : > { %v3176_v58 = vsel %vm13310_vm10, %v3174_v52, %v3175_v53 }
 0x140   : > { %v2032_v19 = vpop.f32.mrf.mxu2  ;;  %v13849_v62 = vrot.slane %v3927_v40, 5 }
 0x141   : > { %v2093_v23 = vadd.f32 %v2032_v19, %v1653_v8  ;;  %v1655_v37 = vpop.f32.mrf.mxu1  ;;  %v3915_v8 = vrot.slane %v3913_v47, 5  ;;  %v3906_v19 = vsel %vm13301_vm8, %v3901_v63, %v13820_v24  ;;  %v2873_v47 = vunpack.c.l.b16 %v2486_v16  ;;  %v12587_v16 = vld [vmem:[#allocation2 + $0x18] sm:$0xff] }
 0x142   : > { %v2345_v35 = vpop.f32.mrf.mxu3  ;;  %v2874_v24 = vunpack.c.l.b16 %v2496_v26  ;;  %v4293_v52 = vunpack.c.l.b16 %v3906_v19 }
 0x143   : > { %v13825_v32 = vadd.f32 %v2345_v35, %v2093_v23  ;;  %v3916_v11 = vsel %vm13301_vm8, %v3911_v7, %v3915_v8  ;;  %v3921_v23 = vshll.u32 %v3848_v60, 16  ;;  %v3931_v35 = vshrl.u32 %v3849_v56, 16 }
 0x144   : > { %v1422_v51 = vpop.f32.mrf.mxu0  ;;  %1694 = vmatmul.bf16.gmra.mxu1 %v12522_v28  ;;  %v4294_v53 = vunpack.c.l.b16 %v3916_v11  ;;  %v2514_v8 = vor.u32 %v2513_v46, %v13847_v45  ;;  %v2905_v21 = vpack.c.b16 %v2874_v24, %v2873_v47  ;;  %v12625_v24 = vld [vmem:[#allocation9 + $0x230] sm:$0xff] }
 0x145   : > { %v1656_v55 = vadd.f32 %v1655_v37, %v1422_v51  ;;  %2074 = vmatmul.bf16.gmra.mxu2 %v1926_v31  ;;  %v3299_v31 = vunpack.c.l.b16 %v3176_v58  ;;  %v2430_v51 = vld [vmem:[#allocation2 + $0x20] sm:$0x1]  ;;  %v3923_v57 = vrot.slane %v3921_v23, 5  ;;  %v3933_v59 = vrot.slane %v3931_v35, 4  ;;  %v3851_v35 = vld [vmem:[#allocation2 + $0x30] sm:$0xf]  ;;  %4831 = vmatpush.bf16.msra.mxu0 %v12625_v24 }
 0x146   : > { %v2517_v58 = vshll.u32 %v2430_v51, 16  ;;  %v4325_v56 = vpack.c.b16 %v4294_v53, %v4293_v52  ;;  %v2515_v23 = vrot.slane %v2514_v8, 4  ;;  %v3182_v40 = vrot.slane %v2430_v51, 5  ;;  %v3852_v52 = vld [vmem:[#allocation2 + $0x34] sm:$0xf] }
 0x147   : > { %1461 = vmatmul.bf16.gmra.mxu0 %v1313_v42  ;;  %2387 = vmatmul.bf16.gmra.mxu3 %v12562_v44  ;;  %v2503_v44 = vrot.slane %v2501_v17, 5  ;;  %v3330_v3 = vpack.c.b16 %v3299_v31, %v3298_v22  ;;  %v3179_v17 = vrot.slane %v13827_v6, 5  ;;  %v3934_v22 = vor.u32 %v3933_v59, %v13849_v62  ;;  %v2431_v31 = vld [vmem:[#allocation2 + $0x24] sm:$0xf] }
 0x148   : > { %v2035_v14 = vpop.f32.mrf.mxu2  ;;  %v2522_v46 = vshrl.u32 %v2431_v31, 16  ;;  %v2525_v47 = vshll.u32 %v2431_v31, 16 }
 0x149   : > { %v2094_v1 = vadd.f32 %v2035_v14, %v1656_v55  ;;  %v1657_v50 = vpop.f32.mrf.mxu1  ;;  %v3920_v55 = vrot.slane %v3918_v33, 4  ;;  %v2504_v7 = vor.u32 %v2503_v44, %v2500_v39  ;;  %v13856_v39 = vld [vmem:[#allocation2 + $0x28] sm:$0xf]  ;;  %v3181_v6 = vrot.slane %v3179_v17, 4 }
 0x14a   : > { %v2348_v28 = vpop.f32.mrf.mxu3  ;;  %v3935_v53 = vrot.slane %v3934_v22, 4 }
 0x14b   : > { %v13845_v27 = vadd.f32 %v2348_v28, %v2094_v1  ;;  %v11315_v1 = vrot.slane %v3107_v61, 9  ;;  %v3937_v28 = vshll.u32 %v3850_v9, 16  ;;  %v2505_v33 = vrot.slane %v2504_v7, 4 }
 0x14c   : > { %v1424_v37 = vpop.f32.mrf.mxu0  ;;  %v2535_v61 = vshrl.u32 %v13856_v39, 16  ;;  %v3945_v7 = vshll.u32 %v3851_v35, 16  ;;  %v3183_v9 = vsel %vm13310_vm10, %v3181_v6, %v3182_v40 }
 0x14d   : > { %v1658_v42 = vadd.f32 %v1657_v50, %v1424_v37  ;;  %v3924_v50 = vor.u32 %v3923_v57, %v3920_v55  ;;  %v2519_v37 = vrot.slane %v2517_v58, 5  ;;  %v3939_v55 = vrot.slane %v3937_v28, 5 }
 0x14e   : > { %v2531_v57 = vshll.u32 %v13856_v39, 16  ;;  %v2510_v51 = vsel %vm13301_vm8, %v2505_v33, %v13847_v45  ;;  %v2524_v45 = vrot.slane %v2522_v46, 4  ;;  %v2537_v22 = vrot.slane %v2535_v61, 4  ;;  %v3853_v46 = vld [vmem:[#allocation2 + $0x38] sm:$0x1] }
 0x14f   : > { %v3925_v44 = vrot.slane %v3924_v50, 4  ;;  %v3940_v50 = vsel %vm13301_vm8, %v3935_v53, %v3939_v55  ;;  %v3301_v31 = vunpack.c.l.b16 %v3183_v9  ;;  %v3108_v55 = vld [vmem:[#allocation2 + $0x24] sm:$0xe] }
 0x150   : > { %v2037_v63 = vpop.f32.mrf.mxu2 }
 0x151   : > { %v2095_v60 = vadd.f32 %v2037_v63, %v1658_v42  ;;  %v1660_v14 = vpop.f32.mrf.mxu1  ;;  %v3180_v42 = vsel %vm13310_vm10, %v11315_v1, %v3179_v17  ;;  %v2520_v63 = vsel %vm13301_vm8, %v2515_v23, %v2519_v37  ;;  %v3947_v23 = vrot.slane %v3945_v7, 5 }
 0x152   : > { %v2350_v18 = vpop.f32.mrf.mxu3  ;;  %v3300_v17 = vunpack.c.l.b16 %v3180_v42  ;;  %v2875_v37 = vunpack.c.l.b16 %v2510_v51  ;;  %v2876_v40 = vunpack.c.l.b16 %v2520_v63  ;;  %v4296_v42 = vunpack.c.l.b16 %v3940_v50  ;;  %v12588_v51 = vld [vmem:[#allocation2 + $0x24] sm:$0xff] }
 0x153   : > { %v13853_v19 = vadd.f32 %v2350_v18, %v2095_v60  ;;  %v3951_v60 = vshll.u32 %v3852_v52, 16  ;;  %v3930_v18 = vsel %vm13301_vm8, %v3925_v44, %v13849_v62 }
 0x154   : > { %v1427_v26 = vpop.f32.mrf.mxu0  ;;  %3418 = vmatmul.bf16.vlgmr.msrb.gmra.mxu1 %v3330_v3  ;;  %v3942_v3 = vshrl.u32 %v3851_v35, 16  ;;  %v4295_v35 = vunpack.c.l.b16 %v3930_v18  ;;  %v3331_v53 = vpack.c.b16 %v3301_v31, %v3300_v17 }
 0x155   : > { %v1661_v11 = vadd.f32 %v1660_v14, %v1427_v26  ;;  %3732 = vmatmul.bf16.vlgmr.msrb.gmra.mxu2 %v12587_v16  ;;  %v3955_v14 = vshrl.u32 %v3852_v52, 16  ;;  %v13876_v26 = vrot.slane %v2531_v57, 5  ;;  %v13878_v6 = vrot.slane %v3951_v60, 5 }
 0x156   : > { %v3944_v33 = vrot.slane %v3942_v3, 4  ;;  %v3186_v57 = vrot.slane %v13856_v39, 5  ;;  %v4326_v9 = vpack.c.b16 %v4296_v42, %v4295_v35  ;;  %v3854_v42 = vld [vmem:[#allocation2 + $0x3c] sm:$0xf] }
 0x157   : > { %2993 = vmatmul.bf16.vlgmr.msrb.gmra.mxu0 %v2905_v21  ;;  %4413 = vmatmul.bf16.vlgmr.msrb.gmra.mxu3 %v4325_v56  ;;  %v2527_v21 = vrot.slane %v2525_v47, 5  ;;  %v3957_v62 = vrot.slane %v3955_v14, 4  ;;  %v2538_v47 = vor.u32 %v2537_v22, %v13876_v26  ;;  %v2434_v14 = vld [vmem:[#allocation2 + $0x30] sm:$0xf] }
 0x158   : > { %v2040_v59 = vpop.f32.mrf.mxu2  ;;  %v3948_v61 = vor.u32 %v3947_v23, %v3944_v33  ;;  %v3188_v50 = vrot.slane %v3186_v57, 4  ;;  %v2546_v23 = vshrl.u32 %v2434_v14, 16 }
 0x159   : > { %v2096_v8 = vadd.f32 %v2040_v59, %v1661_v11  ;;  %v1662_v58 = vpop.f32.mrf.mxu1  ;;  %v2433_v11 = vld [vmem:[#allocation2 + $0x2c] sm:$0x1]  ;;  %v2528_v44 = vor.u32 %v2527_v21, %v2524_v45  ;;  %v3958_v7 = vor.u32 %v3957_v62, %v13878_v6  ;;  %v2539_v45 = vrot.slane %v2538_v47, 4 }
 0x15a   : > { %v2353_v16 = vpop.f32.mrf.mxu3  ;;  %v2541_v24 = vshll.u32 %v2433_v11, 16  ;;  %v11316_v21 = vrot.slane %v3108_v55, 9  ;;  %v3189_v22 = vrot.slane %v2433_v11, 5 }
 0x15b   : > { %v13872_v1 = vadd.f32 %v2353_v16, %v2096_v8  ;;  %v3961_v8 = vshll.u32 %v3853_v46, 16  ;;  %v2529_v60 = vrot.slane %v2528_v44, 4  ;;  %v3959_v31 = vrot.slane %v3958_v7, 4 }
 0x15c   : > { %v1429_v56 = vpop.f32.mrf.mxu0  ;;  %v2543_v17 = vrot.slane %v2541_v24, 5  ;;  %v3187_v46 = vsel %vm13310_vm10, %v11316_v21, %v3186_v57  ;;  %v3190_v47 = vsel %vm13310_vm10, %v3188_v50, %v3189_v22  ;;  %v3966_v57 = vshrl.u32 %v3854_v42, 16 }
 0x15d   : > { %v1663_v28 = vadd.f32 %v1662_v58, %v1429_v56  ;;  %v2906_v58 = vpack.c.b16 %v2876_v40, %v2875_v37  ;;  %v13885_v56 = vld [vmem:[#allocation2 + $0x34] sm:$0xf]  ;;  %v3963_v33 = vrot.slane %v3961_v8, 5  ;;  %v2549_v37 = vshll.u32 %v2434_v14, 16 }
 0x15e   : > { %v2555_v62 = vshll.u32 %v13885_v56, 16  ;;  %v2559_v40 = vshrl.u32 %v13885_v56, 16  ;;  %v2534_v35 = vsel %vm13301_vm8, %v2529_v60, %v13876_v26  ;;  %v2544_v11 = vsel %vm13301_vm8, %v2539_v45, %v2543_v17 }
 0x15f   : > { %v3964_v26 = vsel %vm13301_vm8, %v3959_v31, %v3963_v33  ;;  %v3969_v8 = vshll.u32 %v3854_v42, 16  ;;  %v3302_v45 = vunpack.c.l.b16 %v3187_v46  ;;  %v3303_v17 = vunpack.c.l.b16 %v3190_v47 }
 0x160   : > { %v2042_v52 = vpop.f32.mrf.mxu2  ;;  %v2561_v7 = vrot.slane %v2559_v40, 4  ;;  %v2878_v21 = vunpack.c.l.b16 %v2544_v11  ;;  %v4298_v50 = vunpack.c.l.b16 %v3964_v26  ;;  %v3968_v33 = vrot.slane %v3966_v57, 4 }
 0x161   : > { %v2097_v59 = vadd.f32 %v2042_v52, %v1663_v28  ;;  %v1665_v3 = vpop.f32.mrf.mxu1  ;;  %v3949_v28 = vrot.slane %v3948_v61, 4  ;;  %v3855_v52 = vld [vmem:[#allocation2 + $0x40] sm:$0xf]  ;;  %v2548_v61 = vrot.slane %v2546_v23, 4  ;;  %v3971_v23 = vrot.slane %v3969_v8, 5 }
 0x162   : > { %v2355_v63 = vpop.f32.mrf.mxu3  ;;  %v3975_v60 = vshll.u32 %v3855_v52, 16  ;;  %v3332_v42 = vpack.c.b16 %v3303_v17, %v3302_v45  ;;  %v13914_v45 = vld [vmem:[#allocation2 + $0x40] sm:$0xf] }
 0x163   : > { %v13883_v18 = vadd.f32 %v2355_v63, %v2097_v59  ;;  %v3954_v24 = vsel %vm13301_vm8, %v3949_v28, %v13878_v6  ;;  %v2551_v59 = vrot.slane %v2549_v37, 5  ;;  %v3979_v6 = vshrl.u32 %v3855_v52, 16 }
 0x164   : > { %v1432_v16 = vpop.f32.mrf.mxu0  ;;  %3423 = vmatmul.bf16.gmra.mxu1 %v3331_v53  ;;  %v13908_v37 = vrot.slane %v3975_v60, 5  ;;  %v3193_v52 = vrot.slane %v13885_v56, 5 }
 0x165   : > { %v1666_v39 = vadd.f32 %v1665_v3, %v1432_v16  ;;  %3737 = vmatmul.bf16.gmra.mxu2 %v12588_v51  ;;  %v13903_v51 = vrot.slane %v2555_v62, 5  ;;  %v2877_v16 = vunpack.c.l.b16 %v2534_v35  ;;  %v2552_v22 = vor.u32 %v2551_v59, %v2548_v61  ;;  %v3856_v35 = vld [vmem:[#allocation2 + $0x44] sm:$0x1] }
 0x166   : > { %v3981_v62 = vrot.slane %v3979_v6, 4  ;;  %v3985_v60 = vshll.u32 %v3856_v35, 16  ;;  %v3195_v56 = vrot.slane %v3193_v52, 4 }
 0x167   : > { %2998 = vmatmul.bf16.gmra.mxu0 %v2906_v58  ;;  %4418 = vmatmul.bf16.gmra.mxu3 %v4326_v9  ;;  %v2436_v9 = vld [vmem:[#allocation2 + $0x38] sm:$0x1]  ;;  %v2562_v28 = vor.u32 %v2561_v7, %v13903_v51  ;;  %v2907_v11 = vpack.c.b16 %v2878_v21, %v2877_v16  ;;  %v2553_v26 = vrot.slane %v2552_v22, 4  ;;  %v2437_v16 = vld [vmem:[#allocation2 + $0x3c] sm:$0xf] }
 0x168   : > { %v2045_v44 = vpop.f32.mrf.mxu2  ;;  %v2565_v31 = vshll.u32 %v2436_v9, 16 }
 0x169   : > { %v2098_v53 = vadd.f32 %v2045_v44, %v1666_v39  ;;  %v1667_v55 = vpop.f32.mrf.mxu1  ;;  %v4297_v39 = vunpack.c.l.b16 %v3954_v24  ;;  %v3109_v44 = vld [vmem:[#allocation2 + $0x30] sm:$0xe]  ;;  %v2563_v61 = vrot.slane %v2562_v28, 4  ;;  %v2558_v17 = vsel %vm13301_vm8, %v2553_v26, %v13903_v51 }
 0x16a   : > { %v2358_v3 = vpop.f32.mrf.mxu3  ;;  %v12589_v24 = vld [vmem:[#allocation2 + $0x30] sm:$0xff]  ;;  %v2567_v59 = vrot.slane %v2565_v31, 5  ;;  %v11317_v8 = vrot.slane %v3109_v44, 9  ;;  %v3987_v31 = vrot.slane %v3985_v60, 5  ;;  %v2579_v51 = vshll.u32 %v13914_v45, 16 }
 0x16b   : > { %v13905_v58 = vadd.f32 %v2358_v3, %v2098_v53  ;;  %v4327_v53 = vpack.c.b16 %v4298_v50, %v4297_v39  ;;  %v3972_v3 = vor.u32 %v3971_v23, %v3968_v33  ;;  %v12624_v39 = vld [vmem:[#allocation9 + $0x228] sm:$0xff]  ;;  %v3857_v50 = vld [vmem:[#allocation2 + $0x48] sm:$0xf]  ;;  %v3858_v33 = vld [vmem:[#allocation2 + $0x4c] sm:$0xf] }
 0x16c   : > { %v1434_v63 = vpop.f32.mrf.mxu0  ;;  %v2568_v21 = vsel %vm13301_vm8, %v2563_v61, %v2567_v59  ;;  %v3194_v22 = vsel %vm13310_vm10, %v11317_v8, %v3193_v52  ;;  %4832 = vmatpush.bf16.msra.mxu0 %v12624_v39  ;;  %v4003_v26 = vshrl.u32 %v3858_v33, 16 }
 0x16d   : > { %v1668_v14 = vadd.f32 %v1667_v55, %v1434_v63  ;;  %v3982_v63 = vor.u32 %v3981_v62, %v13908_v37  ;;  %v3973_v28 = vrot.slane %v3972_v3, 4  ;;  %v3304_v3 = vunpack.c.l.b16 %v3194_v22 }
 0x170   : > { %v2047_v40 = vpop.f32.mrf.mxu2 }
 0x171   : > { %v2099_v46 = vadd.f32 %v2047_v40, %v1668_v14  ;;  %v1670_v47 = vpop.f32.mrf.mxu1  ;;  %v3196_v14 = vrot.slane %v2436_v9, 5  ;;  %v3983_v9 = vrot.slane %v3982_v63, 4  ;;  %v2570_v40 = vshrl.u32 %v2437_v16, 16 }
 0x172   : > { %v2360_v55 = vpop.f32.mrf.mxu3 }
 0x173   : > { %v13911_v57 = vadd.f32 %v2360_v55, %v2099_v46  ;;  %v3197_v62 = vsel %vm13310_vm10, %v3195_v56, %v3196_v14  ;;  %v2583_v46 = vshrl.u32 %v13914_v45, 16  ;;  %v3999_v55 = vshll.u32 %v3858_v33, 16  ;;  %v2439_v33 = vld [vmem:[#allocation2 + $0x44] sm:$0x1] }
 0x174   : > { %v1437_v7 = vpop.f32.mrf.mxu0  ;;  %3428 = vmatmul.bf16.gmra.mxu1 %v3332_v42  ;;  %v2573_v42 = vshll.u32 %v2437_v16, 16  ;;  %v3988_v8 = vsel %vm13301_vm8, %v3983_v9, %v3987_v31  ;;  %v3305_v60 = vunpack.c.l.b16 %v3197_v62  ;;  %v13934_v14 = vrot.slane %v2579_v51, 5 }
 0x175   : > { %v1671_v6 = vadd.f32 %v1670_v47, %v1437_v7  ;;  %3742 = vmatmul.bf16.gmra.mxu2 %v12589_v24  ;;  %v3990_v47 = vshrl.u32 %v3857_v50, 16  ;;  %v2879_v24 = vunpack.c.l.b16 %v2558_v17  ;;  %v3978_v7 = vsel %vm13301_vm8, %v3973_v28, %v13908_v37  ;;  %v3859_v28 = vld [vmem:[#allocation2 + $0x50] sm:$0x1] }
 0x176   : > { %v2575_v56 = vrot.slane %v2573_v42, 5  ;;  %v2585_v16 = vrot.slane %v2583_v46, 4  ;;  %v4299_v39 = vunpack.c.l.b16 %v3978_v7  ;;  %v13936_v22 = vrot.slane %v3999_v55, 5 }
 0x177   : > { %3003 = vmatmul.bf16.gmra.mxu0 %v2907_v11  ;;  %4423 = vmatmul.bf16.gmra.mxu3 %v4327_v53  ;;  %v3993_v11 = vshll.u32 %v3857_v50, 16  ;;  %v2880_v53 = vunpack.c.l.b16 %v2568_v21  ;;  %v3992_v17 = vrot.slane %v3990_v47, 4  ;;  %v4300_v50 = vunpack.c.l.b16 %v3988_v8 }
 0x178   : > { %v2050_v23 = vpop.f32.mrf.mxu2  ;;  %v3200_v37 = vrot.slane %v13914_v45, 5  ;;  %v3333_v62 = vpack.c.b16 %v3305_v60, %v3304_v3  ;;  %v2586_v46 = vor.u32 %v2585_v16, %v13934_v14  ;;  %v2589_v47 = vshll.u32 %v2439_v33, 16  ;;  %v13943_v16 = vld [vmem:[#allocation2 + $0x4c] sm:$0xf] }
 0x179   : > { %v2100_v44 = vadd.f32 %v2050_v23, %v1671_v6  ;;  %v1672_v35 = vpop.f32.mrf.mxu1  ;;  %v2572_v6 = vrot.slane %v2570_v40, 4  ;;  %v3995_v21 = vrot.slane %v3993_v11, 5  ;;  %v4005_v23 = vrot.slane %v4003_v26, 4 }
 0x17a   : > { %v2363_v52 = vpop.f32.mrf.mxu3  ;;  %v2908_v31 = vpack.c.b16 %v2880_v53, %v2879_v24  ;;  %v4009_v7 = vshll.u32 %v3859_v28, 16  ;;  %v3202_v36 = vrot.slane %v3200_v37, 4  ;;  %v3203_v24 = vrot.slane %v2439_v33, 5 }
 0x17b   : > { %v13927_v59 = vadd.f32 %v2363_v52, %v2100_v44  ;;  %v3110_v44 = vld [vmem:[#allocation2 + $0x3c] sm:$0xe]  ;;  %v2576_v40 = vor.u32 %v2575_v56, %v2572_v6  ;;  %v3996_v11 = vor.u32 %v3995_v21, %v3992_v17  ;;  %v4006_v26 = vor.u32 %v4005_v23, %v13936_v22  ;;  %v3860_v23 = vld [vmem:[#allocation2 + $0x54] sm:$0xf] }
 0x17c   : > { %v1439_v61 = vpop.f32.mrf.mxu0  ;;  %v11318_v55 = vrot.slane %v3110_v44, 9  ;;  %v2587_v60 = vrot.slane %v2586_v46, 4  ;;  %v2591_v6 = vrot.slane %v2589_v47, 5 }
 0x17d   : > { %v1673_v63 = vadd.f32 %v1672_v35, %v1439_v61  ;;  %v12590_v35 = vld [vmem:[#allocation2 + $0x3c] sm:$0xff]  ;;  %v4328_v61 = vpack.c.b16 %v4300_v50, %v4299_v39  ;;  %v2577_v3 = vrot.slane %v2576_v40, 4  ;;  %v3997_v56 = vrot.slane %v3996_v11, 4  ;;  %v3861_v40 = vld [vmem:[#allocation2 + $0x58] sm:$0xf] }
 0x17e   : > { %v3201_v17 = vsel %vm13310_vm10, %v11318_v55, %v3200_v37  ;;  %v4007_v21 = vrot.slane %v4006_v26, 4  ;;  %v4011_v39 = vrot.slane %v4009_v7, 5  ;;  %v3204_v50 = vsel %vm13310_vm10, %v3202_v36, %v3203_v24 }
 0x17f   : > { %v2582_v28 = vsel %vm13301_vm8, %v2577_v3, %v13934_v14  ;;  %v4002_v36 = vsel %vm13301_vm8, %v3997_v56, %v13936_v22  ;;  %v3307_v47 = vunpack.c.l.b16 %v3204_v50  ;;  %v4014_v11 = vshrl.u32 %v3860_v23, 16 }
 0x180   : > { %v2052_v9 = vpop.f32.mrf.mxu2  ;;  %v4012_v14 = vsel %vm13301_vm8, %v4007_v21, %v4011_v39  ;;  %v4023_v7 = vshll.u32 %v3861_v40, 16  ;;  %v4301_v56 = vunpack.c.l.b16 %v4002_v36  ;;  %v3111_v39 = vld [vmem:[#allocation2 + $0x48] sm:$0xe] }
 0x181   : > { %v2101_v42 = vadd.f32 %v2052_v9, %v1673_v63  ;;  %v1675_v51 = vpop.f32.mrf.mxu1  ;;  %v2440_v63 = vld [vmem:[#allocation2 + $0x48] sm:$0xf]  ;;  %v4016_v50 = vrot.slane %v4014_v11, 4 }
 0x182   : > { %v2365_v52 = vpop.f32.mrf.mxu3  ;;  %v2594_v33 = vshrl.u32 %v2440_v63, 16  ;;  %v2597_v9 = vshll.u32 %v2440_v63, 16 }
 0x183   : > { %v13941_v45 = vadd.f32 %v2365_v52, %v2101_v42  ;;  %v4017_v52 = vshll.u32 %v3860_v23, 16  ;;  %v13965_v23 = vrot.slane %v4023_v7, 5 }
 0x184   : > { %v1442_v8 = vpop.f32.mrf.mxu0  ;;  %3433 = vmatmul.bf16.gmra.mxu1 %v3333_v62  ;;  %v2603_v62 = vshll.u32 %v13943_v16, 16  ;;  %v2596_v26 = vrot.slane %v2594_v33, 4 }
 0x185   : > { %v1676_v53 = vadd.f32 %v1675_v51, %v1442_v8  ;;  %3747 = vmatmul.bf16.gmra.mxu2 %v12590_v35  ;;  %v2592_v51 = vsel %vm13301_vm8, %v2587_v60, %v2591_v6  ;;  %v3306_v35 = vunpack.c.l.b16 %v3201_v17  ;;  %v4027_v8 = vshrl.u32 %v3861_v40, 16  ;;  %v2442_v6 = vld [vmem:[#allocation2 + $0x50] sm:$0x1] }
 0x186   : > { %v13963_v3 = vrot.slane %v2603_v62, 5  ;;  %v2881_v60 = vunpack.c.l.b16 %v2582_v28  ;;  %v2882_v22 = vunpack.c.l.b16 %v2592_v51  ;;  %v4302_v17 = vunpack.c.l.b16 %v4012_v14  ;;  %v3862_v62 = vld [vmem:[#allocation2 + $0x5c] sm:$0x1]  ;;  %v12591_v28 = vld [vmem:[#allocation2 + $0x48] sm:$0xff] }
 0x187   : > { %3008 = vmatmul.bf16.gmra.mxu0 %v2908_v31  ;;  %4428 = vmatmul.bf16.gmra.mxu3 %v4328_v61  ;;  %v2607_v31 = vshrl.u32 %v13943_v16, 16  ;;  %v4019_v21 = vrot.slane %v4017_v52, 5  ;;  %v3334_v33 = vpack.c.b16 %v3307_v47, %v3306_v35  ;;  %v3207_v51 = vrot.slane %v13943_v16, 5 }
 0x188   : > { %v2055_v44 = vpop.f32.mrf.mxu2  ;;  %v2909_v14 = vpack.c.b16 %v2882_v22, %v2881_v60  ;;  %v4329_v11 = vpack.c.b16 %v4302_v17, %v4301_v56  ;;  %v11319_v52 = vrot.slane %v3111_v39, 9  ;;  %v4033_v47 = vshll.u32 %v3862_v62, 16  ;;  %v3863_v22 = vld [vmem:[#allocation2 + $0x60] sm:$0xf]  ;;  %v12623_v39 = vld [vmem:[#allocation9 + $0x220] sm:$0xff] }
 0x189   : > { %v2102_v42 = vadd.f32 %v2055_v44, %v1676_v53  ;;  %v1677_v37 = vpop.f32.mrf.mxu1  ;;  %v2599_v53 = vrot.slane %v2597_v9, 5  ;;  %v2609_v63 = vrot.slane %v2607_v31, 4  ;;  %v4029_v44 = vrot.slane %v4027_v8, 4  ;;  %4833 = vmatpush.bf16.msra.mxu0 %v12623_v39 }
 0x18a   : > { %v2368_v46 = vpop.f32.mrf.mxu3  ;;  %v2613_v9 = vshll.u32 %v2442_v6, 16  ;;  %v3209_v16 = vrot.slane %v3207_v51, 4  ;;  %v3210_v60 = vrot.slane %v2442_v6, 5  ;;  %v3208_v56 = vsel %vm13310_vm10, %v11319_v52, %v3207_v51 }
 0x18b   : > { %v13961_v55 = vadd.f32 %v2368_v46, %v2102_v42  ;;  %v2600_v46 = vor.u32 %v2599_v53, %v2596_v26  ;;  %v2610_v40 = vor.u32 %v2609_v63, %v13963_v3  ;;  %v4030_v35 = vor.u32 %v4029_v44, %v13965_v23  ;;  %v2443_v26 = vld [vmem:[#allocation2 + $0x54] sm:$0xf]  ;;  %v3864_v44 = vld [vmem:[#allocation2 + $0x64] sm:$0xf] }
 0x18c   : > { %v1444_v61 = vpop.f32.mrf.mxu0  ;;  %v2615_v63 = vrot.slane %v2613_v9, 5  ;;  %v4051_v52 = vshrl.u32 %v3864_v44, 16 }
 0x18d   : > { %15805 = vst [vmem:[#allocation21_spill] sm:$0xff] %v13961_v55  ;;  %v1678_v24 = vadd.f32 %v1677_v37, %v1444_v61  ;;  %v4020_v61 = vor.u32 %v4019_v21, %v4016_v50  ;;  %v2601_v53 = vrot.slane %v2600_v46, 4  ;;  %v2618_v50 = vshrl.u32 %v2443_v26, 16  ;;  %v14001_v55 = vld [vmem:[#allocation2 + $0x64] sm:$0xf] }
 0x18e   : > { %v2621_v21 = vshll.u32 %v2443_v26, 16  ;;  %v4035_v46 = vrot.slane %v4033_v47, 5 }
 0x18f   : > { %v4021_v17 = vrot.slane %v4020_v61, 4  ;;  %v2606_v6 = vsel %vm13301_vm8, %v2601_v53, %v13963_v3  ;;  %v2620_v3 = vrot.slane %v2618_v50, 4 }
 0x190   : > { %v2057_v42 = vpop.f32.mrf.mxu2  ;;  %v2623_v47 = vrot.slane %v2621_v21, 5 }
 0x191   : > { %v2103_v37 = vadd.f32 %v2057_v42, %v1678_v24  ;;  %v1680_v31 = vpop.f32.mrf.mxu1  ;;  %v2611_v24 = vrot.slane %v2610_v40, 4  ;;  %v13972_v42 = vld [vmem:[#allocation2 + $0x58] sm:$0xf] }
 0x192   : > { %v2370_v36 = vpop.f32.mrf.mxu3  ;;  %v2627_v40 = vshll.u32 %v13972_v42, 16  ;;  %v2631_v9 = vshrl.u32 %v13972_v42, 16 }
 0x193   : > { %v13969_v0 = vadd.f32 %v2370_v36, %v2103_v37  ;;  %v2616_v37 = vsel %vm13301_vm8, %v2611_v24, %v2615_v63 }
 0x194   : > { %v1447_v7 = vpop.f32.mrf.mxu0  ;;  %3438 = vmatmul.bf16.gmra.mxu1 %v3334_v33  ;;  %v4031_v33 = vrot.slane %v4030_v35, 4  ;;  %v4026_v35 = vsel %vm13301_vm8, %v4021_v17, %v13965_v23  ;;  %v13992_v24 = vrot.slane %v2627_v40, 5  ;;  %v2633_v63 = vrot.slane %v2631_v9, 4  ;;  %v3112_v9 = vld [vmem:[#allocation2 + $0x54] sm:$0xe] }
 0x195   : > { %15806 = vst [vmem:[#allocation22_spill] sm:$0xff] %v13969_v0  ;;  %v1681_v8 = vadd.f32 %v1680_v31, %v1447_v7  ;;  %3752 = vmatmul.bf16.gmra.mxu2 %v12591_v28  ;;  %v4038_v31 = vshrl.u32 %v3863_v22, 16  ;;  %v4041_v28 = vshll.u32 %v3863_v22, 16  ;;  %v3308_v7 = vunpack.c.l.b16 %v3208_v56  ;;  %v2445_v22 = vld [vmem:[#allocation2 + $0x5c] sm:$0x1] }
 0x196   : > { %v4053_v23 = vrot.slane %v4051_v52, 4  ;;  %v2884_v17 = vunpack.c.l.b16 %v2616_v37  ;;  %v4303_v50 = vunpack.c.l.b16 %v4026_v35 }
 0x197   : > { %3013 = vmatmul.bf16.gmra.mxu0 %v2909_v14  ;;  %4433 = vmatmul.bf16.gmra.mxu3 %v4329_v11  ;;  %v3211_v14 = vsel %vm13310_vm10, %v3209_v16, %v3210_v60  ;;  %v4047_v11 = vshll.u32 %v3864_v44, 16  ;;  %v4040_v39 = vrot.slane %v4038_v31, 4  ;;  %v4043_v56 = vrot.slane %v4041_v28, 5 }
 0x198   : > { %v2060_v62 = vpop.f32.mrf.mxu2  ;;  %v3309_v60 = vunpack.c.l.b16 %v3211_v14  ;;  %v2883_v44 = vunpack.c.l.b16 %v2606_v6  ;;  %v12592_v6 = vld [vmem:[#allocation2 + $0x54] sm:$0xff] }
 0x199   : > { %v2104_v51 = vadd.f32 %v2060_v62, %v1681_v8  ;;  %v1682_v36 = vpop.f32.mrf.mxu1  ;;  %v4036_v8 = vsel %vm13301_vm8, %v4031_v33, %v4035_v46  ;;  %v13994_v62 = vrot.slane %v4047_v11, 5  ;;  %v2637_v33 = vshll.u32 %v2445_v22, 16 }
 0x19a   : > { %v2373_v61 = vpop.f32.mrf.mxu3  ;;  %v4304_v21 = vunpack.c.l.b16 %v4036_v8  ;;  %v3335_v40 = vpack.c.b16 %v3309_v60, %v3308_v7  ;;  %v4044_v14 = vor.u32 %v4043_v56, %v4040_v39  ;;  %v2910_v35 = vpack.c.b16 %v2884_v17, %v2883_v44 }
 0x19b   : > { %v13988_v53 = vadd.f32 %v2373_v61, %v2104_v51  ;;  %v2624_v51 = vor.u32 %v2623_v47, %v2620_v3  ;;  %v3865_v61 = vld [vmem:[#allocation2 + $0x68] sm:$0x1]  ;;  %v4054_v11 = vor.u32 %v4053_v23, %v13994_v62  ;;  %v2446_v47 = vld [vmem:[#allocation2 + $0x60] sm:$0xf]  ;;  %v2639_v7 = vrot.slane %v2637_v33, 5 }
 0x19c   : > { %v1449_v26 = vpop.f32.mrf.mxu0  ;;  %v4057_v52 = vshll.u32 %v3865_v61, 16  ;;  %v11320_v60 = vrot.slane %v3112_v9, 9  ;;  %v3217_v39 = vrot.slane %v2445_v22, 5  ;;  %v4045_v56 = vrot.slane %v4044_v14, 4  ;;  %v3867_v14 = vld [vmem:[#allocation2 + $0x70] sm:$0xf] }
 0x19d   : > { %15807 = vst [vmem:[#allocation23_spill] sm:$0xff] %v13988_v53  ;;  %v1683_v16 = vadd.f32 %v1682_v36, %v1449_v26  ;;  %v2634_v53 = vor.u32 %v2633_v63, %v13992_v24  ;;  %v3214_v36 = vrot.slane %v13972_v42, 5  ;;  %v4330_v26 = vpack.c.b16 %v4304_v21, %v4303_v50 }
 0x19e   : > { %v2625_v3 = vrot.slane %v2624_v51, 4  ;;  %v4055_v23 = vrot.slane %v4054_v11, 4  ;;  %v4059_v61 = vrot.slane %v4057_v52, 5  ;;  %v2642_v44 = vshrl.u32 %v2446_v47, 16  ;;  %v3866_v51 = vld [vmem:[#allocation2 + $0x6c] sm:$0xf] }
 0x19f   : > { %v2635_v0 = vrot.slane %v2634_v53, 4  ;;  %v2645_v17 = vshll.u32 %v2446_v47, 16  ;;  %v2651_v50 = vshll.u32 %v14001_v55, 16  ;;  %v2655_v53 = vshrl.u32 %v14001_v55, 16  ;;  %v2448_v47 = vld [vmem:[#allocation2 + $0x68] sm:$0x1] }
 0x1a0   : > { %v2062_v46 = vpop.f32.mrf.mxu2  ;;  %v2630_v21 = vsel %vm13301_vm8, %v2625_v3, %v13992_v24  ;;  %v4050_v9 = vsel %vm13301_vm8, %v4045_v56, %v13994_v62  ;;  %v4060_v24 = vsel %vm13301_vm8, %v4055_v23, %v4059_v61  ;;  %v4075_v62 = vshrl.u32 %v3867_v14, 16 }
 0x1a1   : > { %v2105_v31 = vadd.f32 %v2062_v46, %v1683_v16  ;;  %v1685_v28 = vpop.f32.mrf.mxu1  ;;  %v3216_v16 = vrot.slane %v3214_v36, 4  ;;  %v2640_v22 = vsel %vm13301_vm8, %v2635_v0, %v2639_v7  ;;  %v3215_v46 = vsel %vm13310_vm10, %v11320_v60, %v3214_v36 }
 0x1a2   : > { %v2375_v37 = vpop.f32.mrf.mxu3  ;;  %v2647_v11 = vrot.slane %v2645_v17, 5  ;;  %v14019_v0 = vrot.slane %v2651_v50, 5  ;;  %v4062_v36 = vshrl.u32 %v3866_v51, 16  ;;  %v2885_v60 = vunpack.c.l.b16 %v2630_v21  ;;  %v3868_v21 = vld [vmem:[#allocation2 + $0x74] sm:$0x1] }
 0x1a3   : > { %v13999_v63 = vadd.f32 %v2375_v37, %v2105_v31  ;;  %v2657_v37 = vrot.slane %v2655_v53, 4  ;;  %v4305_v56 = vunpack.c.l.b16 %v4050_v9  ;;  %v4306_v23 = vunpack.c.l.b16 %v4060_v24  ;;  %v12593_v9 = vld [vmem:[#allocation2 + $0x60] sm:$0xff] }
 0x1a4   : > { %v1452_v8 = vpop.f32.mrf.mxu0  ;;  %3443 = vmatmul.bf16.gmra.mxu1 %v3335_v40  ;;  %v3218_v40 = vsel %vm13310_vm10, %v3216_v16, %v3217_v39  ;;  %v2886_v39 = vunpack.c.l.b16 %v2640_v22  ;;  %v2661_v17 = vshll.u32 %v2448_v47, 16  ;;  %v4064_v50 = vrot.slane %v4062_v36, 4 }
 0x1a5   : > { %15808 = vst [vmem:[#allocation24_spill] sm:$0xff] %v13999_v63  ;;  %v1686_v42 = vadd.f32 %v1685_v28, %v1452_v8  ;;  %3757 = vmatmul.bf16.gmra.mxu2 %v12592_v6  ;;  %v2644_v6 = vrot.slane %v2642_v44, 4  ;;  %v4071_v8 = vshll.u32 %v3867_v14, 16  ;;  %v3311_v16 = vunpack.c.l.b16 %v3218_v40 }
 0x1a6   : > { %v2658_v44 = vor.u32 %v2657_v37, %v14019_v0  ;;  %v3221_v14 = vrot.slane %v14001_v55, 5  ;;  %v2911_v22 = vpack.c.b16 %v2886_v39, %v2885_v60  ;;  %v2663_v37 = vrot.slane %v2661_v17, 5  ;;  %v2449_v60 = vld [vmem:[#allocation2 + $0x6c] sm:$0xf]  ;;  %v14030_v39 = vld [vmem:[#allocation2 + $0x70] sm:$0xf] }
 0x1a7   : > { %3018 = vmatmul.bf16.gmra.mxu0 %v2910_v35  ;;  %4438 = vmatmul.bf16.gmra.mxu3 %v4330_v26  ;;  %v4065_v35 = vshll.u32 %v3866_v51, 16  ;;  %v2648_v61 = vor.u32 %v2647_v11, %v2644_v6  ;;  %v14024_v51 = vrot.slane %v4071_v8, 5 }
 0x1a8   : > { %v2065_v33 = vpop.f32.mrf.mxu2  ;;  %v2659_v11 = vrot.slane %v2658_v44, 4  ;;  %v3223_v55 = vrot.slane %v3221_v14, 4 }
 0x1a9   : > { %v2106_v31 = vadd.f32 %v2065_v33, %v1686_v42  ;;  %v1687_v28 = vpop.f32.mrf.mxu1  ;;  %v3310_v42 = vunpack.c.l.b16 %v3215_v46  ;;  %v4067_v53 = vrot.slane %v4065_v35, 5  ;;  %v4077_v33 = vrot.slane %v4075_v62, 4 }
 0x1aa   : > { %v2378_v52 = vpop.f32.mrf.mxu3  ;;  %v2649_v6 = vrot.slane %v2648_v61, 4  ;;  %v3869_v61 = vld [vmem:[#allocation2 + $0x78] sm:$0xf] }
 0x1ab   : > { %v14021_v3 = vadd.f32 %v2378_v52, %v2106_v31  ;;  %v3336_v52 = vpack.c.b16 %v3311_v16, %v3310_v42  ;;  %v4068_v36 = vor.u32 %v4067_v53, %v4064_v50  ;;  %v4078_v62 = vor.u32 %v4077_v33, %v14024_v51  ;;  %v3870_v53 = vld [vmem:[#allocation2 + $0x7c] sm:$0xf] }
 0x1ac   : > { %v1454_v26 = vpop.f32.mrf.mxu0  ;;  %v4081_v42 = vshll.u32 %v3868_v21, 16  ;;  %v2669_v21 = vshll.u32 %v2449_v60, 16 }
 0x1ad   : > { %15809 = vst [vmem:[#allocation25_spill] sm:$0xff] %v14021_v3  ;;  %v1688_v7 = vadd.f32 %v1687_v28, %v1454_v26  ;;  %v3113_v3 = vld [vmem:[#allocation2 + $0x60] sm:$0xe]  ;;  %v4331_v28 = vpack.c.b16 %v4306_v23, %v4305_v56  ;;  %v2654_v56 = vsel %vm13301_vm8, %v2649_v6, %v14019_v0  ;;  %v4069_v17 = vrot.slane %v4068_v36, 4 }
 0x1ae   : > { %v11321_v8 = vrot.slane %v3113_v3, 9  ;;  %v2664_v3 = vsel %vm13301_vm8, %v2659_v11, %v2663_v37  ;;  %v12622_v23 = vld [vmem:[#allocation9 + $0x218] sm:$0xff]  ;;  %v4083_v50 = vrot.slane %v4081_v42, 5  ;;  %v2675_v0 = vshll.u32 %v14030_v39, 16 }
 0x1af   : > { %4834 = vmatpush.bf16.msra.mxu0 %v12622_v23  ;;  %v2888_v6 = vunpack.c.l.b16 %v2664_v3  ;;  %v4095_v11 = vshll.u32 %v3870_v53, 16  ;;  %v4099_v37 = vshrl.u32 %v3870_v53, 16 }
 0x1b0   : > { %v2067_v31 = vpop.f32.mrf.mxu2  ;;  %v3222_v44 = vsel %vm13310_vm10, %v11321_v8, %v3221_v14  ;;  %v14050_v23 = vrot.slane %v2675_v0, 5 }
 0x1b1   : > { %v2107_v46 = vadd.f32 %v2067_v31, %v1688_v7  ;;  %v1690_v40 = vpop.f32.mrf.mxu1  ;;  %v3224_v7 = vrot.slane %v2448_v47, 5  ;;  %v4079_v47 = vrot.slane %v4078_v62, 4  ;;  %v3312_v8 = vunpack.c.l.b16 %v3222_v44 }
 0x1b2   : > { %v2380_v24 = vpop.f32.mrf.mxu3  ;;  %v4074_v62 = vsel %vm13301_vm8, %v4069_v17, %v14024_v51  ;;  %v14052_v44 = vrot.slane %v4095_v11, 5  ;;  %v3228_v51 = vrot.slane %v14030_v39, 5  ;;  %v3871_v17 = vld [vmem:[#allocation2 + $0x80] sm:$0x1] }
 0x1b3   : > { %v14027_v26 = vadd.f32 %v2380_v24, %v2107_v46  ;;  %v3225_v31 = vsel %vm13310_vm10, %v3223_v55, %v3224_v7  ;;  %v2887_v24 = vunpack.c.l.b16 %v2654_v56  ;;  %v4084_v42 = vsel %vm13301_vm8, %v4079_v47, %v4083_v50 }
 0x1b4   : > { %v1457_v35 = vpop.f32.mrf.mxu0  ;;  %3448 = vmatmul.bf16.gmra.mxu1 %v3336_v52  ;;  %v2666_v52 = vshrl.u32 %v2449_v60, 16  ;;  %v3313_v55 = vunpack.c.l.b16 %v3225_v31  ;;  %v2671_v60 = vrot.slane %v2669_v21, 5  ;;  %v4307_v53 = vunpack.c.l.b16 %v4074_v62 }
 0x1b5   : > { %15810 = vst [vmem:[#allocation26_spill] sm:$0xff] %v14027_v26  ;;  %v1691_v16 = vadd.f32 %v1690_v40, %v1457_v35  ;;  %3762 = vmatmul.bf16.gmra.mxu2 %v12593_v9  ;;  %v4086_v9 = vshrl.u32 %v3869_v61, 16  ;;  %v2912_v50 = vpack.c.b16 %v2888_v6, %v2887_v24  ;;  %v3230_v63 = vrot.slane %v3228_v51, 4 }
 0x1b6   : > { %v2668_v7 = vrot.slane %v2666_v52, 4  ;;  %v3337_v31 = vpack.c.b16 %v3313_v55, %v3312_v8 }
 0x1b7   : > { %3023 = vmatmul.bf16.gmra.mxu0 %v2911_v22  ;;  %4443 = vmatmul.bf16.gmra.mxu3 %v4331_v28  ;;  %v2679_v22 = vshrl.u32 %v14030_v39, 16  ;;  %v4089_v28 = vshll.u32 %v3869_v61, 16  ;;  %v4088_v3 = vrot.slane %v4086_v9, 4 }
 0x1b8   : > { %v2070_v33 = vpop.f32.mrf.mxu2  ;;  %v2672_v52 = vor.u32 %v2671_v60, %v2668_v7 }
 0x1b9   : > { %v2108_v46 = vadd.f32 %v2070_v33, %v1691_v16  ;;  %v1692_v40 = vpop.f32.mrf.mxu1  ;;  %v2681_v56 = vrot.slane %v2679_v22, 4  ;;  %v4091_v61 = vrot.slane %v4089_v28, 5  ;;  %v4308_v33 = vunpack.c.l.b16 %v4084_v42 }
 0x1ba   : > { %v2383_v14 = vpop.f32.mrf.mxu3  ;;  %v4105_v42 = vshll.u32 %v3871_v17, 16  ;;  %v2673_v8 = vrot.slane %v2672_v52, 4 }
 0x1bb   : > { %v14043_v35 = vadd.f32 %v2383_v14, %v2108_v46  ;;  %v2451_v46 = vld [vmem:[#allocation2 + $0x74] sm:$0x1]  ;;  %v4101_v14 = vrot.slane %v4099_v37, 4  ;;  %v2682_v22 = vor.u32 %v2681_v56, %v14050_v23  ;;  %v4092_v28 = vor.u32 %v4091_v61, %v4088_v3  ;;  %v14059_v56 = vld [vmem:[#allocation2 + $0x7c] sm:$0xf] }
 0x1bc   : > { %v1459_v36 = vpop.f32.mrf.mxu0  ;;  %v2685_v9 = vshll.u32 %v2451_v46, 16  ;;  %v4332_v62 = vpack.c.b16 %v4308_v33, %v4307_v53  ;;  %v3231_v24 = vrot.slane %v2451_v46, 5  ;;  %v4107_v61 = vrot.slane %v4105_v42, 5  ;;  %v3872_v33 = vld [vmem:[#allocation2 + $0x84] sm:$0xf] }
 0x1bd   : > { %15811 = vst [vmem:[#allocation27_spill] sm:$0xff] %v14043_v35  ;;  %v1693_v16 = vadd.f32 %v1692_v40, %v1459_v36  ;;  %v3114_v35 = vld [vmem:[#allocation2 + $0x6c] sm:$0xe]  ;;  %v4102_v37 = vor.u32 %v4101_v14, %v14052_v44  ;;  %v2683_v55 = vrot.slane %v2682_v22, 4  ;;  %v4093_v60 = vrot.slane %v4092_v28, 4 }
 0x1be   : > { %v12594_v40 = vld [vmem:[#allocation2 + $0x6c] sm:$0xff]  ;;  %v11322_v11 = vrot.slane %v3114_v35, 9  ;;  %v2687_v7 = vrot.slane %v2685_v9, 5  ;;  %v3232_v53 = vsel %vm13310_vm10, %v3230_v63, %v3231_v24  ;;  %v2678_v14 = vsel %vm13301_vm8, %v2673_v8, %v14050_v23 }
 0x1bf   : > { %v4103_v3 = vrot.slane %v4102_v37, 4  ;;  %v4098_v63 = vsel %vm13301_vm8, %v4093_v60, %v14052_v44  ;;  %v3315_v22 = vunpack.c.l.b16 %v3232_v53  ;;  %v4110_v9 = vshrl.u32 %v3872_v33, 16 }
 0x1c0   : > { %v2072_v47 = vpop.f32.mrf.mxu2  ;;  %v3229_v35 = vsel %vm13310_vm10, %v11322_v11, %v3228_v51  ;;  %v4113_v28 = vshll.u32 %v3872_v33, 16  ;;  %v4309_v60 = vunpack.c.l.b16 %v4098_v63 }
 0x1c1   : > { %v2109_v21 = vadd.f32 %v2072_v47, %v1693_v16  ;;  %v1695_v0 = vpop.f32.mrf.mxu1  ;;  %v2452_v16 = vld [vmem:[#allocation2 + $0x78] sm:$0xf]  ;;  %v2699_v47 = vshll.u32 %v14059_v56, 16  ;;  %v4108_v23 = vsel %vm13301_vm8, %v4103_v3, %v4107_v61  ;;  %v4112_v53 = vrot.slane %v4110_v9, 4 }
 0x1c2   : > { %v2385_v36 = vpop.f32.mrf.mxu3  ;;  %v2693_v17 = vshll.u32 %v2452_v16, 16  ;;  %v4115_v3 = vrot.slane %v4113_v28, 5  ;;  %v3115_v61 = vld [vmem:[#allocation2 + $0x78] sm:$0xe] }
 0x1c3   : > { %v14057_v39 = vadd.f32 %v2385_v36, %v2109_v21  ;;  %v2688_v21 = vsel %vm13301_vm8, %v2683_v55, %v2687_v7  ;;  %v14079_v8 = vrot.slane %v2699_v47, 5  ;;  %v2889_v55 = vunpack.c.l.b16 %v2678_v14  ;;  %v2454_v7 = vld [vmem:[#allocation2 + $0x80] sm:$0x1]  ;;  %v3874_v47 = vld [vmem:[#allocation2 + $0x8c] sm:$0x1]  ;;  %v12595_v14 = vld [vmem:[#allocation2 + $0x78] sm:$0xff] }
 0x1c4   : > { %v1462_v26 = vpop.f32.mrf.mxu0  ;;  %3453 = vmatmul.bf16.gmra.mxu1 %v3337_v31  ;;  %v3873_v31 = vld [vmem:[#allocation2 + $0x88] sm:$0xf]  ;;  %v2890_v44 = vunpack.c.l.b16 %v2688_v21  ;;  %v3235_v21 = vrot.slane %v14059_v56, 5  ;;  %v11323_v28 = vrot.slane %v3115_v61, 9 }
 0x1c5   : > { %15812 = vst [vmem:[#allocation28_spill] sm:$0xff] %v14057_v39  ;;  %v1696_v6 = vadd.f32 %v1695_v0, %v1462_v26  ;;  %3767 = vmatmul.bf16.gmra.mxu2 %v12594_v40  ;;  %v2690_v26 = vshrl.u32 %v2452_v16, 16  ;;  %v3314_v0 = vunpack.c.l.b16 %v3229_v35  ;;  %v4119_v37 = vshll.u32 %v3873_v31, 16 }
 0x1c6   : > { %v4123_v42 = vshrl.u32 %v3873_v31, 16  ;;  %v4310_v35 = vunpack.c.l.b16 %v4108_v23  ;;  %v2913_v23 = vpack.c.b16 %v2890_v44, %v2889_v55  ;;  %v3238_v55 = vrot.slane %v2454_v7, 5 }
 0x1c7   : > { %3028 = vmatmul.bf16.gmra.mxu0 %v2912_v50  ;;  %4448 = vmatmul.bf16.gmra.mxu3 %v4332_v62  ;;  %v2703_v50 = vshrl.u32 %v14059_v56, 16  ;;  %v2692_v11 = vrot.slane %v2690_v26, 4  ;;  %v14081_v33 = vrot.slane %v4119_v37, 5  ;;  %v3338_v26 = vpack.c.b16 %v3315_v22, %v3314_v0  ;;  %v2455_v37 = vld [vmem:[#allocation2 + $0x84] sm:$0xf] }
 0x1c8   : > { %v2075_v46 = vpop.f32.mrf.mxu2  ;;  %v4333_v9 = vpack.c.b16 %v4310_v35, %v4309_v60  ;;  %v4129_v22 = vshll.u32 %v3874_v47, 16  ;;  %v3237_v56 = vrot.slane %v3235_v21, 4  ;;  %v2714_v44 = vshrl.u32 %v2455_v37, 16  ;;  %v3875_v35 = vld [vmem:[#allocation2 + $0x90] sm:$0xf] }
 0x1c9   : > { %v2110_v52 = vadd.f32 %v2075_v46, %v1696_v6  ;;  %v1697_v51 = vpop.f32.mrf.mxu1  ;;  %v2695_v6 = vrot.slane %v2693_v17, 5  ;;  %v2705_v16 = vrot.slane %v2703_v50, 4  ;;  %v4125_v46 = vrot.slane %v4123_v42, 4 }
 0x1ca   : > { %v2388_v40 = vpop.f32.mrf.mxu3  ;;  %v2709_v17 = vshll.u32 %v2454_v7, 16  ;;  %v2717_v60 = vshll.u32 %v2455_v37, 16 }
 0x1cb   : > { %v14077_v62 = vadd.f32 %v2388_v40, %v2110_v52  ;;  %v2696_v40 = vor.u32 %v2695_v6, %v2692_v11  ;;  %v2706_v31 = vor.u32 %v2705_v16, %v14079_v8  ;;  %v4126_v0 = vor.u32 %v4125_v46, %v14081_v33 }
 0x1cc   : > { %v1464_v36 = vpop.f32.mrf.mxu0  ;;  %v2711_v16 = vrot.slane %v2709_v17, 5  ;;  %v3876_v17 = vld [vmem:[#allocation2 + $0x94] sm:$0xf] }
 0x1cd   : > { %v1698_v24 = vadd.f32 %v1697_v51, %v1464_v36  ;;  %v4116_v36 = vor.u32 %v4115_v3, %v4112_v53  ;;  %v2707_v6 = vrot.slane %v2706_v31, 4  ;;  %v3236_v3 = vsel %vm13310_vm10, %v11323_v28, %v3235_v21 }
 0x1ce   : > { %v4127_v46 = vrot.slane %v4126_v0, 4  ;;  %v2719_v28 = vrot.slane %v2717_v60, 5  ;;  %v3316_v37 = vunpack.c.l.b16 %v3236_v3  ;;  %v4147_v0 = vshrl.u32 %v3876_v17, 16 }
 0x1cf   : > { %v4117_v61 = vrot.slane %v4116_v36, 4 }
 0x1d0   : > { %v2077_v52 = vpop.f32.mrf.mxu2 }
 0x1d1   : > { %v2111_v51 = vadd.f32 %v2077_v52, %v1698_v24  ;;  %v3419_v50 = vpop.f32.mrf.mxu1  ;;  %v2697_v24 = vrot.slane %v2696_v40, 4  ;;  %v14089_v52 = vld [vmem:[#allocation2 + $0x88] sm:$0xf] }
 0x1d2   : > { %v2390_v63 = vpop.f32.mrf.mxu3  ;;  %v2723_v40 = vshll.u32 %v14089_v52, 16  ;;  %v2727_v31 = vshrl.u32 %v14089_v52, 16 }
 0x1d3   : > { %v14085_v39 = vadd.f32 %v2390_v63, %v2111_v51  ;;  %v2702_v7 = vsel %vm13301_vm8, %v2697_v24, %v14079_v8  ;;  %v2712_v51 = vsel %vm13301_vm8, %v2707_v6, %v2711_v16  ;;  %v4143_v8 = vshll.u32 %v3876_v17, 16 }
 0x1d4   : > { %v2994_v42 = vpop.f32.mrf.mxu0  ;;  %3458 = vmatmul.bf16.gmra.mxu1 %v3338_v26  ;;  %v4131_v26 = vrot.slane %v4129_v22, 5  ;;  %v2725_v6 = vrot.slane %v2723_v40, 5  ;;  %v2729_v16 = vrot.slane %v2727_v31, 4  ;;  %v2892_v3 = vunpack.c.l.b16 %v2712_v51  ;;  %v3116_v31 = vld [vmem:[#allocation2 + $0x84] sm:$0xe] }
 0x1d5   : > { %15813 = vst [vmem:[#allocation29_spill] sm:$0xff] %v14085_v39  ;;  %v3074_v11 = vadd.f32 %v2994_v42, %v13635_v2  ;;  %3772 = vmatmul.bf16.gmra.mxu2 %v12595_v14  ;;  %v12621_v2 = vld [vmem:[#allocation9 + $0x210] sm:$0xff]  ;;  %v4137_v14 = vshll.u32 %v3875_v35, 16  ;;  %v4122_v42 = vsel %vm13301_vm8, %v4117_v61, %v14081_v33 }
 0x1d6   : > { %4835 = vmatpush.bf16.msra.mxu0 %v12621_v2  ;;  %v4132_v24 = vsel %vm13301_vm8, %v4127_v46, %v4131_v26  ;;  %v4311_v2 = vunpack.c.l.b16 %v4122_v42  ;;  %v3877_v46 = vld [vmem:[#allocation2 + $0x98] sm:$0x1] }
 0x1d7   : > { %v3499_v53 = vadd.f32 %v3419_v50, %v3074_v11  ;;  %3033 = vmatmul.bf16.gmra.mxu0 %v2913_v23  ;;  %4453 = vmatmul.bf16.gmra.mxu3 %v4333_v9  ;;  %v4134_v50 = vshrl.u32 %v3875_v35, 16  ;;  %v3239_v23 = vsel %vm13310_vm10, %v3237_v56, %v3238_v55  ;;  %v2716_v9 = vrot.slane %v2714_v44, 4  ;;  %v2457_v44 = vld [vmem:[#allocation2 + $0x8c] sm:$0x1] }
 0x1d8   : > { %v3733_v47 = vpop.f32.mrf.mxu2  ;;  %v3317_v55 = vunpack.c.l.b16 %v3239_v23  ;;  %v4139_v35 = vrot.slane %v4137_v14, 5  ;;  %v4312_v17 = vunpack.c.l.b16 %v4132_v24  ;;  %v2733_v39 = vshll.u32 %v2457_v44, 16 }
 0x1d9   : > { %v3813_v21 = vadd.f32 %v3733_v47, %v3499_v53  ;;  %v3421_v63 = vpop.f32.mrf.mxu1  ;;  %v4136_v60 = vrot.slane %v4134_v50, 4  ;;  %v2891_v53 = vunpack.c.l.b16 %v2702_v7  ;;  %v2720_v33 = vor.u32 %v2719_v28, %v2716_v9  ;;  %v12596_v7 = vld [vmem:[#allocation2 + $0x84] sm:$0xff] }
 0x1da   : > { %v4414_v36 = vpop.f32.mrf.mxu3  ;;  %v14110_v47 = vrot.slane %v4143_v8, 5  ;;  %v3339_v40 = vpack.c.b16 %v3317_v55, %v3316_v37  ;;  %v4153_v8 = vshll.u32 %v3877_v46, 16  ;;  %v11324_v37 = vrot.slane %v3116_v31, 9  ;;  %v3879_v46 = vld [vmem:[#allocation2 + $0xa0] sm:$0xf] }
 0x1db   : > { %v14105_v11 = vadd.f32 %v4414_v36, %v3813_v21  ;;  %v4149_v21 = vrot.slane %v4147_v0, 4  ;;  %v2730_v36 = vor.u32 %v2729_v16, %v2725_v6  ;;  %v4140_v23 = vor.u32 %v4139_v35, %v4136_v60 }
 0x1dc   : > { %v2996_v22 = vpop.f32.mrf.mxu0  ;;  %v2721_v51 = vrot.slane %v2720_v33, 4  ;;  %v2914_v9 = vpack.c.b16 %v2892_v3, %v2891_v53  ;;  %v2735_v16 = vrot.slane %v2733_v39, 5  ;;  %v3245_v55 = vrot.slane %v2457_v44, 5  ;;  %v2458_v33 = vld [vmem:[#allocation2 + $0x90] sm:$0xf] }
 0x1dd   : > { %15814 = vst [vmem:[#allocation30_spill] sm:$0xff] %v14105_v11  ;;  %v3075_v56 = vadd.f32 %v2996_v22, %v13645_v34  ;;  %v3242_v34 = vrot.slane %v14089_v52, 5  ;;  %v4150_v28 = vor.u32 %v4149_v21, %v14110_v47  ;;  %v2731_v24 = vrot.slane %v2730_v36, 4 }
 0x1de   : > { %v4141_v60 = vrot.slane %v4140_v23, 4  ;;  %v2726_v35 = vsel %vm13301_vm8, %v2721_v51, %v2725_v6  ;;  %v2738_v31 = vshrl.u32 %v2458_v33, 16  ;;  %v2741_v23 = vshll.u32 %v2458_v33, 16 }
 0x1df   : > { %v3500_v61 = vadd.f32 %v3421_v63, %v3075_v56  ;;  %v4334_v63 = vpack.c.b16 %v4312_v17, %v4311_v2  ;;  %v3244_v52 = vrot.slane %v3242_v34, 4  ;;  %v4151_v3 = vrot.slane %v4150_v28, 4 }
 0x1e0   : > { %v3735_v26 = vpop.f32.mrf.mxu2  ;;  %v4155_v2 = vrot.slane %v4153_v8, 5  ;;  %v2736_v39 = vsel %vm13301_vm8, %v2731_v24, %v2735_v16  ;;  %v14123_v21 = vunpack.c.l.b16 %v2726_v35  ;;  %v3243_v44 = vsel %vm13310_vm10, %v11324_v37, %v3242_v34 }
 0x1e1   : > { %v3814_v50 = vadd.f32 %v3735_v26, %v3500_v61  ;;  %v3424_v14 = vpop.f32.mrf.mxu1  ;;  %v14119_v61 = vld [vmem:[#allocation2 + $0x94] sm:$0xf]  ;;  %v3246_v6 = vsel %vm13310_vm10, %v3244_v52, %v3245_v55  ;;  %v4146_v36 = vsel %vm13301_vm8, %v4141_v60, %v14110_v47  ;;  %v2894_v28 = vunpack.c.l.b16 %v2736_v39 }
 0x1e2   : > { %v4416_v42 = vpop.f32.mrf.mxu3  ;;  %v2751_v34 = vshrl.u32 %v14119_v61, 16  ;;  %v4167_v47 = vshll.u32 %v3879_v46, 16  ;;  %v4171_v8 = vshrl.u32 %v3879_v46, 16  ;;  %v3318_v24 = vunpack.c.l.b16 %v3243_v44  ;;  %v3880_v44 = vld [vmem:[#allocation2 + $0xa4] sm:$0x1] }
 0x1e3   : > { %v14114_v22 = vadd.f32 %v4416_v42, %v3814_v50  ;;  %v2747_v50 = vshll.u32 %v14119_v61, 16  ;;  %v3319_v16 = vunpack.c.l.b16 %v3246_v6  ;;  %v4313_v37 = vunpack.c.l.b16 %v4146_v36 }
 0x1e4   : > { %v2999_v0 = vpop.f32.mrf.mxu0  ;;  %3463 = vmatmul.bf16.gmra.mxu1 %v3339_v40  ;;  %v2740_v52 = vrot.slane %v2738_v31, 4  ;;  %v2743_v55 = vrot.slane %v2741_v23, 5  ;;  %v4173_v39 = vrot.slane %v4171_v8, 4  ;;  %v2915_v31 = vpack.c.b16 %v2894_v28, %v14123_v21  ;;  %v12597_v23 = vld [vmem:[#allocation2 + $0x90] sm:$0xff] }
 0x1e5   : > { %15815 = vst [vmem:[#allocation31_spill] sm:$0xff] %v14114_v22  ;;  %v3076_v56 = vadd.f32 %v2999_v0, %v13668_v13  ;;  %3777 = vmatmul.bf16.gmra.mxu2 %v12596_v7  ;;  %v3878_v13 = vld [vmem:[#allocation2 + $0x9c] sm:$0xf]  ;;  %v4156_v7 = vsel %vm13301_vm8, %v4151_v3, %v4155_v2  ;;  %v14139_v60 = vrot.slane %v2747_v50, 5  ;;  %v2753_v3 = vrot.slane %v2751_v34, 4 }
 0x1e6   : > { %v4158_v51 = vshrl.u32 %v3878_v13, 16  ;;  %v4161_v42 = vshll.u32 %v3878_v13, 16  ;;  %v3117_v13 = vld [vmem:[#allocation2 + $0x90] sm:$0xe]  ;;  %v2744_v50 = vor.u32 %v2743_v55, %v2740_v52 }
 0x1e7   : > { %v3501_v53 = vadd.f32 %v3424_v14, %v3076_v56  ;;  %3038 = vmatmul.bf16.gmra.mxu0 %v2914_v9  ;;  %4458 = vmatmul.bf16.gmra.mxu3 %v4334_v63  ;;  %v4314_v56 = vunpack.c.l.b16 %v4156_v7 }
 0x1e8   : > { %v3738_v17 = vpop.f32.mrf.mxu2  ;;  %v4160_v2 = vrot.slane %v4158_v51, 4  ;;  %v4163_v33 = vrot.slane %v4161_v42, 5  ;;  %v2754_v51 = vor.u32 %v2753_v3, %v14139_v60  ;;  %v11325_v42 = vrot.slane %v3117_v13, 9 }
 0x1e9   : > { %v3815_v26 = vadd.f32 %v3738_v17, %v3501_v53  ;;  %v3426_v40 = vpop.f32.mrf.mxu1  ;;  %v2460_v53 = vld [vmem:[#allocation2 + $0x98] sm:$0x1]  ;;  %v14141_v17 = vrot.slane %v4167_v47, 5  ;;  %v4335_v34 = vpack.c.b16 %v4314_v56, %v4313_v37  ;;  %v2745_v37 = vrot.slane %v2744_v50, 4 }
 0x1ea   : > { %v4419_v14 = vpop.f32.mrf.mxu3  ;;  %v3252_v28 = vrot.slane %v2460_v53, 5 }
 0x1eb   : > { %v14136_v63 = vadd.f32 %v4419_v14, %v3815_v26  ;;  %v3340_v26 = vpack.c.b16 %v3319_v16, %v3318_v24  ;;  %v2461_v14 = vld [vmem:[#allocation2 + $0x9c] sm:$0xf]  ;;  %v14150_v16 = vld [vmem:[#allocation2 + $0xa0] sm:$0xf] }
 0x1ec   : > { %v3001_v9 = vpop.f32.mrf.mxu0  ;;  %v2762_v52 = vshrl.u32 %v2461_v14, 16  ;;  %v2765_v55 = vshll.u32 %v2461_v14, 16 }
 0x1ed   : > { %15816 = vst [vmem:[#allocation32_spill] sm:$0xff] %v14136_v63  ;;  %v3077_v0 = vadd.f32 %v3001_v9, %v13680_v54  ;;  %v3249_v54 = vrot.slane %v14119_v61, 5  ;;  %v4164_v9 = vor.u32 %v4163_v33, %v4160_v2  ;;  %v4174_v61 = vor.u32 %v4173_v39, %v14141_v17  ;;  %v3882_v39 = vld [vmem:[#allocation2 + $0xac] sm:$0xf]  ;;  %v12934_v63 = vld [vmem:[#allocation2 + $0x40] sm:$0xf] }
 0x1ee   : > { %v2755_v2 = vrot.slane %v2754_v51, 4  ;;  %v4613_v22 = vrot.slane %v12934_v63, 5 }
 0x1ef   : > { %v3502_v35 = vadd.f32 %v3426_v40, %v3077_v0  ;;  %v2757_v40 = vshll.u32 %v2460_v53, 16  ;;  %v4177_v0 = vshll.u32 %v3880_v44, 16  ;;  %v3251_v21 = vrot.slane %v3249_v54, 4 }
 0x1f0   : > { %v3740_v46 = vpop.f32.mrf.mxu2  ;;  %v3250_v33 = vsel %vm13310_vm10, %v11325_v42, %v3249_v54  ;;  %v4165_v13 = vrot.slane %v4164_v9, 4  ;;  %v2775_v44 = vshrl.u32 %v14150_v16, 16  ;;  %v2767_v54 = vrot.slane %v2765_v55, 5 }
 0x1f1   : > { %v3816_v6 = vadd.f32 %v3740_v46, %v3502_v35  ;;  %v3429_v36 = vpop.f32.mrf.mxu1  ;;  %v2759_v56 = vrot.slane %v2757_v40, 5  ;;  %v3881_v35 = vld [vmem:[#allocation2 + $0xa8] sm:$0xf]  ;;  %v4175_v46 = vrot.slane %v4174_v61, 4  ;;  %v4179_v53 = vrot.slane %v4177_v0, 5 }
 0x1f2   : > { %v4421_v7 = vpop.f32.mrf.mxu3  ;;  %v4185_v50 = vshll.u32 %v3881_v35, 16  ;;  %v2750_v42 = vsel %vm13301_vm8, %v2745_v37, %v14139_v60  ;;  %v4170_v61 = vsel %vm13301_vm8, %v4165_v13, %v14141_v17  ;;  %v2463_v60 = vld [vmem:[#allocation2 + $0xa4] sm:$0x1] }
 0x1f3   : > { %v14146_v8 = vadd.f32 %v4421_v7, %v3816_v6  ;;  %v4191_v7 = vshll.u32 %v3882_v39, 16  ;;  %v2760_v9 = vsel %vm13301_vm8, %v2755_v2, %v2759_v56  ;;  %v2895_v56 = vunpack.c.l.b16 %v2750_v42  ;;  %v12598_v42 = vld [vmem:[#allocation2 + $0x9c] sm:$0xff] }
 0x1f4   : > { %v3004_v47 = vpop.f32.mrf.mxu0  ;;  %3468 = vmatmul.bf16.gmra.mxu1 %v3340_v26  ;;  %v2771_v26 = vshll.u32 %v14150_v16, 16  ;;  %v2896_v13 = vunpack.c.l.b16 %v2760_v9 }
 0x1f5   : > { %15817 = vst [vmem:[#allocation33_spill] sm:$0xff] %v14146_v8  ;;  %v3078_v24 = vadd.f32 %v3004_v47, %v13700_v30  ;;  %3782 = vmatmul.bf16.gmra.mxu2 %v12597_v23  ;;  %v12620_v30 = vld [vmem:[#allocation9 + $0x208] sm:$0xff]  ;;  %v3253_v23 = vsel %vm13310_vm10, %v3251_v21, %v3252_v28  ;;  %v3320_v47 = vunpack.c.l.b16 %v3250_v33  ;;  %v4180_v21 = vsel %vm13301_vm8, %v4175_v46, %v4179_v53 }
 0x1f6   : > { %4836 = vmatpush.bf16.msra.mxu0 %v12620_v30  ;;  %v2773_v28 = vrot.slane %v2771_v26, 5  ;;  %v14171_v33 = vrot.slane %v4191_v7, 5  ;;  %v3883_v46 = vld [vmem:[#allocation2 + $0xb0] sm:$0x1] }
 0x1f7   : > { %v3503_v3 = vadd.f32 %v3429_v36, %v3078_v24  ;;  %3043 = vmatmul.bf16.gmra.mxu0 %v2915_v31  ;;  %4463 = vmatmul.bf16.gmra.mxu3 %v4335_v34  ;;  %v2764_v36 = vrot.slane %v2762_v52, 4  ;;  %v4182_v31 = vshrl.u32 %v3881_v35, 16  ;;  %v4195_v34 = vshrl.u32 %v3882_v39, 16 }
 0x1f8   : > { %v3743_v6 = vpop.f32.mrf.mxu2  ;;  %v2777_v52 = vrot.slane %v2775_v44, 4  ;;  %v3321_v35 = vunpack.c.l.b16 %v3253_v23  ;;  %v4315_v39 = vunpack.c.l.b16 %v4170_v61  ;;  %v3118_v44 = vld [vmem:[#allocation2 + $0x9c] sm:$0xe]  ;;  %v4201_v9 = vshll.u32 %v3883_v46, 16 }
 0x1f9   : > { %v3817_v40 = vadd.f32 %v3743_v6, %v3503_v3  ;;  %v3431_v14 = vpop.f32.mrf.mxu1  ;;  %v4184_v37 = vrot.slane %v4182_v31, 4  ;;  %v4187_v3 = vrot.slane %v4185_v50, 5  ;;  %v2768_v2 = vor.u32 %v2767_v54, %v2764_v36 }
 0x1fa   : > { %v4424_v51 = vpop.f32.mrf.mxu3  ;;  %v4197_v30 = vrot.slane %v4195_v34, 4  ;;  %v4316_v6 = vunpack.c.l.b16 %v4180_v21  ;;  %v3341_v26 = vpack.c.b16 %v3321_v35, %v3320_v47  ;;  %v11326_v47 = vrot.slane %v3118_v44, 9  ;;  %v3885_v44 = vld [vmem:[#allocation2 + $0xb8] sm:$0xf] }
 0x1fb   : > { %v14166_v24 = vadd.f32 %v4424_v51, %v3817_v40  ;;  %v2778_v40 = vor.u32 %v2777_v52, %v2773_v28  ;;  %v2781_v51 = vshll.u32 %v2463_v60, 16  ;;  %v4188_v23 = vor.u32 %v4187_v3, %v4184_v37 }
 0x1fc   : > { %v3006_v0 = vpop.f32.mrf.mxu0  ;;  %v2769_v36 = vrot.slane %v2768_v2, 4  ;;  %v4198_v54 = vor.u32 %v4197_v30, %v14171_v33  ;;  %v4336_v34 = vpack.c.b16 %v4316_v6, %v4315_v39  ;;  %v3259_v37 = vrot.slane %v2463_v60, 5  ;;  %v14180_v39 = vld [vmem:[#allocation2 + $0xac] sm:$0xf] }
 0x1fd   : > { %15818 = vst [vmem:[#allocation34_spill] sm:$0xff] %v14166_v24  ;;  %v3079_v55 = vadd.f32 %v3006_v0, %v13710_v10  ;;  %v3256_v10 = vrot.slane %v14150_v16, 5  ;;  %v2779_v21 = vrot.slane %v2778_v40, 4  ;;  %v2783_v52 = vrot.slane %v2781_v51, 5  ;;  %v3884_v40 = vld [vmem:[#allocation2 + $0xb4] sm:$0xf] }
 0x1fe   : > { %v4189_v3 = vrot.slane %v4188_v23, 4  ;;  %v2774_v2 = vsel %vm13301_vm8, %v2769_v36, %v2773_v28 }
 0x1ff   : > { %v3504_v17 = vadd.f32 %v3431_v14, %v3079_v55  ;;  %v2916_v14 = vpack.c.b16 %v2896_v13, %v2895_v56  ;;  %v360_v55 = vld [vmem:[#allocation2 + $0xc8] sm:$0x1]  ;;  %v3258_v35 = vrot.slane %v3256_v10, 4  ;;  %v4199_v56 = vrot.slane %v4198_v54, 4 }
 0x200   : > { %v3745_v53 = vpop.f32.mrf.mxu2  ;;  %v2464_v13 = vld [vmem:[#allocation2 + $0xa8] sm:$0xf]  ;;  %v361_v6 = vsel %vm13295_vm5, 0, %v360_v55  ;;  %v2784_v60 = vsel %vm13301_vm8, %v2779_v21, %v2783_v52  ;;  %v14187_v28 = vunpack.c.l.b16 %v2774_v2  ;;  %v3257_v46 = vsel %vm13310_vm10, %v11326_v47, %v3256_v10 }
 0x201   : > { %v3818_v31 = vadd.f32 %v3745_v53, %v3504_v17  ;;  %v3434_v50 = vpop.f32.mrf.mxu1  ;;  %v4203_v17 = vrot.slane %v4201_v9, 5  ;;  %362 = vst [vmem:[#allocation2 + $0xc8] sm:$0x1] %v361_v6  ;;  %v3260_v53 = vsel %vm13310_vm10, %v3258_v35, %v3259_v37  ;;  %v2799_v10 = vshrl.u32 %v14180_v39, 16 }
 0x202   : > { %v4426_v7 = vpop.f32.mrf.mxu3  ;;  %v4219_v21 = vshrl.u32 %v3885_v44, 16  ;;  %v3322_v47 = vunpack.c.l.b16 %v3257_v46  ;;  %v3323_v55 = vunpack.c.l.b16 %v3260_v53 }
 0x203   : > { %v14175_v0 = vadd.f32 %v4426_v7, %v3818_v31  ;;  %v2786_v31 = vshrl.u32 %v2464_v13, 16  ;;  %v4204_v54 = vsel %vm13301_vm8, %v4199_v56, %v4203_v17  ;;  %v4206_v7 = vshrl.u32 %v3884_v40, 16 }
 0x204   : > { %v3009_v61 = vpop.f32.mrf.mxu0  ;;  %3473 = vmatmul.bf16.gmra.mxu1 %v3341_v26  ;;  %v4194_v26 = vsel %vm13301_vm8, %v4189_v3, %v14171_v33  ;;  %v4215_v33 = vshll.u32 %v3885_v44, 16  ;;  %v4318_v35 = vunpack.c.l.b16 %v4204_v54  ;;  %v4221_v44 = vrot.slane %v4219_v21, 4 }
 0x205   : > { %15819 = vst [vmem:[#allocation35_spill] sm:$0xff] %v14175_v0  ;;  %v3080_v16 = vadd.f32 %v3009_v61, %v13732_v49  ;;  %3787 = vmatmul.bf16.gmra.mxu2 %v12598_v42  ;;  %v636_v49 = vrot.slane %v13769_v29, 4  ;;  %v2795_v42 = vshll.u32 %v14180_v39, 16  ;;  %v2898_v61 = vunpack.c.l.b16 %v2784_v60 }
 0x206   : > { %v2788_v37 = vrot.slane %v2786_v31, 4  ;;  %v4208_v17 = vrot.slane %v4206_v7, 4  ;;  %v14205_v60 = vrot.slane %v4215_v33, 5  ;;  %v3342_v53 = vpack.c.b16 %v3323_v55, %v3322_v47  ;;  %v2467_v55 = vld [vmem:[#allocation2 + $0xb4] sm:$0xf] }
 0x207   : > { %v3505_v30 = vadd.f32 %v3434_v50, %v3080_v16  ;;  %3048 = vmatmul.bf16.gmra.mxu0 %v2916_v14  ;;  %4468 = vmatmul.bf16.gmra.mxu3 %v4336_v34  ;;  %v2789_v50 = vshll.u32 %v2464_v13, 16  ;;  %v4209_v14 = vshll.u32 %v3884_v40, 16  ;;  %v4317_v16 = vunpack.c.l.b16 %v4194_v26  ;;  %v2466_v40 = vld [vmem:[#allocation2 + $0xb0] sm:$0x1]  ;;  %v3119_v26 = vld [vmem:[#allocation2 + $0xa8] sm:$0xe] }
 0x208   : > { %v3748_v51 = vpop.f32.mrf.mxu2  ;;  %v14203_v2 = vrot.slane %v2795_v42, 5  ;;  %v796_v6 = vld [vmem:[#allocation2 + $0xc8] sm:$0x1]  ;;  %v11327_v21 = vrot.slane %v3119_v26, 9 }
 0x209   : > { %v3819_v29 = vadd.f32 %v3748_v51, %v3505_v30  ;;  %v3436_v23 = vpop.f32.mrf.mxu1  ;;  %v2791_v3 = vrot.slane %v2789_v50, 5  ;;  %v2801_v30 = vrot.slane %v2799_v10, 4  ;;  %v4211_v13 = vrot.slane %v4209_v14, 5  ;;  %v3886_v51 = vld [vmem:[#allocation2 + $0xbc] sm:$0x1]  ;;  %v12599_v42 = vld [vmem:[#allocation2 + $0xa8] sm:$0xff] }
 0x20a   : > { %v4429_v36 = vpop.f32.mrf.mxu3  ;;  %v2917_v50 = vpack.c.b16 %v2898_v61, %v14187_v28  ;;  %v4337_v10 = vpack.c.b16 %v4318_v35, %v4317_v16  ;;  %v2805_v14 = vshll.u32 %v2466_v40, 16  ;;  %v3266_v61 = vrot.slane %v2466_v40, 5  ;;  %v14220_v35 = vld [vmem:[#allocation2 + $0xb8] sm:$0xf] }
 0x20b   : > { %v14200_v9 = vadd.f32 %v4429_v36, %v3819_v29  ;;  %v3263_v29 = vrot.slane %v14180_v39, 5  ;;  %v2792_v36 = vor.u32 %v2791_v3, %v2788_v37  ;;  %v2802_v7 = vor.u32 %v2801_v30, %v14203_v2  ;;  %v12619_v30 = vld [vmem:[#allocation9 + $0x200] sm:$0xff] }
 0x20c   : > { %v3011_v34 = vpop.f32.mrf.mxu0  ;;  %v4222_v39 = vor.u32 %v4221_v44, %v14205_v60  ;;  %v2807_v3 = vrot.slane %v2805_v14, 5  ;;  %v3888_v44 = vld [vmem:[#allocation2 + $0xc4] sm:$0xf]  ;;  %v2823_v26 = vshrl.u32 %v14220_v35, 16  ;;  %4837 = vmatpush.bf16.msra.mxu0 %v12619_v30 }
 0x20d   : > { %15820 = vst [vmem:[#allocation36_spill] sm:$0xff] %v14200_v9  ;;  %v3081_v52 = vadd.f32 %v3011_v34, %v13746_v25  ;;  %v797_v25 = vsel %vm13268_vm7, %v636_v49, %v796_v6  ;;  %v4212_v34 = vor.u32 %v4211_v13, %v4208_v17  ;;  %v3265_v28 = vrot.slane %v3263_v29, 4  ;;  %v3887_v17 = vld [vmem:[#allocation2 + $0xc0] sm:$0xf] }
 0x20e   : > { %798 = vst [vmem:[#allocation2 + $0xc8] sm:$0x1] %v797_v25  ;;  %v2793_v16 = vrot.slane %v2792_v36, 4  ;;  %v2803_v37 = vrot.slane %v2802_v7, 4  ;;  %v3264_v13 = vsel %vm13310_vm10, %v11327_v21, %v3263_v29  ;;  %v4239_v7 = vshll.u32 %v3888_v44, 16 }
 0x20f   : > { %v3506_v56 = vadd.f32 %v3436_v23, %v3081_v52  ;;  %v4225_v52 = vshll.u32 %v3886_v51, 16  ;;  %v2810_v51 = vshrl.u32 %v2467_v55, 16  ;;  %v3267_v25 = vsel %vm13310_vm10, %v3265_v28, %v3266_v61 }
 0x210   : > { %v3750_v46 = vpop.f32.mrf.mxu2  ;;  %v2798_v29 = vsel %vm13301_vm8, %v2793_v16, %v14203_v2  ;;  %v4243_v14 = vshrl.u32 %v3888_v44, 16 }
 0x211   : > { %v3820_v31 = vadd.f32 %v3750_v46, %v3506_v56  ;;  %v14210_v23 = vpop.f32.mrf.mxu1  ;;  %v4213_v56 = vrot.slane %v4212_v34, 4  ;;  %v4227_v6 = vrot.slane %v4225_v52, 5  ;;  %v2813_v46 = vshll.u32 %v2467_v55, 16 }
 0x212   : > { %v4431_v54 = vpop.f32.mrf.mxu3  ;;  %v2812_v2 = vrot.slane %v2810_v51, 4  ;;  %v2825_v55 = vrot.slane %v2823_v26, 4  ;;  %v2899_v16 = vunpack.c.l.b16 %v2798_v29  ;;  %v3270_v26 = vrot.slane %v14220_v35, 5 }
 0x213   : > { %v14214_v33 = vadd.f32 %v4431_v54, %v3820_v31  ;;  %v2808_v54 = vsel %vm13301_vm8, %v2803_v37, %v2807_v3  ;;  %v4218_v21 = vsel %vm13301_vm8, %v4213_v56, %v14205_v60  ;;  %v2815_v28 = vrot.slane %v2813_v46, 5  ;;  %v2469_v3 = vld [vmem:[#allocation2 + $0xbc] sm:$0x1] }
 0x214   : > { %v3014_v49 = vpop.f32.mrf.mxu0  ;;  %3478 = vmatmul.bf16.gmra.mxu1 %v3342_v53  ;;  %v2819_v53 = vshll.u32 %v14220_v35, 16  ;;  %v2900_v37 = vunpack.c.l.b16 %v2808_v54  ;;  %v4245_v60 = vrot.slane %v4243_v14, 4  ;;  %v2829_v51 = vshll.u32 %v2469_v3, 16 }
 0x215   : > { %15821 = vst [vmem:[#allocation37_spill] sm:$0xff] %v14214_v33  ;;  %v14218_v47 = vadd.f32 %v3014_v49, %v13763_v12  ;;  %3792 = vmatmul.bf16.gmra.mxu2 %v12599_v42  ;;  %v4223_v12 = vrot.slane %v4222_v39, 4  ;;  %v4233_v42 = vshll.u32 %v3887_v17, 16  ;;  %v3325_v49 = vunpack.c.l.b16 %v3267_v25  ;;  %v3889_v56 = vld [vmem:[#allocation2 + $0xc8] sm:$0x1] }
 0x216   : > { %v14247_v61 = vrot.slane %v2819_v53, 5  ;;  %v4241_v25 = vrot.slane %v4239_v7, 5  ;;  %v12600_v53 = vld [vmem:[#allocation2 + $0xb4] sm:$0xff]  ;;  %v3273_v35 = vrot.slane %v2469_v3, 5  ;;  %v2472_v0 = vld [vmem:[#allocation2 + $0xc8] sm:$0x1] }
 0x217   : > { %3053 = vmatmul.bf16.gmra.mxu0 %v2917_v50  ;;  %4473 = vmatmul.bf16.gmra.mxu3 %v4337_v10  ;;  %v4230_v50 = vshrl.u32 %v3887_v17, 16  ;;  %v3324_v10 = vunpack.c.l.b16 %v3264_v13  ;;  %v4228_v39 = vsel %vm13301_vm8, %v4223_v12, %v4227_v6  ;;  %v4235_v17 = vrot.slane %v4233_v42, 5  ;;  %v3120_v7 = vld [vmem:[#allocation2 + $0xb4] sm:$0xe] }
 0x218   : > { %v14224_v40 = vpop.f32.mrf.mxu2  ;;  %v4319_v13 = vunpack.c.l.b16 %v4218_v21  ;;  %v4320_v44 = vunpack.c.l.b16 %v4228_v39  ;;  %v2816_v6 = vor.u32 %v2815_v28, %v2812_v2  ;;  %v2918_v42 = vpack.c.b16 %v2900_v37, %v2899_v16 }
 0x219   : > { %v14230_v31 = vpop.f32.mrf.mxu1  ;;  %v4232_v30 = vrot.slane %v4230_v50, 4  ;;  %v3343_v12 = vpack.c.b16 %v3325_v49, %v3324_v10  ;;  %v4246_v14 = vor.u32 %v4245_v60, %v4241_v25  ;;  %v2831_v2 = vrot.slane %v2829_v51, 5 }
 0x21a   : > { %v14235_v36 = vpop.f32.mrf.mxu3  ;;  %v4338_v54 = vpack.c.b16 %v4320_v44, %v4319_v13  ;;  %v2817_v49 = vrot.slane %v2816_v6, 4  ;;  %v11328_v28 = vrot.slane %v3120_v7, 9  ;;  %v14260_v13 = vld [vmem:[#allocation2 + $0xc4] sm:$0xf] }
 0x21b   : > { %v4236_v29 = vor.u32 %v4235_v17, %v4232_v30  ;;  %v4247_v16 = vrot.slane %v4246_v14, 4  ;;  %v2470_v17 = vld [vmem:[#allocation2 + $0xc0] sm:$0xf]  ;;  %v2847_v7 = vshrl.u32 %v14260_v13, 16 }
 0x21c   : > { %v3016_v34 = vpop.f32.mrf.mxu0  ;;  %v3271_v6 = vsel %vm13310_vm10, %v11328_v28, %v3270_v26 }
 0x21d   : > { %v14245_v52 = vadd.f32 %v3016_v34, %v13777_v4  ;;  %v2826_v4 = vor.u32 %v2825_v55, %v14247_v61  ;;  %v4249_v34 = vshll.u32 %v3889_v56, 16  ;;  %v3272_v55 = vrot.slane %v3270_v26, 4  ;;  %v3890_v56 = vld [vmem:[#allocation2 + $0xcc] sm:$0xf] }
 0x21e   : > { %v4237_v30 = vrot.slane %v4236_v29, 4  ;;  %v4257_v26 = vshll.u32 %v3890_v56, 16  ;;  %v2849_v9 = vrot.slane %v2847_v7, 4 }
 0x21f   : > { %v2827_v39 = vrot.slane %v2826_v4, 4  ;;  %v4251_v37 = vrot.slane %v4249_v34, 5  ;;  %v3274_v4 = vsel %vm13310_vm10, %v3272_v55, %v3273_v35  ;;  %v4254_v34 = vshrl.u32 %v3890_v56, 16 }
 0x220   : > { %v14249_v33 = vpop.f32.mrf.mxu2  ;;  %v4242_v51 = vsel %vm13301_vm8, %v4237_v30, %v4241_v25  ;;  %v3326_v25 = vunpack.c.l.b16 %v3271_v6  ;;  %v4259_v15 = vrot.slane %v4257_v26, 5  ;;  %v12601_v6 = vld [vmem:[#allocation2 + $0xc0] sm:$0xff] }
 0x221   : > { %v14252_v46 = vpop.f32.mrf.mxu1  ;;  %v2832_v60 = vsel %vm13301_vm8, %v2827_v39, %v2831_v2  ;;  %v3327_v2 = vunpack.c.l.b16 %v3274_v4  ;;  %v4321_v35 = vunpack.c.l.b16 %v4242_v51  ;;  %v4256_v24 = vrot.slane %v4254_v34, 4 }
 0x222   : > { %v14255_v50 = vpop.f32.mrf.mxu3  ;;  %v2902_v55 = vunpack.c.l.b16 %v2832_v60 }
 0x223   : > { %v4260_v34 = vor.u32 %v4259_v15, %v4256_v24 }
 0x224   : > { %v3019_v21 = vpop.f32.mrf.mxu0  ;;  %3483 = vmatmul.bf16.gmra.mxu1 %v3343_v12  ;;  %v3891_v12 = vld [vmem:[#allocation2 + $0xd0] sm:$0xf] }
 0x225   : > { %v14258_v10 = vadd.f32 %v3019_v21, %v13791_v38  ;;  %3797 = vmatmul.bf16.gmra.mxu2 %v12600_v53  ;;  %v2822_v38 = vsel %vm13301_vm8, %v2817_v49, %v14247_v61  ;;  %v2834_v53 = vshrl.u32 %v2470_v17, 16  ;;  %v4252_v61 = vsel %vm13301_vm8, %v4247_v16, %v4251_v37 }
 0x226   : > { %v4263_v21 = vshll.u32 %v3891_v12, 16  ;;  %v4267_v49 = vshrl.u32 %v3891_v12, 16  ;;  %v2901_v28 = vunpack.c.l.b16 %v2822_v38  ;;  %v4322_v16 = vunpack.c.l.b16 %v4252_v61 }
 0x227   : > { %3058 = vmatmul.bf16.gmra.mxu0 %v2918_v42  ;;  %4478 = vmatmul.bf16.gmra.mxu3 %v4338_v54  ;;  %v2837_v42 = vshll.u32 %v2470_v17, 16  ;;  %v2843_v54 = vshll.u32 %v14260_v13, 16  ;;  %v2836_v30 = vrot.slane %v2834_v53, 4  ;;  %v3344_v12 = vpack.c.b16 %v3327_v2, %v3326_v25 }
 0x228   : > { %v14262_v44 = vpop.f32.mrf.mxu2  ;;  %v4265_v8 = vrot.slane %v4263_v21, 5  ;;  %v4269_v56 = vrot.slane %v4267_v49, 4  ;;  %v3277_v38 = vrot.slane %v14260_v13, 5  ;;  %v2919_v4 = vpack.c.b16 %v2902_v55, %v2901_v28 }
 0x229   : > { %v14269_v3 = vpop.f32.mrf.mxu1  ;;  %v2839_v37 = vrot.slane %v2837_v42, 5  ;;  %v2845_v17 = vrot.slane %v2843_v54, 5  ;;  %v4339_v51 = vpack.c.b16 %v4322_v16, %v4321_v35  ;;  %v2853_v61 = vshll.u32 %v2472_v0, 16  ;;  %v3121_v42 = vld [vmem:[#allocation2 + $0xc0] sm:$0xe] }
 0x22a   : > { %v14277_v29 = vpop.f32.mrf.mxu3  ;;  %v4270_v26 = vor.u32 %v4269_v56, %v4265_v8  ;;  %v11329_v25 = vrot.slane %v3121_v42, 9  ;;  %v3279_v2 = vrot.slane %v3277_v38, 4  ;;  %v3280_v13 = vrot.slane %v2472_v0, 5 }
 0x22b   : > { %v2840_v53 = vor.u32 %v2839_v37, %v2836_v30  ;;  %v2850_v7 = vor.u32 %v2849_v9, %v2845_v17  ;;  %v2855_v55 = vrot.slane %v2853_v61, 5  ;;  %v4261_v30 = vrot.slane %v4260_v34, 4 }
 0x22c   : > { %v3021_v14 = vpop.f32.mrf.mxu0  ;;  %v4271_v16 = vrot.slane %v4270_v26, 4  ;;  %v3278_v15 = vsel %vm13310_vm10, %v11329_v25, %v3277_v38  ;;  %v12602_v26 = vld [vmem:[#allocation2 + $0xcc] sm:$0xff] }
 0x22d   : > { %v14284_v39 = vadd.f32 %v3021_v14, %v13800_v20  ;;  %v3892_v20 = vld [vmem:[#allocation2 + $0xd4] sm:$0x1]  ;;  %v2841_v28 = vrot.slane %v2840_v53, 4  ;;  %v2851_v35 = vrot.slane %v2850_v7, 4 }
 0x22e   : > { %v4273_v21 = vshll.u32 %v3892_v20, 16 }
 0x22f   : > { %v2856_v20 = vsel %vm13301_vm8, %v2851_v35, %v2855_v55  ;;  %v4526_v55 = vld [vmem:[#allocation2 + $0x18] sm:$0xe] }
 0x230   : > { %v14286_v41 = vpop.f32.mrf.mxu2  ;;  %v4275_v37 = vrot.slane %v4273_v21, 5  ;;  %v2904_v42 = vunpack.c.l.b16 %v2856_v20 }
 0x231   : > { %v14288_v14 = vpop.f32.mrf.mxu1 }
 0x232   : > { %v14291_v60 = vpop.f32.mrf.mxu3  ;;  %v4276_v38 = vsel %vm13301_vm8, %v4271_v16, %v4275_v37  ;;  %v11490_v37 = vrot.slane %v4526_v55, 9 }
 0x233   : > { %v4324_v7 = vunpack.c.l.b16 %v4276_v38 }
 0x234   : > { %v3024_v54 = vpop.f32.mrf.mxu0  ;;  %3488 = vmatmul.bf16.gmra.mxu1 %v3344_v12  ;;  %v2846_v12 = vsel %vm13301_vm8, %v2841_v28, %v2845_v17 }
 0x235   : > { %v14294_v49 = vadd.f32 %v3024_v54, %v13811_v5  ;;  %3802 = vmatmul.bf16.gmra.mxu2 %v12601_v6  ;;  %v3281_v5 = vsel %vm13310_vm10, %v3279_v2, %v3280_v13  ;;  %v4266_v6 = vsel %vm13301_vm8, %v4261_v30, %v4265_v8  ;;  %v2903_v61 = vunpack.c.l.b16 %v2846_v12  ;;  %v12928_v13 = vld [vmem:[#allocation2 + $0x1c] sm:$0xf]  ;;  %v12929_v30 = vld [vmem:[#allocation2 + $0x20] sm:$0x1] }
 0x236   : > { %v3329_v53 = vunpack.c.l.b16 %v3281_v5  ;;  %v4323_v54 = vunpack.c.l.b16 %v4266_v6  ;;  %v4592_v28 = vrot.slane %v12928_v13, 5  ;;  %v4595_v16 = vrot.slane %v12929_v30, 5  ;;  %v12931_v13 = vld [vmem:[#allocation2 + $0x2c] sm:$0x1] }
 0x237   : > { %3063 = vmatmul.bf16.gmra.mxu0 %v2919_v4  ;;  %4483 = vmatmul.bf16.gmra.mxu3 %v4339_v51  ;;  %v3328_v51 = vunpack.c.l.b16 %v3278_v15  ;;  %v2920_v25 = vpack.c.b16 %v2904_v42, %v2903_v61 }
 0x238   : > { %v14296_v9 = vpop.f32.mrf.mxu2  ;;  %v4340_v8 = vpack.c.b16 %v4324_v7, %v4323_v54  ;;  %v4594_v15 = vrot.slane %v4592_v28, 4  ;;  %v12930_v7 = vld [vmem:[#allocation2 + $0x28] sm:$0xf] }
 0x239   : > { %v14304_v0 = vpop.f32.mrf.mxu1  ;;  %v3345_v17 = vpack.c.b16 %v3329_v53, %v3328_v51 }
 0x23a   : > { %v14302_v24 = vpop.f32.mrf.mxu3  ;;  %v4596_v20 = vsel %vm13310_vm10, %v4594_v15, %v4595_v16 }
 0x23b   : > { %v4719_v51 = vunpack.c.l.b16 %v4596_v20 }
 0x23c   : > { %v3026_v56 = vpop.f32.mrf.mxu0 }
 0x23d   : > { %v14315_v4 = vadd.f32 %v3026_v56, %v13825_v32 }
 0x240   : > { %v14317_v34 = vpop.f32.mrf.mxu2 }
 0x241   : > { %v14324_v35 = vpop.f32.mrf.mxu1 }
 0x242   : > { %v14319_v21 = vpop.f32.mrf.mxu3 }
 0x244   : > { %v3029_v2 = vpop.f32.mrf.mxu0  ;;  %3493 = vmatmul.bf16.gmra.mxu1 %v3345_v17  ;;  %v4599_v17 = vrot.slane %v12930_v7, 5 }
 0x245   : > { %v14322_v32 = vadd.f32 %v3029_v2, %v13845_v27  ;;  %3807 = vmatmul.bf16.gmra.mxu2 %v12602_v26  ;;  %v4593_v27 = vsel %vm13310_vm10, %v11490_v37, %v4592_v28  ;;  %v4602_v28 = vrot.slane %v12931_v13, 5  ;;  %v12933_v13 = vld [vmem:[#allocation2 + $0x38] sm:$0x1] }
 0x246   : > { %v4718_v38 = vunpack.c.l.b16 %v4593_v27 }
 0x247   : > { %3068 = vmatmul.bf16.gmra.mxu0 %v2920_v25  ;;  %4488 = vmatmul.bf16.gmra.mxu3 %v4340_v8  ;;  %v4527_v25 = vld [vmem:[#allocation2 + $0x24] sm:$0xe] }
 0x248   : > { %v14326_v5 = vpop.f32.mrf.mxu2  ;;  %v4750_v42 = vpack.c.b16 %v4719_v51, %v4718_v38  ;;  %v11491_v2 = vrot.slane %v4527_v25, 9 }
 0x249   : > { %v14337_v53 = vpop.f32.mrf.mxu1 }
 0x24a   : > { %v14328_v12 = vpop.f32.mrf.mxu3  ;;  %v4600_v37 = vsel %vm13310_vm10, %v11491_v2, %v4599_v17 }
 0x24c   : > { %v3031_v56 = vpop.f32.mrf.mxu0 }
 0x24d   : > { %v14335_v6 = vadd.f32 %v3031_v56, %v13853_v19  ;;  %v4601_v19 = vrot.slane %v4599_v17, 4  ;;  %v4720_v56 = vunpack.c.l.b16 %v4600_v37  ;;  %v4528_v17 = vld [vmem:[#allocation2 + $0x30] sm:$0xe] }
 0x250   : > { %v14339_v61 = vpop.f32.mrf.mxu2 }
 0x251   : > { %v14346_v55 = vpop.f32.mrf.mxu1 }
 0x252   : > { %v14344_v8 = vpop.f32.mrf.mxu3 }
 0x254   : > { %v3034_v54 = vpop.f32.mrf.mxu0 }
 0x255   : > { %v14342_v26 = vadd.f32 %v3034_v54, %v13872_v1  ;;  %v4603_v1 = vsel %vm13310_vm10, %v4601_v19, %v4602_v28  ;;  %v12932_v54 = vld [vmem:[#allocation2 + $0x34] sm:$0xf]  ;;  %v11492_v19 = vrot.slane %v4528_v17, 9  ;;  %v4609_v28 = vrot.slane %v12933_v13, 5 }
 0x256   : > { %v4721_v27 = vunpack.c.l.b16 %v4603_v1  ;;  %v4606_v7 = vrot.slane %v12932_v54, 5 }
 0x257   : > { %4838 = vmatmul.bf16.vlgmr.msra.gmra.mxu0 %v4750_v42 }
 0x258   : > { %v14348_v30 = vpop.f32.mrf.mxu2  ;;  %v4751_v38 = vpack.c.b16 %v4721_v27, %v4720_v56  ;;  %v4607_v1 = vsel %vm13310_vm10, %v11492_v19, %v4606_v7  ;;  %v4529_v19 = vld [vmem:[#allocation2 + $0x3c] sm:$0xe] }
 0x259   : > { %v14359_v51 = vpop.f32.mrf.mxu1 }
 0x25a   : > { %v14357_v20 = vpop.f32.mrf.mxu3 }
 0x25c   : > { %v3036_v16 = vpop.f32.mrf.mxu0 }
 0x25d   : > { %v14355_v15 = vadd.f32 %v3036_v16, %v13883_v18  ;;  %v4608_v18 = vrot.slane %v4606_v7, 4 }
 0x25f   : > { %v4610_v56 = vsel %vm13310_vm10, %v4608_v18, %v4609_v28  ;;  %v4615_v28 = vrot.slane %v4613_v22, 4 }
 0x260   : > { %v14364_v2 = vpop.f32.mrf.mxu2 }
 0x261   : > { %v14375_v27 = vpop.f32.mrf.mxu1 }
 0x262   : > { %v14366_v16 = vpop.f32.mrf.mxu3 }
 0x263   : > { %15822 = vst [vmem:[#allocation38_spill] sm:$0xff] %v14366_v16 }
 0x264   : > { %v3039_v42 = vpop.f32.mrf.mxu0 }
 0x265   : > { %v14362_v25 = vadd.f32 %v3039_v42, %v13905_v58  ;;  %v4722_v42 = vunpack.c.l.b16 %v4607_v1 }
 0x267   : > { %4843 = vmatmul.bf16.gmra.mxu0 %v4751_v38  ;;  %v4723_v38 = vunpack.c.l.b16 %v4610_v56 }
 0x268   : > { %v14377_v54 = vpop.f32.mrf.mxu2 }
 0x269   : > { %v4752_v17 = vpack.c.b16 %v4723_v38, %v4722_v42  ;;  %v14384_v18 = vpop.f32.mrf.mxu1 }
 0x26a   : > { %v14379_v13 = vpop.f32.mrf.mxu3  ;;  %15825 = vst [vmem:[#allocation41_spill] sm:$0xff] %v14384_v18  ;;  %v15831_v18 = vld [vmem:[#allocation21_spill] sm:$0xff] }
 0x26b   : > { %15823 = vst [vmem:[#allocation39_spill] sm:$0xff] %v14379_v13 }
 0x26c   : > { %v3041_v37 = vpop.f32.mrf.mxu0 }
 0x26d   : > { %v14373_v58 = vadd.f32 %v3041_v37, %v13911_v57  ;;  %v11493_v57 = vrot.slane %v4529_v19, 9  ;;  %v12935_v37 = vld [vmem:[#allocation2 + $0x44] sm:$0x1] }
 0x26e   : > { %v4616_v1 = vrot.slane %v12935_v37, 5 }
 0x26f   : > { %v4614_v42 = vsel %vm13310_vm10, %v11493_v57, %v4613_v22  ;;  %v4530_v57 = vld [vmem:[#allocation2 + $0x48] sm:$0xe] }
 0x270   : > { %v14386_v56 = vpop.f32.mrf.mxu2  ;;  %v4617_v63 = vsel %vm13310_vm10, %v4615_v28, %v4616_v1  ;;  %v4724_v38 = vunpack.c.l.b16 %v4614_v42  ;;  %v12937_v1 = vld [vmem:[#allocation2 + $0x50] sm:$0x1] }
 0x271   : > { %15826 = vst [vmem:[#allocation42_spill] sm:$0xff] %v14386_v56  ;;  %v14397_v19 = vpop.f32.mrf.mxu1  ;;  %v12936_v56 = vld [vmem:[#allocation2 + $0x4c] sm:$0xf]  ;;  %v4623_v42 = vrot.slane %v12937_v1, 5  ;;  %v12654_v1 = vld [vmem:[#allocation9 + $0x2f8] sm:$0xff] }
 0x272   : > { %15829 = vst [vmem:[#allocation45_spill] sm:$0xff] %v14397_v19  ;;  %6937 = vmatpush.bf16.msra.mxu3 %v12654_v1  ;;  %v15844_v1 = vld [vmem:[#allocation24_spill] sm:$0xff] }
 0x274   : > { %v3044_v43 = vpop.f32.mrf.mxu0 }
 0x275   : > { %v14382_v7 = vadd.f32 %v3044_v43, %v13927_v59  ;;  %v14395_v59 = vpop.f32.mrf.mxu3 }
 0x276   : > { %15828 = vst [vmem:[#allocation44_spill] sm:$0xff] %v14395_v59 }
 0x277   : > { %15824 = vst [vmem:[#allocation40_spill] sm:$0xff] %v14382_v7  ;;  %4848 = vmatmul.bf16.gmra.mxu0 %v4752_v17  ;;  %v4725_v17 = vunpack.c.l.b16 %v4617_v63  ;;  %v4620_v7 = vrot.slane %v12936_v56, 5 }
 0x278   : > { %v14399_v37 = vpop.f32.mrf.mxu2 }
 0x279   : > { %v4753_v13 = vpack.c.b16 %v4725_v17, %v4724_v38  ;;  %15830 = vst [vmem:[#allocation46_spill] sm:$0xff] %v14399_v37  ;;  %v14406_v63 = vpop.f32.mrf.mxu1  ;;  %v15835_v17 = vld [vmem:[#allocation22_spill] sm:$0xff] }
 0x27a   : > { %15834 = vst [vmem:[#allocation48_spill] sm:$0xff] %v14406_v63 }
 0x27c   : > { %v3046_v16 = vpop.f32.mrf.mxu0 }
 0x27d   : > { %v14393_v43 = vadd.f32 %v3046_v16, %v13941_v45  ;;  %v14404_v28 = vpop.f32.mrf.mxu3  ;;  %v11494_v45 = vrot.slane %v4530_v57, 9  ;;  %v4622_v16 = vrot.slane %v4620_v7, 4  ;;  %v12638_v57 = vld [vmem:[#allocation9 + $0x278] sm:$0xff] }
 0x27e   : > { %15833 = vst [vmem:[#allocation47_spill] sm:$0xff] %v14404_v28  ;;  %6772 = vmatpush.bf16.msra.mxu2 %v12638_v57  ;;  %v12939_v57 = vld [vmem:[#allocation2 + $0x5c] sm:$0x1] }
 0x27f   : > { %15827 = vst [vmem:[#allocation43_spill] sm:$0xff] %v14393_v43  ;;  %v4621_v38 = vsel %vm13310_vm10, %v11494_v45, %v4620_v7  ;;  %v4624_v56 = vsel %vm13310_vm10, %v4622_v16, %v4623_v42  ;;  %v12938_v43 = vld [vmem:[#allocation2 + $0x58] sm:$0xf]  ;;  %v15839_v7 = vld [vmem:[#allocation23_spill] sm:$0xff]  ;;  %v4531_v16 = vld [vmem:[#allocation2 + $0x54] sm:$0xe] }
 0x280   : > { %v4727_v28 = vunpack.c.l.b16 %v4624_v56  ;;  %v4627_v19 = vrot.slane %v12938_v43, 5  ;;  %v11495_v56 = vrot.slane %v4531_v16, 9 }
 0x281   : > { %v14422_v42 = vpop.f32.mrf.mxu1 }
 0x282   : > { %15841 = vst [vmem:[#allocation51_spill] sm:$0xff] %v14422_v42  ;;  %v4628_v43 = vsel %vm13310_vm10, %v11495_v56, %v4627_v19 }
 0x284   : > { %v3049_v11 = vpop.f32.mrf.mxu0 }
 0x285   : > { %v14402_v22 = vadd.f32 %v3049_v11, %v15831_v18  ;;  %v14415_v18 = vpop.f32.mrf.mxu2  ;;  %v14417_v37 = vpop.f32.mrf.mxu3 }
 0x286   : > { %15837 = vst [vmem:[#allocation49_spill] sm:$0xff] %v14415_v18 }
 0x287   : > { %15832 = vst [vmem:[#allocation21_spill] sm:$0xff] %v14402_v22  ;;  %4853 = vmatmul.bf16.gmra.mxu0 %v4753_v13  ;;  %v4726_v13 = vunpack.c.l.b16 %v4621_v38 }
 0x288   : > { %15838 = vst [vmem:[#allocation50_spill] sm:$0xff] %v14417_v37  ;;  %v4630_v37 = vrot.slane %v12939_v57, 5 }
 0x289   : > { %v4754_v22 = vpack.c.b16 %v4727_v28, %v4726_v13  ;;  %v14435_v18 = vpop.f32.mrf.mxu1 }
 0x28a   : > { %15846 = vst [vmem:[#allocation54_spill] sm:$0xff] %v14435_v18 }
 0x28c   : > { %v3051_v59 = vpop.f32.mrf.mxu0 }
 0x28d   : > { %v14413_v11 = vadd.f32 %v3051_v59, %v15835_v17  ;;  %v12646_v59 = vld [vmem:[#allocation9 + $0x2b8] sm:$0xff]  ;;  %v14424_v38 = vpop.f32.mrf.mxu2  ;;  %v4629_v17 = vrot.slane %v4627_v19, 4  ;;  %v14426_v28 = vpop.f32.mrf.mxu3 }
 0x28e   : > { %6671 = vmatpush.bf16.msra.mxu1 %v12646_v59  ;;  %15842 = vst [vmem:[#allocation52_spill] sm:$0xff] %v14424_v38  ;;  %v4532_v19 = vld [vmem:[#allocation2 + $0x60] sm:$0xe] }
 0x28f   : > { %15836 = vst [vmem:[#allocation22_spill] sm:$0xff] %v14413_v11  ;;  %v15848_v11 = vld [vmem:[#allocation25_spill] sm:$0xff] }
 0x290   : > { %15843 = vst [vmem:[#allocation53_spill] sm:$0xff] %v14426_v28 }
 0x294   : > { %v3054_v63 = vpop.f32.mrf.mxu0 }
 0x295   : > { %v14420_v45 = vadd.f32 %v3054_v63, %v15839_v7  ;;  %v4631_v63 = vsel %vm13310_vm10, %v4629_v17, %v4630_v37  ;;  %v14437_v16 = vpop.f32.mrf.mxu2  ;;  %v14442_v56 = vpop.f32.mrf.mxu3  ;;  %v11496_v37 = vrot.slane %v4532_v19, 9  ;;  %v12637_v19 = vld [vmem:[#allocation9 + $0x270] sm:$0xff] }
 0x296   : > { %v4729_v59 = vunpack.c.l.b16 %v4631_v63  ;;  %15847 = vst [vmem:[#allocation55_spill] sm:$0xff] %v14437_v16  ;;  %v14444_v63 = vpop.f32.mrf.mxu1  ;;  %6773 = vmatpush.bf16.msra.mxu2 %v12637_v19  ;;  %v12645_v19 = vld [vmem:[#allocation9 + $0x2b0] sm:$0xff] }
 0x297   : > { %15840 = vst [vmem:[#allocation23_spill] sm:$0xff] %v14420_v45  ;;  %4858 = vmatmul.bf16.gmra.mxu0 %v4754_v22  ;;  %v4728_v22 = vunpack.c.l.b16 %v4628_v43  ;;  %v12940_v45 = vld [vmem:[#allocation2 + $0x64] sm:$0xf]  ;;  %6672 = vmatpush.bf16.msra.mxu1 %v12645_v19 }
 0x298   : > { %v4634_v28 = vrot.slane %v12940_v45, 5  ;;  %15850 = vst [vmem:[#allocation56_spill] sm:$0xff] %v14442_v56  ;;  %v15853_v45 = vld [vmem:[#allocation26_spill] sm:$0xff] }
 0x299   : > { %v4755_v38 = vpack.c.b16 %v4729_v59, %v4728_v22  ;;  %15851 = vst [vmem:[#allocation57_spill] sm:$0xff] %v14444_v63  ;;  %v12942_v63 = vld [vmem:[#allocation2 + $0x70] sm:$0xf] }
 0x29a   : > { %v4636_v17 = vrot.slane %v4634_v28, 4  ;;  %v4635_v22 = vsel %vm13310_vm10, %v11496_v37, %v4634_v28  ;;  %v4641_v18 = vrot.slane %v12942_v63, 5  ;;  %v15856_v28 = vld [vmem:[#allocation27_spill] sm:$0xff] }
 0x29c   : > { %v3056_v13 = vpop.f32.mrf.mxu0 }
 0x29d   : > { %v14433_v7 = vadd.f32 %v3056_v13, %v15844_v1  ;;  %v12941_v13 = vld [vmem:[#allocation2 + $0x68] sm:$0x1]  ;;  %v14446_v1 = vpop.f32.mrf.mxu2  ;;  %v14455_v56 = vpop.f32.mrf.mxu3 }
 0x29e   : > { %v4637_v43 = vrot.slane %v12941_v13, 5  ;;  %15852 = vst [vmem:[#allocation58_spill] sm:$0xff] %v14446_v1  ;;  %v12653_v13 = vld [vmem:[#allocation9 + $0x2f0] sm:$0xff]  ;;  %v14457_v16 = vpop.f32.mrf.mxu1 }
 0x29f   : > { %15845 = vst [vmem:[#allocation24_spill] sm:$0xff] %v14433_v7  ;;  %6938 = vmatpush.bf16.msra.mxu3 %v12653_v13 }
 0x2a0   : > { %15855 = vst [vmem:[#allocation59_spill] sm:$0xff] %v14455_v56 }
 0x2a4   : > { %v3059_v57 = vpop.f32.mrf.mxu0 }
 0x2a5   : > { %v14440_v42 = vadd.f32 %v3059_v57, %v15848_v11  ;;  %v4638_v11 = vsel %vm13310_vm10, %v4636_v17, %v4637_v43  ;;  %v4730_v57 = vunpack.c.l.b16 %v4635_v22  ;;  %v4533_v17 = vld [vmem:[#allocation2 + $0x6c] sm:$0xe]  ;;  %v4643_v22 = vrot.slane %v4641_v18, 4  ;;  %v14464_v56 = vpop.f32.mrf.mxu3 }
 0x2a6   : > { %v11497_v43 = vrot.slane %v4533_v17, 9  ;;  %15859 = vst [vmem:[#allocation61_spill] sm:$0xff] %v14464_v56  ;;  %v12944_v56 = vld [vmem:[#allocation2 + $0x7c] sm:$0xf] }
 0x2a7   : > { %15849 = vst [vmem:[#allocation25_spill] sm:$0xff] %v14440_v42  ;;  %4863 = vmatmul.bf16.gmra.mxu0 %v4755_v38  ;;  %v4731_v38 = vunpack.c.l.b16 %v4638_v11  ;;  %v12943_v11 = vld [vmem:[#allocation2 + $0x74] sm:$0x1]  ;;  %v4648_v19 = vrot.slane %v12944_v56, 5 }
 0x2a8   : > { %v4642_v63 = vsel %vm13310_vm10, %v11497_v43, %v4641_v18 }
 0x2a9   : > { %v4756_v42 = vpack.c.b16 %v4731_v38, %v4730_v57  ;;  %v14472_v38 = vpop.f32.mrf.mxu1  ;;  %v4732_v13 = vunpack.c.l.b16 %v4642_v63 }
 0x2ac   : > { %v3061_v7 = vpop.f32.mrf.mxu0 }
 0x2ad   : > { %v14453_v59 = vadd.f32 %v3061_v7, %v15853_v45  ;;  %v14462_v7 = vpop.f32.mrf.mxu2  ;;  %v4644_v45 = vrot.slane %v12943_v11, 5  ;;  %v14476_v11 = vpop.f32.mrf.mxu3 }
 0x2ae   : > { %15858 = vst [vmem:[#allocation60_spill] sm:$0xff] %v14462_v7 }
 0x2af   : > { %15854 = vst [vmem:[#allocation26_spill] sm:$0xff] %v14453_v59  ;;  %v4534_v59 = vld [vmem:[#allocation2 + $0x78] sm:$0xe] }
 0x2b0   : > { %v11498_v43 = vrot.slane %v4534_v59, 9  ;;  %v3508_v59 = vadd.f32 %v14230_v31, %v14245_v52 }
 0x2b1   : > { %v14481_v18 = vpop.f32.mrf.mxu1 }
 0x2b4   : > { %v3064_v1 = vpop.f32.mrf.mxu0 }
 0x2b5   : > { %v14460_v37 = vadd.f32 %v3064_v1, %v15856_v28  ;;  %v4645_v1 = vsel %vm13310_vm10, %v4643_v22, %v4644_v45  ;;  %v14474_v28 = vpop.f32.mrf.mxu2  ;;  %v4650_v22 = vrot.slane %v4648_v19, 4  ;;  %v12945_v45 = vld [vmem:[#allocation2 + $0x80] sm:$0x1] }
 0x2b6   : > { %15860 = vst [vmem:[#allocation62_spill] sm:$0xff] %v14474_v28  ;;  %v4651_v63 = vrot.slane %v12945_v45, 5  ;;  %v3509_v45 = vadd.f32 %v14252_v46, %v14258_v10 }
 0x2b7   : > { %15857 = vst [vmem:[#allocation27_spill] sm:$0xff] %v14460_v37  ;;  %4868 = vmatmul.bf16.gmra.mxu0 %v4756_v42  ;;  %v4733_v42 = vunpack.c.l.b16 %v4645_v1 }
 0x2b8   : > { %v4652_v56 = vsel %vm13310_vm10, %v4650_v22, %v4651_v63  ;;  %v15863_v63 = vld [vmem:[#allocation40_spill] sm:$0xff] }
 0x2b9   : > { %v4757_v17 = vpack.c.b16 %v4733_v42, %v4732_v13  ;;  %v4649_v13 = vsel %vm13310_vm10, %v11498_v43, %v4648_v19  ;;  %v3511_v19 = vadd.f32 %v14288_v14, %v14294_v49  ;;  %v3512_v43 = vadd.f32 %v14304_v0, %v14315_v4  ;;  %v3489_v10 = vpop.f32.mrf.mxu1 }
 0x2ba   : > { %v4734_v42 = vunpack.c.l.b16 %v4649_v13  ;;  %v15864_v13 = vld [vmem:[#allocation45_spill] sm:$0xff] }
 0x2bb   : > { %v3825_v52 = vadd.f32 %v14296_v9, %v3511_v19  ;;  %v3826_v46 = vadd.f32 %v14317_v34, %v3512_v43  ;;  %v4535_v34 = vld [vmem:[#allocation2 + $0x84] sm:$0xe] }
 0x2bc   : > { %v14466_v57 = vpop.f32.mrf.mxu0  ;;  %v15871_v43 = vld [vmem:[#allocation23_spill] sm:$0xff] }
 0x2bd   : > { %v14483_v1 = vpop.f32.mrf.mxu2 }
 0x2c4   : > { %v3069_v7 = vpop.f32.mrf.mxu0 }
 0x2c5   : > { %v14479_v37 = vadd.f32 %v3069_v7, %v14077_v62  ;;  %v14491_v62 = vpop.f32.mrf.mxu3  ;;  %v3507_v7 = vadd.f32 %v14210_v23, %v14218_v47  ;;  %v3822_v23 = vadd.f32 %v14249_v33, %v3508_v59  ;;  %v3823_v47 = vadd.f32 %v14262_v44, %v3509_v45  ;;  %v3803_v33 = vpop.f32.mrf.mxu2  ;;  %v12946_v44 = vld [vmem:[#allocation2 + $0x88] sm:$0xf]  ;;  %v15866_v59 = vld [vmem:[#allocation48_spill] sm:$0xff]  ;;  %v15869_v45 = vld [vmem:[#allocation22_spill] sm:$0xff] }
 0x2c6   : > { %v4655_v0 = vrot.slane %v12946_v44, 5 }
 0x2c7   : > { %4873 = vmatmul.bf16.gmra.mxu0 %v4757_v17  ;;  %v4735_v17 = vunpack.c.l.b16 %v4652_v56  ;;  %v3821_v22 = vadd.f32 %v14224_v40, %v3507_v7  ;;  %v3515_v40 = vadd.f32 %v14346_v55, %v14342_v26  ;;  %v14533_v26 = vadd.f32 %v14302_v24, %v3825_v52  ;;  %v15865_v7 = vld [vmem:[#allocation43_spill] sm:$0xff] }
 0x2c8   : > { %v11499_v55 = vrot.slane %v4535_v34, 9  ;;  %v3519_v56 = vadd.f32 %v15864_v13, %v15863_v63  ;;  %v15882_v63 = vld [vmem:[#allocation26_spill] sm:$0xff] }
 0x2c9   : > { %v4758_v14 = vpack.c.b16 %v4735_v17, %v4734_v42  ;;  %v3829_v4 = vadd.f32 %v14348_v30, %v3515_v40  ;;  %v12947_v30 = vld [vmem:[#allocation2 + $0x8c] sm:$0x1]  ;;  %v15867_v42 = vld [vmem:[#allocation21_spill] sm:$0xff]  ;;  %v15883_v13 = vld [vmem:[#allocation30_spill] sm:$0xff] }
 0x2cc   : > { %v14485_v28 = vpop.f32.mrf.mxu0 }
 0x2cd   : > { %15861 = vst [vmem:[#allocation63_spill] sm:$0xff] %v14485_v28  ;;  %v3510_v28 = vadd.f32 %v14269_v3, %v14284_v39  ;;  %v3513_v3 = vadd.f32 %v14324_v35, %v14322_v32  ;;  %v3514_v39 = vadd.f32 %v14337_v53, %v14335_v6  ;;  %v14521_v32 = vadd.f32 %v14235_v36, %v3821_v22 }
 0x2ce   : > { %v14524_v35 = vadd.f32 %v14255_v50, %v3822_v23  ;;  %v14527_v6 = vadd.f32 %v14277_v29, %v3823_v47  ;;  %v3517_v36 = vadd.f32 %v14375_v27, %v14362_v25  ;;  %v4484_v50 = vpop.f32.mrf.mxu3  ;;  %v4657_v29 = vrot.slane %v4655_v0, 4  ;;  %v15862_v25 = vld [vmem:[#allocation41_spill] sm:$0xff] }
 0x2cf   : > { %v3824_v31 = vadd.f32 %v14286_v41, %v3510_v28  ;;  %v3827_v41 = vadd.f32 %v14326_v5, %v3513_v3  ;;  %v3828_v9 = vadd.f32 %v14339_v61, %v3514_v39  ;;  %v14536_v5 = vadd.f32 %v14319_v21, %v3826_v46  ;;  %v3491_v46 = vpop.f32.mrf.mxu1 }
 0x2d0   : > { %v3516_v61 = vadd.f32 %v14359_v51, %v14355_v15  ;;  %v4658_v28 = vrot.slane %v12947_v30, 5  ;;  %v14549_v21 = vadd.f32 %v14357_v20, %v3829_v4  ;;  %v3831_v51 = vadd.f32 %v14377_v54, %v3517_v36  ;;  %v15870_v20 = vld [vmem:[#allocation54_spill] sm:$0xff]  ;;  %v15873_v54 = vld [vmem:[#allocation28_spill] sm:$0xff]  ;;  %v15878_v4 = vld [vmem:[#allocation55_spill] sm:$0xff] }
 0x2d1   : > { %v14530_v53 = vadd.f32 %v14291_v60, %v3824_v31  ;;  %v14543_v60 = vadd.f32 %v14328_v12, %v3827_v41  ;;  %v14546_v24 = vadd.f32 %v14344_v8, %v3828_v9  ;;  %v3518_v27 = vadd.f32 %v15862_v25, %v14373_v58  ;;  %v15868_v8 = vld [vmem:[#allocation51_spill] sm:$0xff]  ;;  %v15874_v58 = vld [vmem:[#allocation42_spill] sm:$0xff]  ;;  %v15877_v41 = vld [vmem:[#allocation52_spill] sm:$0xff] }
 0x2d2   : > { %v3830_v15 = vadd.f32 %v14364_v2, %v3516_v61  ;;  %v3520_v12 = vadd.f32 %v15866_v59, %v15865_v7  ;;  %v3521_v17 = vadd.f32 %v15868_v8, %v15867_v42  ;;  %v3522_v19 = vadd.f32 %v15870_v20, %v15869_v45  ;;  %v15872_v2 = vld [vmem:[#allocation57_spill] sm:$0xff]  ;;  %v15875_v31 = vld [vmem:[#allocation46_spill] sm:$0xff]  ;;  %v15880_v36 = vld [vmem:[#allocation24_spill] sm:$0xff] }
 0x2d3   : > { %v3523_v22 = vadd.f32 %v15872_v2, %v15871_v43  ;;  %v3103_v23 = vadd.f32 %v14466_v57, %v15873_v54  ;;  %v3832_v47 = vadd.f32 %v15874_v58, %v3518_v27  ;;  %v3833_v52 = vadd.f32 %v15875_v31, %v3519_v56  ;;  %v15879_v61 = vld [vmem:[#allocation58_spill] sm:$0xff]  ;;  %v15881_v25 = vld [vmem:[#allocation25_spill] sm:$0xff]  ;;  %v15889_v43 = vld [vmem:[#allocation44_spill] sm:$0xff] }
 0x2d4   : > { %v4839_v49 = vpop.f32.mrf.mxu0  ;;  %v4656_v39 = vsel %vm13310_vm10, %v11499_v55, %v4655_v0  ;;  %v4659_v40 = vsel %vm13310_vm10, %v4657_v29, %v4658_v28  ;;  %v3835_v9 = vadd.f32 %v15877_v41, %v3521_v17  ;;  %v3836_v34 = vadd.f32 %v15878_v4, %v3522_v19  ;;  %v3805_v55 = vpop.f32.mrf.mxu2  ;;  %v15884_v28 = vld [vmem:[#allocation27_spill] sm:$0xff]  ;;  %v15885_v42 = vld [vmem:[#allocation38_spill] sm:$0xff]  ;;  %v15896_v4 = vld [vmem:[#allocation61_spill] sm:$0xff] }
 0x2d5   : > { %v3837_v57 = vadd.f32 %v15879_v61, %v3523_v22  ;;  %v3524_v30 = vadd.f32 %v14457_v16, %v15880_v36  ;;  %v3525_v27 = vadd.f32 %v14472_v38, %v15881_v25  ;;  %v3526_v0 = vadd.f32 %v14481_v18, %v15882_v63  ;;  %v15886_v17 = vld [vmem:[#allocation39_spill] sm:$0xff]  ;;  %v15887_v16 = vld [vmem:[#allocation60_spill] sm:$0xff]  ;;  %v15888_v38 = vld [vmem:[#allocation62_spill] sm:$0xff] }
 0x2d6   : > { %v4919_v29 = vadd.f32 %v4839_v49, %v15883_v13  ;;  %v3527_v56 = vadd.f32 %v3489_v10, %v15884_v28  ;;  %v3528_v7 = vadd.f32 %v3491_v46, %v3103_v23  ;;  %v4736_v59 = vunpack.c.l.b16 %v4656_v39  ;;  %v15890_v22 = vld [vmem:[#allocation47_spill] sm:$0xff]  ;;  %v15891_v23 = vld [vmem:[#allocation50_spill] sm:$0xff]  ;;  %v4486_v58 = vpop.f32.mrf.mxu3  ;;  %v15893_v39 = vld [vmem:[#allocation53_spill] sm:$0xff] }
 0x2d7   : > { %4878 = vmatmul.bf16.gmra.mxu0 %v4758_v14  ;;  %v15876_v14 = vld [vmem:[#allocation49_spill] sm:$0xff]  ;;  %v14586_v8 = vadd.f32 %v15885_v42, %v3830_v15  ;;  %v14589_v45 = vadd.f32 %v15886_v17, %v3831_v51  ;;  %v3838_v20 = vadd.f32 %v15887_v16, %v3524_v30  ;;  %v3839_v19 = vadd.f32 %v15888_v38, %v3525_v27  ;;  %v15892_v31 = vld [vmem:[#allocation31_spill] sm:$0xff]  ;;  %v15899_v25 = vld [vmem:[#allocation32_spill] sm:$0xff] }
 0x2d8   : > { %v3834_v44 = vadd.f32 %v15876_v14, %v3520_v12  ;;  %v4737_v12 = vunpack.c.l.b16 %v4659_v40  ;;  %v14594_v18 = vadd.f32 %v15889_v43, %v3832_v47  ;;  %v3840_v49 = vadd.f32 %v14483_v1, %v3526_v0  ;;  %v15894_v14 = vld [vmem:[#allocation56_spill] sm:$0xff]  ;;  %v15895_v41 = vld [vmem:[#allocation59_spill] sm:$0xff]  ;;  %v6040_v42 = vld [vmem:[#allocation3 + $0xc] sm:$0x1] }
 0x2d9   : > { %v3841_v2 = vadd.f32 %v3803_v33, %v3527_v56  ;;  %v3842_v10 = vadd.f32 %v3805_v55, %v3528_v7  ;;  %v14598_v54 = vadd.f32 %v15890_v22, %v3833_v52  ;;  %v4983_v51 = vrot.slane %v4919_v29, 2  ;;  %v12636_v17 = vld [vmem:[#allocation9 + $0x268] sm:$0xff] }
 0x2da   : > { %v14601_v15 = vadd.f32 %v15891_v23, %v3834_v44  ;;  %v14605_v40 = vadd.f32 %v15893_v39, %v3835_v9  ;;  %v14608_v47 = vadd.f32 %v15894_v14, %v3836_v34  ;;  %v14611_v1 = vadd.f32 %v15895_v41, %v3837_v57  ;;  %6774 = vmatpush.bf16.msra.mxu2 %v12636_v17  ;;  %v14637_v22 = vld [vmem:[#allocation2 + $0x90] sm:$0xe]  ;;  %v6016_v39 = vld [vmem:[#allocation3 + $0x8] sm:$0x1] }
 0x2db   : > { %v4759_v33 = vpack.c.b16 %v4737_v12, %v4736_v59  ;;  %v14614_v52 = vadd.f32 %v15896_v4, %v3838_v20  ;;  %v14617_v44 = vadd.f32 %v14476_v11, %v3839_v19  ;;  %v4984_v61 = vrot.slane %v4919_v29, 4 }
 0x2dc   : > { %v4841_v3 = vpop.f32.mrf.mxu0  ;;  %v4985_v36 = vrot.slane %v4919_v29, 6  ;;  %v14622_v9 = vadd.f32 %v4484_v50, %v3841_v2  ;;  %v14624_v34 = vadd.f32 %v4486_v58, %v3842_v10  ;;  %v5176_v27 = vsel %vm5175_vm1, %v4919_v29, -inf }
 0x2dd   : > { %v4920_v46 = vadd.f32 %v4841_v3, %v15892_v31  ;;  %v14620_v3 = vadd.f32 %v14491_v62, %v3840_v49  ;;  %v5185_v63 = vsel %vm5175_vm1, %v4983_v51, -inf  ;;  %v3494_v62 = vpop.f32.mrf.mxu1  ;;  %v5194_v50 = vsel %vm5175_vm1, %v4984_v61, -inf }
 0x2de   : > { %15897 = vst [vmem:[#allocation41_spill] sm:$0xff] %v14622_v9  ;;  %v5203_v7 = vsel %vm5175_vm1, %v4985_v36, -inf  ;;  %v6041_v19 = vsel %vm13295_vm5, 0, %v6040_v42  ;;  %v14640_v23 = vadd.f32 %v3494_v62, %v14479_v37  ;;  %v6017_v37 = vsel %vm13268_vm7, 0, %v6016_v39 }
 0x2df   : > { %15898 = vst [vmem:[#allocation40_spill] sm:$0xff] %v14624_v34  ;;  %v4986_v0 = vrot.slane %v4920_v46, 2  ;;  %v4987_v55 = vrot.slane %v4920_v46, 4  ;;  %v4988_v59 = vrot.slane %v4920_v46, 6  ;;  %v5212_v58 = vsel %vm5175_vm1, %v4920_v46, -inf }
 0x2e0   : > { %6042 = vst [vmem:[#allocation3 + $0xc] sm:$0x1] %v6041_v19  ;;  %v11500_v46 = vrot.slane %v14637_v22, 9  ;;  %v12643_v22 = vld [vmem:[#allocation9 + $0x2a0] sm:$0xff] }
 0x2e1   : > { %v5221_v51 = vsel %vm5175_vm1, %v4986_v0, -inf  ;;  %v5230_v31 = vsel %vm5175_vm1, %v4987_v55, -inf  ;;  %v5239_v36 = vsel %vm5175_vm1, %v4988_v59, -inf  ;;  %6018 = vst [vmem:[#allocation3 + $0x8] sm:$0x1] %v6017_v37 }
 0x2e4   : > { %v4844_v30 = vpop.f32.mrf.mxu0 }
 0x2e5   : > { %v4921_v57 = vadd.f32 %v4844_v30, %v15899_v25  ;;  %v15901_v30 = vld [vmem:[#allocation33_spill] sm:$0xff] }
 0x2e7   : > { %v4989_v11 = vrot.slane %v4921_v57, 2  ;;  %v4990_v13 = vrot.slane %v4921_v57, 4  ;;  %v4991_v28 = vrot.slane %v4921_v57, 6  ;;  %v5177_v56 = vsel %vm5175_vm1, %v4921_v57, -inf  ;;  %4883 = vmatmul.bf16.gmra.mxu0 %v4759_v33  ;;  %v9921_v57 = vld [vmem:[#allocation5] sm:$0x1] }
 0x2e8   : > { %v5178_v12 = vmax.f32 %v5176_v27, %v5177_v56  ;;  %v12652_v27 = vld [vmem:[#allocation9 + $0x2e8] sm:$0xff] }
 0x2e9   : > { %v5186_v29 = vsel %vm5175_vm1, %v4989_v11, -inf  ;;  %v5195_v16 = vsel %vm5175_vm1, %v4990_v13, -inf  ;;  %v5204_v20 = vsel %vm5175_vm1, %v4991_v28, -inf  ;;  %6939 = vmatpush.bf16.msra.mxu3 %v12652_v27 }
 0x2ea   : > { %v5179_v43 = vrot.slane %v5178_v12, 4  ;;  %v5187_v49 = vmax.f32 %v5185_v63, %v5186_v29  ;;  %v5196_v2 = vmax.f32 %v5194_v50, %v5195_v16  ;;  %v5205_v10 = vmax.f32 %v5203_v7, %v5204_v20 }
 0x2ec   : > { %v5180_v14 = vmax.f32 %v5178_v12, %v5179_v43  ;;  %v5188_v41 = vrot.slane %v5187_v49, 4  ;;  %v5197_v33 = vrot.slane %v5196_v2, 4  ;;  %v5206_v4 = vrot.slane %v5205_v10, 4  ;;  %v4846_v61 = vpop.f32.mrf.mxu0 }
 0x2ed   : > { %v4922_v25 = vadd.f32 %v4846_v61, %v15901_v30 }
 0x2ee   : > { %v5181_v63 = vrot.slane %v5180_v14, 2  ;;  %v5189_v0 = vmax.f32 %v5187_v49, %v5188_v41  ;;  %v5198_v11 = vmax.f32 %v5196_v2, %v5197_v33  ;;  %v5207_v55 = vmax.f32 %v5205_v10, %v5206_v4  ;;  %v14654_v2 = vld [vmem:[#allocation11] ss:$0 sm:$0xff] }
 0x2ef   : > { %v4992_v13 = vrot.slane %v4922_v25, 2  ;;  %v4993_v28 = vrot.slane %v4922_v25, 4  ;;  %v4994_v56 = vrot.slane %v4922_v25, 6  ;;  %v5213_v62 = vsel %vm5175_vm1, %v4922_v25, -inf }
 0x2f0   : > { %v5182_v50 = vmax.f32 %v5180_v14, %v5181_v63  ;;  %v5190_v7 = vrot.slane %v5189_v0, 2  ;;  %v5199_v59 = vrot.slane %v5198_v11, 2  ;;  %v5208_v12 = vrot.slane %v5207_v55, 2 }
 0x2f1   : > { %v5214_v42 = vmax.f32 %v5212_v58, %v5213_v62  ;;  %v5222_v17 = vsel %vm5175_vm1, %v4992_v13, -inf  ;;  %v5231_v29 = vsel %vm5175_vm1, %v4993_v28, -inf  ;;  %v5240_v16 = vsel %vm5175_vm1, %v4994_v56, -inf  ;;  %v12644_v28 = vld [vmem:[#allocation9 + $0x2a8] sm:$0xff] }
 0x2f2   : > { %v5183_v20 = vrot.slane %v5182_v50, 1  ;;  %v5191_v19 = vmax.f32 %v5189_v0, %v5190_v7  ;;  %v5200_v43 = vmax.f32 %v5198_v11, %v5199_v59  ;;  %v5209_v49 = vmax.f32 %v5207_v55, %v5208_v12  ;;  %6673 = vmatpush.bf16.msra.mxu1 %v12644_v28 }
 0x2f3   : > { %v5215_v10 = vrot.slane %v5214_v42, 4  ;;  %v5223_v39 = vmax.f32 %v5221_v51, %v5222_v17  ;;  %v5232_v41 = vmax.f32 %v5230_v31, %v5231_v29  ;;  %v5241_v14 = vmax.f32 %v5239_v36, %v5240_v16 }
 0x2f4   : > { %v5184_v33 = vmax.f32 %v5182_v50, %v5183_v20  ;;  %v5192_v4 = vrot.slane %v5191_v19, 1  ;;  %v5201_v61 = vrot.slane %v5200_v43, 1  ;;  %v5210_v58 = vrot.slane %v5209_v49, 1  ;;  %v14656_v63 = vpop.f32.mrf.mxu0 }
 0x2f5   : > { %v5216_v30 = vmax.f32 %v5214_v42, %v5215_v10  ;;  %v5224_v25 = vrot.slane %v5223_v39, 4  ;;  %v5233_v37 = vrot.slane %v5232_v41, 4  ;;  %v5242_v27 = vrot.slane %v5241_v14, 4 }
 0x2f6   : > { %v5193_v13 = vmax.f32 %v5191_v19, %v5192_v4  ;;  %v5202_v0 = vmax.f32 %v5200_v43, %v5201_v61  ;;  %v5211_v11 = vmax.f32 %v5209_v49, %v5210_v58  ;;  %v5754_v55 = vadd.f32 %v14654_v2, %v5184_v33  ;;  %6674 = vmatpush.bf16.msra.mxu1 %v12643_v22 }
 0x2f7   : > { %v5217_v56 = vrot.slane %v5216_v30, 2  ;;  %v5225_v51 = vmax.f32 %v5223_v39, %v5224_v25  ;;  %v5234_v31 = vmax.f32 %v5232_v41, %v5233_v37  ;;  %v5243_v36 = vmax.f32 %v5241_v14, %v5242_v27 }
 0x2f8   : > { %v5755_v62 = vadd.f32 %v14654_v2, %v5193_v13  ;;  %v5756_v50 = vadd.f32 %v14654_v2, %v5202_v0  ;;  %v5757_v7 = vadd.f32 %v14654_v2, %v5211_v11  ;;  %vm5818_vm4 = vcmp.gt.f32.partialorder %v5754_v55, 0.0 }
 0x2f9   : > { %v5882_v59 = vmul.f32 0.01, %v5754_v55  ;;  %v5218_v12 = vmax.f32 %v5216_v30, %v5217_v56  ;;  %v5226_v42 = vrot.slane %v5225_v51, 2  ;;  %v5235_v17 = vrot.slane %v5234_v31, 2 }
 0x2fa   : > { %vm5819_vm13 = vcmp.gt.f32.partialorder %v5755_v62, 0.0  ;;  %vm5820_vm14 = vcmp.gt.f32.partialorder %v5756_v50, 0.0  ;;  %vm5821_vm9 = vcmp.gt.f32.partialorder %v5757_v7, 0.0  ;;  %v5883_v29 = vmul.f32 0.01, %v5755_v62 }
 0x2fb   : > { %v5884_v16 = vmul.f32 0.01, %v5756_v50  ;;  %v5885_v20 = vmul.f32 0.01, %v5757_v7  ;;  %v5946_v19 = vsel %vm5818_vm4, %v5754_v55, %v5882_v59  ;;  %v5219_v43 = vrot.slane %v5218_v12, 1 }
 0x2fc   : > { %v5947_v49 = vsel %vm5819_vm13, %v5755_v62, %v5883_v29  ;;  %v6064_v10 = vpack.c.bf16 %v5946_v19, %v5946_v19  ;;  %v5227_v39 = vmax.f32 %v5225_v51, %v5226_v42  ;;  %v5236_v41 = vmax.f32 %v5234_v31, %v5235_v17  ;;  %v14663_v28 = vpop.f32.mrf.mxu0  ;;  %v14666_v17 = vld [vmem:[#allocation2 + $0x94] sm:$0xf] }
 0x2fd   : > { %v5948_v14 = vsel %vm5820_vm14, %v5756_v50, %v5884_v16  ;;  %v5949_v33 = vsel %vm5821_vm9, %v5757_v7, %v5885_v20  ;;  %v6065_v4 = vpack.c.bf16 %v5947_v49, %v5947_v49  ;;  %v5220_v61 = vmax.f32 %v5218_v12, %v5219_v43 }
 0x2fe   : > { %v6066_v58 = vpack.c.bf16 %v5948_v14, %v5948_v14  ;;  %v6067_v30 = vpack.c.bf16 %v5949_v33, %v5949_v33  ;;  %v6192_v25 = vunpack.c.l.b16 %v6064_v10  ;;  %v5228_v37 = vrot.slane %v5227_v39, 1 }
 0x2ff   : > { %v6193_v27 = vunpack.c.l.b16 %v6065_v4  ;;  %v5237_v13 = vrot.slane %v5236_v41, 1  ;;  %v5244_v0 = vrot.slane %v5243_v36, 2  ;;  %v5758_v11 = vadd.f32 %v14654_v2, %v5220_v61 }
 0x300   : > { %v6194_v55 = vunpack.c.l.b16 %v6066_v58  ;;  %v6195_v56 = vunpack.c.l.b16 %v6067_v30  ;;  %v6256_v62 = vrot.slane %v6192_v25, 7  ;;  %v5229_v51 = vmax.f32 %v5227_v39, %v5228_v37  ;;  %v8493_v39 = vld [vmem:[#allocation4] sm:$0x7] }
 0x301   : > { %v6257_v31 = vrot.slane %v6193_v27, 6  ;;  %v5238_v50 = vmax.f32 %v5236_v41, %v5237_v13  ;;  %v5245_v7 = vmax.f32 %v5243_v36, %v5244_v0  ;;  %vm5822_vm4 = vcmp.gt.f32.partialorder %v5758_v11, 0.0  ;;  %v12635_v58 = vld [vmem:[#allocation9 + $0x260] sm:$0xff] }
 0x302   : > { %v6260_v59 = vrot.slane %v6194_v55, 5  ;;  %v5759_v12 = vadd.f32 %v14654_v2, %v5229_v51  ;;  %v5886_v42 = vmul.f32 0.01, %v5758_v11  ;;  %v4662_v29 = vrot.slane %v14666_v17, 5  ;;  %6775 = vmatpush.bf16.msra.mxu2 %v12635_v58  ;;  %v4537_v17 = vld [vmem:[#allocation2 + $0x9c] sm:$0xe] }
 0x303   : > { %v6259_v16 = vsel %vm6258_vm2, %v6257_v31, %v6256_v62  ;;  %v6263_v20 = vrot.slane %v6195_v56, 4  ;;  %v5246_v19 = vrot.slane %v5245_v7, 1  ;;  %v5760_v43 = vadd.f32 %v14654_v2, %v5238_v50 }
 0x304   : > { %v6262_v49 = vsel %vm15775_vm11, %v6260_v59, %v6259_v16  ;;  %vm5823_vm13 = vcmp.gt.f32.partialorder %v5759_v12, 0.0  ;;  %v5887_v10 = vmul.f32 0.01, %v5759_v12  ;;  %v5950_v36 = vsel %vm5822_vm4, %v5758_v11, %v5886_v42  ;;  %v14674_v56 = vpop.f32.mrf.mxu0  ;;  %v12651_v16 = vld [vmem:[#allocation9 + $0x2e0] sm:$0xff] }
 0x305   : > { %v6265_v41 = vsel %vm15776_vm3, %v6263_v20, %v6262_v49  ;;  %v5247_v14 = vmax.f32 %v5245_v7, %v5246_v19  ;;  %vm5824_vm14 = vcmp.gt.f32.partialorder %v5760_v43, 0.0  ;;  %v5888_v33 = vmul.f32 0.01, %v5760_v43  ;;  %v12634_v7 = vld [vmem:[#allocation9 + $0x258] sm:$0xff]  ;;  %v12949_v49 = vld [vmem:[#allocation2 + $0x98] sm:$0x1]  ;;  %6940 = vmatpush.bf16.msra.mxu3 %v12651_v16 }
 0x306   : > { %v5951_v4 = vsel %vm5823_vm13, %v5759_v12, %v5887_v10  ;;  %v6068_v61 = vpack.c.bf16 %v5950_v36, %v5950_v36  ;;  %vm6267_vm9 = vcmask 1045509   ;;  %v8501_v27 = vrot.slane %v8493_v39, 2  ;;  %6776 = vmatpush.bf16.msra.mxu2 %v12634_v7  ;;  %v3808_v36 = vpop.f32.mrf.mxu2 }
 0x307   : > { %v5761_v30 = vadd.f32 %v14654_v2, %v5247_v14  ;;  %v5952_v25 = vsel %vm5824_vm14, %v5760_v43, %v5888_v33  ;;  %v6069_v37 = vpack.c.bf16 %v5951_v4, %v5951_v4  ;;  %vm15779_vm4 = vcmask 1043458  }
 0x308   : > { %v6070_v13 = vpack.c.bf16 %v5952_v25, %v5952_v25  ;;  %v6196_v0 = vunpack.c.l.b16 %v6068_v61  ;;  %vm8530_vm3 = vsmask.f32 1280  ;;  %v8507_v31 = vsel %vm5175_vm1, %v8493_v39, %v8501_v27 }
 0x309   : > { %vm5825_vm11 = vcmp.gt.f32.partialorder %v5761_v30, 0.0  ;;  %v5889_v11 = vmul.f32 0.01, %v5761_v30  ;;  %v6197_v55 = vunpack.c.l.b16 %v6069_v37  ;;  %v8509_v50 = vsel %vm15779_vm4, %v8493_v39, %v8501_v27  ;;  %v12633_v27 = vld [vmem:[#allocation9 + $0x250] sm:$0xff] }
 0x30a   : > { %v6198_v62 = vunpack.c.l.b16 %v6070_v13  ;;  %v6266_v51 = vrot.slane %v6196_v0, 3  ;;  %v8511_v42 = vrot.slane %v8509_v50, 2  ;;  %vm8531_vm13 = vsmask.f32 3336  ;;  %v6401_v0 = vld [vmem:[#allocation3 + $0xc] sm:$0x1]  ;;  %6777 = vmatpush.bf16.msra.mxu2 %v12633_v27 }
 0x30b   : > { %v5953_v59 = vsel %vm5825_vm11, %v5761_v30, %v5889_v11  ;;  %v6269_v12 = vrot.slane %v6197_v55, 2  ;;  %v4665_v10 = vrot.slane %v12949_v49, 5  ;;  %v8537_v33 = vshrl.u32 %v8507_v31, 16  ;;  %v6398_v30 = vld [vmem:[#allocation3 + $0x8] sm:$0xf]  ;;  %vm14683_vm11 = vmor %vm8530_vm3, %vm8531_vm13 }
 0x30c   : > { %v6071_v20 = vpack.c.bf16 %v5953_v59, %v5953_v59  ;;  %v6268_v19 = vsel %vm6267_vm9, %v6266_v51, %v6265_v41  ;;  %v6272_v43 = vrot.slane %v6198_v62, 1  ;;  %v8540_v4 = vshll.u32 %v8507_v31, 16  ;;  %v15905_v41 = vld [vmem:[#allocation34_spill] sm:$0xff] }
 0x30d   : > { %v6271_v14 = vsel %vm6270_vm0, %v6269_v12, %v6268_v19  ;;  %v8546_v61 = vshll.u32 %v8511_v42, 16  ;;  %vm8533_vm14 = vsmask.f32 5392  ;;  %v4923_v37 = vadd.f32 %v14656_v63, %v15905_v41  ;;  %v12650_v51 = vld [vmem:[#allocation9 + $0x2d8] sm:$0xff]  ;;  %v15916_v42 = vld [vmem:[#allocation37_spill] sm:$0xff] }
 0x30e   : > { %v6199_v39 = vunpack.c.l.b16 %v6071_v20  ;;  %v6274_v58 = vsel %vm15780_vm12, %v6272_v43, %v6271_v14  ;;  %v8539_v11 = vrot.slane %v8537_v33, 6  ;;  %v8542_v55 = vrot.slane %v8540_v4, 7  ;;  %vm14705_vm3 = vmor %vm14683_vm11, %vm8533_vm14  ;;  %6941 = vmatpush.bf16.msra.mxu3 %v12650_v51  ;;  %v15909_v20 = vld [vmem:[#allocation29_spill] sm:$0xff]  ;;  %v15910_v19 = vld [vmem:[#allocation63_spill] sm:$0xff] }
 0x30f   : > { %v6366_v13 = vpack.c.b16 %v6274_v58, %v6274_v58  ;;  %v4664_v62 = vrot.slane %v4662_v29, 4  ;;  %v14692_v31 = vadd.f32 %v3808_v36, %v14640_v23  ;;  %v4995_v7 = vrot.slane %v4923_v37, 2  ;;  %v12632_v36 = vld [vmem:[#allocation9 + $0x248] sm:$0xff]  ;;  %v12950_v51 = vld [vmem:[#allocation2 + $0xa0] sm:$0xf] }
 0x310   : > { %v6367_v50 = vpack.c.b16 %v6199_v39, %v6199_v39  ;;  %v4663_v63 = vsel %vm13310_vm10, %v11500_v46, %v4662_v29  ;;  %vm8535_vm13 = vsmask.f32 7448  ;;  %v8543_v23 = vor.u32 %v8542_v55, %v8539_v11  ;;  %v4856_v39 = vpop.f32.mrf.mxu0  ;;  %6778 = vmatpush.bf16.msra.mxu2 %v12632_v36 }
 0x311   : > { %v6399_v12 = vsel %vm13325_vm6, %v6366_v13, %v6398_v30  ;;  %v8548_v16 = vrot.slane %v8546_v61, 7  ;;  %v14711_v46 = vadd.f32 %v15910_v19, %v15909_v20  ;;  %v4996_v43 = vrot.slane %v4923_v37, 4  ;;  %vm14722_vm11 = vmor %vm14705_vm3, %vm8535_vm13 }
 0x312   : > { %6400 = vst [vmem:[#allocation3 + $0x8] sm:$0xf] %v6399_v12  ;;  %v6402_v29 = vsel %vm13268_vm7, %v6367_v50, %v6401_v0  ;;  %v4997_v49 = vrot.slane %v4923_v37, 6  ;;  %v8544_v14 = vrot.slane %v8543_v23, 2  ;;  %v5248_v33 = vsel %vm5175_vm1, %v4923_v37, -inf  ;;  %v15915_v0 = vld [vmem:[#allocation36_spill] sm:$0xff] }
 0x313   : > { %6403 = vst [vmem:[#allocation3 + $0xc] sm:$0x1] %v6402_v29  ;;  %v5257_v4 = vsel %vm5175_vm1, %v4995_v7, -inf  ;;  %v4666_v61 = vsel %vm13310_vm10, %v4664_v62, %v4665_v10  ;;  %v15911_v58 = vmov 0  ;;  %v5266_v30 = vsel %vm5175_vm1, %v4996_v43, -inf  ;;  %v15914_v10 = vld [vmem:[#allocation35_spill] sm:$0xff] }
 0x314   : > { %v15912_v58 = vsel %vm14722_vm11, 4294967295, %v15911_v58  ;;  %v5275_v25 = vsel %vm5175_vm1, %v4997_v49, -inf  ;;  %v4738_v41 = vunpack.c.l.b16 %v4663_v63  ;;  %v4739_v37 = vunpack.c.l.b16 %v4666_v61  ;;  %v12951_v7 = vld [vmem:[#allocation2 + $0xa4] sm:$0x1]  ;;  %v12649_v23 = vld [vmem:[#allocation9 + $0x2d0] sm:$0xff] }
 0x315   : > { %15913 = vst [vmem:[#allocation45_spill] sm:$0xff] %v15912_v58  ;;  %v8549_v27 = vsel %vm14722_vm11, %v8544_v14, %v8548_v16  ;;  %v4924_v13 = vadd.f32 %v14663_v28, %v15914_v10  ;;  %v4925_v11 = vadd.f32 %v14674_v56, %v15915_v0  ;;  %v11501_v55 = vrot.slane %v4537_v17, 9  ;;  %6942 = vmatpush.bf16.msra.mxu3 %v12649_v23  ;;  %v12642_v43 = vld [vmem:[#allocation9 + $0x298] sm:$0xff] }
 0x316   : > { %8606 = vst [vmem:[#allocation1] ss:$4 sm:$0xff] %v8549_v27  ;;  %v4760_v62 = vpack.c.b16 %v4739_v37, %v4738_v41  ;;  %v4669_v50 = vrot.slane %v12950_v51, 5  ;;  %v4672_v12 = vrot.slane %v12951_v7, 5  ;;  %v14735_v63 = vadd.f32 %v4856_v39, %v15916_v42  ;;  %6675 = vmatpush.bf16.msra.mxu1 %v12642_v43 }
 0x317   : > { %v4998_v22 = vrot.slane %v4924_v13, 2  ;;  %v4999_v20 = vrot.slane %v4924_v13, 4  ;;  %v5000_v16 = vrot.slane %v4924_v13, 6  ;;  %v5284_v19 = vsel %vm5175_vm1, %v4924_v13, -inf }
 0x318   : > { %4888 = vmatmul.bf16.gmra.mxu0 %v4760_v62  ;;  %v5001_v28 = vrot.slane %v4925_v11, 2  ;;  %v5002_v29 = vrot.slane %v4925_v11, 4  ;;  %v5003_v56 = vrot.slane %v4925_v11, 6  ;;  %v5249_v17 = vsel %vm5175_vm1, %v4925_v11, -inf }
 0x319   : > { %v5293_v49 = vsel %vm5175_vm1, %v4998_v22, -inf  ;;  %v5302_v36 = vsel %vm5175_vm1, %v4999_v20, -inf  ;;  %v5311_v14 = vsel %vm5175_vm1, %v5000_v16, -inf  ;;  %v5250_v61 = vmax.f32 %v5248_v33, %v5249_v17 }
 0x31a   : > { %v5258_v39 = vsel %vm5175_vm1, %v5001_v28, -inf  ;;  %v5267_v41 = vsel %vm5175_vm1, %v5002_v29, -inf  ;;  %v5276_v37 = vsel %vm5175_vm1, %v5003_v56, -inf  ;;  %v4670_v27 = vsel %vm13310_vm10, %v11501_v55, %v4669_v50 }
 0x31b   : > { %v5251_v10 = vrot.slane %v5250_v61, 4  ;;  %v5259_v13 = vmax.f32 %v5257_v4, %v5258_v39  ;;  %v5268_v0 = vmax.f32 %v5266_v30, %v5267_v41  ;;  %v5277_v11 = vmax.f32 %v5275_v25, %v5276_v37 }
 0x31c   : > { %v4671_v62 = vrot.slane %v4669_v50, 4  ;;  %v4740_v51 = vunpack.c.l.b16 %v4670_v27  ;;  %v5004_v7 = vrot.slane %v14735_v63, 2  ;;  %v5005_v33 = vrot.slane %v14735_v63, 4 }
 0x31d   : > { %v5252_v42 = vmax.f32 %v5250_v61, %v5251_v10  ;;  %v5260_v23 = vrot.slane %v5259_v13, 4  ;;  %v5269_v22 = vrot.slane %v5268_v0, 4  ;;  %v5278_v20 = vrot.slane %v5277_v11, 4 }
 0x31e   : > { %v4673_v16 = vsel %vm13310_vm10, %v4671_v62, %v4672_v12  ;;  %v5006_v55 = vrot.slane %v14735_v63, 6  ;;  %v5285_v4 = vsel %vm5175_vm1, %v14735_v63, -inf  ;;  %v5294_v30 = vsel %vm5175_vm1, %v5004_v7, -inf  ;;  %v12631_v63 = vld [vmem:[#allocation9 + $0x240] sm:$0xff] }
 0x31f   : > { %v5253_v25 = vrot.slane %v5252_v42, 2  ;;  %v5261_v50 = vmax.f32 %v5259_v13, %v5260_v23  ;;  %v5270_v28 = vmax.f32 %v5268_v0, %v5269_v22  ;;  %v5279_v29 = vmax.f32 %v5277_v11, %v5278_v20  ;;  %v12648_v0 = vld [vmem:[#allocation9 + $0x2c8] sm:$0xff]  ;;  %6779 = vmatpush.bf16.msra.mxu2 %v12631_v63 }
 0x320   : > { %v4741_v56 = vunpack.c.l.b16 %v4673_v16  ;;  %v5286_v17 = vmax.f32 %v5284_v19, %v5285_v4  ;;  %v5295_v43 = vmax.f32 %v5293_v49, %v5294_v30  ;;  %v5303_v61 = vsel %vm5175_vm1, %v5005_v33, -inf  ;;  %v12641_v33 = vld [vmem:[#allocation9 + $0x290] sm:$0xff]  ;;  %6943 = vmatpush.bf16.msra.mxu3 %v12648_v0  ;;  %v12647_v16 = vld [vmem:[#allocation9 + $0x2c0] sm:$0xff] }
 0x321   : > { %v5254_v39 = vmax.f32 %v5252_v42, %v5253_v25  ;;  %v5262_v41 = vrot.slane %v5261_v50, 2  ;;  %v5271_v37 = vrot.slane %v5270_v28, 2  ;;  %v5280_v12 = vrot.slane %v5279_v29, 2  ;;  %6676 = vmatpush.bf16.msra.mxu1 %v12641_v33 }
 0x322   : > { %v4761_v27 = vpack.c.b16 %v4741_v56, %v4740_v51  ;;  %v5287_v10 = vrot.slane %v5286_v17, 4  ;;  %v5296_v62 = vrot.slane %v5295_v43, 4  ;;  %v5304_v58 = vmax.f32 %v5302_v36, %v5303_v61 }
 0x323   : > { %v5255_v34 = vrot.slane %v5254_v39, 1  ;;  %v5263_v7 = vmax.f32 %v5261_v50, %v5262_v41  ;;  %v5272_v9 = vmax.f32 %v5270_v28, %v5271_v37  ;;  %v5281_v13 = vmax.f32 %v5279_v29, %v5280_v12  ;;  %v14757_v50 = vpop.f32.mrf.mxu0  ;;  %v12640_v28 = vld [vmem:[#allocation9 + $0x288] sm:$0xff] }
 0x324   : > { %v5288_v11 = vmax.f32 %v5286_v17, %v5287_v10  ;;  %v5297_v23 = vmax.f32 %v5295_v43, %v5296_v62  ;;  %v5305_v19 = vrot.slane %v5304_v58, 4  ;;  %v5312_v49 = vsel %vm5175_vm1, %v5006_v55, -inf  ;;  %6944 = vmatpush.bf16.msra.mxu3 %v12647_v16  ;;  %v12639_v62 = vld [vmem:[#allocation9 + $0x280] sm:$0xff] }
 0x325   : > { %v5256_v42 = vmax.f32 %v5254_v39, %v5255_v34  ;;  %v5264_v22 = vrot.slane %v5263_v7, 1  ;;  %v5273_v20 = vrot.slane %v5272_v9, 1  ;;  %v5282_v51 = vrot.slane %v5281_v13, 1  ;;  %6677 = vmatpush.bf16.msra.mxu1 %v12640_v28 }
 0x326   : > { %v5289_v36 = vrot.slane %v5288_v11, 2  ;;  %v5298_v4 = vrot.slane %v5297_v23, 2  ;;  %v5306_v30 = vmax.f32 %v5304_v58, %v5305_v19  ;;  %v5313_v25 = vmax.f32 %v5311_v14, %v5312_v49 }
 0x327   : > { %v5265_v29 = vmax.f32 %v5263_v7, %v5264_v22  ;;  %v5274_v56 = vmax.f32 %v5272_v9, %v5273_v20  ;;  %v5283_v17 = vmax.f32 %v5281_v13, %v5282_v51  ;;  %v5762_v55 = vadd.f32 %v14654_v2, %v5256_v42 }
 0x328   : > { %4893 = vmatmul.bf16.gmra.mxu0 %v4761_v27  ;;  %v5290_v34 = vmax.f32 %v5288_v11, %v5289_v36  ;;  %v5299_v43 = vmax.f32 %v5297_v23, %v5298_v4  ;;  %v5307_v61 = vrot.slane %v5306_v30, 2  ;;  %v5314_v39 = vrot.slane %v5313_v25, 4 }
 0x329   : > { %v5763_v41 = vadd.f32 %v14654_v2, %v5265_v29  ;;  %v5764_v37 = vadd.f32 %v14654_v2, %v5274_v56  ;;  %v5765_v58 = vadd.f32 %v14654_v2, %v5283_v17  ;;  %vm5826_vm14 = vcmp.gt.f32.partialorder %v5762_v55, 0.0  ;;  %6678 = vmatpush.bf16.msra.mxu1 %v12639_v62 }
 0x32a   : > { %v5890_v14 = vmul.f32 0.01, %v5762_v55  ;;  %v5291_v12 = vrot.slane %v5290_v34, 1  ;;  %v5300_v10 = vrot.slane %v5299_v43, 1  ;;  %v5308_v9 = vmax.f32 %v5306_v30, %v5307_v61 }
 0x32b   : > { %vm5827_vm3 = vcmp.gt.f32.partialorder %v5763_v41, 0.0  ;;  %vm5828_vm13 = vcmp.gt.f32.partialorder %v5764_v37, 0.0  ;;  %vm5829_vm4 = vcmp.gt.f32.partialorder %v5765_v58, 0.0  ;;  %v5891_v27 = vmul.f32 0.01, %v5763_v41  ;;  %v14765_v17 = vpop.f32.mrf.mxu0 }
 0x32c   : > { %v5892_v63 = vmul.f32 0.01, %v5764_v37  ;;  %v5893_v7 = vmul.f32 0.01, %v5765_v58  ;;  %v5954_v13 = vsel %vm5826_vm14, %v5762_v55, %v5890_v14  ;;  %v5292_v0 = vmax.f32 %v5290_v34, %v5291_v12 }
 0x32d   : > { %v5955_v11 = vsel %vm5827_vm3, %v5763_v41, %v5891_v27  ;;  %v6072_v23 = vpack.c.bf16 %v5954_v13, %v5954_v13  ;;  %v5301_v19 = vmax.f32 %v5299_v43, %v5300_v10  ;;  %v5309_v49 = vrot.slane %v5308_v9, 1  ;;  %v6019_v41 = vld [vmem:[#allocation3 + $0x10] sm:$0x1] }
 0x32e   : > { %v5956_v33 = vsel %vm5828_vm13, %v5764_v37, %v5892_v63  ;;  %v5957_v42 = vsel %vm5829_vm4, %v5765_v58, %v5893_v7  ;;  %v6073_v22 = vpack.c.bf16 %v5955_v11, %v5955_v11  ;;  %v5315_v20 = vmax.f32 %v5313_v25, %v5314_v39  ;;  %v6043_v37 = vld [vmem:[#allocation3 + $0x14] sm:$0x1]  ;;  %v4538_v11 = vld [vmem:[#allocation2 + $0xa8] sm:$0xe] }
 0x32f   : > { %v6074_v51 = vpack.c.bf16 %v5956_v33, %v5956_v33  ;;  %v6075_v16 = vpack.c.bf16 %v5957_v42, %v5957_v42  ;;  %v6200_v36 = vunpack.c.l.b16 %v6072_v23  ;;  %v5310_v4 = vmax.f32 %v5308_v9, %v5309_v49 }
 0x330   : > { %v6201_v30 = vunpack.c.l.b16 %v6073_v22  ;;  %v5316_v28 = vrot.slane %v5315_v20, 2  ;;  %v5766_v29 = vadd.f32 %v14654_v2, %v5292_v0  ;;  %v5767_v56 = vadd.f32 %v14654_v2, %v5301_v19 }
 0x331   : > { %v6202_v55 = vunpack.c.l.b16 %v6074_v51  ;;  %v6203_v34 = vunpack.c.l.b16 %v6075_v16  ;;  %v6275_v43 = vrot.slane %v6200_v36, 7  ;;  %v5768_v61 = vadd.f32 %v14654_v2, %v5310_v4  ;;  %v12952_v4 = vld [vmem:[#allocation2 + $0xac] sm:$0xf] }
 0x332   : > { %v6276_v25 = vrot.slane %v6201_v30, 6  ;;  %v5317_v39 = vmax.f32 %v5315_v20, %v5316_v28  ;;  %vm5830_vm4 = vcmp.gt.f32.partialorder %v5766_v29, 0.0  ;;  %vm5831_vm14 = vcmp.gt.f32.partialorder %v5767_v56, 0.0  ;;  %v12953_v28 = vld [vmem:[#allocation2 + $0xb0] sm:$0x1] }
 0x333   : > { %v6278_v58 = vrot.slane %v6202_v55, 5  ;;  %v6280_v14 = vrot.slane %v6203_v34, 4  ;;  %vm5832_vm3 = vcmp.gt.f32.partialorder %v5768_v61, 0.0  ;;  %v5894_v12 = vmul.f32 0.01, %v5766_v29 }
 0x334   : > { %v6277_v10 = vsel %vm6258_vm2, %v6276_v25, %v6275_v43  ;;  %v5318_v9 = vrot.slane %v5317_v39, 1  ;;  %v5895_v27 = vmul.f32 0.01, %v5767_v56  ;;  %v5896_v62 = vmul.f32 0.01, %v5768_v61 }
 0x335   : > { %vm15917_vm13 = vcmask 1043459   ;;  %v5958_v7 = vsel %vm5830_vm4, %v5766_v29, %v5894_v12  ;;  %v6020_v13 = vsel %vm13268_vm7, 0, %v6019_v41  ;;  %v6044_v0 = vsel %vm13295_vm5, 0, %v6043_v37  ;;  %v4864_v37 = vpop.f32.mrf.mxu0  ;;  %v12627_v12 = vld [vmem:[#allocation3 + $0x4] sm:$0xf0] }
 0x336   : > { %v6279_v63 = vsel %vm15917_vm13, %v6278_v58, %v6277_v10  ;;  %vm15918_vm12 = vcmask 1044484   ;;  %v5319_v19 = vmax.f32 %v5317_v39, %v5318_v9  ;;  %v5959_v49 = vsel %vm5831_vm14, %v5767_v56, %v5895_v27  ;;  %6021 = vst [vmem:[#allocation3 + $0x10] sm:$0x1] %v6020_v13 }
 0x337   : > { %v6281_v23 = vsel %vm15918_vm12, %v6280_v14, %v6279_v63  ;;  %v5960_v33 = vsel %vm5832_vm3, %v5768_v61, %v5896_v62  ;;  %6045 = vst [vmem:[#allocation3 + $0x14] sm:$0x1] %v6044_v0  ;;  %v6076_v42 = vpack.c.bf16 %v5958_v7, %v5958_v7  ;;  %v6077_v22 = vpack.c.bf16 %v5959_v49, %v5959_v49  ;;  %v11572_v61 = vld [vmem:[#allocation3] sm:$0xf] }
 0x338   : > { %v6078_v20 = vpack.c.bf16 %v5960_v33, %v5960_v33  ;;  %v4927_v51 = vadd.f32 %v14757_v50, %v14521_v32  ;;  %v5769_v16 = vadd.f32 %v14654_v2, %v5319_v19  ;;  %v11502_v36 = vrot.slane %v4538_v11, 9  ;;  %v6801_v63 = vld [vmem:[#allocation3] sm:$0xe] }
 0x339   : > { %v4676_v30 = vrot.slane %v12952_v4, 5  ;;  %v4679_v29 = vrot.slane %v12953_v28, 5  ;;  %v6204_v55 = vunpack.c.l.b16 %v6076_v42  ;;  %v6205_v34 = vunpack.c.l.b16 %v6077_v22  ;;  %v6471_v22 = vld [vmem:[#allocation3 + $0x4] sm:$0x1] }
 0x33a   : > { %v6206_v43 = vunpack.c.l.b16 %v6078_v20  ;;  %v5007_v56 = vrot.slane %v4927_v51, 2  ;;  %vm5833_vm12 = vcmp.gt.f32.partialorder %v5769_v16, 0.0  ;;  %v5897_v41 = vmul.f32 0.01, %v5769_v16 }
 0x33b   : > { %v5008_v25 = vrot.slane %v4927_v51, 4  ;;  %v5009_v39 = vrot.slane %v4927_v51, 6  ;;  %v6282_v58 = vrot.slane %v6204_v55, 3  ;;  %v6284_v14 = vrot.slane %v6205_v34, 2 }
 0x33c   : > { %v6286_v32 = vrot.slane %v6206_v43, 1  ;;  %v14780_v50 = vsel %vm5175_vm1, %v4927_v51, -inf  ;;  %v5961_v10 = vsel %vm5833_vm12, %v5769_v16, %v5897_v41  ;;  %v14783_v9 = vsel %vm5175_vm1, %v5007_v56, -inf  ;;  %v6802_v56 = vld [vmem:[#allocation3 + $0x8] sm:$0xe] }
 0x33d   : > { %v14786_v27 = vsel %vm5175_vm1, %v5008_v25, -inf  ;;  %v14789_v62 = vsel %vm5175_vm1, %v5009_v39, -inf  ;;  %v6079_v7 = vpack.c.bf16 %v5961_v10, %v5961_v10  ;;  %v6283_v13 = vsel %vm6267_vm9, %v6282_v58, %v6281_v23  ;;  %v6404_v16 = vld [vmem:[#allocation3 + $0x10] sm:$0xf]  ;;  %v14800_v23 = vld [vmem:[#allocation3 + $0xc] sm:$0x1] }
 0x33e   : > { %v4677_v0 = vsel %vm13310_vm10, %v11502_v36, %v4676_v30  ;;  %v4678_v11 = vrot.slane %v4676_v30, 4  ;;  %v6285_v19 = vsel %vm6270_vm0, %v6284_v14, %v6283_v13  ;;  %v11573_v33 = vor.u32 %v12627_v12, %v11572_v61  ;;  %v6407_v30 = vld [vmem:[#allocation3 + $0x14] sm:$0x1]  ;;  %v6446_v25 = vld [vmem:[#allocation3] sm:$0xf] }
 0x33f   : > { %v4742_v49 = vunpack.c.l.b16 %v4677_v0  ;;  %v4928_v42 = vadd.f32 %v14765_v17, %v14524_v35  ;;  %v6207_v20 = vunpack.c.l.b16 %v6079_v7  ;;  %vm15919_vm4 = vcmask 1047559  }
 0x340   : > { %v6287_v51 = vsel %vm15919_vm4, %v6286_v32, %v6285_v19  ;;  %v4680_v4 = vsel %vm13310_vm10, %v4678_v11, %v4679_v29  ;;  %v11618_v28 = vrot.slane %v6801_v63, 9  ;;  %6780 = vmatmul.bf16.vlgmr.msra.gmra.mxu2 %v11573_v33  ;;  %v6827_v41 = vrot.slane %v6471_v22, 5  ;;  %v6447_v32 = vld [vmem:[#allocation3 + $0x8] sm:$0xf] }
 0x341   : > { %v6368_v36 = vpack.c.b16 %v6287_v51, %v6287_v51  ;;  %v4743_v55 = vunpack.c.l.b16 %v4680_v4  ;;  %v5010_v34 = vrot.slane %v4928_v42, 2  ;;  %v5011_v43 = vrot.slane %v4928_v42, 4 }
 0x342   : > { %v6369_v61 = vpack.c.b16 %v6207_v20, %v6207_v20  ;;  %v5012_v35 = vrot.slane %v4928_v42, 6  ;;  %v14803_v17 = vsel %vm5175_vm1, %v4928_v42, -inf  ;;  %v6828_v63 = vsel %vm13310_vm10, %v11618_v28, %v6827_v41 }
 0x343   : > { %v6405_v29 = vsel %vm13325_vm6, %v6368_v36, %v6404_v16  ;;  %v4762_v39 = vpack.c.b16 %v4743_v55, %v4742_v49  ;;  %v14808_v58 = vsel %vm5175_vm1, %v5010_v34, -inf  ;;  %v14811_v14 = vsel %vm5175_vm1, %v5011_v43, -inf  ;;  %v14822_v49 = vpop.f32.mrf.mxu0 }
 0x344   : > { %v6408_v12 = vsel %vm13268_vm7, %v6369_v61, %v6407_v30  ;;  %6406 = vst [vmem:[#allocation3 + $0x10] sm:$0xf] %v6405_v29  ;;  %v14816_v10 = vsel %vm5175_vm1, %v5012_v35, -inf  ;;  %v11619_v7 = vrot.slane %v6802_v56, 9  ;;  %v6831_v13 = vrot.slane %v14800_v23, 5 }
 0x345   : > { %6409 = vst [vmem:[#allocation3 + $0x14] sm:$0x1] %v6408_v12  ;;  %4898 = vmatmul.bf16.gmra.mxu0 %v4762_v39  ;;  %v6873_v0 = vunpack.c.l.b16 %v6828_v63  ;;  %v4929_v11 = vadd.f32 %v4864_v37, %v14527_v6  ;;  %v6480_v19 = vshrl.u32 %v6446_v25, 16  ;;  %v6483_v33 = vshll.u32 %v6446_v25, 16  ;;  %v4539_v29 = vld [vmem:[#allocation2 + $0xb4] sm:$0xe] }
 0x346   : > { %v6489_v42 = vshll.u32 %v6471_v22, 16  ;;  %v6494_v20 = vshrl.u32 %v6447_v32, 16  ;;  %v6497_v51 = vshll.u32 %v6447_v32, 16  ;;  %v6832_v16 = vsel %vm13310_vm10, %v11619_v7, %v6831_v13 }
 0x347   : > { %v5013_v4 = vrot.slane %v4929_v11, 2  ;;  %v5014_v28 = vrot.slane %v4929_v11, 4  ;;  %v5015_v36 = vrot.slane %v4929_v11, 6  ;;  %v6874_v30 = vunpack.c.l.b16 %v6832_v16 }
 0x348   : > { %v5321_v55 = vsel %vm5175_vm1, %v4929_v11, -inf  ;;  %v6482_v34 = vrot.slane %v6480_v19, 4  ;;  %v6485_v43 = vrot.slane %v6483_v33, 5  ;;  %v6491_v12 = vrot.slane %v6489_v42, 5 }
 0x349   : > { %v5322_v6 = vmax.f32 %v14780_v50, %v5321_v55  ;;  %v5330_v37 = vsel %vm5175_vm1, %v5013_v4, -inf  ;;  %v5339_v56 = vsel %vm5175_vm1, %v5014_v28, -inf  ;;  %v5348_v22 = vsel %vm5175_vm1, %v5015_v36, -inf }
 0x34a   : > { %v6881_v61 = vpack.c.b16 %v6874_v30, %v6873_v0  ;;  %v5331_v35 = vmax.f32 %v14783_v9, %v5330_v37  ;;  %v5340_v41 = vmax.f32 %v14786_v27, %v5339_v56  ;;  %v5349_v25 = vmax.f32 %v14789_v62, %v5348_v22 }
 0x34b   : > { %v5323_v39 = vrot.slane %v5322_v6, 4  ;;  %v6486_v32 = vor.u32 %v6485_v43, %v6482_v34  ;;  %v6496_v63 = vrot.slane %v6494_v20, 4  ;;  %v6499_v11 = vrot.slane %v6497_v51, 5  ;;  %v12954_v20 = vld [vmem:[#allocation2 + $0xb8] sm:$0xf]  ;;  %v14837_v34 = vpop.f32.mrf.mxu0 }
 0x34c   : > { %6945 = vmatmul.bf16.vlgmr.msra.gmra.mxu3 %v6881_v61  ;;  %v5332_v50 = vrot.slane %v5331_v35, 4  ;;  %v5341_v7 = vrot.slane %v5340_v41, 4  ;;  %v5350_v13 = vrot.slane %v5349_v25, 4  ;;  %v6503_v0 = vshll.u32 %v14800_v23, 16 }
 0x34d   : > { %v5324_v19 = vmax.f32 %v5322_v6, %v5323_v39  ;;  %v6487_v33 = vrot.slane %v6486_v32, 4  ;;  %v11503_v16 = vrot.slane %v4539_v29, 9  ;;  %v6500_v28 = vor.u32 %v6499_v11, %v6496_v63 }
 0x34e   : > { %v5333_v9 = vmax.f32 %v5331_v35, %v5332_v50  ;;  %v5342_v4 = vmax.f32 %v5340_v41, %v5341_v7  ;;  %v5351_v27 = vmax.f32 %v5349_v25, %v5350_v13  ;;  %v6505_v42 = vrot.slane %v6503_v0, 5  ;;  %v6022_v7 = vld [vmem:[#allocation3 + $0x18] sm:$0x1] }
 0x34f   : > { %v5325_v62 = vrot.slane %v5324_v19, 2  ;;  %v6492_v30 = vsel %vm13301_vm8, %v6487_v33, %v6491_v12  ;;  %v4683_v55 = vrot.slane %v12954_v20, 5  ;;  %v6501_v37 = vrot.slane %v6500_v28, 4  ;;  %v12955_v12 = vld [vmem:[#allocation2 + $0xbc] sm:$0x1] }
 0x350   : > { %v5334_v43 = vrot.slane %v5333_v9, 2  ;;  %v5343_v51 = vrot.slane %v5342_v4, 2  ;;  %v5352_v6 = vrot.slane %v5351_v27, 2  ;;  %v6607_v23 = vunpack.c.l.b16 %v6492_v30 }
 0x351   : > { %v5326_v56 = vmax.f32 %v5324_v19, %v5325_v62  ;;  %v4684_v22 = vsel %vm13310_vm10, %v11503_v16, %v4683_v55  ;;  %v4685_v61 = vrot.slane %v4683_v55, 4  ;;  %v6506_v29 = vsel %vm13301_vm8, %v6501_v37, %v6505_v42 }
 0x352   : > { %v5335_v35 = vmax.f32 %v5333_v9, %v5334_v43  ;;  %v5344_v41 = vmax.f32 %v5342_v4, %v5343_v51  ;;  %v5353_v25 = vmax.f32 %v5351_v27, %v5352_v6  ;;  %v6608_v32 = vunpack.c.l.b16 %v6506_v29 }
 0x353   : > { %v5327_v39 = vrot.slane %v5326_v56, 1  ;;  %v4686_v63 = vrot.slane %v12955_v12, 5  ;;  %v4744_v50 = vunpack.c.l.b16 %v4684_v22  ;;  %v4930_v33 = vadd.f32 %v14822_v49, %v14530_v53  ;;  %v14855_v22 = vpop.f32.mrf.mxu0 }
 0x354   : > { %v5336_v13 = vrot.slane %v5335_v35, 1  ;;  %v5345_v11 = vrot.slane %v5344_v41, 1  ;;  %v5354_v19 = vrot.slane %v5353_v25, 1  ;;  %v6615_v16 = vpack.c.b16 %v6608_v32, %v6607_v23 }
 0x355   : > { %v5328_v0 = vmax.f32 %v5326_v56, %v5327_v39  ;;  %v4687_v9 = vsel %vm13310_vm10, %v4685_v61, %v4686_v63  ;;  %v6023_v4 = vsel %vm13268_vm7, 0, %v6022_v7  ;;  %v5016_v20 = vrot.slane %v4930_v33, 2 }
 0x356   : > { %v5337_v27 = vmax.f32 %v5335_v35, %v5336_v13  ;;  %v5346_v28 = vmax.f32 %v5344_v41, %v5345_v11  ;;  %v5355_v62 = vmax.f32 %v5353_v25, %v5354_v19  ;;  %v4745_v30 = vunpack.c.l.b16 %v4687_v9  ;;  %6024 = vst [vmem:[#allocation3 + $0x18] sm:$0x1] %v6023_v4  ;;  %6679 = vmatmul.bf16.vlgmr.msra.gmra.mxu1 %v6615_v16 }
 0x357   : > { %v5770_v42 = vadd.f32 %v14654_v2, %v5328_v0  ;;  %v5017_v55 = vrot.slane %v4930_v33, 4  ;;  %v5018_v43 = vrot.slane %v4930_v33, 6  ;;  %v5357_v56 = vsel %vm5175_vm1, %v4930_v33, -inf }
 0x358   : > { %v5771_v53 = vadd.f32 %v14654_v2, %v5337_v27  ;;  %v5772_v49 = vadd.f32 %v14654_v2, %v5346_v28  ;;  %v5773_v51 = vadd.f32 %v14654_v2, %v5355_v62  ;;  %v4763_v6 = vpack.c.b16 %v4745_v30, %v4744_v50  ;;  %v6046_v27 = vld [vmem:[#allocation3 + $0x1c] sm:$0x1] }
 0x359   : > { %vm5834_vm14 = vcmp.gt.f32.partialorder %v5770_v42, 0.0  ;;  %v5898_v37 = vmul.f32 0.01, %v5770_v42  ;;  %v5366_v23 = vsel %vm5175_vm1, %v5016_v20, -inf  ;;  %v5358_v29 = vmax.f32 %v14803_v17, %v5357_v56 }
 0x35a   : > { %vm5835_vm3 = vcmp.gt.f32.partialorder %v5771_v53, 0.0  ;;  %vm5836_vm13 = vcmp.gt.f32.partialorder %v5772_v49, 0.0  ;;  %vm5837_vm12 = vcmp.gt.f32.partialorder %v5773_v51, 0.0  ;;  %v5899_v61 = vmul.f32 0.01, %v5771_v53  ;;  %4903 = vmatmul.bf16.gmra.mxu0 %v4763_v6 }
 0x35b   : > { %v5900_v35 = vmul.f32 0.01, %v5772_v49  ;;  %v5901_v41 = vmul.f32 0.01, %v5773_v51  ;;  %v5962_v25 = vsel %vm5834_vm14, %v5770_v42, %v5898_v37  ;;  %v5367_v32 = vmax.f32 %v14808_v58, %v5366_v23 }
 0x35c   : > { %v5963_v2 = vsel %vm5835_vm3, %v5771_v53, %v5899_v61  ;;  %v6080_v39 = vpack.c.bf16 %v5962_v25, %v5962_v25  ;;  %v5375_v12 = vsel %vm5175_vm1, %v5017_v55, -inf  ;;  %v5359_v13 = vrot.slane %v5358_v29, 4 }
 0x35d   : > { %v5964_v63 = vsel %vm5836_vm13, %v5772_v49, %v5900_v35  ;;  %v5965_v50 = vsel %vm5837_vm12, %v5773_v51, %v5901_v41  ;;  %v6081_v7 = vpack.c.bf16 %v5963_v2, %v5963_v2  ;;  %v5368_v0 = vrot.slane %v5367_v32, 4  ;;  %v4540_v49 = vld [vmem:[#allocation2 + $0xc0] sm:$0xe]  ;;  %v4874_v51 = vpop.f32.mrf.mxu0 }
 0x35e   : > { %v6082_v11 = vpack.c.bf16 %v5964_v63, %v5964_v63  ;;  %v6083_v19 = vpack.c.bf16 %v5965_v50, %v5965_v50  ;;  %v6208_v33 = vunpack.c.l.b16 %v6080_v39  ;;  %v5360_v9 = vmax.f32 %v5358_v29, %v5359_v13 }
 0x35f   : > { %v6209_v16 = vunpack.c.l.b16 %v6081_v7  ;;  %v5376_v4 = vmax.f32 %v14811_v14, %v5375_v12  ;;  %v5384_v17 = vsel %vm5175_vm1, %v5018_v43, -inf  ;;  %v5369_v30 = vmax.f32 %v5367_v32, %v5368_v0 }
 0x360   : > { %v6210_v28 = vunpack.c.l.b16 %v6082_v11  ;;  %v6211_v62 = vunpack.c.l.b16 %v6083_v19  ;;  %v6288_v58 = vrot.slane %v6208_v33, 7  ;;  %v5361_v20 = vrot.slane %v5360_v9, 2 }
 0x361   : > { %v6289_v42 = vrot.slane %v6209_v16, 6  ;;  %v5377_v55 = vrot.slane %v5376_v4, 4  ;;  %v5385_v53 = vmax.f32 %v14816_v10, %v5384_v17  ;;  %v5370_v56 = vrot.slane %v5369_v30, 2 }
 0x362   : > { %v6291_v6 = vrot.slane %v6210_v28, 5  ;;  %v6293_v37 = vrot.slane %v6211_v62, 4  ;;  %v6047_v14 = vsel %vm13295_vm5, 0, %v6046_v27  ;;  %v5362_v23 = vmax.f32 %v5360_v9, %v5361_v20  ;;  %v14884_v27 = vld [vmem:[#allocation11] ss:$0 sm:$0xff] }
 0x363   : > { %v6290_v43 = vsel %vm6258_vm2, %v6289_v42, %v6288_v58  ;;  %v5378_v61 = vmax.f32 %v5376_v4, %v5377_v55  ;;  %v5386_v35 = vrot.slane %v5385_v53, 4  ;;  %6048 = vst [vmem:[#allocation3 + $0x1c] sm:$0x1] %v6047_v14  ;;  %vm15921_vm4 = vcmask 1043459   ;;  %v12957_v62 = vld [vmem:[#allocation2 + $0xc4] sm:$0xf] }
 0x364   : > { %v6292_v41 = vsel %vm15921_vm4, %v6291_v6, %v6290_v43  ;;  %v5371_v25 = vmax.f32 %v5369_v30, %v5370_v56  ;;  %v4931_v10 = vadd.f32 %v14837_v34, %v14533_v26  ;;  %v11504_v29 = vrot.slane %v4540_v49, 9  ;;  %v12958_v20 = vld [vmem:[#allocation2 + $0xc8] sm:$0x1] }
 0x365   : > { %vm15922_vm14 = vcmask 1044484   ;;  %v5363_v39 = vrot.slane %v5362_v23, 1  ;;  %v5379_v32 = vrot.slane %v5378_v61, 2  ;;  %v5387_v12 = vmax.f32 %v5385_v53, %v5386_v35  ;;  %v14887_v30 = vpop.f32.mrf.mxu0 }
 0x366   : > { %v14870_v2 = vsel %vm15922_vm14, %v6293_v37, %v6292_v41  ;;  %v5372_v63 = vrot.slane %v5371_v25, 1  ;;  %v5019_v50 = vrot.slane %v4931_v10, 2  ;;  %v5020_v7 = vrot.slane %v4931_v10, 4 }
 0x367   : > { %v5021_v13 = vrot.slane %v4931_v10, 6  ;;  %v5364_v11 = vmax.f32 %v5362_v23, %v5363_v39  ;;  %v5380_v19 = vmax.f32 %v5378_v61, %v5379_v32  ;;  %v5388_v33 = vrot.slane %v5387_v12, 2 }
 0x368   : > { %v14873_v0 = vsel %vm5175_vm1, %v4931_v10, -inf  ;;  %v5373_v16 = vmax.f32 %v5371_v25, %v5372_v63  ;;  %v14876_v26 = vsel %vm5175_vm1, %v5019_v50, -inf  ;;  %v14879_v34 = vsel %vm5175_vm1, %v5020_v7, -inf }
 0x369   : > { %v14882_v9 = vsel %vm5175_vm1, %v5021_v13, -inf  ;;  %v5381_v4 = vrot.slane %v5380_v19, 1  ;;  %v5389_v17 = vmax.f32 %v5387_v12, %v5388_v33  ;;  %v5774_v28 = vadd.f32 %v14884_v27, %v5364_v11 }
 0x36a   : > { %v4690_v58 = vrot.slane %v12957_v62, 5  ;;  %v5775_v42 = vadd.f32 %v14884_v27, %v5373_v16  ;;  %v4693_v55 = vrot.slane %v12958_v20, 5  ;;  %v4932_v53 = vadd.f32 %v14855_v22, %v14536_v5  ;;  %v4541_v20 = vld [vmem:[#allocation2 + $0xcc] sm:$0xe] }
 0x36b   : > { %v4933_v49 = vadd.f32 %v4874_v51, %v14543_v60  ;;  %v5382_v6 = vmax.f32 %v5380_v19, %v5381_v4  ;;  %v5390_v37 = vrot.slane %v5389_v17, 1  ;;  %vm5838_vm3 = vcmp.gt.f32.partialorder %v5774_v28, 0.0 }
 0x36c   : > { %v5902_v56 = vmul.f32 0.01, %v5774_v28  ;;  %vm5839_vm13 = vcmp.gt.f32.partialorder %v5775_v42, 0.0  ;;  %v5903_v14 = vmul.f32 0.01, %v5775_v42  ;;  %v4691_v43 = vsel %vm13310_vm10, %v11504_v29, %v4690_v58 }
 0x36d   : > { %v4692_v23 = vrot.slane %v4690_v58, 4  ;;  %v5391_v61 = vmax.f32 %v5389_v17, %v5390_v37  ;;  %v5776_v35 = vadd.f32 %v14884_v27, %v5382_v6  ;;  %v4746_v25 = vunpack.c.l.b16 %v4691_v43  ;;  %v4879_v17 = vpop.f32.mrf.mxu0 }
 0x36e   : > { %v5966_v41 = vsel %vm5838_vm3, %v5774_v28, %v5902_v56  ;;  %v5967_v10 = vsel %vm5839_vm13, %v5775_v42, %v5903_v14  ;;  %v5022_v60 = vrot.slane %v4932_v53, 2  ;;  %v5023_v29 = vrot.slane %v4932_v53, 4 }
 0x36f   : > { %v6084_v39 = vpack.c.bf16 %v5966_v41, %v5966_v41  ;;  %v4694_v5 = vsel %vm13310_vm10, %v4692_v23, %v4693_v55  ;;  %v5777_v22 = vadd.f32 %v14884_v27, %v5391_v61  ;;  %vm5840_vm12 = vcmp.gt.f32.partialorder %v5776_v35, 0.0 }
 0x370   : > { %v5904_v51 = vmul.f32 0.01, %v5776_v35  ;;  %v6085_v32 = vpack.c.bf16 %v5967_v10, %v5967_v10  ;;  %v4747_v63 = vunpack.c.l.b16 %v4694_v5  ;;  %v5024_v50 = vrot.slane %v4932_v53, 6  ;;  %v6413_v10 = vld [vmem:[#allocation3 + $0x1c] sm:$0x1] }
 0x371   : > { %v6212_v12 = vunpack.c.l.b16 %v6084_v39  ;;  %vm5841_vm4 = vcmp.gt.f32.partialorder %v5777_v22, 0.0  ;;  %v5905_v7 = vmul.f32 0.01, %v5777_v22  ;;  %v14900_v4 = vsel %vm5175_vm1, %v4932_v53, -inf }
 0x372   : > { %v5968_v13 = vsel %vm5840_vm12, %v5776_v35, %v5904_v51  ;;  %v6213_v11 = vunpack.c.l.b16 %v6085_v32  ;;  %v4764_v16 = vpack.c.b16 %v4747_v63, %v4746_v25  ;;  %v14903_v58 = vsel %vm5175_vm1, %v5022_v60, -inf  ;;  %v6410_v32 = vld [vmem:[#allocation3 + $0x18] sm:$0xf] }
 0x373   : > { %v6086_v19 = vpack.c.bf16 %v5968_v13, %v5968_v13  ;;  %v6295_v33 = vrot.slane %v6212_v12, 3  ;;  %v5969_v28 = vsel %vm5841_vm4, %v5777_v22, %v5905_v7  ;;  %v14906_v42 = vsel %vm5175_vm1, %v5023_v29, -inf  ;;  %v12959_v7 = vld [vmem:[#allocation2 + $0xd0] sm:$0xf] }
 0x374   : > { %v6297_v62 = vrot.slane %v6213_v11, 2  ;;  %v6087_v55 = vpack.c.bf16 %v5969_v28, %v5969_v28  ;;  %4908 = vmatmul.bf16.gmra.mxu0 %v4764_v16  ;;  %v14911_v56 = vsel %vm5175_vm1, %v5024_v50, -inf  ;;  %v5025_v14 = vrot.slane %v4933_v49, 2 }
 0x375   : > { %v6214_v6 = vunpack.c.l.b16 %v6086_v19  ;;  %v6296_v37 = vsel %vm6267_vm9, %v6295_v33, %v14870_v2  ;;  %v5026_v43 = vrot.slane %v4933_v49, 4  ;;  %v5027_v23 = vrot.slane %v4933_v49, 6  ;;  %v12960_v33 = vld [vmem:[#allocation2 + $0xd4] sm:$0x1] }
 0x376   : > { %v6298_v53 = vsel %vm6270_vm0, %v6297_v62, %v6296_v37  ;;  %v6215_v61 = vunpack.c.l.b16 %v6087_v55  ;;  %v5393_v41 = vsel %vm5175_vm1, %v4933_v49, -inf  ;;  %v11505_v25 = vrot.slane %v4541_v20, 9  ;;  %v4881_v37 = vpop.f32.mrf.mxu0 }
 0x377   : > { %v6299_v35 = vrot.slane %v6214_v6, 1  ;;  %v5394_v39 = vmax.f32 %v14873_v0, %v5393_v41  ;;  %v5402_v5 = vsel %vm5175_vm1, %v5025_v14, -inf  ;;  %v5411_v2 = vsel %vm5175_vm1, %v5026_v43, -inf }
 0x378   : > { %v5420_v60 = vsel %vm5175_vm1, %v5027_v23, -inf  ;;  %vm15923_vm14 = vcmask 1047559   ;;  %v6371_v51 = vpack.c.b16 %v6215_v61, %v6215_v61  ;;  %v5403_v12 = vmax.f32 %v14876_v26, %v5402_v5 }
 0x379   : > { %v6300_v22 = vsel %vm15923_vm14, %v6299_v35, %v6298_v53  ;;  %v5412_v63 = vmax.f32 %v14879_v34, %v5411_v2  ;;  %v5395_v49 = vrot.slane %v5394_v39, 4  ;;  %v5421_v50 = vmax.f32 %v14882_v9, %v5420_v60 }
 0x37a   : > { %v6370_v29 = vpack.c.b16 %v6300_v22, %v6300_v22  ;;  %v4697_v0 = vrot.slane %v12959_v7, 5  ;;  %v6414_v13 = vsel %vm13268_vm7, %v6371_v51, %v6413_v10  ;;  %v5404_v11 = vrot.slane %v5403_v12, 4 }
 0x37b   : > { %v5413_v19 = vrot.slane %v5412_v63, 4  ;;  %v4700_v16 = vrot.slane %v12960_v33, 5  ;;  %6415 = vst [vmem:[#allocation3 + $0x1c] sm:$0x1] %v6414_v13  ;;  %v5396_v26 = vmax.f32 %v5394_v39, %v5395_v49  ;;  %v5422_v62 = vrot.slane %v5421_v50, 4 }
 0x37c   : > { %v6411_v28 = vsel %vm13325_vm6, %v6370_v29, %v6410_v32  ;;  %v4698_v34 = vsel %vm13310_vm10, %v11505_v25, %v4697_v0  ;;  %v5405_v9 = vmax.f32 %v5403_v12, %v5404_v11  ;;  %v4699_v55 = vrot.slane %v4697_v0, 4 }
 0x37d   : > { %6412 = vst [vmem:[#allocation3 + $0x18] sm:$0xf] %v6411_v28  ;;  %v5414_v20 = vmax.f32 %v5412_v63, %v5413_v19  ;;  %v4748_v6 = vunpack.c.l.b16 %v4698_v34  ;;  %v5397_v53 = vrot.slane %v5396_v26, 2  ;;  %v5423_v14 = vmax.f32 %v5421_v50, %v5422_v62 }
 0x37e   : > { %v4934_v43 = vadd.f32 %v14887_v30, %v14546_v24  ;;  %v14932_v23 = vadd.f32 %v4879_v17, %v14549_v21  ;;  %v5406_v61 = vrot.slane %v5405_v9, 2  ;;  %v4701_v41 = vsel %vm13310_vm10, %v4699_v55, %v4700_v16 }
 0x37f   : > { %v5415_v35 = vrot.slane %v5414_v20, 2  ;;  %v14937_v25 = vadd.f32 %v4881_v37, %v14586_v8  ;;  %v5398_v10 = vmax.f32 %v5396_v26, %v5397_v53  ;;  %v5424_v39 = vrot.slane %v5423_v14, 2 }
 0x380   : > { %v4749_v5 = vunpack.c.l.b16 %v4701_v41  ;;  %v5028_v2 = vrot.slane %v4934_v43, 2  ;;  %v5407_v60 = vmax.f32 %v5405_v9, %v5406_v61  ;;  %v5029_v51 = vrot.slane %v4934_v43, 4 }
 0x381   : > { %v5416_v22 = vmax.f32 %v5414_v20, %v5415_v35  ;;  %v5030_v32 = vrot.slane %v4934_v43, 6  ;;  %v5399_v24 = vrot.slane %v5398_v10, 1  ;;  %v5425_v30 = vmax.f32 %v5423_v14, %v5424_v39 }
 0x382   : > { %v4765_v21 = vpack.c.b16 %v4749_v5, %v4748_v6  ;;  %v5429_v17 = vsel %vm5175_vm1, %v4934_v43, -inf  ;;  %v5408_v12 = vrot.slane %v5407_v60, 1  ;;  %v5438_v8 = vsel %vm5175_vm1, %v5028_v2, -inf }
 0x383   : > { %v5417_v63 = vrot.slane %v5416_v22, 1  ;;  %v5430_v29 = vmax.f32 %v14900_v4, %v5429_v17  ;;  %v5400_v49 = vmax.f32 %v5398_v10, %v5399_v24  ;;  %v5426_v50 = vrot.slane %v5425_v30, 1 }
 0x384   : > { %v5439_v7 = vmax.f32 %v14903_v58, %v5438_v8  ;;  %v5447_v0 = vsel %vm5175_vm1, %v5029_v51, -inf  ;;  %v5409_v13 = vmax.f32 %v5407_v60, %v5408_v12  ;;  %4913 = vmatmul.bf16.gmra.mxu0 %v4765_v21  ;;  %v5456_v4 = vsel %vm5175_vm1, %v5030_v32, -inf }
 0x385   : > { %v5418_v11 = vmax.f32 %v5416_v22, %v5417_v63  ;;  %v5431_v19 = vrot.slane %v5430_v29, 4  ;;  %v5448_v33 = vmax.f32 %v14906_v42, %v5447_v0  ;;  %v5427_v16 = vmax.f32 %v5425_v30, %v5426_v50  ;;  %v6025_v63 = vld [vmem:[#allocation3 + $0x20] sm:$0x1] }
 0x386   : > { %v5778_v28 = vadd.f32 %v14884_v27, %v5400_v49  ;;  %v5440_v26 = vrot.slane %v5439_v7, 4  ;;  %v5779_v62 = vadd.f32 %v14884_v27, %v5409_v13  ;;  %v5457_v12 = vmax.f32 %v14911_v56, %v5456_v4 }
 0x387   : > { %v5780_v34 = vadd.f32 %v14884_v27, %v5418_v11  ;;  %v5432_v9 = vmax.f32 %v5430_v29, %v5431_v19  ;;  %v5449_v58 = vrot.slane %v5448_v33, 4  ;;  %v5781_v20 = vadd.f32 %v14884_v27, %v5427_v16 }
 0x388   : > { %vm5842_vm3 = vcmp.gt.f32.partialorder %v5778_v28, 0.0  ;;  %v5906_v55 = vmul.f32 0.01, %v5778_v28  ;;  %v5441_v6 = vmax.f32 %v5439_v7, %v5440_v26  ;;  %vm5843_vm13 = vcmp.gt.f32.partialorder %v5779_v62, 0.0  ;;  %v6049_v7 = vld [vmem:[#allocation3 + $0x24] sm:$0x1] }
 0x389   : > { %vm5844_vm12 = vcmp.gt.f32.partialorder %v5780_v34, 0.0  ;;  %v5907_v42 = vmul.f32 0.01, %v5779_v62  ;;  %v5908_v37 = vmul.f32 0.01, %v5780_v34  ;;  %vm5845_vm4 = vcmp.gt.f32.partialorder %v5781_v20, 0.0 }
 0x38a   : > { %v5909_v53 = vmul.f32 0.01, %v5781_v20  ;;  %v5970_v14 = vsel %vm5842_vm3, %v5778_v28, %v5906_v55  ;;  %v5433_v43 = vrot.slane %v5432_v9, 2  ;;  %v5442_v10 = vrot.slane %v5441_v6, 2 }
 0x38b   : > { %v5971_v61 = vsel %vm5843_vm13, %v5779_v62, %v5907_v42  ;;  %v5972_v35 = vsel %vm5844_vm12, %v5780_v34, %v5908_v37  ;;  %v6088_v41 = vpack.c.bf16 %v5970_v14, %v5970_v14  ;;  %v5450_v24 = vmax.f32 %v5448_v33, %v5449_v58 }
 0x38c   : > { %v5973_v39 = vsel %vm5845_vm4, %v5781_v20, %v5909_v53  ;;  %v6089_v5 = vpack.c.bf16 %v5971_v61, %v5971_v61  ;;  %v6090_v2 = vpack.c.bf16 %v5972_v35, %v5972_v35  ;;  %v5434_v60 = vmax.f32 %v5432_v9, %v5433_v43 }
 0x38d   : > { %v6091_v22 = vpack.c.bf16 %v5973_v39, %v5973_v39  ;;  %v6216_v51 = vunpack.c.l.b16 %v6088_v41  ;;  %v5443_v32 = vmax.f32 %v5441_v6, %v5442_v10  ;;  %v5451_v50 = vrot.slane %v5450_v24, 2  ;;  %v12628_v39 = vld [vmem:[#allocation3 + $0x14] sm:$0xf0] }
 0x38e   : > { %v6217_v30 = vunpack.c.l.b16 %v6089_v5  ;;  %v6218_v21 = vunpack.c.l.b16 %v6090_v2  ;;  %v5435_v17 = vrot.slane %v5434_v60, 1  ;;  %v5458_v19 = vrot.slane %v5457_v12, 4 }
 0x38f   : > { %v6219_v29 = vunpack.c.l.b16 %v6091_v22  ;;  %v6301_v8 = vrot.slane %v6216_v51, 7  ;;  %v5444_v49 = vrot.slane %v5443_v32, 1  ;;  %v5452_v26 = vmax.f32 %v5450_v24, %v5451_v50  ;;  %v6803_v50 = vld [vmem:[#allocation3 + $0x10] sm:$0xe] }
 0x390   : > { %v6302_v0 = vrot.slane %v6217_v30, 6  ;;  %v6304_v13 = vrot.slane %v6218_v21, 5  ;;  %v5436_v11 = vmax.f32 %v5434_v60, %v5435_v17  ;;  %v6026_v33 = vsel %vm13268_vm7, 0, %v6025_v63  ;;  %v11576_v21 = vld [vmem:[#allocation3 + $0x10] sm:$0xf] }
 0x391   : > { %v6306_v16 = vrot.slane %v6219_v29, 4  ;;  %v5445_v28 = vmax.f32 %v5443_v32, %v5444_v49  ;;  %v5459_v34 = vmax.f32 %v5457_v12, %v5458_v19  ;;  %6027 = vst [vmem:[#allocation3 + $0x20] sm:$0x1] %v6026_v33  ;;  %v6050_v4 = vsel %vm13295_vm5, 0, %v6049_v7  ;;  %v14984_v19 = vld [vmem:[#allocation3 + $0x14] sm:$0x1] }
 0x392   : > { %v6303_v62 = vsel %vm6258_vm2, %v6302_v0, %v6301_v8  ;;  %v5782_v56 = vadd.f32 %v14884_v27, %v5436_v11  ;;  %vm15924_vm14 = vcmask 1043459   ;;  %v5453_v58 = vrot.slane %v5452_v26, 1  ;;  %6051 = vst [vmem:[#allocation3 + $0x24] sm:$0x1] %v6050_v4 }
 0x393   : > { %v6305_v9 = vsel %vm15924_vm14, %v6304_v13, %v6303_v62  ;;  %v5783_v20 = vadd.f32 %v14884_v27, %v5445_v28  ;;  %v5031_v55 = vrot.slane %v14932_v23, 2  ;;  %vm15925_vm3 = vcmask 1044484   ;;  %v14990_v62 = vld [vmem:[#allocation3 + $0x1c] sm:$0x1] }
 0x394   : > { %v6307_v6 = vsel %vm15925_vm3, %v6306_v16, %v6305_v9  ;;  %v5460_v42 = vrot.slane %v5459_v34, 2  ;;  %vm5846_vm13 = vcmp.gt.f32.partialorder %v5782_v56, 0.0  ;;  %v5910_v37 = vmul.f32 0.01, %v5782_v56 }
 0x395   : > { %v5454_v53 = vmax.f32 %v5452_v26, %v5453_v58  ;;  %vm5847_vm12 = vcmp.gt.f32.partialorder %v5783_v20, 0.0  ;;  %v5911_v14 = vmul.f32 0.01, %v5783_v20  ;;  %v5032_v43 = vrot.slane %v14932_v23, 4 }
 0x396   : > { %v5461_v61 = vmax.f32 %v5459_v34, %v5460_v42  ;;  %v5974_v35 = vsel %vm5846_vm13, %v5782_v56, %v5910_v37  ;;  %v5033_v41 = vrot.slane %v14932_v23, 6  ;;  %v14965_v10 = vsel %vm5175_vm1, %v14932_v23, -inf  ;;  %v6804_v34 = vld [vmem:[#allocation3 + $0x18] sm:$0xe]  ;;  %v4884_v56 = vpop.f32.mrf.mxu0 }
 0x397   : > { %v5784_v5 = vadd.f32 %v14884_v27, %v5454_v53  ;;  %v5975_v2 = vsel %vm5847_vm12, %v5783_v20, %v5911_v14  ;;  %v6092_v60 = vpack.c.bf16 %v5974_v35, %v5974_v35  ;;  %v14969_v22 = vsel %vm5175_vm1, %v5031_v55, -inf  ;;  %v6448_v20 = vld [vmem:[#allocation3 + $0x10] sm:$0xf] }
 0x398   : > { %v5462_v51 = vrot.slane %v5461_v61, 1  ;;  %v6093_v32 = vpack.c.bf16 %v5975_v2, %v5975_v2  ;;  %v14972_v24 = vsel %vm5175_vm1, %v5032_v43, -inf  ;;  %v14975_v30 = vsel %vm5175_vm1, %v5033_v41, -inf }
 0x399   : > { %vm5848_vm4 = vcmp.gt.f32.partialorder %v5784_v5, 0.0  ;;  %v5912_v23 = vmul.f32 0.01, %v5784_v5  ;;  %v6220_v17 = vunpack.c.l.b16 %v6092_v60  ;;  %v11577_v12 = vor.u32 %v12628_v39, %v11576_v21  ;;  %v6416_v21 = vld [vmem:[#allocation3 + $0x20] sm:$0xf] }
 0x39a   : > { %v5463_v63 = vmax.f32 %v5461_v61, %v5462_v51  ;;  %v6221_v29 = vunpack.c.l.b16 %v6093_v32  ;;  %v5034_v8 = vrot.slane %v14937_v25, 2  ;;  %v5035_v49 = vrot.slane %v14937_v25, 4 }
 0x39b   : > { %v5976_v7 = vsel %vm5848_vm4, %v5784_v5, %v5912_v23  ;;  %v6308_v0 = vrot.slane %v6220_v17, 3  ;;  %6785 = vmatmul.bf16.gmra.mxu2 %v11577_v12  ;;  %v5036_v13 = vrot.slane %v14937_v25, 6  ;;  %v14982_v11 = vsel %vm5175_vm1, %v14937_v25, -inf }
 0x39c   : > { %v5785_v16 = vadd.f32 %v14884_v27, %v5463_v63  ;;  %v6094_v28 = vpack.c.bf16 %v5976_v7, %v5976_v7  ;;  %v6310_v26 = vrot.slane %v6221_v29, 2  ;;  %v14988_v33 = vsel %vm5175_vm1, %v5034_v8, -inf }
 0x39d   : > { %v6309_v4 = vsel %vm6267_vm9, %v6308_v0, %v6307_v6  ;;  %v14994_v9 = vsel %vm5175_vm1, %v5035_v49, -inf  ;;  %v14997_v25 = vsel %vm5175_vm1, %v5036_v13, -inf  ;;  %v11620_v58 = vrot.slane %v6803_v50, 9  ;;  %v6419_v49 = vld [vmem:[#allocation3 + $0x24] sm:$0x1] }
 0x39e   : > { %vm5849_vm14 = vcmp.gt.f32.partialorder %v5785_v16, 0.0  ;;  %v5913_v55 = vmul.f32 0.01, %v5785_v16  ;;  %v6222_v42 = vunpack.c.l.b16 %v6094_v28  ;;  %v6311_v37 = vsel %vm6270_vm0, %v6310_v26, %v6309_v4 }
 0x39f   : > { %v6835_v53 = vrot.slane %v14984_v19, 5  ;;  %v11621_v14 = vrot.slane %v6804_v34, 9  ;;  %v6839_v43 = vrot.slane %v14990_v62, 5  ;;  %v4937_v6 = vadd.f32 %v4884_v56, %v14589_v45  ;;  %v6449_v56 = vld [vmem:[#allocation3 + $0x18] sm:$0xf] }
 0x3a0   : > { %v5977_v61 = vsel %vm5849_vm14, %v5785_v16, %v5913_v55  ;;  %v6312_v35 = vrot.slane %v6222_v42, 1  ;;  %v6508_v41 = vshrl.u32 %v6448_v20, 16  ;;  %v6511_v39 = vshll.u32 %v6448_v20, 16 }
 0x3a1   : > { %v6095_v5 = vpack.c.bf16 %v5977_v61, %v5977_v61  ;;  %v6836_v2 = vsel %vm13310_vm10, %v11620_v58, %v6835_v53  ;;  %v6840_v60 = vsel %vm13310_vm10, %v11621_v14, %v6839_v43  ;;  %v5037_v51 = vrot.slane %v4937_v6, 2 }
 0x3a2   : > { %vm15926_vm3 = vcmask 1047559   ;;  %v6875_v23 = vunpack.c.l.b16 %v6836_v2  ;;  %v6876_v17 = vunpack.c.l.b16 %v6840_v60  ;;  %v5038_v12 = vrot.slane %v4937_v6, 4  ;;  %v4886_v2 = vpop.f32.mrf.mxu0 }
 0x3a3   : > { %v6313_v32 = vsel %vm15926_vm3, %v6312_v35, %v6311_v37  ;;  %v6223_v63 = vunpack.c.l.b16 %v6095_v5  ;;  %v5039_v29 = vrot.slane %v4937_v6, 6  ;;  %v5465_v8 = vsel %vm5175_vm1, %v4937_v6, -inf }
 0x3a4   : > { %v6372_v45 = vpack.c.b16 %v6313_v32, %v6313_v32  ;;  %v6882_v50 = vpack.c.b16 %v6876_v17, %v6875_v23  ;;  %v5466_v7 = vmax.f32 %v14965_v10, %v5465_v8  ;;  %v5474_v0 = vsel %vm5175_vm1, %v5037_v51, -inf }
 0x3a5   : > { %v5483_v13 = vsel %vm5175_vm1, %v5038_v12, -inf  ;;  %v6373_v16 = vpack.c.b16 %v6223_v63, %v6223_v63  ;;  %v5475_v26 = vmax.f32 %v14969_v22, %v5474_v0  ;;  %v5492_v58 = vsel %vm5175_vm1, %v5039_v29, -inf }
 0x3a6   : > { %v6417_v28 = vsel %vm13325_vm6, %v6372_v45, %v6416_v21  ;;  %v5484_v34 = vmax.f32 %v14972_v24, %v5483_v13  ;;  %6950 = vmatmul.bf16.gmra.mxu3 %v6882_v50  ;;  %v5467_v4 = vrot.slane %v5466_v7, 4  ;;  %v6510_v20 = vrot.slane %v6508_v41, 4 }
 0x3a7   : > { %6418 = vst [vmem:[#allocation3 + $0x20] sm:$0xf] %v6417_v28  ;;  %v6513_v10 = vrot.slane %v6511_v39, 5  ;;  %v6420_v55 = vsel %vm13268_vm7, %v6373_v16, %v6419_v49  ;;  %v5476_v42 = vrot.slane %v5475_v26, 4  ;;  %v5493_v53 = vmax.f32 %v14975_v30, %v5492_v58 }
 0x3a8   : > { %v5485_v37 = vrot.slane %v5484_v34, 4  ;;  %6421 = vst [vmem:[#allocation3 + $0x24] sm:$0x1] %v6420_v55  ;;  %v5468_v14 = vmax.f32 %v5466_v7, %v5467_v4  ;;  %v6517_v24 = vshll.u32 %v14984_v19, 16  ;;  %v6522_v43 = vshrl.u32 %v6449_v56, 16 }
 0x3a9   : > { %v6514_v22 = vor.u32 %v6513_v10, %v6510_v20  ;;  %v5477_v6 = vmax.f32 %v5475_v26, %v5476_v42  ;;  %v5494_v35 = vrot.slane %v5493_v53, 4  ;;  %v6525_v5 = vshll.u32 %v6449_v56, 16 }
 0x3aa   : > { %v5486_v61 = vmax.f32 %v5484_v34, %v5485_v37  ;;  %v5469_v41 = vrot.slane %v5468_v14, 2  ;;  %v6519_v60 = vrot.slane %v6517_v24, 5  ;;  %v6524_v51 = vrot.slane %v6522_v43, 4 }
 0x3ab   : > { %v6515_v39 = vrot.slane %v6514_v22, 4  ;;  %v5478_v32 = vrot.slane %v5477_v6, 2  ;;  %v5495_v23 = vmax.f32 %v5493_v53, %v5494_v35  ;;  %v6527_v17 = vrot.slane %v6525_v5, 5 }
 0x3ac   : > { %v5487_v21 = vrot.slane %v5486_v61, 2  ;;  %v5470_v30 = vmax.f32 %v5468_v14, %v5469_v41  ;;  %v6531_v19 = vshll.u32 %v14990_v62, 16  ;;  %v15025_v63 = vadd.f32 %v4886_v2, %v14594_v18 }
 0x3ad   : > { %v6520_v12 = vsel %vm13301_vm8, %v6515_v39, %v6519_v60  ;;  %v5479_v45 = vmax.f32 %v5477_v6, %v5478_v32  ;;  %v5496_v8 = vrot.slane %v5495_v23, 2  ;;  %v6528_v49 = vor.u32 %v6527_v17, %v6524_v51 }
 0x3ae   : > { %v5488_v29 = vmax.f32 %v5486_v61, %v5487_v21  ;;  %v5471_v50 = vrot.slane %v5470_v30, 1  ;;  %v6533_v7 = vrot.slane %v6531_v19, 5  ;;  %v6609_v0 = vunpack.c.l.b16 %v6520_v12  ;;  %v4889_v19 = vpop.f32.mrf.mxu0 }
 0x3af   : > { %v5040_v13 = vrot.slane %v15025_v63, 2  ;;  %v5480_v16 = vrot.slane %v5479_v45, 1  ;;  %v5497_v26 = vmax.f32 %v5495_v23, %v5496_v8  ;;  %v6529_v34 = vrot.slane %v6528_v49, 4 }
 0x3b0   : > { %v5489_v28 = vrot.slane %v5488_v29, 1  ;;  %v5472_v56 = vmax.f32 %v5470_v30, %v5471_v50  ;;  %v5041_v4 = vrot.slane %v15025_v63, 4  ;;  %v5042_v62 = vrot.slane %v15025_v63, 6 }
 0x3b1   : > { %v5501_v18 = vsel %vm5175_vm1, %v15025_v63, -inf  ;;  %v5481_v58 = vmax.f32 %v5479_v45, %v5480_v16  ;;  %v5498_v10 = vrot.slane %v5497_v26, 1  ;;  %v6534_v55 = vsel %vm13301_vm8, %v6529_v34, %v6533_v7 }
 0x3b2   : > { %v5490_v20 = vmax.f32 %v5488_v29, %v5489_v28  ;;  %v5786_v42 = vadd.f32 %v14884_v27, %v5472_v56  ;;  %v6610_v37 = vunpack.c.l.b16 %v6534_v55  ;;  %v5502_v53 = vmax.f32 %v14982_v11, %v5501_v18 }
 0x3b3   : > { %v5510_v14 = vsel %vm5175_vm1, %v5040_v13, -inf  ;;  %v5499_v22 = vmax.f32 %v5497_v26, %v5498_v10  ;;  %v5787_v24 = vadd.f32 %v14884_v27, %v5481_v58  ;;  %v5519_v8 = vsel %vm5175_vm1, %v5041_v4, -inf  ;;  %v6028_v13 = vld [vmem:[#allocation3 + $0x28] sm:$0x1]  ;;  %v6052_v10 = vld [vmem:[#allocation3 + $0x2c] sm:$0x1] }
 0x3b4   : > { %v5788_v43 = vadd.f32 %v14884_v27, %v5490_v20  ;;  %v5511_v6 = vmax.f32 %v14988_v33, %v5510_v14  ;;  %vm5850_vm13 = vcmp.gt.f32.partialorder %v5786_v42, 0.0  ;;  %v5914_v61 = vmul.f32 0.01, %v5786_v42 }
 0x3b5   : > { %v6616_v35 = vpack.c.b16 %v6610_v37, %v6609_v0  ;;  %v5503_v5 = vrot.slane %v5502_v53, 4  ;;  %v5789_v2 = vadd.f32 %v14884_v27, %v5499_v22  ;;  %vm5851_vm12 = vcmp.gt.f32.partialorder %v5787_v24, 0.0 }
 0x3b6   : > { %vm5852_vm4 = vcmp.gt.f32.partialorder %v5788_v43, 0.0  ;;  %v5915_v41 = vmul.f32 0.01, %v5787_v24  ;;  %v5916_v39 = vmul.f32 0.01, %v5788_v43  ;;  %v5978_v11 = vsel %vm5850_vm13, %v5786_v42, %v5914_v61 }
 0x3b7   : > { %6684 = vmatmul.bf16.gmra.mxu1 %v6616_v35  ;;  %v5504_v60 = vmax.f32 %v5502_v53, %v5503_v5  ;;  %v5512_v51 = vrot.slane %v5511_v6, 4  ;;  %vm5853_vm14 = vcmp.gt.f32.partialorder %v5789_v2, 0.0  ;;  %v5917_v32 = vmul.f32 0.01, %v5789_v2  ;;  %v4489_v53 = vpop.f32.mrf.mxu3  ;;  %v3496_v35 = vpop.f32.mrf.mxu1 }
 0x3b8   : > { %v5979_v21 = vsel %vm5851_vm12, %v5787_v24, %v5915_v41  ;;  %v6096_v23 = vpack.c.bf16 %v5978_v11, %v5978_v11  ;;  %v5980_v17 = vsel %vm5852_vm4, %v5788_v43, %v5916_v39  ;;  %v5520_v26 = vmax.f32 %v14994_v9, %v5519_v8  ;;  %v4891_v39 = vpop.f32.mrf.mxu0 }
 0x3b9   : > { %v6097_v33 = vpack.c.bf16 %v5979_v21, %v5979_v21  ;;  %v5505_v30 = vrot.slane %v5504_v60, 2  ;;  %v5513_v12 = vmax.f32 %v5511_v6, %v5512_v51  ;;  %v5981_v63 = vsel %vm5853_vm14, %v5789_v2, %v5917_v32  ;;  %v3810_v21 = vpop.f32.mrf.mxu2 }
 0x3ba   : > { %v6098_v45 = vpack.c.bf16 %v5980_v17, %v5980_v17  ;;  %v6224_v29 = vunpack.c.l.b16 %v6096_v23  ;;  %v6099_v49 = vpack.c.bf16 %v5981_v63, %v5981_v63  ;;  %v5528_v34 = vsel %vm5175_vm1, %v5042_v62, -inf }
 0x3bb   : > { %v6225_v50 = vunpack.c.l.b16 %v6097_v33  ;;  %v5506_v7 = vmax.f32 %v5504_v60, %v5505_v30  ;;  %v5514_v0 = vrot.slane %v5513_v12, 2  ;;  %v5521_v42 = vrot.slane %v5520_v26, 4 }
 0x3bc   : > { %v6226_v16 = vunpack.c.l.b16 %v6098_v45  ;;  %v6314_v28 = vrot.slane %v6224_v29, 7  ;;  %v6227_v56 = vunpack.c.l.b16 %v6099_v49  ;;  %v5529_v4 = vmax.f32 %v14997_v25, %v5528_v34 }
 0x3bd   : > { %v6315_v18 = vrot.slane %v6225_v50, 6  ;;  %v5507_v58 = vrot.slane %v5506_v7, 1  ;;  %v5515_v20 = vmax.f32 %v5513_v12, %v5514_v0  ;;  %v6029_v37 = vsel %vm13268_vm7, 0, %v6028_v13 }
 0x3be   : > { %v6317_v55 = vrot.slane %v6226_v16, 5  ;;  %v6319_v22 = vrot.slane %v6227_v56, 4  ;;  %6030 = vst [vmem:[#allocation3 + $0x28] sm:$0x1] %v6029_v37  ;;  %vm15927_vm3 = vcmask 1043459   ;;  %v5522_v43 = vmax.f32 %v5520_v26, %v5521_v42 }
 0x3bf   : > { %v6316_v14 = vsel %vm6258_vm2, %v6315_v18, %v6314_v28  ;;  %v5508_v24 = vmax.f32 %v5506_v7, %v5507_v58  ;;  %v5516_v9 = vrot.slane %v5515_v20, 1  ;;  %v5530_v6 = vrot.slane %v5529_v4, 4 }
 0x3c0   : > { %v6318_v62 = vsel %vm15927_vm3, %v6317_v55, %v6316_v14  ;;  %v6053_v61 = vsel %vm13295_vm5, 0, %v6052_v10  ;;  %vm15928_vm13 = vcmask 1044484   ;;  %v4939_v41 = vadd.f32 %v4889_v19, %v14598_v54 }
 0x3c1   : > { %v6320_v25 = vsel %vm15928_vm13, %v6319_v22, %v6318_v62  ;;  %v5517_v5 = vmax.f32 %v5515_v20, %v5516_v9  ;;  %v5790_v2 = vadd.f32 %v14884_v27, %v5508_v24  ;;  %6054 = vst [vmem:[#allocation3 + $0x2c] sm:$0x1] %v6053_v61  ;;  %v15055_v11 = vadd.f32 %v4489_v53, %v14692_v31  ;;  %v4894_v20 = vpop.f32.mrf.mxu0 }
 0x3c2   : > { %v5523_v60 = vrot.slane %v5522_v43, 2  ;;  %v5531_v51 = vmax.f32 %v5529_v4, %v5530_v6  ;;  %v15058_v32 = vadd.f32 %v4891_v39, %v14601_v15  ;;  %v5043_v33 = vrot.slane %v4939_v41, 2 }
 0x3c3   : > { %v5791_v23 = vadd.f32 %v14884_v27, %v5517_v5  ;;  %vm5854_vm12 = vcmp.gt.f32.partialorder %v5790_v2, 0.0  ;;  %v5918_v17 = vmul.f32 0.01, %v5790_v2  ;;  %v3530_v30 = vadd.f32 %v3496_v35, %v14711_v46 }
 0x3c4   : > { %v5524_v12 = vmax.f32 %v5522_v43, %v5523_v60  ;;  %v5532_v63 = vrot.slane %v5531_v51, 2  ;;  %v5044_v54 = vrot.slane %v4939_v41, 4  ;;  %v5045_v45 = vrot.slane %v4939_v41, 6 }
 0x3c5   : > { %vm5855_vm4 = vcmp.gt.f32.partialorder %v5791_v23, 0.0  ;;  %v5919_v19 = vmul.f32 0.01, %v5791_v23  ;;  %v5982_v31 = vsel %vm5854_vm12, %v5790_v2, %v5918_v17  ;;  %v15062_v29 = vadd.f32 %v3810_v21, %v3530_v30 }
 0x3c6   : > { %v5525_v8 = vrot.slane %v5524_v12, 1  ;;  %v5533_v15 = vmax.f32 %v5531_v51, %v5532_v63  ;;  %v6100_v49 = vpack.c.bf16 %v5982_v31, %v5982_v31  ;;  %v5536_v7 = vsel %vm5175_vm1, %v4939_v41, -inf }
 0x3c7   : > { %v5983_v50 = vsel %vm5855_vm4, %v5791_v23, %v5919_v19  ;;  %v5545_v0 = vsel %vm5175_vm1, %v5043_v33, -inf  ;;  %v5046_v13 = vrot.slane %v15058_v32, 2  ;;  %v5554_v34 = vsel %vm5175_vm1, %v5044_v54, -inf }
 0x3c8   : > { %v5526_v46 = vmax.f32 %v5524_v12, %v5525_v8  ;;  %v5534_v16 = vrot.slane %v5533_v15, 1  ;;  %v6101_v28 = vpack.c.bf16 %v5983_v50, %v5983_v50  ;;  %v6228_v26 = vunpack.c.l.b16 %v6100_v49 }
 0x3c9   : > { %v5563_v56 = vsel %vm5175_vm1, %v5045_v45, -inf  ;;  %v5047_v18 = vrot.slane %v15058_v32, 4  ;;  %v5048_v58 = vrot.slane %v15058_v32, 6  ;;  %v5572_v37 = vsel %vm5175_vm1, %v15058_v32, -inf  ;;  %v4896_v63 = vpop.f32.mrf.mxu0 }
 0x3ca   : > { %v5535_v10 = vmax.f32 %v5533_v15, %v5534_v16  ;;  %v5792_v55 = vadd.f32 %v14884_v27, %v5526_v46  ;;  %v6229_v42 = vunpack.c.l.b16 %v6101_v28  ;;  %v6321_v4 = vrot.slane %v6228_v26, 3 }
 0x3cb   : > { %v15075_v53 = vsel %vm5175_vm1, %v5046_v13, -inf  ;;  %v15078_v14 = vsel %vm5175_vm1, %v5047_v18, -inf  ;;  %v4941_v22 = vadd.f32 %v4894_v20, %v14605_v40  ;;  %v5599_v54 = vsel %vm5175_vm1, %v5048_v58, -inf }
 0x3cc   : > { %v5793_v24 = vadd.f32 %v14884_v27, %v5535_v10  ;;  %vm5856_vm14 = vcmp.gt.f32.partialorder %v5792_v55, 0.0  ;;  %v5920_v9 = vmul.f32 0.01, %v5792_v55  ;;  %v6322_v62 = vsel %vm6267_vm9, %v6321_v4, %v6320_v25 }
 0x3cd   : > { %v6323_v43 = vrot.slane %v6229_v42, 2  ;;  %v5049_v6 = vrot.slane %v4941_v22, 2  ;;  %v5050_v61 = vrot.slane %v4941_v22, 4  ;;  %v5051_v35 = vrot.slane %v4941_v22, 6 }
 0x3ce   : > { %vm5857_vm3 = vcmp.gt.f32.partialorder %v5793_v24, 0.0  ;;  %v5921_v5 = vmul.f32 0.01, %v5793_v24  ;;  %v5984_v2 = vsel %vm5856_vm14, %v5792_v55, %v5920_v9  ;;  %v5537_v41 = vsel %vm5175_vm1, %v4941_v22, -inf }
 0x3cf   : > { %v6102_v39 = vpack.c.bf16 %v5984_v2, %v5984_v2  ;;  %v6324_v60 = vsel %vm6270_vm0, %v6323_v43, %v6322_v62  ;;  %v5538_v51 = vmax.f32 %v5536_v7, %v5537_v41  ;;  %v5546_v40 = vsel %vm5175_vm1, %v5049_v6, -inf  ;;  %v6425_v7 = vld [vmem:[#allocation3 + $0x2c] sm:$0x1] }
 0x3d0   : > { %v5985_v32 = vsel %vm5857_vm3, %v5793_v24, %v5921_v5  ;;  %v5547_v21 = vmax.f32 %v5545_v0, %v5546_v40  ;;  %v5555_v23 = vsel %vm5175_vm1, %v5050_v61, -inf  ;;  %v5564_v25 = vsel %vm5175_vm1, %v5051_v35, -inf }
 0x3d1   : > { %v6103_v17 = vpack.c.bf16 %v5985_v32, %v5985_v32  ;;  %v6230_v33 = vunpack.c.l.b16 %v6102_v39  ;;  %v5539_v30 = vrot.slane %v5538_v51, 4  ;;  %v5556_v12 = vmax.f32 %v5554_v34, %v5555_v23  ;;  %v6422_v34 = vld [vmem:[#allocation3 + $0x28] sm:$0xf] }
 0x3d2   : > { %v5548_v19 = vrot.slane %v5547_v21, 4  ;;  %v5565_v31 = vmax.f32 %v5563_v56, %v5564_v25  ;;  %v4942_v45 = vadd.f32 %v4896_v63, %v14608_v47  ;;  %vm15929_vm13 = vcmask 1047559  }
 0x3d3   : > { %v6231_v8 = vunpack.c.l.b16 %v6103_v17  ;;  %v6325_v15 = vrot.slane %v6230_v33, 1  ;;  %v5540_v49 = vmax.f32 %v5538_v51, %v5539_v30  ;;  %v5557_v50 = vrot.slane %v5556_v12, 4 }
 0x3d4   : > { %v5549_v0 = vmax.f32 %v5547_v21, %v5548_v19  ;;  %v5566_v13 = vrot.slane %v5565_v31, 4  ;;  %v5052_v46 = vrot.slane %v4942_v45, 2  ;;  %v5053_v16 = vrot.slane %v4942_v45, 4 }
 0x3d5   : > { %v6326_v28 = vsel %vm15929_vm13, %v6325_v15, %v6324_v60  ;;  %v6375_v26 = vpack.c.b16 %v6231_v8, %v6231_v8  ;;  %v5541_v18 = vrot.slane %v5540_v49, 2  ;;  %v5558_v20 = vmax.f32 %v5556_v12, %v5557_v50 }
 0x3d6   : > { %v6374_v58 = vpack.c.b16 %v6326_v28, %v6326_v28  ;;  %v5550_v10 = vrot.slane %v5549_v0, 2  ;;  %v5567_v56 = vmax.f32 %v5565_v31, %v5566_v13  ;;  %v5054_v55 = vrot.slane %v4942_v45, 6 }
 0x3d7   : > { %v6426_v47 = vsel %vm13268_vm7, %v6375_v26, %v6425_v7  ;;  %v5542_v42 = vmax.f32 %v5540_v49, %v5541_v18  ;;  %v5559_v4 = vrot.slane %v5558_v20, 2  ;;  %v5573_v22 = vsel %vm5175_vm1, %v4942_v45, -inf  ;;  %v15104_v49 = vld [vmem:[#allocation11] ss:$0 sm:$0xff] }
 0x3d8   : > { %v6423_v24 = vsel %vm13325_vm6, %v6374_v58, %v6422_v34  ;;  %6427 = vst [vmem:[#allocation3 + $0x2c] sm:$0x1] %v6426_v47  ;;  %v5551_v9 = vmax.f32 %v5549_v0, %v5550_v10  ;;  %v5568_v62 = vrot.slane %v5567_v56, 2  ;;  %v5574_v43 = vmax.f32 %v5572_v37, %v5573_v22 }
 0x3d9   : > { %6424 = vst [vmem:[#allocation3 + $0x28] sm:$0xf] %v6423_v24  ;;  %v5543_v6 = vrot.slane %v5542_v42, 1  ;;  %v5560_v61 = vmax.f32 %v5558_v20, %v5559_v4  ;;  %v5582_v35 = vsel %vm5175_vm1, %v5052_v46, -inf  ;;  %v5591_v5 = vsel %vm5175_vm1, %v5053_v16, -inf  ;;  %v4899_v16 = vpop.f32.mrf.mxu0 }
 0x3da   : > { %v5552_v2 = vrot.slane %v5551_v9, 1  ;;  %v5569_v41 = vmax.f32 %v5567_v56, %v5568_v62  ;;  %v5575_v39 = vrot.slane %v5574_v43, 4  ;;  %v5583_v60 = vmax.f32 %v15075_v53, %v5582_v35 }
 0x3db   : > { %v5544_v51 = vmax.f32 %v5542_v42, %v5543_v6  ;;  %v5561_v40 = vrot.slane %v5560_v61, 1  ;;  %v5592_v32 = vmax.f32 %v15078_v14, %v5591_v5  ;;  %v5600_v21 = vsel %vm5175_vm1, %v5054_v55, -inf }
 0x3dc   : > { %v5553_v23 = vmax.f32 %v5551_v9, %v5552_v2  ;;  %v5570_v37 = vrot.slane %v5569_v41, 1  ;;  %v5576_v25 = vmax.f32 %v5574_v43, %v5575_v39  ;;  %v5584_v17 = vrot.slane %v5583_v60, 4  ;;  %v6031_v9 = vld [vmem:[#allocation3 + $0x30] sm:$0x1] }
 0x3dd   : > { %v5562_v33 = vmax.f32 %v5560_v61, %v5561_v40  ;;  %v5794_v30 = vadd.f32 %v14884_v27, %v5544_v51  ;;  %v5593_v12 = vrot.slane %v5592_v32, 4  ;;  %v5601_v63 = vmax.f32 %v5599_v54, %v5600_v21 }
 0x3de   : > { %v5571_v19 = vmax.f32 %v5569_v41, %v5570_v37  ;;  %v5795_v31 = vadd.f32 %v14884_v27, %v5553_v23  ;;  %v5577_v45 = vrot.slane %v5576_v25, 2  ;;  %v5585_v53 = vmax.f32 %v5583_v60, %v5584_v17 }
 0x3df   : > { %v5796_v8 = vadd.f32 %v14884_v27, %v5562_v33  ;;  %vm5858_vm12 = vcmp.gt.f32.partialorder %v5794_v30, 0.0  ;;  %v5922_v14 = vmul.f32 0.01, %v5794_v30  ;;  %v5594_v15 = vmax.f32 %v5592_v32, %v5593_v12  ;;  %v6055_v32 = vld [vmem:[#allocation3 + $0x34] sm:$0x1] }
 0x3e0   : > { %v5797_v50 = vadd.f32 %v15104_v49, %v5571_v19  ;;  %vm5859_vm4 = vcmp.gt.f32.partialorder %v5795_v31, 0.0  ;;  %v5923_v7 = vmul.f32 0.01, %v5795_v31  ;;  %v5578_v0 = vmax.f32 %v5576_v25, %v5577_v45  ;;  %v15112_v25 = vld [vmem:[#allocation3 + $0x8] sm:$0xf] }
 0x3e1   : > { %vm5860_vm14 = vcmp.gt.f32.partialorder %v5796_v8, 0.0  ;;  %v5924_v13 = vmul.f32 0.01, %v5796_v8  ;;  %v5986_v54 = vsel %vm5858_vm12, %v5794_v30, %v5922_v14  ;;  %v5586_v46 = vrot.slane %v5585_v53, 2  ;;  %v12629_v19 = vld [vmem:[#allocation3 + $0x24] sm:$0xf0] }
 0x3e2   : > { %vm5861_vm3 = vcmp.gt.f32.partialorder %v5797_v50, 0.0  ;;  %v5925_v28 = vmul.f32 0.01, %v5797_v50  ;;  %v5987_v26 = vsel %vm5859_vm4, %v5795_v31, %v5923_v7  ;;  %v6104_v34 = vpack.c.bf16 %v5986_v54, %v5986_v54  ;;  %v11580_v7 = vld [vmem:[#allocation3 + $0x20] sm:$0xf] }
 0x3e3   : > { %v5988_v27 = vsel %vm5860_vm14, %v5796_v8, %v5924_v13  ;;  %v6105_v18 = vpack.c.bf16 %v5987_v26, %v5987_v26  ;;  %v5579_v20 = vrot.slane %v5578_v0, 1  ;;  %v5587_v58 = vmax.f32 %v5585_v53, %v5586_v46  ;;  %v4901_v53 = vpop.f32.mrf.mxu0  ;;  %v15120_v46 = vld [vmem:[#allocation3 + $0x24] sm:$0x1] }
 0x3e4   : > { %v5989_v10 = vsel %vm5861_vm3, %v5797_v50, %v5925_v28  ;;  %v6106_v56 = vpack.c.bf16 %v5988_v27, %v5988_v27  ;;  %v6232_v55 = vunpack.c.l.b16 %v6104_v34  ;;  %v5595_v47 = vrot.slane %v5594_v15, 2 }
 0x3e5   : > { %v6107_v42 = vpack.c.bf16 %v5989_v10, %v5989_v10  ;;  %v6233_v4 = vunpack.c.l.b16 %v6105_v18  ;;  %v5580_v22 = vmax.f32 %v5578_v0, %v5579_v20  ;;  %v5588_v24 = vrot.slane %v5587_v58, 1  ;;  %v6805_v18 = vld [vmem:[#allocation3 + $0x20] sm:$0xe] }
 0x3e6   : > { %v6234_v62 = vunpack.c.l.b16 %v6106_v56  ;;  %v6327_v43 = vrot.slane %v6232_v55, 7  ;;  %v5596_v6 = vmax.f32 %v5594_v15, %v5595_v47  ;;  %v5602_v61 = vrot.slane %v5601_v63, 4  ;;  %v15123_v55 = vpop.f32.mrf.mxu3 }
 0x3e7   : > { %v6235_v35 = vunpack.c.l.b16 %v6107_v42  ;;  %v6328_v5 = vrot.slane %v6233_v4, 6  ;;  %v5589_v2 = vmax.f32 %v5587_v58, %v5588_v24  ;;  %v5798_v41 = vadd.f32 %v15104_v49, %v5580_v22 }
 0x3e8   : > { %v6330_v39 = vrot.slane %v6234_v62, 5  ;;  %v5597_v60 = vrot.slane %v5596_v6, 1  ;;  %v5603_v51 = vmax.f32 %v5601_v63, %v5602_v61  ;;  %v6032_v40 = vsel %vm13268_vm7, 0, %v6031_v9 }
 0x3e9   : > { %v6329_v21 = vsel %vm6258_vm2, %v6328_v5, %v6327_v43  ;;  %v6332_v23 = vrot.slane %v6235_v35, 4  ;;  %v5799_v37 = vadd.f32 %v15104_v49, %v5589_v2  ;;  %vm5862_vm13 = vcmp.gt.f32.partialorder %v5798_v41, 0.0  ;;  %6033 = vst [vmem:[#allocation3 + $0x30] sm:$0x1] %v6032_v40 }
 0x3ea   : > { %vm15930_vm12 = vcmask 1043459   ;;  %v5598_v33 = vmax.f32 %v5596_v6, %v5597_v60  ;;  %v5604_v30 = vrot.slane %v5603_v51, 2  ;;  %v5926_v12 = vmul.f32 0.01, %v5798_v41 }
 0x3eb   : > { %v6331_v17 = vsel %vm15930_vm12, %v6330_v39, %v6329_v21  ;;  %vm15931_vm4 = vcmask 1044484   ;;  %vm5863_vm14 = vcmp.gt.f32.partialorder %v5799_v37, 0.0  ;;  %v5927_v31 = vmul.f32 0.01, %v5799_v37  ;;  %v6806_v39 = vld [vmem:[#allocation3 + $0x28] sm:$0xe] }
 0x3ec   : > { %v6333_v63 = vsel %vm15931_vm4, %v6332_v23, %v6331_v17  ;;  %v6056_v45 = vsel %vm13295_vm5, 0, %v6055_v32  ;;  %v5605_v8 = vmax.f32 %v5603_v51, %v5604_v30  ;;  %v5800_v14 = vadd.f32 %v15104_v49, %v5598_v33  ;;  %v6680_v32 = vpop.f32.mrf.mxu1  ;;  %v4904_v33 = vpop.f32.mrf.mxu0  ;;  %v6450_v30 = vld [vmem:[#allocation3 + $0x20] sm:$0xf] }
 0x3ed   : > { %v5990_v15 = vsel %vm5862_vm13, %v5798_v41, %v5926_v12  ;;  %6057 = vst [vmem:[#allocation3 + $0x34] sm:$0x1] %v6056_v45  ;;  %v4943_v50 = vadd.f32 %v4899_v16, %v14611_v1  ;;  %v5991_v0 = vsel %vm5863_vm14, %v5799_v37, %v5927_v31  ;;  %v11581_v54 = vor.u32 %v12629_v19, %v11580_v7  ;;  %v15135_v41 = vld [vmem:[#allocation3 + $0x2c] sm:$0x1]  ;;  %v6781_v19 = vpop.f32.mrf.mxu2 }
 0x3ee   : > { %v6108_v13 = vpack.c.bf16 %v5990_v15, %v5990_v15  ;;  %v7124_v28 = vshrl.u32 %v15112_v25, 16  ;;  %v5606_v26 = vrot.slane %v5605_v8, 1  ;;  %vm5864_vm3 = vcmp.gt.f32.partialorder %v5800_v14, 0.0 }
 0x3ef   : > { %v5928_v34 = vmul.f32 0.01, %v5800_v14  ;;  %v6109_v27 = vpack.c.bf16 %v5991_v0, %v5991_v0  ;;  %v5055_v58 = vrot.slane %v4943_v50, 2  ;;  %v5056_v10 = vrot.slane %v4943_v50, 4  ;;  %6790 = vmatmul.bf16.gmra.mxu2 %v11581_v54 }
 0x3f0   : > { %v6236_v20 = vunpack.c.l.b16 %v6108_v13  ;;  %v5057_v56 = vrot.slane %v4943_v50, 6  ;;  %v5607_v1 = vmax.f32 %v5605_v8, %v5606_v26  ;;  %v15126_v42 = vadd.f32 %v4901_v53, %v14614_v52  ;;  %v6946_v13 = vpop.f32.mrf.mxu3 }
 0x3f1   : > { %v5992_v16 = vsel %vm5864_vm3, %v5800_v14, %v5928_v34  ;;  %v6237_v47 = vunpack.c.l.b16 %v6109_v27  ;;  %v11622_v24 = vrot.slane %v6805_v18, 9  ;;  %v6843_v9 = vrot.slane %v15120_v46, 5  ;;  %v6428_v14 = vld [vmem:[#allocation3 + $0x30] sm:$0xf] }
 0x3f2   : > { %v6110_v4 = vpack.c.bf16 %v5992_v16, %v5992_v16  ;;  %v6334_v22 = vrot.slane %v6236_v20, 3  ;;  %v5801_v62 = vadd.f32 %v15104_v49, %v5607_v1  ;;  %v5608_v6 = vsel %vm5175_vm1, %v4943_v50, -inf }
 0x3f3   : > { %v6336_v43 = vrot.slane %v6237_v47, 2  ;;  %v5617_v61 = vsel %vm5175_vm1, %v5055_v58, -inf  ;;  %v5626_v2 = vsel %vm5175_vm1, %v5056_v10, -inf  ;;  %v5635_v52 = vsel %vm5175_vm1, %v5057_v56, -inf }
 0x3f4   : > { %v6238_v35 = vunpack.c.l.b16 %v6110_v4  ;;  %v6335_v5 = vsel %vm6267_vm9, %v6334_v22, %v6333_v63  ;;  %vm5865_vm13 = vcmp.gt.f32.partialorder %v5801_v62, 0.0  ;;  %v5929_v60 = vmul.f32 0.01, %v5801_v62  ;;  %v6431_v10 = vld [vmem:[#allocation3 + $0x34] sm:$0x1] }
 0x3f5   : > { %v6337_v51 = vsel %vm6270_vm0, %v6336_v43, %v6335_v5  ;;  %v5058_v40 = vrot.slane %v15126_v42, 2  ;;  %v5059_v23 = vrot.slane %v15126_v42, 4  ;;  %v5060_v37 = vrot.slane %v15126_v42, 6 }
 0x3f6   : > { %v6338_v21 = vrot.slane %v6238_v35, 1  ;;  %v15143_v17 = vsel %vm5175_vm1, %v15126_v42, -inf  ;;  %v5993_v12 = vsel %vm5865_vm13, %v5801_v62, %v5929_v60  ;;  %v6844_v63 = vsel %vm13310_vm10, %v11622_v24, %v6843_v9  ;;  %v6451_v24 = vld [vmem:[#allocation3 + $0x28] sm:$0xf] }
 0x3f7   : > { %v11623_v31 = vrot.slane %v6806_v39, 9  ;;  %v6847_v45 = vrot.slane %v15135_v41, 5  ;;  %v6111_v53 = vpack.c.bf16 %v5993_v12, %v5993_v12  ;;  %vm15932_vm12 = vcmask 1047559  }
 0x3f8   : > { %v6339_v8 = vsel %vm15932_vm12, %v6338_v21, %v6337_v51  ;;  %v6877_v15 = vunpack.c.l.b16 %v6844_v63  ;;  %v6782_v50 = vadd.f32 %v6781_v19, %v6680_v32  ;;  %v4945_v54 = vadd.f32 %v4904_v33, %v14617_v44 }
 0x3f9   : > { %v6376_v7 = vpack.c.b16 %v6339_v8, %v6339_v8  ;;  %v6848_v0 = vsel %vm13310_vm10, %v11623_v31, %v6847_v45  ;;  %v6536_v26 = vshrl.u32 %v6450_v30, 16  ;;  %v6239_v34 = vunpack.c.l.b16 %v6111_v53 }
 0x3fa   : > { %v6878_v27 = vunpack.c.l.b16 %v6848_v0  ;;  %v15152_v18 = vadd.f32 %v6946_v13, %v6782_v50  ;;  %v6539_v20 = vshll.u32 %v6450_v30, 16  ;;  %v5061_v56 = vrot.slane %v4945_v54, 2 }
 0x3fb   : > { %v6429_v58 = vsel %vm13325_vm6, %v6376_v7, %v6428_v14  ;;  %v5062_v1 = vrot.slane %v4945_v54, 4  ;;  %v5063_v16 = vrot.slane %v4945_v54, 6  ;;  %v6377_v47 = vpack.c.b16 %v6239_v34, %v6239_v34  ;;  %v4906_v34 = vpop.f32.mrf.mxu0 }
 0x3fc   : > { %6430 = vst [vmem:[#allocation3 + $0x30] sm:$0xf] %v6429_v58  ;;  %v6883_v4 = vpack.c.b16 %v6878_v27, %v6877_v15  ;;  %v5609_v22 = vsel %vm5175_vm1, %v4945_v54, -inf  ;;  %v6538_v44 = vrot.slane %v6536_v26, 4  ;;  %v5618_v62 = vsel %vm5175_vm1, %v5061_v56, -inf }
 0x3fd   : > { %v5610_v9 = vmax.f32 %v5608_v6, %v5609_v22  ;;  %v5627_v43 = vsel %vm5175_vm1, %v5062_v1, -inf  ;;  %v5636_v35 = vsel %vm5175_vm1, %v5063_v16, -inf  ;;  %v6432_v5 = vsel %vm13268_vm7, %v6377_v47, %v6431_v10 }
 0x3fe   : > { %6955 = vmatmul.bf16.gmra.mxu3 %v6883_v4  ;;  %v5619_v39 = vmax.f32 %v5617_v61, %v5618_v62  ;;  %v5628_v60 = vmax.f32 %v5626_v2, %v5627_v43  ;;  %v5637_v51 = vmax.f32 %v5635_v52, %v5636_v35  ;;  %6433 = vst [vmem:[#allocation3 + $0x34] sm:$0x1] %v6432_v5  ;;  %v6541_v21 = vrot.slane %v6539_v20, 5 }
 0x3ff   : > { %v5611_v32 = vrot.slane %v5610_v9, 4  ;;  %v6545_v33 = vshll.u32 %v15120_v46, 16  ;;  %v6550_v30 = vshrl.u32 %v6451_v24, 16  ;;  %v6553_v63 = vshll.u32 %v6451_v24, 16 }
 0x400   : > { %v5620_v6 = vrot.slane %v5619_v39, 4  ;;  %v5629_v12 = vrot.slane %v5628_v60, 4  ;;  %v5638_v19 = vrot.slane %v5637_v51, 4  ;;  %v5653_v31 = vsel %vm5175_vm1, %v5058_v40, -inf }
 0x401   : > { %v5612_v45 = vmax.f32 %v5610_v9, %v5611_v32  ;;  %v6542_v53 = vor.u32 %v6541_v21, %v6538_v44  ;;  %v6552_v8 = vrot.slane %v6550_v30, 4  ;;  %v6555_v2 = vrot.slane %v6553_v63, 5 }
 0x402   : > { %v5621_v14 = vmax.f32 %v5619_v39, %v5620_v6  ;;  %v5630_v15 = vmax.f32 %v5628_v60, %v5629_v12  ;;  %v5639_v61 = vmax.f32 %v5637_v51, %v5638_v19  ;;  %v6547_v7 = vrot.slane %v6545_v33, 5 }
 0x403   : > { %v5613_v52 = vrot.slane %v5612_v45, 2  ;;  %v6543_v50 = vrot.slane %v6542_v53, 4  ;;  %v6559_v0 = vshll.u32 %v15135_v41, 16  ;;  %v6556_v26 = vor.u32 %v6555_v2, %v6552_v8  ;;  %v12674_v2 = vld [vmem:[#allocation9 + $0x378] sm:$0xff] }
 0x404   : > { %v5622_v46 = vrot.slane %v5621_v14, 2  ;;  %v5631_v13 = vrot.slane %v5630_v15, 2  ;;  %v5640_v54 = vrot.slane %v5639_v61, 2  ;;  %v5662_v40 = vsel %vm5175_vm1, %v5059_v23, -inf  ;;  %7315 = vmatpush.bf16.msrb.mxu2 %v12674_v2 }
 0x405   : > { %v5614_v27 = vmax.f32 %v5612_v45, %v5613_v52  ;;  %v6548_v20 = vsel %vm13301_vm8, %v6543_v50, %v6547_v7  ;;  %v6561_v58 = vrot.slane %v6559_v0, 5  ;;  %v6557_v16 = vrot.slane %v6556_v26, 4  ;;  %v4909_v52 = vpop.f32.mrf.mxu0 }
 0x406   : > { %v5623_v10 = vmax.f32 %v5621_v14, %v5622_v46  ;;  %v5632_v56 = vmax.f32 %v5630_v15, %v5631_v13  ;;  %v5641_v1 = vmax.f32 %v5639_v61, %v5640_v54  ;;  %v15173_v41 = vsel %vm5175_vm1, %v5060_v37, -inf  ;;  %v12682_v46 = vld [vmem:[#allocation9 + $0x3b8] sm:$0xff] }
 0x407   : > { %v5615_v47 = vrot.slane %v5614_v27, 1  ;;  %v6611_v4 = vunpack.c.l.b16 %v6548_v20  ;;  %v4946_v22 = vadd.f32 %v4906_v34, %v14620_v3  ;;  %v6562_v9 = vsel %vm13301_vm8, %v6557_v16, %v6561_v58  ;;  %v12666_v13 = vld [vmem:[#allocation9 + $0x338] sm:$0xff]  ;;  %7488 = vmatpush.bf16.msrb.mxu3 %v12682_v46  ;;  %v12665_v16 = vld [vmem:[#allocation9 + $0x330] sm:$0xff] }
 0x408   : > { %v5624_v24 = vrot.slane %v5623_v10, 1  ;;  %v5633_v23 = vrot.slane %v5632_v56, 1  ;;  %v5642_v44 = vrot.slane %v5641_v1, 1  ;;  %v6612_v43 = vunpack.c.l.b16 %v6562_v9  ;;  %7070 = vmatpush.bf16.msrb.mxu1 %v12666_v13 }
 0x409   : > { %v5616_v62 = vmax.f32 %v5614_v27, %v5615_v47  ;;  %v5064_v35 = vrot.slane %v4946_v22, 2  ;;  %v5065_v5 = vrot.slane %v4946_v22, 4  ;;  %v5066_v51 = vrot.slane %v4946_v22, 6  ;;  %v12673_v27 = vld [vmem:[#allocation9 + $0x370] sm:$0xff] }
 0x40a   : > { %v5625_v39 = vmax.f32 %v5623_v10, %v5624_v24  ;;  %v5634_v60 = vmax.f32 %v5632_v56, %v5633_v23  ;;  %v5643_v42 = vmax.f32 %v5641_v1, %v5642_v44  ;;  %v6617_v32 = vpack.c.b16 %v6612_v43, %v6611_v4  ;;  %v12681_v1 = vld [vmem:[#allocation9 + $0x3b0] sm:$0xff]  ;;  %v6034_v24 = vld [vmem:[#allocation3 + $0x38] sm:$0x1]  ;;  %7316 = vmatpush.bf16.msrb.mxu2 %v12673_v27 }
 0x40b   : > { %v5802_v37 = vadd.f32 %v15104_v49, %v5616_v62  ;;  %v5645_v21 = vsel %vm5175_vm1, %v4946_v22, -inf  ;;  %v5654_v3 = vsel %vm5175_vm1, %v5064_v35, -inf  ;;  %v5663_v45 = vsel %vm5175_vm1, %v5065_v5, -inf  ;;  %7489 = vmatpush.bf16.msrb.mxu3 %v12681_v1 }
 0x40c   : > { %v5803_v33 = vadd.f32 %v15104_v49, %v5625_v39  ;;  %v5804_v30 = vadd.f32 %v15104_v49, %v5634_v60  ;;  %v5805_v6 = vadd.f32 %v15104_v49, %v5643_v42  ;;  %v5646_v12 = vmax.f32 %v15143_v17, %v5645_v21  ;;  %6689 = vmatmul.bf16.gmra.mxu1 %v6617_v32  ;;  %v6058_v60 = vld [vmem:[#allocation3 + $0x3c] sm:$0x1] }
 0x40d   : > { %vm5866_vm4 = vcmp.gt.f32.partialorder %v5802_v37, 0.0  ;;  %v5930_v19 = vmul.f32 0.01, %v5802_v37  ;;  %v5655_v63 = vmax.f32 %v5653_v31, %v5654_v3  ;;  %v5664_v17 = vmax.f32 %v5662_v40, %v5663_v45  ;;  %7071 = vmatpush.bf16.msrb.mxu1 %v12665_v16  ;;  %v12680_v3 = vld [vmem:[#allocation9 + $0x3a8] sm:$0xff] }
 0x40e   : > { %vm5867_vm14 = vcmp.gt.f32.partialorder %v5803_v33, 0.0  ;;  %vm5868_vm3 = vcmp.gt.f32.partialorder %v5804_v30, 0.0  ;;  %vm5869_vm13 = vcmp.gt.f32.partialorder %v5805_v6, 0.0  ;;  %v5931_v53 = vmul.f32 0.01, %v5803_v33 }
 0x40f   : > { %v5932_v8 = vmul.f32 0.01, %v5804_v30  ;;  %v5933_v14 = vmul.f32 0.01, %v5805_v6  ;;  %v5994_v15 = vsel %vm5866_vm4, %v5802_v37, %v5930_v19  ;;  %v5647_v61 = vrot.slane %v5646_v12, 4  ;;  %v4911_v19 = vpop.f32.mrf.mxu0  ;;  %7490 = vmatpush.bf16.msrb.mxu3 %v12680_v3 }
 0x410   : > { %v5995_v50 = vsel %vm5867_vm14, %v5803_v33, %v5931_v53  ;;  %v6112_v7 = vpack.c.bf16 %v5994_v15, %v5994_v15  ;;  %v5656_v0 = vrot.slane %v5655_v63, 4  ;;  %v5665_v22 = vrot.slane %v5664_v17, 4  ;;  %v15934_v53 = vld [vmem:[#allocation41_spill] sm:$0xff] }
 0x411   : > { %v5996_v54 = vsel %vm5868_vm3, %v5804_v30, %v5932_v8  ;;  %v5997_v31 = vsel %vm5869_vm13, %v5805_v6, %v5933_v14  ;;  %v6113_v26 = vpack.c.bf16 %v5995_v50, %v5995_v50  ;;  %v5648_v34 = vmax.f32 %v5646_v12, %v5647_v61 }
 0x412   : > { %v6114_v20 = vpack.c.bf16 %v5996_v54, %v5996_v54  ;;  %v6115_v58 = vpack.c.bf16 %v5997_v31, %v5997_v31  ;;  %v6240_v10 = vunpack.c.l.b16 %v6112_v7  ;;  %v5657_v56 = vmax.f32 %v5655_v63, %v5656_v0 }
 0x413   : > { %v6241_v47 = vunpack.c.l.b16 %v6113_v26  ;;  %v5649_v4 = vrot.slane %v5648_v34, 2  ;;  %v5672_v40 = vsel %vm5175_vm1, %v5066_v51, -inf  ;;  %v5666_v5 = vmax.f32 %v5664_v17, %v5665_v22  ;;  %v12672_v51 = vld [vmem:[#allocation9 + $0x368] sm:$0xff] }
 0x414   : > { %v6242_v23 = vunpack.c.l.b16 %v6114_v20  ;;  %v6243_v44 = vunpack.c.l.b16 %v6115_v58  ;;  %v6340_v9 = vrot.slane %v6240_v10, 7  ;;  %v5658_v62 = vrot.slane %v5657_v56, 2  ;;  %7317 = vmatpush.bf16.msrb.mxu2 %v12672_v51  ;;  %v15222_v51 = vld [vmem:[#allocation3 + $0x30] sm:$0xe] }
 0x415   : > { %v6341_v43 = vrot.slane %v6241_v47, 6  ;;  %v5650_v35 = vmax.f32 %v5648_v34, %v5649_v4  ;;  %v5673_v39 = vmax.f32 %v15173_v41, %v5672_v40  ;;  %v6035_v21 = vsel %vm13268_vm7, 0, %v6034_v24 }
 0x416   : > { %v6343_v42 = vrot.slane %v6242_v23, 5  ;;  %v6345_v37 = vrot.slane %v6243_v44, 4  ;;  %v5659_v32 = vmax.f32 %v5657_v56, %v5658_v62  ;;  %v5667_v6 = vrot.slane %v5666_v5, 2  ;;  %6036 = vst [vmem:[#allocation3 + $0x38] sm:$0x1] %v6035_v21  ;;  %v15936_v56 = vld [vmem:[#allocation40_spill] sm:$0xff] }
 0x417   : > { %v6342_v33 = vsel %vm6258_vm2, %v6341_v43, %v6340_v9  ;;  %v5651_v30 = vrot.slane %v5650_v35, 1  ;;  %v5674_v12 = vrot.slane %v5673_v39, 4  ;;  %vm15933_vm12 = vcmask 1043459   ;;  %v4914_v40 = vpop.f32.mrf.mxu0 }
 0x418   : > { %v6344_v41 = vsel %vm15933_vm12, %v6343_v42, %v6342_v33  ;;  %v5660_v63 = vrot.slane %v5659_v32, 1  ;;  %v6059_v45 = vsel %vm13295_vm5, 0, %v6058_v60  ;;  %v4947_v8 = vadd.f32 %v4909_v52, %v15934_v53 }
 0x419   : > { %vm15935_vm4 = vcmask 1044484   ;;  %v5652_v15 = vmax.f32 %v5650_v35, %v5651_v30  ;;  %v5668_v61 = vmax.f32 %v5666_v5, %v5667_v6  ;;  %v5675_v2 = vmax.f32 %v5673_v39, %v5674_v12  ;;  %6060 = vst [vmem:[#allocation3 + $0x3c] sm:$0x1] %v6059_v45  ;;  %v12664_v12 = vld [vmem:[#allocation9 + $0x328] sm:$0xff] }
 0x41a   : > { %v6346_v14 = vsel %vm15935_vm4, %v6345_v37, %v6344_v41  ;;  %v15198_v50 = vadd.f32 %v15123_v55, %v15062_v29  ;;  %v5661_v7 = vmax.f32 %v5659_v32, %v5660_v63  ;;  %v5067_v0 = vrot.slane %v4947_v8, 2  ;;  %v12679_v41 = vld [vmem:[#allocation9 + $0x3a0] sm:$0xff]  ;;  %7072 = vmatpush.bf16.msrb.mxu1 %v12664_v12 }
 0x41b   : > { %v5068_v17 = vrot.slane %v4947_v8, 4  ;;  %v5669_v46 = vrot.slane %v5668_v61, 1  ;;  %v5676_v13 = vrot.slane %v5675_v2, 2  ;;  %v5806_v54 = vadd.f32 %v15104_v49, %v5652_v15  ;;  %7491 = vmatpush.bf16.msrb.mxu3 %v12679_v41 }
 0x41c   : > { %v5069_v52 = vrot.slane %v4947_v8, 6  ;;  %v5807_v31 = vadd.f32 %v15104_v49, %v5661_v7  ;;  %v5680_v26 = vsel %vm5175_vm1, %v4947_v8, -inf  ;;  %v5689_v34 = vsel %vm5175_vm1, %v5067_v0, -inf }
 0x41d   : > { %v15206_v29 = vrot.slane %v7124_v28, 4  ;;  %v5670_v55 = vmax.f32 %v5668_v61, %v5669_v46  ;;  %v5677_v27 = vmax.f32 %v5675_v2, %v5676_v13  ;;  %vm5870_vm14 = vcmp.gt.f32.partialorder %v5806_v54, 0.0 }
 0x41e   : > { %v5934_v20 = vmul.f32 0.01, %v5806_v54  ;;  %vm5871_vm3 = vcmp.gt.f32.partialorder %v5807_v31, 0.0  ;;  %v5935_v58 = vmul.f32 0.01, %v5807_v31  ;;  %v5698_v10 = vsel %vm5175_vm1, %v5068_v17, -inf }
 0x41f   : > { %v4948_v1 = vadd.f32 %v4911_v19, %v15936_v56  ;;  %v5678_v16 = vrot.slane %v5677_v27, 1  ;;  %v5808_v47 = vadd.f32 %v15104_v49, %v5670_v55  ;;  %v5707_v22 = vsel %vm5175_vm1, %v5069_v52, -inf  ;;  %v12671_v19 = vld [vmem:[#allocation9 + $0x360] sm:$0xff]  ;;  %v4916_v46 = vpop.f32.mrf.mxu0 }
 0x420   : > { %v5998_v4 = vsel %vm5870_vm14, %v5806_v54, %v5934_v20  ;;  %v5999_v24 = vsel %vm5871_vm3, %v5807_v31, %v5935_v58  ;;  %v4949_v6 = vadd.f32 %v4914_v40, %v15055_v11  ;;  %v11624_v53 = vrot.slane %v15222_v51, 9  ;;  %7318 = vmatpush.bf16.msrb.mxu2 %v12671_v19  ;;  %v6437_v40 = vld [vmem:[#allocation3 + $0x3c] sm:$0x1] }
 0x421   : > { %v6116_v28 = vpack.c.bf16 %v5998_v4, %v5998_v4  ;;  %v5070_v23 = vrot.slane %v4948_v1, 2  ;;  %v5071_v44 = vrot.slane %v4948_v1, 4  ;;  %v5679_v9 = vmax.f32 %v5677_v27, %v5678_v16 }
 0x422   : > { %vm5872_vm13 = vcmp.gt.f32.partialorder %v5808_v47, 0.0  ;;  %v5936_v62 = vmul.f32 0.01, %v5808_v47  ;;  %v6117_v43 = vpack.c.bf16 %v5999_v24, %v5999_v24  ;;  %v5072_v5 = vrot.slane %v4948_v1, 6 }
 0x423   : > { %v6244_v35 = vunpack.c.l.b16 %v6116_v28  ;;  %v15213_v39 = vsel %vm5175_vm1, %v4948_v1, -inf  ;;  %v15216_v60 = vsel %vm5175_vm1, %v5070_v23, -inf  ;;  %v5809_v42 = vadd.f32 %v15104_v49, %v5679_v9  ;;  %v6434_v1 = vld [vmem:[#allocation3 + $0x38] sm:$0xf] }
 0x424   : > { %v6000_v37 = vsel %vm5872_vm13, %v5808_v47, %v5936_v62  ;;  %v6245_v32 = vunpack.c.l.b16 %v6117_v43  ;;  %v15220_v21 = vsel %vm5175_vm1, %v5071_v44, -inf  ;;  %v15225_v30 = vsel %vm5175_vm1, %v5072_v5, -inf }
 0x425   : > { %v6118_v3 = vpack.c.bf16 %v6000_v37, %v6000_v37  ;;  %v6347_v33 = vrot.slane %v6244_v35, 3  ;;  %vm5873_vm12 = vcmp.gt.f32.partialorder %v5809_v42, 0.0  ;;  %v5937_v63 = vmul.f32 0.01, %v5809_v42 }
 0x426   : > { %v6349_v45 = vrot.slane %v6245_v32, 2  ;;  %v5073_v61 = vrot.slane %v4949_v6, 2  ;;  %v5074_v2 = vrot.slane %v4949_v6, 4  ;;  %v5075_v17 = vrot.slane %v4949_v6, 6 }
 0x427   : > { %v6246_v8 = vunpack.c.l.b16 %v6118_v3  ;;  %v6348_v15 = vsel %vm6267_vm9, %v6347_v33, %v6346_v14  ;;  %v6001_v7 = vsel %vm5873_vm12, %v5809_v42, %v5937_v63  ;;  %v5681_v11 = vsel %vm5175_vm1, %v4949_v6, -inf }
 0x428   : > { %v6350_v0 = vsel %vm6270_vm0, %v6349_v45, %v6348_v15  ;;  %v6119_v13 = vpack.c.bf16 %v6001_v7, %v6001_v7  ;;  %v5682_v52 = vmax.f32 %v5680_v26, %v5681_v11  ;;  %v5690_v31 = vsel %vm5175_vm1, %v5073_v61, -inf }
 0x429   : > { %v6351_v54 = vrot.slane %v6246_v8, 1  ;;  %v5691_v55 = vmax.f32 %v5689_v34, %v5690_v31  ;;  %v5699_v14 = vsel %vm5175_vm1, %v5074_v2, -inf  ;;  %v5708_v27 = vsel %vm5175_vm1, %v5075_v17, -inf  ;;  %v12663_v31 = vld [vmem:[#allocation9 + $0x320] sm:$0xff] }
 0x42a   : > { %v4950_v20 = vadd.f32 %v4916_v46, %v15198_v50  ;;  %v6247_v58 = vunpack.c.l.b16 %v6119_v13  ;;  %vm15937_vm4 = vcmask 1047559   ;;  %v5683_v16 = vrot.slane %v5682_v52, 4  ;;  %7073 = vmatpush.bf16.msrb.mxu1 %v12663_v31 }
 0x42b   : > { %v6352_v56 = vsel %vm15937_vm4, %v6351_v54, %v6350_v0  ;;  %v5700_v47 = vmax.f32 %v5698_v10, %v5699_v14  ;;  %v5692_v24 = vrot.slane %v5691_v55, 4  ;;  %v5709_v28 = vmax.f32 %v5707_v22, %v5708_v27  ;;  %v12678_v14 = vld [vmem:[#allocation9 + $0x398] sm:$0xff] }
 0x42c   : > { %v6378_v4 = vpack.c.b16 %v6352_v56, %v6352_v56  ;;  %v5076_v26 = vrot.slane %v4950_v20, 2  ;;  %v6379_v23 = vpack.c.b16 %v6247_v58, %v6247_v58  ;;  %v5684_v44 = vmax.f32 %v5682_v52, %v5683_v16  ;;  %7492 = vmatpush.bf16.msrb.mxu3 %v12678_v14 }
 0x42d   : > { %v5701_v34 = vrot.slane %v5700_v47, 4  ;;  %v5077_v9 = vrot.slane %v4950_v20, 4  ;;  %v5693_v43 = vmax.f32 %v5691_v55, %v5692_v24  ;;  %v5710_v50 = vrot.slane %v5709_v28, 4  ;;  %v12670_v55 = vld [vmem:[#allocation9 + $0x358] sm:$0xff] }
 0x42e   : > { %v6435_v62 = vsel %vm13325_vm6, %v6378_v4, %v6434_v1  ;;  %v5078_v35 = vrot.slane %v4950_v20, 6  ;;  %v6438_v5 = vsel %vm13268_vm7, %v6379_v23, %v6437_v40  ;;  %v5685_v10 = vrot.slane %v5684_v44, 2  ;;  %7319 = vmatpush.bf16.msrb.mxu2 %v12670_v55  ;;  %v12662_v4 = vld [vmem:[#allocation9 + $0x318] sm:$0xff]  ;;  %v12669_v40 = vld [vmem:[#allocation9 + $0x350] sm:$0xff] }
 0x42f   : > { %6436 = vst [vmem:[#allocation3 + $0x38] sm:$0xf] %v6435_v62  ;;  %v5702_v42 = vmax.f32 %v5700_v47, %v5701_v34  ;;  %v5717_v37 = vsel %vm5175_vm1, %v4950_v20, -inf  ;;  %v5694_v22 = vrot.slane %v5693_v43, 2  ;;  %v5711_v32 = vmax.f32 %v5709_v28, %v5710_v50  ;;  %v12677_v23 = vld [vmem:[#allocation9 + $0x390] sm:$0xff]  ;;  %7074 = vmatpush.bf16.msrb.mxu1 %v12662_v4  ;;  %v15261_v4 = vpop.f32.mrf.mxu3 }
 0x430   : > { %6439 = vst [vmem:[#allocation3 + $0x3c] sm:$0x1] %v6438_v5  ;;  %v5718_v3 = vmax.f32 %v15213_v39, %v5717_v37  ;;  %v5726_v33 = vsel %vm5175_vm1, %v5076_v26, -inf  ;;  %v5686_v6 = vmax.f32 %v5684_v44, %v5685_v10  ;;  %v5735_v41 = vsel %vm5175_vm1, %v5077_v9, -inf  ;;  %v12668_v37 = vld [vmem:[#allocation9 + $0x348] sm:$0xff]  ;;  %7493 = vmatpush.bf16.msrb.mxu3 %v12677_v23  ;;  %v12710_v23 = vld [vmem:[#allocation9 + $0x478] sm:$0xff] }
 0x431   : > { %v5703_v12 = vrot.slane %v5702_v42, 2  ;;  %v5727_v19 = vmax.f32 %v15216_v60, %v5726_v33  ;;  %v5695_v63 = vmax.f32 %v5693_v43, %v5694_v22  ;;  %v5712_v45 = vrot.slane %v5711_v32, 2  ;;  %v12676_v33 = vld [vmem:[#allocation9 + $0x388] sm:$0xff]  ;;  %v6037_v55 = vld [vmem:[#allocation3 + $0x40] sm:$0x1] }
 0x432   : > { %v5719_v8 = vrot.slane %v5718_v3, 4  ;;  %v5736_v15 = vmax.f32 %v15220_v21, %v5735_v41  ;;  %v5687_v61 = vrot.slane %v5686_v6, 1  ;;  %v5744_v0 = vsel %vm5175_vm1, %v5078_v35, -inf  ;;  %7320 = vmatpush.bf16.msrb.mxu2 %v12669_v40 }
 0x433   : > { %v5704_v2 = vmax.f32 %v5702_v42, %v5703_v12  ;;  %v5728_v7 = vrot.slane %v5727_v19, 4  ;;  %v5696_v17 = vrot.slane %v5695_v63, 1  ;;  %v5713_v39 = vmax.f32 %v5711_v32, %v5712_v45  ;;  %v12661_v42 = vld [vmem:[#allocation9 + $0x310] sm:$0xff] }
 0x434   : > { %v5720_v11 = vmax.f32 %v5718_v3, %v5719_v8  ;;  %v5737_v46 = vrot.slane %v5736_v15, 4  ;;  %v5688_v13 = vmax.f32 %v5686_v6, %v5687_v61  ;;  %v5745_v60 = vmax.f32 %v15225_v30, %v5744_v0  ;;  %7075 = vmatpush.bf16.msrb.mxu1 %v12661_v42  ;;  %7494 = vmatpush.bf16.msrb.mxu3 %v12676_v33 }
 0x435   : > { %v5705_v54 = vrot.slane %v5704_v2, 1  ;;  %v5729_v52 = vmax.f32 %v5727_v19, %v5728_v7  ;;  %v5697_v27 = vmax.f32 %v5695_v63, %v5696_v17  ;;  %v5714_v20 = vrot.slane %v5713_v39, 1  ;;  %v15253_v63 = vpop.f32.mrf.mxu1 }
 0x436   : > { %v5721_v21 = vrot.slane %v5720_v11, 2  ;;  %v5738_v58 = vmax.f32 %v5736_v15, %v5737_v46  ;;  %v5810_v1 = vadd.f32 %v15104_v49, %v5688_v13  ;;  %v5746_v47 = vrot.slane %v5745_v60, 4  ;;  %7321 = vmatpush.bf16.msrb.mxu2 %v12668_v37  ;;  %v15256_v46 = vpop.f32.mrf.mxu2  ;;  %v6453_v51 = vld [vmem:[#allocation3 + $0x38] sm:$0xf] }
 0x437   : > { %v5706_v56 = vmax.f32 %v5704_v2, %v5705_v54  ;;  %v5730_v16 = vrot.slane %v5729_v52, 2  ;;  %v5715_v24 = vmax.f32 %v5713_v39, %v5714_v20  ;;  %v5811_v28 = vadd.f32 %v15104_v49, %v5697_v27  ;;  %v12660_v39 = vld [vmem:[#allocation9 + $0x308] sm:$0xff] }
 0x438   : > { %v5722_v30 = vmax.f32 %v5720_v11, %v5721_v21  ;;  %v5739_v26 = vrot.slane %v5738_v58, 2  ;;  %vm5874_vm14 = vcmp.gt.f32.partialorder %v5810_v1, 0.0  ;;  %v5938_v34 = vmul.f32 0.01, %v5810_v1  ;;  %v12667_v11 = vld [vmem:[#allocation9 + $0x340] sm:$0xff]  ;;  %v12702_v21 = vld [vmem:[#allocation9 + $0x438] sm:$0xff]  ;;  %7076 = vmatpush.bf16.msrb.mxu1 %v12660_v39 }
 0x439   : > { %v5812_v44 = vadd.f32 %v15104_v49, %v5706_v56  ;;  %v5731_v9 = vmax.f32 %v5729_v52, %v5730_v16  ;;  %v5813_v62 = vadd.f32 %v15104_v49, %v5715_v24  ;;  %vm5875_vm3 = vcmp.gt.f32.partialorder %v5811_v28, 0.0  ;;  %v6061_v16 = vld [vmem:[#allocation3 + $0x44] sm:$0x1] }
 0x43a   : > { %v5939_v43 = vmul.f32 0.01, %v5811_v28  ;;  %v5723_v50 = vrot.slane %v5722_v30, 1  ;;  %v6002_v5 = vsel %vm5874_vm14, %v5810_v1, %v5938_v34  ;;  %v5740_v61 = vmax.f32 %v5738_v58, %v5739_v26  ;;  %7322 = vmatpush.bf16.msrb.mxu2 %v12667_v11  ;;  %v12659_v26 = vld [vmem:[#allocation9 + $0x300] sm:$0xff] }
 0x43b   : > { %vm5876_vm13 = vcmp.gt.f32.partialorder %v5812_v44, 0.0  ;;  %v5940_v35 = vmul.f32 0.01, %v5812_v44  ;;  %v5732_v10 = vrot.slane %v5731_v9, 1  ;;  %vm5877_vm12 = vcmp.gt.f32.partialorder %v5813_v62, 0.0 }
 0x43c   : > { %v5941_v22 = vmul.f32 0.01, %v5813_v62  ;;  %v6003_v32 = vsel %vm5875_vm3, %v5811_v28, %v5939_v43  ;;  %v6120_v3 = vpack.c.bf16 %v6002_v5, %v6002_v5  ;;  %v5724_v19 = vmax.f32 %v5722_v30, %v5723_v50  ;;  %v11584_v43 = vld [vmem:[#allocation3 + $0x30] sm:$0xf]  ;;  %v12630_v50 = vld [vmem:[#allocation3 + $0x34] sm:$0xf0]  ;;  %7077 = vmatpush.bf16.msrb.mxu1 %v12659_v26 }
 0x43d   : > { %v6004_v6 = vsel %vm5876_vm13, %v5812_v44, %v5940_v35  ;;  %v6121_v12 = vpack.c.bf16 %v6003_v32, %v6003_v32  ;;  %v5733_v41 = vmax.f32 %v5731_v9, %v5732_v10  ;;  %v5747_v0 = vmax.f32 %v5745_v60, %v5746_v47  ;;  %v12675_v60 = vld [vmem:[#allocation9 + $0x380] sm:$0xff]  ;;  %v6808_v35 = vld [vmem:[#allocation3 + $0x38] sm:$0xe]  ;;  %v6685_v33 = vpop.f32.mrf.mxu1 }
 0x43e   : > { %v6005_v45 = vsel %vm5877_vm12, %v5813_v62, %v5941_v22  ;;  %v6122_v8 = vpack.c.bf16 %v6004_v6, %v6004_v6  ;;  %v6248_v15 = vunpack.c.l.b16 %v6120_v3  ;;  %v5814_v17 = vadd.f32 %v15104_v49, %v5724_v19  ;;  %v15259_v47 = vld [vmem:[#allocation3 + $0x34] sm:$0x1]  ;;  %7495 = vmatpush.bf16.msrb.mxu3 %v12675_v60  ;;  %7867 = vmatpush.bf16.msra.mxu2 %v12702_v21  ;;  %v6786_v38 = vpop.f32.mrf.mxu2  ;;  %v6452_v11 = vld [vmem:[#allocation3 + $0x30] sm:$0xf] }
 0x43f   : > { %v6123_v2 = vpack.c.bf16 %v6005_v45, %v6005_v45  ;;  %v6249_v7 = vunpack.c.l.b16 %v6121_v12  ;;  %v5741_v52 = vrot.slane %v5740_v61, 1  ;;  %v5815_v31 = vadd.f32 %v15104_v49, %v5733_v41 }
 0x440   : > { %v6250_v13 = vunpack.c.l.b16 %v6122_v8  ;;  %v6353_v54 = vrot.slane %v6248_v15, 7  ;;  %v5748_v20 = vrot.slane %v5747_v0, 2  ;;  %vm5878_vm4 = vcmp.gt.f32.partialorder %v5814_v17, 0.0 }
 0x441   : > { %v6251_v14 = vunpack.c.l.b16 %v6123_v2  ;;  %v6354_v27 = vrot.slane %v6249_v7, 6  ;;  %v5742_v56 = vmax.f32 %v5740_v61, %v5741_v52  ;;  %vm5879_vm14 = vcmp.gt.f32.partialorder %v5815_v31, 0.0  ;;  %v12962_v2 = vld [vmem:[#allocation11] ss:$0 sm:$0xff] }
 0x442   : > { %v6356_v58 = vrot.slane %v6250_v13, 5  ;;  %v5942_v1 = vmul.f32 0.01, %v5814_v17  ;;  %v5749_v28 = vmax.f32 %v5747_v0, %v5748_v20  ;;  %v5943_v30 = vmul.f32 0.01, %v5815_v31  ;;  %8040 = vmatpush.bf16.msra.mxu3 %v12710_v23  ;;  %v6951_v20 = vpop.f32.mrf.mxu3 }
 0x443   : > { %v6355_v40 = vsel %vm6258_vm2, %v6354_v27, %v6353_v54  ;;  %v6358_v24 = vrot.slane %v6251_v14, 4  ;;  %vm15938_vm3 = vcmask 1043459   ;;  %v5816_v34 = vadd.f32 %v15104_v49, %v5742_v56  ;;  %v15273_v49 = vld [vmem:[#allocation3 + $0x3c] sm:$0x1]  ;;  %v12694_v56 = vld [vmem:[#allocation9 + $0x3f8] sm:$0xff] }
 0x444   : > { %v6357_v44 = vsel %vm15938_vm3, %v6356_v58, %v6355_v40  ;;  %v6006_v9 = vsel %vm5878_vm4, %v5814_v17, %v5942_v1  ;;  %v6038_v62 = vsel %vm13268_vm7, 0, %v6037_v55  ;;  %vm15939_vm13 = vcmask 1044484   ;;  %v12701_v1 = vld [vmem:[#allocation9 + $0x430] sm:$0xff]  ;;  %7622 = vmatpush.bf16.msra.mxu1 %v12694_v56 }
 0x445   : > { %v6359_v5 = vsel %vm15939_vm13, %v6358_v24, %v6357_v44  ;;  %v5750_v10 = vrot.slane %v5749_v28, 1  ;;  %v6007_v42 = vsel %vm5879_vm14, %v5815_v31, %v5943_v30  ;;  %6039 = vst [vmem:[#allocation3 + $0x40] sm:$0x1] %v6038_v62  ;;  %v6062_v37 = vsel %vm13295_vm5, 0, %v6061_v16  ;;  %v15287_v44 = vld [vmem:[#allocation3 + $0xc] sm:$0x1]  ;;  %7868 = vmatpush.bf16.msra.mxu2 %v12701_v1 }
 0x446   : > { %vm5880_vm12 = vcmp.gt.f32.partialorder %v5816_v34, 0.0  ;;  %v5944_v22 = vmul.f32 0.01, %v5816_v34  ;;  %6063 = vst [vmem:[#allocation3 + $0x44] sm:$0x1] %v6062_v37  ;;  %v6124_v32 = vpack.c.bf16 %v6006_v9, %v6006_v9  ;;  %v6125_v3 = vpack.c.bf16 %v6007_v42, %v6007_v42 }
 0x447   : > { %v5751_v6 = vmax.f32 %v5749_v28, %v5750_v10  ;;  %v11585_v12 = vor.u32 %v12630_v50, %v11584_v43  ;;  %v6851_v19 = vrot.slane %v15259_v47, 5  ;;  %v11625_v41 = vrot.slane %v6808_v35, 9 }
 0x448   : > { %v6008_v45 = vsel %vm5880_vm12, %v5816_v34, %v5944_v22  ;;  %v6252_v8 = vunpack.c.l.b16 %v6124_v32  ;;  %v6253_v15 = vunpack.c.l.b16 %v6125_v3  ;;  %v6855_v61 = vrot.slane %v15273_v49, 5  ;;  %v7109_v32 = vld [vmem:[#allocation3 + $0x10] sm:$0xf] }
 0x449   : > { %v5817_v7 = vadd.f32 %v12962_v2, %v5751_v6  ;;  %v6126_v0 = vpack.c.bf16 %v6008_v45, %v6008_v45  ;;  %6795 = vmatmul.bf16.gmra.mxu2 %v11585_v12  ;;  %v6852_v17 = vsel %vm13310_vm10, %v11624_v53, %v6851_v19  ;;  %v6787_v39 = vadd.f32 %v6786_v38, %v6685_v33  ;;  %v12693_v6 = vld [vmem:[#allocation9 + $0x3f0] sm:$0xff]  ;;  %v12700_v12 = vld [vmem:[#allocation9 + $0x428] sm:$0xff] }
 0x44a   : > { %v6360_v13 = vrot.slane %v6252_v8, 3  ;;  %v6362_v54 = vrot.slane %v6253_v15, 2  ;;  %v6856_v52 = vsel %vm13310_vm10, %v11625_v41, %v6855_v61  ;;  %v6879_v31 = vunpack.c.l.b16 %v6852_v17  ;;  %v7352_v15 = vld [vmem:[#allocation3 + $0x8] sm:$0xe]  ;;  %7623 = vmatpush.bf16.msra.mxu1 %v12693_v6  ;;  %7869 = vmatpush.bf16.msra.mxu2 %v12700_v12 }
 0x44b   : > { %vm5881_vm5 = vcmp.gt.f32.partialorder %v5817_v7, 0.0  ;;  %v5945_v55 = vmul.f32 0.01, %v5817_v7  ;;  %v6254_v14 = vunpack.c.l.b16 %v6126_v0  ;;  %v6880_v27 = vunpack.c.l.b16 %v6856_v52 }
 0x44c   : > { %v6361_v60 = vsel %vm6267_vm9, %v6360_v13, %v6359_v5  ;;  %v15284_v21 = vadd.f32 %v6951_v20, %v6787_v39  ;;  %v6564_v58 = vshrl.u32 %v6452_v11, 16  ;;  %v6567_v53 = vshll.u32 %v6452_v11, 16  ;;  %v6440_v62 = vld [vmem:[#allocation3 + $0x40] sm:$0xf]  ;;  %v7353_v11 = vld [vmem:[#allocation3 + $0x10] sm:$0xe] }
 0x44d   : > { %v6009_v16 = vsel %vm5881_vm5, %v5817_v7, %v5945_v55  ;;  %v6363_v40 = vsel %vm6270_vm0, %v6362_v54, %v6361_v60  ;;  %v6364_v24 = vrot.slane %v6254_v14, 1  ;;  %v6884_v28 = vpack.c.b16 %v6880_v27, %v6879_v31  ;;  %v6443_v42 = vld [vmem:[#allocation3 + $0x44] sm:$0x1]  ;;  %v12708_v7 = vld [vmem:[#allocation9 + $0x468] sm:$0xff] }
 0x44e   : > { %v6127_v30 = vpack.c.bf16 %v6009_v16, %v6009_v16  ;;  %v6566_v26 = vrot.slane %v6564_v58, 4  ;;  %v6569_v23 = vrot.slane %v6567_v53, 5  ;;  %v7127_v34 = vshll.u32 %v15112_v25, 16  ;;  %v12709_v25 = vld [vmem:[#allocation9 + $0x470] sm:$0xff]  ;;  %v7111_v16 = vld [vmem:[#allocation3 + $0x18] sm:$0xf] }
 0x44f   : > { %vm15940_vm9 = vcmask 1047559   ;;  %6960 = vmatmul.bf16.gmra.mxu3 %v6884_v28  ;;  %v6573_v43 = vshll.u32 %v15259_v47, 16  ;;  %v6578_v50 = vshrl.u32 %v6453_v51, 16  ;;  %v6581_v35 = vshll.u32 %v6453_v51, 16  ;;  %v7110_v47 = vld [vmem:[#allocation3 + $0x14] sm:$0x1] }
 0x450   : > { %v6365_v9 = vsel %vm15940_vm9, %v6364_v24, %v6363_v40  ;;  %v6255_v5 = vunpack.c.l.b16 %v6127_v30  ;;  %v6570_v37 = vor.u32 %v6569_v23, %v6566_v26  ;;  %v6587_v22 = vshll.u32 %v15273_v49, 16  ;;  %8041 = vmatpush.bf16.msra.mxu3 %v12709_v25  ;;  %v7113_v40 = vld [vmem:[#allocation3 + $0x20] sm:$0xf] }
 0x451   : > { %v6380_v10 = vpack.c.b16 %v6365_v9, %v6365_v9  ;;  %v6580_v3 = vrot.slane %v6578_v50, 4  ;;  %v6583_v33 = vrot.slane %v6581_v35, 5  ;;  %v7129_v8 = vrot.slane %v7127_v34, 5 }
 0x452   : > { %v6381_v19 = vpack.c.b16 %v6255_v5, %v6255_v5  ;;  %v6571_v45 = vrot.slane %v6570_v37, 4  ;;  %v6575_v38 = vrot.slane %v6573_v43, 5  ;;  %v7133_v2 = vshll.u32 %v15287_v44, 16 }
 0x453   : > { %v6441_v41 = vsel %vm13325_vm6, %v6380_v10, %v6440_v62  ;;  %v6584_v61 = vor.u32 %v6583_v33, %v6580_v3  ;;  %v7138_v49 = vshrl.u32 %v7109_v32, 16  ;;  %v6589_v17 = vrot.slane %v6587_v22, 5  ;;  %v12692_v10 = vld [vmem:[#allocation9 + $0x3e8] sm:$0xff] }
 0x454   : > { %6442 = vst [vmem:[#allocation3 + $0x40] sm:$0xf] %v6441_v41  ;;  %v6444_v0 = vsel %vm13268_vm7, %v6381_v19, %v6443_v42  ;;  %v7130_v59 = vor.u32 %v7129_v8, %v15206_v29  ;;  %v7141_v39 = vshll.u32 %v7109_v32, 16  ;;  %v6576_v13 = vsel %vm13301_vm8, %v6571_v45, %v6575_v38  ;;  %8042 = vmatpush.bf16.msra.mxu3 %v12708_v7  ;;  %v12699_v42 = vld [vmem:[#allocation9 + $0x420] sm:$0xff]  ;;  %v7114_v19 = vld [vmem:[#allocation3 + $0x24] sm:$0x1] }
 0x455   : > { %6445 = vst [vmem:[#allocation3 + $0x44] sm:$0x1] %v6444_v0  ;;  %v6585_v54 = vrot.slane %v6584_v61, 4  ;;  %v7135_v52 = vrot.slane %v7133_v2, 5  ;;  %v7140_v31 = vrot.slane %v7138_v49, 4  ;;  %v7147_v27 = vshll.u32 %v7110_v47, 16  ;;  %7624 = vmatpush.bf16.msra.mxu1 %v12692_v10  ;;  %7870 = vmatpush.bf16.msra.mxu2 %v12699_v42 }
 0x456   : > { %v7131_v55 = vrot.slane %v7130_v59, 4  ;;  %v7143_v14 = vrot.slane %v7141_v39, 5  ;;  %v11738_v20 = vrot.slane %v7352_v15, 9  ;;  %v7378_v51 = vrot.slane %v15287_v44, 5  ;;  %v7355_v41 = vld [vmem:[#allocation3 + $0x20] sm:$0xe] }
 0x457   : > { %v6590_v60 = vsel %vm13301_vm8, %v6585_v54, %v6589_v17  ;;  %v11739_v29 = vrot.slane %v7353_v11, 9  ;;  %v7382_v58 = vrot.slane %v7110_v47, 5  ;;  %v6613_v53 = vunpack.c.l.b16 %v6576_v13  ;;  %v7112_v45 = vld [vmem:[#allocation3 + $0x1c] sm:$0x1]  ;;  %v7354_v8 = vld [vmem:[#allocation3 + $0x18] sm:$0xe] }
 0x458   : > { %v6614_v56 = vunpack.c.l.b16 %v6590_v60  ;;  %v7144_v1 = vor.u32 %v7143_v14, %v7140_v31  ;;  %v7136_v24 = vsel %vm13301_vm8, %v7131_v55, %v7135_v52  ;;  %v7379_v28 = vsel %vm13310_vm10, %v11738_v20, %v7378_v51  ;;  %v12707_v15 = vld [vmem:[#allocation9 + $0x460] sm:$0xff]  ;;  %v12698_v61 = vld [vmem:[#allocation9 + $0x418] sm:$0xff] }
 0x459   : > { %v7383_v30 = vsel %vm13310_vm10, %v11739_v29, %v7382_v58  ;;  %v7149_v44 = vrot.slane %v7147_v27, 5  ;;  %v7424_v9 = vunpack.c.l.b16 %v7379_v28  ;;  %v7152_v62 = vshrl.u32 %v7111_v16, 16  ;;  %v12691_v38 = vld [vmem:[#allocation9 + $0x3e0] sm:$0xff]  ;;  %8043 = vmatpush.bf16.msra.mxu3 %v12707_v15  ;;  %v12706_v17 = vld [vmem:[#allocation9 + $0x458] sm:$0xff]  ;;  %7871 = vmatpush.bf16.msra.mxu2 %v12698_v61 }
 0x45a   : > { %v6618_v26 = vpack.c.b16 %v6614_v56, %v6613_v53  ;;  %v7145_v23 = vrot.slane %v7144_v1, 4  ;;  %v7425_v34 = vunpack.c.l.b16 %v7383_v30  ;;  %v7155_v43 = vshll.u32 %v7111_v16, 16  ;;  %7625 = vmatpush.bf16.msra.mxu1 %v12691_v38  ;;  %v7117_v13 = vld [vmem:[#allocation3 + $0x30] sm:$0xf]  ;;  %v7115_v20 = vld [vmem:[#allocation3 + $0x28] sm:$0xf] }
 0x45b   : > { %v7166_v50 = vshrl.u32 %v7113_v40, 16  ;;  %v7169_v5 = vshll.u32 %v7113_v40, 16  ;;  %v7251_v37 = vunpack.c.l.b16 %v7136_v24  ;;  %v7154_v3 = vrot.slane %v7152_v62, 4  ;;  %v12655_v14 = vld [vmem:[#allocation3 + $0xc] sm:$0xf0] }
 0x45c   : > { %6694 = vmatmul.bf16.gmra.mxu1 %v6618_v26  ;;  %v7150_v35 = vsel %vm13301_vm8, %v7145_v23, %v7149_v44  ;;  %v7432_v32 = vpack.c.b16 %v7425_v34, %v7424_v9  ;;  %v7157_v33 = vrot.slane %v7155_v43, 5  ;;  %v7175_v49 = vshll.u32 %v7114_v19, 16  ;;  %v11660_v53 = vld [vmem:[#allocation3 + $0x8] sm:$0xf]  ;;  %v12697_v34 = vld [vmem:[#allocation9 + $0x410] sm:$0xff] }
 0x45d   : > { %v7252_v22 = vunpack.c.l.b16 %v7150_v35  ;;  %v7168_v25 = vrot.slane %v7166_v50, 4  ;;  %v7171_v6 = vrot.slane %v7169_v5, 5  ;;  %v11741_v7 = vrot.slane %v7355_v41, 9  ;;  %8044 = vmatpush.bf16.msra.mxu3 %v12706_v17  ;;  %v12690_v44 = vld [vmem:[#allocation9 + $0x3d8] sm:$0xff]  ;;  %7872 = vmatpush.bf16.msra.mxu2 %v12697_v34  ;;  %v7118_v5 = vld [vmem:[#allocation3 + $0x34] sm:$0x1] }
 0x45e   : > { %v7158_v2 = vor.u32 %v7157_v33, %v7154_v3  ;;  %v7161_v0 = vshll.u32 %v7112_v45, 16  ;;  %v11740_v39 = vrot.slane %v7354_v8, 9  ;;  %v7390_v11 = vrot.slane %v7114_v19, 5  ;;  %7626 = vmatpush.bf16.msra.mxu1 %v12690_v44  ;;  %v7357_v10 = vld [vmem:[#allocation3 + $0x30] sm:$0xe]  ;;  %v12689_v3 = vld [vmem:[#allocation9 + $0x3d0] sm:$0xff] }
 0x45f   : > { %v7259_v12 = vpack.c.b16 %v7252_v22, %v7251_v37  ;;  %7496 = vmatmul.bf16.vlgmr.msrb.gmra.mxu3 %v7432_v32  ;;  %v7172_v47 = vor.u32 %v7171_v6, %v7168_v25  ;;  %v7177_v52 = vrot.slane %v7175_v49, 5  ;;  %v7386_v31 = vrot.slane %v7112_v45, 5  ;;  %v7116_v42 = vld [vmem:[#allocation3 + $0x2c] sm:$0x1]  ;;  %v7356_v22 = vld [vmem:[#allocation3 + $0x28] sm:$0xe] }
 0x460   : > { %v7159_v54 = vrot.slane %v7158_v2, 4  ;;  %v7391_v55 = vsel %vm13310_vm10, %v11741_v7, %v7390_v11  ;;  %v7163_v27 = vrot.slane %v7161_v0, 5  ;;  %v7194_v29 = vshrl.u32 %v7117_v13, 16  ;;  %v12705_v32 = vld [vmem:[#allocation9 + $0x450] sm:$0xff]  ;;  %v12704_v41 = vld [vmem:[#allocation9 + $0x448] sm:$0xff]  ;;  %v12703_v34 = vld [vmem:[#allocation9 + $0x440] sm:$0xff] }
 0x461   : > { %7323 = vmatmul.bf16.vlgmr.msrb.gmra.mxu2 %v7259_v12  ;;  %v7173_v59 = vrot.slane %v7172_v47, 4  ;;  %v7387_v51 = vsel %vm13310_vm10, %v11740_v39, %v7386_v31  ;;  %v7197_v58 = vshll.u32 %v7117_v13, 16  ;;  %v7427_v56 = vunpack.c.l.b16 %v7391_v55  ;;  %v12696_v12 = vld [vmem:[#allocation9 + $0x408] sm:$0xff]  ;;  %8045 = vmatpush.bf16.msra.mxu3 %v12705_v32  ;;  %v7121_v15 = vld [vmem:[#allocation3 + $0x40] sm:$0xf]  ;;  %v15332_v32 = vpop.f32.mrf.mxu3 }
 0x462   : > { %v11661_v1 = vor.u32 %v12655_v14, %v11660_v53  ;;  %v7164_v16 = vsel %vm13301_vm8, %v7159_v54, %v7163_v27  ;;  %v7180_v40 = vshrl.u32 %v7115_v20, 16  ;;  %v7183_v24 = vshll.u32 %v7115_v20, 16  ;;  %7627 = vmatpush.bf16.msra.mxu1 %v12689_v3  ;;  %7873 = vmatpush.bf16.msra.mxu2 %v12696_v12  ;;  %v12656_v7 = vld [vmem:[#allocation3 + $0x1c] sm:$0xf0]  ;;  %v7119_v17 = vld [vmem:[#allocation3 + $0x38] sm:$0xf] }
 0x463   : > { %v7178_v60 = vsel %vm13301_vm8, %v7173_v59, %v7177_v52  ;;  %v7426_v30 = vunpack.c.l.b16 %v7387_v51  ;;  %v7196_v26 = vrot.slane %v7194_v29, 4  ;;  %v7199_v23 = vrot.slane %v7197_v58, 5  ;;  %v11664_v54 = vld [vmem:[#allocation3 + $0x18] sm:$0xf]  ;;  %v12695_v53 = vld [vmem:[#allocation9 + $0x400] sm:$0xff] }
 0x464   : > { %v7254_v28 = vunpack.c.l.b16 %v7178_v60  ;;  %v7253_v9 = vunpack.c.l.b16 %v7164_v16  ;;  %v7182_v43 = vrot.slane %v7180_v40, 4  ;;  %v7185_v50 = vrot.slane %v7183_v24, 5  ;;  %v12688_v58 = vld [vmem:[#allocation9 + $0x3c8] sm:$0xff] }
 0x465   : > { %v7433_v62 = vpack.c.b16 %v7427_v56, %v7426_v30  ;;  %v7200_v37 = vor.u32 %v7199_v23, %v7196_v26  ;;  %v7203_v25 = vshll.u32 %v7118_v5, 16  ;;  %v11743_v6 = vrot.slane %v7357_v10, 9  ;;  %8046 = vmatpush.bf16.msra.mxu3 %v12704_v41  ;;  %v7359_v30 = vld [vmem:[#allocation3 + $0x40] sm:$0xe]  ;;  %v7120_v26 = vld [vmem:[#allocation3 + $0x3c] sm:$0x1] }
 0x466   : > { %v7260_v35 = vpack.c.b16 %v7254_v28, %v7253_v9  ;;  %v7186_v33 = vor.u32 %v7185_v50, %v7182_v43  ;;  %v7189_v19 = vshll.u32 %v7116_v42, 16  ;;  %v11742_v47 = vrot.slane %v7356_v22, 9  ;;  %7628 = vmatpush.bf16.msra.mxu1 %v12688_v58  ;;  %7874 = vmatpush.bf16.msra.mxu2 %v12695_v53  ;;  %v7122_v28 = vld [vmem:[#allocation3 + $0x44] sm:$0x1]  ;;  %v7358_v44 = vld [vmem:[#allocation3 + $0x38] sm:$0xe] }
 0x467   : > { %v7201_v45 = vrot.slane %v7200_v37, 4  ;;  %v7398_v8 = vrot.slane %v7118_v5, 5  ;;  %v7205_v61 = vrot.slane %v7203_v25, 5  ;;  %v7394_v2 = vrot.slane %v7116_v42, 5  ;;  %v12687_v9 = vld [vmem:[#allocation9 + $0x3c0] sm:$0xff]  ;;  %v15330_v5 = vpop.f32.mrf.mxu1 }
 0x468   : > { %v7187_v38 = vrot.slane %v7186_v33, 4  ;;  %v7191_v0 = vrot.slane %v7189_v19, 5  ;;  %v7222_v11 = vshrl.u32 %v7121_v15, 16  ;;  %v7225_v13 = vshll.u32 %v7121_v15, 16  ;;  %v7661_v3 = vld [vmem:[#allocation3 + $0x18] sm:$0xf] }
 0x469   : > { %v7399_v49 = vsel %vm13310_vm10, %v11743_v6, %v7398_v8  ;;  %v7206_v59 = vsel %vm13301_vm8, %v7201_v45, %v7205_v61  ;;  %v7395_v39 = vsel %vm13310_vm10, %v11742_v47, %v7394_v2  ;;  %v11665_v31 = vor.u32 %v12656_v7, %v11664_v54  ;;  %8047 = vmatpush.bf16.msra.mxu3 %v12703_v34  ;;  %v12657_v19 = vld [vmem:[#allocation3 + $0x2c] sm:$0xf0]  ;;  %v11668_v61 = vld [vmem:[#allocation3 + $0x28] sm:$0xf]  ;;  %v7662_v58 = vld [vmem:[#allocation3 + $0x1c] sm:$0x1] }
 0x46a   : > { %v7429_v52 = vunpack.c.l.b16 %v7399_v49  ;;  %v7192_v55 = vsel %vm13301_vm8, %v7187_v38, %v7191_v0  ;;  %v7208_v14 = vshrl.u32 %v7119_v17, 16  ;;  %v7211_v27 = vshll.u32 %v7119_v17, 16  ;;  %7629 = vmatpush.bf16.msra.mxu1 %v12687_v9  ;;  %v7659_v45 = vld [vmem:[#allocation3 + $0x10] sm:$0xf]  ;;  %v7905_v53 = vld [vmem:[#allocation3 + $0x18] sm:$0xe] }
 0x46b   : > { %v7256_v20 = vunpack.c.l.b16 %v7206_v59  ;;  %v7428_v60 = vunpack.c.l.b16 %v7395_v39  ;;  %v7224_v51 = vrot.slane %v7222_v11, 4  ;;  %v7227_v29 = vrot.slane %v7225_v13, 5  ;;  %v7665_v34 = vld [vmem:[#allocation3 + $0x28] sm:$0xf] }
 0x46c   : > { %7078 = vmatmul.bf16.vlgmr.msrb.gmra.mxu1 %v11661_v1  ;;  %v7255_v56 = vunpack.c.l.b16 %v7192_v55  ;;  %v7210_v16 = vrot.slane %v7208_v14, 4  ;;  %v7213_v40 = vrot.slane %v7211_v27, 5  ;;  %v7231_v43 = vshll.u32 %v7122_v28, 16 }
 0x46d   : > { %v7434_v1 = vpack.c.b16 %v7429_v52, %v7428_v60  ;;  %v7228_v23 = vor.u32 %v7227_v29, %v7224_v51  ;;  %v11745_v50 = vrot.slane %v7359_v30, 9  ;;  %v7217_v10 = vshll.u32 %v7120_v26, 16 }
 0x46e   : > { %v7261_v24 = vpack.c.b16 %v7256_v20, %v7255_v56  ;;  %v11744_v37 = vrot.slane %v7358_v44, 9  ;;  %v7406_v22 = vrot.slane %v7122_v28, 5  ;;  %v7233_v25 = vrot.slane %v7231_v43, 5  ;;  %v7660_v56 = vld [vmem:[#allocation3 + $0x14] sm:$0x1] }
 0x46f   : > { %7501 = vmatmul.bf16.gmra.mxu3 %v7433_v62  ;;  %v7214_v62 = vor.u32 %v7213_v40, %v7210_v16  ;;  %v7229_v42 = vrot.slane %v7228_v23, 4  ;;  %v7402_v6 = vrot.slane %v7120_v26, 5  ;;  %v7219_v41 = vrot.slane %v7217_v10, 5  ;;  %v7904_v16 = vld [vmem:[#allocation3 + $0x10] sm:$0xe] }
 0x470   : > { %v7407_v12 = vsel %vm13310_vm10, %v11745_v50, %v7406_v22  ;;  %v7690_v15 = vshrl.u32 %v7661_v3, 16  ;;  %v7693_v38 = vshll.u32 %v7661_v3, 16  ;;  %v11669_v49 = vor.u32 %v12657_v19, %v11668_v61  ;;  %v12658_v10 = vld [vmem:[#allocation3 + $0x3c] sm:$0xf0] }
 0x471   : > { %7328 = vmatmul.bf16.gmra.mxu2 %v7260_v35  ;;  %v15328_v35 = vpop.f32.mrf.mxu2  ;;  %v7215_v33 = vrot.slane %v7214_v62, 4  ;;  %v7234_v47 = vsel %vm13301_vm8, %v7229_v42, %v7233_v25  ;;  %v7403_v8 = vsel %vm13310_vm10, %v11744_v37, %v7402_v6  ;;  %v7431_v2 = vunpack.c.l.b16 %v7407_v12  ;;  %v7663_v37 = vld [vmem:[#allocation3 + $0x20] sm:$0xf]  ;;  %v11672_v6 = vld [vmem:[#allocation3 + $0x38] sm:$0xf] }
 0x472   : > { %v7676_v0 = vshrl.u32 %v7659_v45, 16  ;;  %v7679_v17 = vshll.u32 %v7659_v45, 16  ;;  %v7258_v59 = vunpack.c.l.b16 %v7234_v47  ;;  %v7430_v11 = vunpack.c.l.b16 %v7403_v8 }
 0x473   : > { %v7220_v7 = vsel %vm13301_vm8, %v7215_v33, %v7219_v41  ;;  %v7692_v52 = vrot.slane %v7690_v15, 4  ;;  %v11859_v28 = vrot.slane %v7905_v53, 9  ;;  %v7685_v30 = vshll.u32 %v7660_v56, 16 }
 0x474   : > { %v7257_v55 = vunpack.c.l.b16 %v7220_v7  ;;  %v7435_v14 = vpack.c.b16 %v7431_v2, %v7430_v11  ;;  %v7678_v60 = vrot.slane %v7676_v0, 4  ;;  %v7681_v51 = vrot.slane %v7679_v17, 5 }
 0x475   : > { %v11858_v23 = vrot.slane %v7904_v16, 9  ;;  %v7934_v44 = vrot.slane %v7662_v58, 5  ;;  %v7930_v43 = vrot.slane %v7660_v56, 5  ;;  %v7687_v42 = vrot.slane %v7685_v30, 5  ;;  %v12683_v16 = vld [vmem:[#allocation3 + $0x14] sm:$0xf0] }
 0x476   : > { %v7262_v29 = vpack.c.b16 %v7258_v59, %v7257_v55  ;;  %v7682_v40 = vor.u32 %v7681_v51, %v7678_v60  ;;  %v7718_v33 = vshrl.u32 %v7665_v34, 16  ;;  %v7721_v25 = vshll.u32 %v7665_v34, 16  ;;  %v7666_v59 = vld [vmem:[#allocation3 + $0x2c] sm:$0x1] }
 0x477   : > { %v7935_v50 = vsel %vm13310_vm10, %v11859_v28, %v7934_v44  ;;  %v7931_v3 = vsel %vm13310_vm10, %v11858_v23, %v7930_v43  ;;  %v11673_v19 = vor.u32 %v12658_v10, %v11672_v6  ;;  %v7704_v45 = vshrl.u32 %v7663_v37, 16  ;;  %v11780_v44 = vld [vmem:[#allocation3 + $0x10] sm:$0xf] }
 0x478   : > { %v7683_v9 = vrot.slane %v7682_v40, 4  ;;  %v7977_v12 = vunpack.c.l.b16 %v7935_v50  ;;  %v7707_v47 = vshll.u32 %v7663_v37, 16  ;;  %v7976_v15 = vunpack.c.l.b16 %v7931_v3  ;;  %v7667_v40 = vld [vmem:[#allocation3 + $0x30] sm:$0xf] }
 0x479   : > { %v6791_v39 = vpop.f32.mrf.mxu2  ;;  %v7723_v61 = vrot.slane %v7721_v25, 5  ;;  %v7706_v7 = vrot.slane %v7704_v45, 4  ;;  %v7942_v51 = vrot.slane %v7666_v59, 5  ;;  %v7732_v43 = vshrl.u32 %v7667_v40, 16  ;;  %v7670_v25 = vld [vmem:[#allocation3 + $0x3c] sm:$0x1] }
 0x47a   : > { %v7688_v41 = vsel %vm13301_vm8, %v7683_v9, %v7687_v42  ;;  %v7709_v0 = vrot.slane %v7707_v47, 5  ;;  %v11781_v9 = vor.u32 %v12683_v16, %v11780_v44  ;;  %v7735_v50 = vshll.u32 %v7667_v40, 16  ;;  %v7909_v45 = vld [vmem:[#allocation3 + $0x38] sm:$0xe]  ;;  %v7668_v47 = vld [vmem:[#allocation3 + $0x34] sm:$0x1] }
 0x47b   : > { %v7803_v2 = vunpack.c.l.b16 %v7688_v41  ;;  %v7734_v6 = vrot.slane %v7732_v43, 4  ;;  %v7674_v43 = vld [vmem:[#allocation3 + $0x4c] sm:$0x1]  ;;  %vm8458_vm13 = vsmask.f32 2306  ;;  %vm15943_vm12 = vcmask 1043459  }
 0x47c   : > { %7083 = vmatmul.bf16.gmra.mxu1 %v11665_v31  ;;  %v7695_v31 = vrot.slane %v7693_v38, 5  ;;  %v7720_v38 = vrot.slane %v7718_v33, 4  ;;  %vm15944_vm5 = vcmask 1044484   ;;  %vm15945_vm9 = vcmask 1042432  }
 0x47e   : > { %v7724_v11 = vor.u32 %v7723_v61, %v7720_v38  ;;  %v11863_v61 = vrot.slane %v7909_v45, 9 }
 0x47f   : > { %7506 = vmatmul.bf16.gmra.mxu3 %v7434_v1  ;;  %v7696_v1 = vor.u32 %v7695_v31, %v7692_v52  ;;  %v7710_v52 = vor.u32 %v7709_v0, %v7706_v7  ;;  %v7727_v31 = vshll.u32 %v7666_v59, 16 }
 0x481   : > { %7333 = vmatmul.bf16.gmra.mxu2 %v7261_v24  ;;  %v6956_v27 = vpop.f32.mrf.mxu3  ;;  %v7699_v24 = vshll.u32 %v7662_v58, 16  ;;  %v7697_v26 = vrot.slane %v7696_v1, 4  ;;  %v7711_v58 = vrot.slane %v7710_v52, 4  ;;  %v7729_v53 = vrot.slane %v7727_v31, 5  ;;  %v12684_v31 = vld [vmem:[#allocation3 + $0x24] sm:$0xf0] }
 0x483   : > { %v7701_v62 = vrot.slane %v7699_v24, 5 }
 0x485   : > { %v7702_v22 = vsel %vm13301_vm8, %v7697_v26, %v7701_v62 }
 0x486   : > { %v7804_v8 = vunpack.c.l.b16 %v7702_v22 }
 0x488   : > { %v7811_v17 = vpack.c.b16 %v7804_v8, %v7803_v2  ;;  %v7908_v8 = vld [vmem:[#allocation3 + $0x30] sm:$0xe]  ;;  %v12766_v2 = vld [vmem:[#allocation9 + $0x638] sm:$0xff] }
 0x489   : > { %v6690_v13 = vpop.f32.mrf.mxu1  ;;  %v11862_v0 = vrot.slane %v7908_v8, 9  ;;  %9418 = vmatpush.bf16.msrb.mxu0 %v12766_v2 }
 0x48a   : > { %v6792_v54 = vadd.f32 %v6791_v39, %v6690_v13  ;;  %v7907_v39 = vld [vmem:[#allocation3 + $0x28] sm:$0xe]  ;;  %v7664_v13 = vld [vmem:[#allocation3 + $0x24] sm:$0x1] }
 0x48b   : > { %v11861_v55 = vrot.slane %v7907_v39, 9  ;;  %v7938_v56 = vrot.slane %v7664_v13, 5  ;;  %v7946_v39 = vrot.slane %v7668_v47, 5 }
 0x48c   : > { %7088 = vmatmul.bf16.gmra.mxu1 %v11669_v49  ;;  %v15342_v20 = vadd.f32 %v6956_v27, %v6792_v54  ;;  %v7984_v49 = vpack.c.b16 %v7977_v12, %v7976_v15  ;;  %v7906_v54 = vld [vmem:[#allocation3 + $0x20] sm:$0xe]  ;;  %v7725_v27 = vrot.slane %v7724_v11, 4  ;;  %v7737_v12 = vrot.slane %v7735_v50, 5 }
 0x48d   : > { %v11860_v60 = vrot.slane %v7906_v54, 9  ;;  %v7943_v1 = vsel %vm13310_vm10, %v11861_v55, %v7942_v51  ;;  %v7755_v15 = vshll.u32 %v7670_v25, 16  ;;  %v7671_v11 = vld [vmem:[#allocation3 + $0x40] sm:$0xf] }
 0x48e   : > { %v7730_v26 = vsel %vm13301_vm8, %v7725_v27, %v7729_v53  ;;  %v7979_v34 = vunpack.c.l.b16 %v7943_v1  ;;  %v7738_v38 = vor.u32 %v7737_v12, %v7734_v6  ;;  %v7947_v27 = vsel %vm13310_vm10, %v11862_v0, %v7946_v39  ;;  %v11784_v53 = vld [vmem:[#allocation3 + $0x20] sm:$0xf] }
 0x48f   : > { %7511 = vmatmul.bf16.gmra.mxu3 %v7435_v14  ;;  %v7713_v14 = vshll.u32 %v7664_v13, 16  ;;  %v7939_v23 = vsel %vm13310_vm10, %v11860_v60, %v7938_v56  ;;  %v7806_v10 = vunpack.c.l.b16 %v7730_v26  ;;  %v7757_v59 = vrot.slane %v7755_v15, 5  ;;  %v7673_v13 = vld [vmem:[#allocation3 + $0x48] sm:$0xf]  ;;  %v7910_v50 = vld [vmem:[#allocation3 + $0x40] sm:$0xe] }
 0x490   : > { %v7978_v42 = vunpack.c.l.b16 %v7939_v23  ;;  %v7739_v54 = vrot.slane %v7738_v38, 4  ;;  %v7760_v60 = vshrl.u32 %v7671_v11, 16  ;;  %v7763_v51 = vshll.u32 %v7671_v11, 16  ;;  %v12685_v38 = vld [vmem:[#allocation3 + $0x34] sm:$0xf0] }
 0x491   : > { %7338 = vmatmul.bf16.gmra.mxu2 %v7262_v29  ;;  %v7669_v29 = vld [vmem:[#allocation3 + $0x38] sm:$0xf]  ;;  %v7715_v30 = vrot.slane %v7713_v14, 5  ;;  %v11785_v1 = vor.u32 %v12684_v31, %v11784_v53  ;;  %v7958_v6 = vrot.slane %v7674_v43, 5  ;;  %v6692_v31 = vpop.f32.mrf.mxu1 }
 0x492   : > { %v7746_v24 = vshrl.u32 %v7669_v29, 16  ;;  %v7749_v28 = vshll.u32 %v7669_v29, 16  ;;  %v7985_v33 = vpack.c.b16 %v7979_v34, %v7978_v42  ;;  %v7774_v29 = vshrl.u32 %v7673_v13, 16 }
 0x493   : > { %v7716_v62 = vsel %vm13301_vm8, %v7711_v58, %v7715_v30  ;;  %v7777_v58 = vshll.u32 %v7673_v13, 16  ;;  %v7765_v30 = vrot.slane %v7763_v51, 5 }
 0x494   : > { %v7748_v37 = vrot.slane %v7746_v24, 4  ;;  %v7751_v22 = vrot.slane %v7749_v28, 5  ;;  %v7805_v3 = vunpack.c.l.b16 %v7716_v62  ;;  %v7980_v24 = vunpack.c.l.b16 %v7947_v27  ;;  %v11792_v27 = vld [vmem:[#allocation3 + $0x40] sm:$0xf] }
 0x495   : > { %v7762_v28 = vrot.slane %v7760_v60, 4  ;;  %v7776_v26 = vrot.slane %v7774_v29, 4  ;;  %v7779_v23 = vrot.slane %v7777_v58, 5  ;;  %v12686_v60 = vld [vmem:[#allocation3 + $0x44] sm:$0xf0] }
 0x496   : > { %v7752_v41 = vor.u32 %v7751_v22, %v7748_v37  ;;  %v7783_v22 = vshll.u32 %v7674_v43, 16  ;;  %v11793_v58 = vor.u32 %v12686_v60, %v11792_v27  ;;  %v12764_v43 = vld [vmem:[#allocation9 + $0x628] sm:$0xff] }
 0x497   : > { %v7766_v42 = vor.u32 %v7765_v30, %v7762_v28  ;;  %v7780_v37 = vor.u32 %v7779_v23, %v7776_v26 }
 0x498   : > { %v7753_v7 = vrot.slane %v7752_v41, 4  ;;  %v7785_v41 = vrot.slane %v7783_v22, 5 }
 0x499   : > { %v7767_v12 = vrot.slane %v7766_v42, 4 }
 0x49a   : > { %v7758_v14 = vsel %vm13301_vm8, %v7753_v7, %v7757_v59  ;;  %v11788_v7 = vld [vmem:[#allocation3 + $0x30] sm:$0xf]  ;;  %v6958_v59 = vpop.f32.mrf.mxu3 }
 0x49b   : > { %v7808_v40 = vunpack.c.l.b16 %v7758_v14  ;;  %v11789_v39 = vor.u32 %v12685_v38, %v11788_v7  ;;  %v12765_v14 = vld [vmem:[#allocation9 + $0x630] sm:$0xff] }
 0x49c   : > { %7093 = vmatmul.bf16.gmra.mxu1 %v11673_v19  ;;  %v7812_v19 = vpack.c.b16 %v7806_v10, %v7805_v3  ;;  %v7911_v10 = vld [vmem:[#allocation3 + $0x48] sm:$0xe]  ;;  %9419 = vmatpush.bf16.msrb.mxu0 %v12765_v14 }
 0x49f   : > { %8048 = vmatmul.bf16.vlgmr.msra.gmra.mxu3 %v7984_v49  ;;  %v7741_v49 = vshll.u32 %v7668_v47, 16 }
 0x4a0   : > { %9420 = vmatpush.bf16.msrb.mxu0 %v12764_v43 }
 0x4a1   : > { %7875 = vmatmul.bf16.vlgmr.msra.gmra.mxu2 %v7811_v17  ;;  %v7950_v17 = vrot.slane %v7670_v25, 5  ;;  %v7743_v55 = vrot.slane %v7741_v49, 5  ;;  %v11865_v25 = vrot.slane %v7911_v10, 9 }
 0x4a3   : > { %v7951_v52 = vsel %vm13310_vm10, %v11863_v61, %v7950_v17  ;;  %v7744_v16 = vsel %vm13301_vm8, %v7739_v54, %v7743_v55  ;;  %v7959_v15 = vsel %vm13310_vm10, %v11865_v25, %v7958_v6  ;;  %v6793_v61 = vpop.f32.mrf.mxu2 }
 0x4a4   : > { %v7981_v56 = vunpack.c.l.b16 %v7951_v52  ;;  %v7807_v44 = vunpack.c.l.b16 %v7744_v16  ;;  %v7983_v17 = vunpack.c.l.b16 %v7959_v15 }
 0x4a6   : > { %v7986_v34 = vpack.c.b16 %v7981_v56, %v7980_v24  ;;  %v7813_v62 = vpack.c.b16 %v7808_v40, %v7807_v44 }
 0x4ac   : > { %7630 = vmatmul.bf16.vlgmr.msra.gmra.mxu1 %v11781_v9  ;;  %v7672_v9 = vld [vmem:[#allocation3 + $0x44] sm:$0x1] }
 0x4ad   : > { %v7769_v3 = vshll.u32 %v7672_v9, 16  ;;  %v7954_v45 = vrot.slane %v7672_v9, 5 }
 0x4af   : > { %8053 = vmatmul.bf16.gmra.mxu3 %v7985_v33  ;;  %v11864_v33 = vrot.slane %v7910_v50, 9  ;;  %v7771_v47 = vrot.slane %v7769_v3, 5 }
 0x4b1   : > { %7880 = vmatmul.bf16.gmra.mxu2 %v7812_v19  ;;  %v7781_v19 = vrot.slane %v7780_v37, 4  ;;  %v7955_v8 = vsel %vm13310_vm10, %v11864_v33, %v7954_v45  ;;  %v7772_v2 = vsel %vm13301_vm8, %v7767_v12, %v7771_v47  ;;  %v6789_v37 = vadd.f32 %v15328_v35, %v15330_v5 }
 0x4b2   : > { %v7982_v0 = vunpack.c.l.b16 %v7955_v8  ;;  %v7809_v11 = vunpack.c.l.b16 %v7772_v2  ;;  %v6794_v8 = vadd.f32 %v6793_v61, %v6692_v31 }
 0x4b3   : > { %v7786_v49 = vsel %vm13301_vm8, %v7781_v19, %v7785_v41  ;;  %v6969_v33 = vadd.f32 %v15332_v32, %v6789_v37  ;;  %vm8360_vm8 = vsmask.f32 7946 }
 0x4b4   : > { %v7810_v13 = vunpack.c.l.b16 %v7786_v49  ;;  %v7987_v54 = vpack.c.b16 %v7983_v17, %v7982_v0  ;;  %v6971_v2 = vadd.f32 %v6958_v59, %v6794_v8  ;;  %v6784_v59 = vadd.f32 %v15256_v46, %v15253_v63  ;;  %vm15402_vm10 = vmand %vm6258_vm2, %vm8360_vm8 }
 0x4b5   : > { %vm15428_vm8 = vmand %vm15945_vm9, %vm8458_vm13 }
 0x4b6   : > { %v7814_v52 = vpack.c.b16 %v7810_v13, %v7809_v11  ;;  %v6967_v60 = vadd.f32 %v15261_v4, %v6784_v59 }
 0x4bc   : > { %7635 = vmatmul.bf16.gmra.mxu1 %v11785_v1 }
 0x4bf   : > { %8058 = vmatmul.bf16.gmra.mxu3 %v7986_v34 }
 0x4c1   : > { %7885 = vmatmul.bf16.gmra.mxu2 %v7813_v62 }
 0x4cc   : > { %7640 = vmatmul.bf16.gmra.mxu1 %v11789_v39  ;;  %v6796_v48 = vpop.f32.mrf.mxu2 }
 0x4cf   : > { %8063 = vmatmul.bf16.gmra.mxu3 %v7987_v54 }
 0x4d1   : > { %7890 = vmatmul.bf16.gmra.mxu2 %v7814_v52 }
 0x4d2   : > { %v6961_v55 = vpop.f32.mrf.mxu3 }
 0x4d4   : > { %v6798_v29 = vpop.f32.mrf.mxu2 }
 0x4d9   : > { %v6695_v36 = vpop.f32.mrf.mxu1 }
 0x4da   : > { %v6797_v51 = vadd.f32 %v6796_v48, %v6695_v36  ;;  %v6963_v53 = vpop.f32.mrf.mxu3 }
 0x4dc   : > { %v6972_v56 = vadd.f32 %v6961_v55, %v6797_v51  ;;  %7645 = vmatmul.bf16.gmra.mxu1 %v11793_v58 }
 0x4e1   : > { %v6697_v1 = vpop.f32.mrf.mxu1 }
 0x4e2   : > { %v7497_v16 = vpop.f32.mrf.mxu3  ;;  %v6799_v54 = vadd.f32 %v6798_v29, %v6697_v1 }
 0x4e4   : > { %v7324_v40 = vpop.f32.mrf.mxu2  ;;  %v6973_v61 = vadd.f32 %v6963_v53, %v6799_v54  ;;  %v8362_v53 = vld [vmem:[#allocation4 + $0x4] sm:$0x4] }
 0x4e9   : > { %v7079_v24 = vpop.f32.mrf.mxu1 }
 0x4ea   : > { %v7099_v28 = vadd.f32 %v7079_v24, %v15152_v18  ;;  %v15377_v30 = vpop.f32.mrf.mxu3  ;;  %v8347_v24 = vld [vmem:[#allocation4 + $0x4] sm:$0x1] }
 0x4ec   : > { %v7344_v26 = vadd.f32 %v7324_v40, %v7099_v28  ;;  %v7326_v23 = vpop.f32.mrf.mxu2  ;;  %v8348_v28 = vsel %vm13268_vm7, 0, %v8347_v24 }
 0x4ed   : > { %8349 = vst [vmem:[#allocation4 + $0x4] sm:$0x1] %v8348_v28 }
 0x4ee   : > { %v7517_v44 = vadd.f32 %v7497_v16, %v7344_v26 }
 0x4f1   : > { %v7081_v34 = vpop.f32.mrf.mxu1 }
 0x4f2   : > { %v7502_v9 = vpop.f32.mrf.mxu3  ;;  %v7100_v51 = vadd.f32 %v7081_v34, %v6967_v60 }
 0x4f4   : > { %v7329_v62 = vpop.f32.mrf.mxu2  ;;  %v7345_v16 = vadd.f32 %v7326_v23, %v7100_v51  ;;  %v8363_v23 = vsel %vm15402_vm10, 0, %v8362_v53 }
 0x4f5   : > { %8364 = vst [vmem:[#allocation4 + $0x4] sm:$0x4] %v8363_v23 }
 0x4f6   : > { %v7518_v46 = vadd.f32 %v15377_v30, %v7345_v16 }
 0x4f9   : > { %v7084_v50 = vpop.f32.mrf.mxu1 }
 0x4fa   : > { %v7101_v10 = vadd.f32 %v7084_v50, %v15284_v21  ;;  %v7504_v42 = vpop.f32.mrf.mxu3 }
 0x4fc   : > { %v7346_v22 = vadd.f32 %v7329_v62, %v7101_v10  ;;  %v7331_v3 = vpop.f32.mrf.mxu2 }
 0x4fe   : > { %v15382_v18 = vadd.f32 %v7502_v9, %v7346_v22 }
 0x501   : > { %v7086_v25 = vpop.f32.mrf.mxu1 }
 0x502   : > { %v7102_v6 = vadd.f32 %v7086_v25, %v6969_v33  ;;  %v7507_v12 = vpop.f32.mrf.mxu3 }
 0x504   : > { %v7347_v19 = vadd.f32 %v7331_v3, %v7102_v6  ;;  %v7334_v41 = vpop.f32.mrf.mxu2 }
 0x506   : > { %v15385_v45 = vadd.f32 %v7504_v42, %v7347_v19 }
 0x509   : > { %v7089_v47 = vpop.f32.mrf.mxu1 }
 0x50a   : > { %v7103_v21 = vadd.f32 %v7089_v47, %v15342_v20  ;;  %v7509_v35 = vpop.f32.mrf.mxu3 }
 0x50c   : > { %v7348_v15 = vadd.f32 %v7334_v41, %v7103_v21  ;;  %v7336_v38 = vpop.f32.mrf.mxu2 }
 0x50e   : > { %v15388_v5 = vadd.f32 %v7507_v12, %v7348_v15 }
 0x511   : > { %v7091_v49 = vpop.f32.mrf.mxu1 }
 0x512   : > { %v7104_v7 = vadd.f32 %v7091_v49, %v6971_v2  ;;  %v7512_v39 = vpop.f32.mrf.mxu3 }
 0x514   : > { %v7349_v32 = vadd.f32 %v7336_v38, %v7104_v7  ;;  %v7339_v0 = vpop.f32.mrf.mxu2 }
 0x516   : > { %v15390_v17 = vadd.f32 %v7509_v35, %v7349_v32 }
 0x519   : > { %v7094_v11 = vpop.f32.mrf.mxu1 }
 0x51a   : > { %v7105_v13 = vadd.f32 %v7094_v11, %v6972_v56  ;;  %v7514_v55 = vpop.f32.mrf.mxu3 }
 0x51c   : > { %v7350_v52 = vadd.f32 %v7339_v0, %v7105_v13  ;;  %v7341_v20 = vpop.f32.mrf.mxu2 }
 0x51e   : > { %v15392_v48 = vadd.f32 %v7512_v39, %v7350_v52 }
 0x521   : > { %v7096_v31 = vpop.f32.mrf.mxu1 }
 0x522   : > { %v7106_v14 = vadd.f32 %v7096_v31, %v6973_v61  ;;  %v8049_v1 = vpop.f32.mrf.mxu3 }
 0x524   : > { %v7351_v27 = vadd.f32 %v7341_v20, %v7106_v14  ;;  %v7876_v58 = vpop.f32.mrf.mxu2 }
 0x526   : > { %v15397_v36 = vadd.f32 %v7514_v55, %v7351_v27  ;;  %v15417_v27 = vld [vmem:[#allocation11 + $0x1] ss:$0 sm:$0xff] }
 0x529   : > { %v7631_v56 = vpop.f32.mrf.mxu1 }
 0x52a   : > { %v7651_v29 = vadd.f32 %v7631_v56, %v7517_v44  ;;  %v8051_v50 = vpop.f32.mrf.mxu3 }
 0x52c   : > { %v7896_v40 = vadd.f32 %v7876_v58, %v7651_v29  ;;  %v7878_v34 = vpop.f32.mrf.mxu2 }
 0x52e   : > { %v8069_v4 = vadd.f32 %v8049_v1, %v7896_v40 }
 0x530   : > { %v8085_v62 = vrot.slane %v8069_v4, 2  ;;  %v8086_v43 = vrot.slane %v8069_v4, 4  ;;  %v8087_v10 = vrot.slane %v8069_v4, 6  ;;  %v8133_v37 = vsel %vm5175_vm1, %v8069_v4, -inf }
 0x531   : > { %v7633_v26 = vpop.f32.mrf.mxu1 }
 0x532   : > { %v7652_v44 = vadd.f32 %v7633_v26, %v7518_v46  ;;  %v8142_v25 = vsel %vm5175_vm1, %v8085_v62, -inf  ;;  %v8151_v6 = vsel %vm5175_vm1, %v8086_v43, -inf  ;;  %v8160_v19 = vsel %vm5175_vm1, %v8087_v10, -inf }
 0x534   : > { %v7897_v9 = vadd.f32 %v7878_v34, %v7652_v44 }
 0x536   : > { %v8070_v42 = vadd.f32 %v8051_v50, %v7897_v9 }
 0x538   : > { %v8088_v22 = vrot.slane %v8070_v42, 2  ;;  %v8089_v3 = vrot.slane %v8070_v42, 4  ;;  %v8090_v30 = vrot.slane %v8070_v42, 6  ;;  %v8134_v33 = vsel %vm5175_vm1, %v8070_v42, -inf }
 0x539   : > { %v8135_v12 = vmax.f32 %v8133_v37, %v8134_v33 }
 0x53a   : > { %v8143_v41 = vsel %vm5175_vm1, %v8088_v22, -inf  ;;  %v8152_v47 = vsel %vm5175_vm1, %v8089_v3, -inf  ;;  %v8161_v21 = vsel %vm5175_vm1, %v8090_v30, -inf  ;;  %v12763_v3 = vld [vmem:[#allocation9 + $0x620] sm:$0xff]  ;;  %v7636_v30 = vpop.f32.mrf.mxu1 }
 0x53b   : > { %v8136_v8 = vrot.slane %v8135_v12, 4  ;;  %v8144_v15 = vmax.f32 %v8142_v25, %v8143_v41  ;;  %v8153_v38 = vmax.f32 %v8151_v6, %v8152_v47  ;;  %v8162_v35 = vmax.f32 %v8160_v19, %v8161_v21  ;;  %v7881_v6 = vpop.f32.mrf.mxu2  ;;  %9421 = vmatpush.bf16.msrb.mxu0 %v12763_v3  ;;  %v8054_v47 = vpop.f32.mrf.mxu3 }
 0x53d   : > { %v8137_v2 = vmax.f32 %v8135_v12, %v8136_v8  ;;  %v8145_v49 = vrot.slane %v8144_v15, 4  ;;  %v8154_v7 = vrot.slane %v8153_v38, 4  ;;  %v8163_v32 = vrot.slane %v8162_v35, 4 }
 0x53f   : > { %v8138_v0 = vrot.slane %v8137_v2, 2  ;;  %v8146_v39 = vmax.f32 %v8144_v15, %v8145_v49  ;;  %v8155_v11 = vmax.f32 %v8153_v38, %v8154_v7  ;;  %v8164_v13 = vmax.f32 %v8162_v35, %v8163_v32  ;;  %v8460_v49 = vld [vmem:[#allocation4 + $0x4] sm:$0x7] }
 0x540   : > { %v7653_v15 = vadd.f32 %v7636_v30, %v15382_v18 }
 0x541   : > { %v8139_v54 = vmax.f32 %v8137_v2, %v8138_v0  ;;  %v8147_v52 = vrot.slane %v8146_v39, 2  ;;  %v8156_v20 = vrot.slane %v8155_v11, 2  ;;  %v8165_v61 = vrot.slane %v8164_v13, 2 }
 0x542   : > { %v7898_v32 = vadd.f32 %v7881_v6, %v7653_v15  ;;  %v7638_v0 = vpop.f32.mrf.mxu1 }
 0x543   : > { %v8140_v31 = vrot.slane %v8139_v54, 1  ;;  %v8148_v55 = vmax.f32 %v8146_v39, %v8147_v52  ;;  %v8157_v59 = vmax.f32 %v8155_v11, %v8156_v20  ;;  %v8166_v14 = vmax.f32 %v8164_v13, %v8165_v61  ;;  %v7883_v18 = vpop.f32.mrf.mxu2  ;;  %v8056_v52 = vpop.f32.mrf.mxu3 }
 0x544   : > { %v7654_v11 = vadd.f32 %v7638_v0, %v15385_v45  ;;  %v8071_v13 = vadd.f32 %v8054_v47, %v7898_v32 }
 0x545   : > { %v8141_v60 = vmax.f32 %v8139_v54, %v8140_v31  ;;  %v8149_v51 = vrot.slane %v8148_v55, 1  ;;  %v8158_v58 = vrot.slane %v8157_v59, 1  ;;  %v8167_v56 = vrot.slane %v8166_v14, 1 }
 0x546   : > { %v7899_v54 = vadd.f32 %v7883_v18, %v7654_v11  ;;  %v8169_v61 = vsel %vm5175_vm1, %v8071_v13, -inf }
 0x547   : > { %v8150_v29 = vmax.f32 %v8148_v55, %v8149_v51  ;;  %v8159_v1 = vmax.f32 %v8157_v59, %v8158_v58  ;;  %v8168_v16 = vmax.f32 %v8166_v14, %v8167_v56  ;;  %v8279_v40 = vadd.f32 %v15417_v27, %v8141_v60 }
 0x548   : > { %v8072_v20 = vadd.f32 %v8056_v52, %v7899_v54 }
 0x549   : > { %v8280_v24 = vadd.f32 %v15417_v27, %v8150_v29  ;;  %v8281_v53 = vadd.f32 %v15417_v27, %v8159_v1  ;;  %v8282_v28 = vadd.f32 %v15417_v27, %v8168_v16  ;;  %vm8295_vm6 = vcmp.gt.f32.partialorder %v8279_v40, 0.0 }
 0x54a   : > { %v8311_v46 = vmul.f32 0.01, %v8279_v40  ;;  %v8170_v31 = vsel %vm5175_vm1, %v8072_v20, -inf  ;;  %v8094_v58 = vrot.slane %v8072_v20, 2  ;;  %v8095_v1 = vrot.slane %v8072_v20, 4 }
 0x54b   : > { %vm8296_vm4 = vcmp.gt.f32.partialorder %v8280_v24, 0.0  ;;  %vm8297_vm14 = vcmp.gt.f32.partialorder %v8281_v53, 0.0  ;;  %vm8298_vm3 = vcmp.gt.f32.partialorder %v8282_v28, 0.0  ;;  %v8312_v4 = vmul.f32 0.01, %v8280_v24 }
 0x54c   : > { %v8313_v26 = vmul.f32 0.01, %v8281_v53  ;;  %v8314_v23 = vmul.f32 0.01, %v8282_v28  ;;  %v8327_v44 = vsel %vm8295_vm6, %v8279_v40, %v8311_v46  ;;  %v8171_v59 = vmax.f32 %v8169_v61, %v8170_v31 }
 0x54d   : > { %v8328_v34 = vsel %vm8296_vm4, %v8280_v24, %v8312_v4  ;;  %v8374_v9 = vpack.c.bf16 %v8327_v44, %v8327_v44  ;;  %vm15948_vm6 = vcmask 1043458   ;;  %v8091_v16 = vrot.slane %v8071_v13, 2 }
 0x54e   : > { %v8329_v62 = vsel %vm8297_vm14, %v8281_v53, %v8313_v26  ;;  %v8330_v43 = vsel %vm8298_vm3, %v8282_v28, %v8314_v23  ;;  %v8375_v50 = vpack.c.bf16 %v8328_v34, %v8328_v34  ;;  %v8092_v40 = vrot.slane %v8071_v13, 4  ;;  %vm15950_vm9 = vmmov %vm15948_vm6 }
 0x54f   : > { %v8376_v10 = vpack.c.bf16 %v8329_v62, %v8329_v62  ;;  %v8377_v42 = vpack.c.bf16 %v8330_v43, %v8330_v43  ;;  %v8406_v37 = vunpack.c.l.b16 %v8374_v9  ;;  %v8172_v46 = vrot.slane %v8171_v59, 4 }
 0x550   : > { %v8407_v22 = vunpack.c.l.b16 %v8375_v50  ;;  %v8093_v4 = vrot.slane %v8071_v13, 6  ;;  %v8096_v26 = vrot.slane %v8072_v20, 6  ;;  %v8179_v23 = vsel %vm5175_vm1, %v8094_v58, -inf }
 0x551   : > { %v8408_v33 = vunpack.c.l.b16 %v8376_v10  ;;  %v8409_v25 = vunpack.c.l.b16 %v8377_v42  ;;  %v8422_v12 = vrot.slane %v8406_v37, 7  ;;  %v8188_v34 = vsel %vm5175_vm1, %v8095_v1, -inf  ;;  %v8350_v37 = vld [vmem:[#allocation4 + $0x8] sm:$0x1] }
 0x552   : > { %v8423_v19 = vrot.slane %v8407_v22, 6  ;;  %v8178_v9 = vsel %vm5175_vm1, %v8091_v16, -inf  ;;  %v8187_v62 = vsel %vm5175_vm1, %v8092_v40, -inf  ;;  %v8173_v10 = vmax.f32 %v8171_v59, %v8172_v46  ;;  %v8365_v22 = vld [vmem:[#allocation4 + $0x8] sm:$0x4] }
 0x553   : > { %v8425_v41 = vrot.slane %v8408_v33, 5  ;;  %v8427_v8 = vrot.slane %v8409_v25, 4  ;;  %v8180_v42 = vmax.f32 %v8178_v9, %v8179_v23  ;;  %v8196_v3 = vsel %vm5175_vm1, %v8093_v4, -inf  ;;  %v12770_v25 = vld [vmem:[#allocation9 + $0x658] sm:$0xff] }
 0x554   : > { %v8424_v21 = vsel %vm6258_vm2, %v8423_v19, %v8422_v12  ;;  %v8189_v30 = vmax.f32 %v8187_v62, %v8188_v34  ;;  %v8197_v33 = vsel %vm5175_vm1, %v8096_v26, -inf  ;;  %v8174_v12 = vrot.slane %v8173_v10, 2 }
 0x555   : > { %v8426_v38 = vsel %vm15943_vm12, %v8425_v41, %v8424_v21  ;;  %v8181_v19 = vrot.slane %v8180_v42, 4  ;;  %v8198_v41 = vmax.f32 %v8196_v3, %v8197_v33  ;;  %v8351_v21 = vsel %vm13268_vm7, 0, %v8350_v37 }
 0x556   : > { %v8428_v35 = vsel %vm15944_vm5, %v8427_v8, %v8426_v38  ;;  %v8190_v47 = vrot.slane %v8189_v30, 4  ;;  %v8366_v8 = vsel %vm15402_vm10, 0, %v8365_v22  ;;  %v8175_v15 = vmax.f32 %v8173_v10, %v8174_v12  ;;  %8352 = vst [vmem:[#allocation4 + $0x8] sm:$0x1] %v8351_v21  ;;  %v7641_v22 = vpop.f32.mrf.mxu1  ;;  %v7886_v12 = vpop.f32.mrf.mxu2 }
 0x557   : > { %v8450_v7 = vpack.c.b16 %v8428_v35, %v8428_v35  ;;  %v8182_v38 = vmax.f32 %v8180_v42, %v8181_v19  ;;  %v8199_v35 = vrot.slane %v8198_v41, 4  ;;  %8367 = vst [vmem:[#allocation4 + $0x8] sm:$0x4] %v8366_v8  ;;  %v7655_v21 = vadd.f32 %v7641_v22, %v15388_v5 }
 0x559   : > { %v8461_v39 = vsel %vm15428_vm8, %v8450_v7, %v8460_v49  ;;  %v8191_v49 = vmax.f32 %v8189_v30, %v8190_v47  ;;  %v8176_v7 = vrot.slane %v8175_v15, 1  ;;  %v8183_v32 = vrot.slane %v8182_v38, 2 }
 0x55a   : > { %8462 = vst [vmem:[#allocation4 + $0x4] sm:$0x7] %v8461_v39  ;;  %v8200_v0 = vmax.f32 %v8198_v41, %v8199_v35  ;;  %v8059_v41 = vpop.f32.mrf.mxu3  ;;  %v7900_v35 = vadd.f32 %v7886_v12, %v7655_v21 }
 0x55b   : > { %v8192_v39 = vrot.slane %v8191_v49, 2  ;;  %v8177_v11 = vmax.f32 %v8175_v15, %v8176_v7  ;;  %v8184_v18 = vmax.f32 %v8182_v38, %v8183_v32 }
 0x55c   : > { %v8201_v13 = vrot.slane %v8200_v0, 2 }
 0x55d   : > { %v8193_v54 = vmax.f32 %v8191_v49, %v8192_v39  ;;  %v8185_v52 = vrot.slane %v8184_v18, 1  ;;  %v8283_v61 = vadd.f32 %v15417_v27, %v8177_v11 }
 0x55e   : > { %v8202_v20 = vmax.f32 %v8200_v0, %v8201_v13  ;;  %v8463_v33 = vld [vmem:[#allocation4 + $0x8] sm:$0x7]  ;;  %v7643_v47 = vpop.f32.mrf.mxu1  ;;  %v7888_v49 = vpop.f32.mrf.mxu2  ;;  %v8073_v13 = vadd.f32 %v8059_v41, %v7900_v35 }
 0x55f   : > { %v8194_v31 = vrot.slane %v8193_v54, 1  ;;  %vm8299_vm4 = vcmp.gt.f32.partialorder %v8283_v61, 0.0  ;;  %v7656_v8 = vadd.f32 %v7643_v47, %v15390_v17 }
 0x560   : > { %v8203_v59 = vrot.slane %v8202_v20, 1 }
 0x561   : > { %v8494_v55 = vld [vmem:[#allocation4 + $0x4] sm:$0x7]  ;;  %v7901_v7 = vadd.f32 %v7888_v49, %v7656_v8 }
 0x562   : > { %v8502_v14 = vrot.slane %v8494_v55, 2 }
 0x564   : > { %v8514_v60 = vsel %vm5175_vm1, %v8494_v55, %v8502_v14  ;;  %v8515_v51 = vsel %vm15948_vm6, %v8494_v55, %v8502_v14  ;;  %v8186_v55 = vmax.f32 %v8184_v18, %v8185_v52  ;;  %v8315_v14 = vmul.f32 0.01, %v8283_v61 }
 0x565   : > { %v8517_v56 = vrot.slane %v8515_v51, 2  ;;  %v8550_v29 = vshrl.u32 %v8514_v60, 16  ;;  %v8553_v45 = vshll.u32 %v8514_v60, 16  ;;  %v8195_v60 = vmax.f32 %v8193_v54, %v8194_v31  ;;  %v8061_v54 = vpop.f32.mrf.mxu3 }
 0x566   : > { %v8204_v51 = vmax.f32 %v8202_v20, %v8203_v59  ;;  %v8284_v58 = vadd.f32 %v15417_v27, %v8186_v55  ;;  %v8074_v5 = vadd.f32 %v8061_v54, %v7901_v7  ;;  %v8097_v59 = vrot.slane %v8073_v13, 2 }
 0x567   : > { %v8552_v24 = vrot.slane %v8550_v29, 6  ;;  %v8555_v53 = vrot.slane %v8553_v45, 7  ;;  %v8559_v28 = vshll.u32 %v8517_v56, 16  ;;  %v8331_v56 = vsel %vm8299_vm4, %v8283_v61, %v8315_v14 }
 0x568   : > { %v8285_v29 = vadd.f32 %v15417_v27, %v8195_v60  ;;  %v8378_v45 = vpack.c.bf16 %v8331_v56, %v8331_v56  ;;  %v8286_v1 = vadd.f32 %v15417_v27, %v8204_v51  ;;  %vm8300_vm14 = vcmp.gt.f32.partialorder %v8284_v58, 0.0 }
 0x569   : > { %v8556_v44 = vor.u32 %v8555_v53, %v8552_v24  ;;  %v8561_v50 = vrot.slane %v8559_v28, 7  ;;  %v8316_v16 = vmul.f32 0.01, %v8284_v58  ;;  %v8100_v14 = vrot.slane %v8074_v5, 2 }
 0x56a   : > { %vm8301_vm3 = vcmp.gt.f32.partialorder %v8285_v29, 0.0  ;;  %v8317_v40 = vmul.f32 0.01, %v8285_v29  ;;  %vm8302_vm13 = vcmp.gt.f32.partialorder %v8286_v1, 0.0  ;;  %v8318_v24 = vmul.f32 0.01, %v8286_v1 }
 0x56b   : > { %v8557_v43 = vrot.slane %v8556_v44, 2  ;;  %v8332_v53 = vsel %vm8300_vm14, %v8284_v58, %v8316_v16  ;;  %v8410_v4 = vunpack.c.l.b16 %v8378_v45  ;;  %v8098_v60 = vrot.slane %v8073_v13, 4  ;;  %v8353_v16 = vld [vmem:[#allocation4 + $0xc] sm:$0x1] }
 0x56c   : > { %v8333_v28 = vsel %vm8301_vm3, %v8285_v29, %v8317_v40  ;;  %v8379_v46 = vpack.c.bf16 %v8332_v53, %v8332_v53  ;;  %v8334_v26 = vsel %vm8302_vm13, %v8286_v1, %v8318_v24  ;;  %v8099_v51 = vrot.slane %v8073_v13, 6  ;;  %vm15951_vm13 = vmmov %vm15943_vm12 }
 0x56d   : > { %v8562_v6 = vsel %vm14722_vm11, %v8557_v43, %v8561_v50  ;;  %v8380_v23 = vpack.c.bf16 %v8333_v28, %v8333_v28  ;;  %v8381_v44 = vpack.c.bf16 %v8334_v26, %v8334_v26  ;;  %v8429_v43 = vrot.slane %v8410_v4, 7 }
 0x56e   : > { %8609 = vst [vmem:[#allocation1 + $0x1] ss:$4 sm:$0xff] %v8562_v6  ;;  %v8411_v34 = vunpack.c.l.b16 %v8379_v46  ;;  %v8101_v58 = vrot.slane %v8074_v5, 4  ;;  %v8102_v56 = vrot.slane %v8074_v5, 6  ;;  %v8206_v45 = vsel %vm5175_vm1, %v8074_v5, -inf }
 0x56f   : > { %v8412_v9 = vunpack.c.l.b16 %v8380_v23  ;;  %v8413_v62 = vunpack.c.l.b16 %v8381_v44  ;;  %v8205_v1 = vsel %vm5175_vm1, %v8073_v13, -inf  ;;  %v8215_v24 = vsel %vm5175_vm1, %v8100_v14, -inf  ;;  %v8368_v46 = vld [vmem:[#allocation4 + $0xc] sm:$0x4] }
 0x570   : > { %v8430_v50 = vrot.slane %v8411_v34, 6  ;;  %v8207_v40 = vmax.f32 %v8205_v1, %v8206_v45  ;;  %v8224_v53 = vsel %vm5175_vm1, %v8101_v58, -inf  ;;  %v8233_v28 = vsel %vm5175_vm1, %v8102_v56, -inf }
 0x571   : > { %v8432_v10 = vrot.slane %v8412_v9, 5  ;;  %v8434_v37 = vrot.slane %v8413_v62, 4  ;;  %v8214_v4 = vsel %vm5175_vm1, %v8097_v59, -inf  ;;  %v8223_v26 = vsel %vm5175_vm1, %v8098_v60, -inf }
 0x572   : > { %v8431_v42 = vsel %vm6258_vm2, %v8430_v50, %v8429_v43  ;;  %v8232_v23 = vsel %vm5175_vm1, %v8099_v51, -inf  ;;  %v8208_v44 = vrot.slane %v8207_v40, 4  ;;  %v8216_v34 = vmax.f32 %v8214_v4, %v8215_v24 }
 0x573   : > { %v8433_v3 = vsel %vm15943_vm12, %v8432_v10, %v8431_v42  ;;  %v8225_v9 = vmax.f32 %v8223_v26, %v8224_v53  ;;  %v8234_v62 = vmax.f32 %v8232_v23, %v8233_v28  ;;  %v8354_v43 = vsel %vm13268_vm7, 0, %v8353_v16  ;;  %vm15952_vm12 = vmmov %vm15944_vm5 }
 0x574   : > { %v8435_v30 = vsel %vm15944_vm5, %v8434_v37, %v8433_v3  ;;  %v8369_v50 = vsel %vm15402_vm10, 0, %v8368_v46  ;;  %v8209_v10 = vmax.f32 %v8207_v40, %v8208_v44  ;;  %v8217_v42 = vrot.slane %v8216_v34, 4  ;;  %8355 = vst [vmem:[#allocation4 + $0xc] sm:$0x1] %v8354_v43  ;;  %vm15953_vm5 = vmmov %vm15950_vm9 }
 0x575   : > { %v8451_v6 = vpack.c.b16 %v8435_v30, %v8435_v30  ;;  %v8226_v37 = vrot.slane %v8225_v9, 4  ;;  %v8235_v22 = vrot.slane %v8234_v62, 4  ;;  %8370 = vst [vmem:[#allocation4 + $0xc] sm:$0x4] %v8369_v50 }
 0x576   : > { %v8210_v3 = vrot.slane %v8209_v10, 2  ;;  %v8218_v30 = vmax.f32 %v8216_v34, %v8217_v42 }
 0x577   : > { %v8464_v19 = vsel %vm15428_vm8, %v8451_v6, %v8463_v33  ;;  %v8227_v33 = vmax.f32 %v8225_v9, %v8226_v37  ;;  %v8236_v6 = vmax.f32 %v8234_v62, %v8235_v22 }
 0x578   : > { %8465 = vst [vmem:[#allocation4 + $0x8] sm:$0x7] %v8464_v19  ;;  %v8211_v12 = vmax.f32 %v8209_v10, %v8210_v3  ;;  %v8219_v19 = vrot.slane %v8218_v30, 2 }
 0x579   : > { %v8228_v41 = vrot.slane %v8227_v33, 2  ;;  %v8237_v47 = vrot.slane %v8236_v6, 2 }
 0x57a   : > { %v8212_v21 = vrot.slane %v8211_v12, 1  ;;  %v8220_v8 = vmax.f32 %v8218_v30, %v8219_v19  ;;  %v8755_v19 = vld [vmem:[#allocation4] sm:$0x6] }
 0x57c   : > { %v8213_v35 = vmax.f32 %v8211_v12, %v8212_v21  ;;  %v8221_v49 = vrot.slane %v8220_v8, 1  ;;  %v8466_v23 = vld [vmem:[#allocation4 + $0xc] sm:$0x7]  ;;  %v7646_v21 = vpop.f32.mrf.mxu1 }
 0x57f   : > { %v8495_v15 = vld [vmem:[#allocation4 + $0x8] sm:$0x7] }
 0x580   : > { %v8503_v38 = vrot.slane %v8495_v15, 2 }
 0x582   : > { %v8520_v32 = vsel %vm5175_vm1, %v8495_v15, %v8503_v38  ;;  %v8521_v0 = vsel %vm15950_vm9, %v8495_v15, %v8503_v38  ;;  %v8229_v15 = vmax.f32 %v8227_v33, %v8228_v41  ;;  %v8238_v38 = vmax.f32 %v8236_v6, %v8237_v47  ;;  %v12762_v47 = vld [vmem:[#allocation9 + $0x618] sm:$0xff]  ;;  %vm15954_vm9 = vmmov %vm15953_vm5 }
 0x583   : > { %v8523_v39 = vrot.slane %v8521_v0, 2  ;;  %v8563_v11 = vshrl.u32 %v8520_v32, 16  ;;  %v8566_v18 = vshll.u32 %v8520_v32, 16  ;;  %v8222_v0 = vmax.f32 %v8220_v8, %v8221_v49  ;;  %9422 = vmatpush.bf16.msrb.mxu0 %v12762_v47  ;;  %v8064_v49 = vpop.f32.mrf.mxu3 }
 0x584   : > { %v8230_v7 = vrot.slane %v8229_v15, 1  ;;  %v8239_v32 = vrot.slane %v8238_v38, 1  ;;  %v8763_v8 = vrot.slane %v8755_v19, 2 }
 0x585   : > { %v8565_v52 = vrot.slane %v8563_v11, 6  ;;  %v8568_v20 = vrot.slane %v8566_v18, 7  ;;  %v8572_v61 = vshll.u32 %v8523_v39, 16  ;;  %v8287_v18 = vadd.f32 %v15417_v27, %v8213_v35 }
 0x586   : > { %v8231_v39 = vmax.f32 %v8229_v15, %v8230_v7  ;;  %v8240_v11 = vmax.f32 %v8238_v38, %v8239_v32  ;;  %v8288_v13 = vadd.f32 %v15417_v27, %v8222_v0  ;;  %v7891_v15 = vpop.f32.mrf.mxu2  ;;  %v8756_v38 = vld [vmem:[#allocation4 + $0x4] sm:$0x6]  ;;  %v7657_v35 = vadd.f32 %v7646_v21, %v15392_v48  ;;  %v8757_v7 = vld [vmem:[#allocation4 + $0x8] sm:$0x6]  ;;  %v8472_v32 = vld [vmem:[#allocation4] sm:$0x3] }
 0x587   : > { %v8569_v31 = vor.u32 %v8568_v20, %v8565_v52  ;;  %v8574_v55 = vrot.slane %v8572_v61, 7  ;;  %vm8303_vm6 = vcmp.gt.f32.partialorder %v8287_v18, 0.0  ;;  %v8319_v20 = vmul.f32 0.01, %v8287_v18  ;;  %v8473_v48 = vld [vmem:[#allocation4 + $0x4] sm:$0x3] }
 0x588   : > { %v8289_v54 = vadd.f32 %v15417_v27, %v8231_v39  ;;  %v8290_v52 = vadd.f32 %v15417_v27, %v8240_v11  ;;  %vm8304_vm4 = vcmp.gt.f32.partialorder %v8288_v13, 0.0  ;;  %v8320_v61 = vmul.f32 0.01, %v8288_v13 }
 0x589   : > { %v8570_v17 = vrot.slane %v8569_v31, 2  ;;  %v8769_v0 = vsel %vm5175_vm1, %v8755_v19, %v8763_v8  ;;  %v7902_v11 = vadd.f32 %v7891_v15, %v7657_v35 }
 0x58a   : > { %vm8305_vm14 = vcmp.gt.f32.partialorder %v8289_v54, 0.0  ;;  %vm8306_vm3 = vcmp.gt.f32.partialorder %v8290_v52, 0.0  ;;  %v8321_v5 = vmul.f32 0.01, %v8289_v54  ;;  %v8322_v31 = vmul.f32 0.01, %v8290_v52 }
 0x58b   : > { %v8575_v29 = vsel %vm14722_vm11, %v8570_v17, %v8574_v55  ;;  %v8335_v17 = vsel %vm8303_vm6, %v8287_v18, %v8319_v20  ;;  %v8336_v55 = vsel %vm8304_vm4, %v8288_v13, %v8320_v61  ;;  %v8771_v18 = vsel %vm15954_vm9, %v8755_v19, %v8763_v8  ;;  %v8371_v61 = vld [vmem:[#allocation4 + $0x10] sm:$0x4] }
 0x58c   : > { %8612 = vst [vmem:[#allocation1 + $0x2] ss:$4 sm:$0xff] %v8575_v29  ;;  %v8382_v59 = vpack.c.bf16 %v8335_v17, %v8335_v17  ;;  %v8337_v14 = vsel %vm8305_vm14, %v8289_v54, %v8321_v5  ;;  %v8338_v60 = vsel %vm8306_vm3, %v8290_v52, %v8322_v31  ;;  %v8383_v51 = vpack.c.bf16 %v8336_v55, %v8336_v55  ;;  %v8356_v54 = vld [vmem:[#allocation4 + $0x10] sm:$0x1]  ;;  %v7648_v17 = vpop.f32.mrf.mxu1  ;;  %vm15956_vm14 = vmmov %vm15952_vm12 }
 0x58d   : > { %v8384_v58 = vpack.c.bf16 %v8337_v14, %v8337_v14  ;;  %v8385_v56 = vpack.c.bf16 %v8338_v60, %v8338_v60  ;;  %vm15955_vm6 = vcmask 1040384   ;;  %v8764_v13 = vrot.slane %v8756_v38, 2  ;;  %v8474_v14 = vld [vmem:[#allocation4 + $0x8] sm:$0x3] }
 0x58e   : > { %v8414_v29 = vunpack.c.l.b16 %v8382_v59  ;;  %v8415_v45 = vunpack.c.l.b16 %v8383_v51  ;;  %vm8795_vm4 = vmor %vm15955_vm6, %vm6258_vm2  ;;  %v8765_v52 = vrot.slane %v8757_v7, 2  ;;  %v11962_v5 = vrot.slane %v8769_v0, 9 }
 0x58f   : > { %v8416_v1 = vunpack.c.l.b16 %v8384_v58  ;;  %v8417_v16 = vunpack.c.l.b16 %v8385_v56  ;;  %vm15499_vm3 = vmor %vm8795_vm4, %vm15956_vm14  ;;  %v11963_v59 = vrot.slane %v8771_v18, 9  ;;  %v8075_v60 = vadd.f32 %v8064_v49, %v7902_v11 }
 0x590   : > { %v8436_v40 = vrot.slane %v8414_v29, 7  ;;  %v8437_v24 = vrot.slane %v8415_v45, 6  ;;  %v8357_v51 = vsel %vm13268_vm7, 0, %v8356_v54  ;;  %v7658_v56 = vadd.f32 %v7648_v17, %v15397_v36 }
 0x591   : > { %v8439_v53 = vrot.slane %v8416_v1, 5  ;;  %v8441_v46 = vrot.slane %v8417_v16, 4  ;;  %v8372_v29 = vsel %vm15402_vm10, 0, %v8371_v61  ;;  %v8776_v45 = vsel %vm5175_vm1, %v8756_v38, %v8764_v13  ;;  %vm15962_vm10 = vmmov %vm15953_vm5  ;;  %8358 = vst [vmem:[#allocation4 + $0x10] sm:$0x1] %v8357_v51 }
 0x592   : > { %v8438_v28 = vsel %vm6258_vm2, %v8437_v24, %v8436_v40  ;;  %v8783_v16 = vsel %vm5175_vm1, %v8757_v7, %v8765_v52  ;;  %v7893_v40 = vpop.f32.mrf.mxu2  ;;  %v8785_v36 = vsel %vm15953_vm5, %v8757_v7, %v8765_v52  ;;  %8373 = vst [vmem:[#allocation4 + $0x10] sm:$0x4] %v8372_v29  ;;  %vm15963_vm14 = vcmask 1043459  }
 0x593   : > { %v8440_v4 = vsel %vm15951_vm13, %v8439_v53, %v8438_v28  ;;  %vm15959_vm13 = vmmov %vm15953_vm5  ;;  %v7903_v28 = vadd.f32 %v7893_v40, %v7658_v56 }
 0x594   : > { %v8442_v26 = vsel %vm15952_vm12, %v8441_v46, %v8440_v4  ;;  %v8778_v1 = vsel %vm15959_vm13, %v8756_v38, %v8764_v13  ;;  %vm15514_vm12 = vmor %vm15499_vm3, %vm6270_vm0  ;;  %v8103_v4 = vrot.slane %v8075_v60, 2  ;;  %vm15964_vm3 = vcmask 1044484  }
 0x595   : > { %v8452_v44 = vpack.c.b16 %v8442_v26, %v8442_v26  ;;  %v8803_v46 = vsel %vm15514_vm12, %v11962_v5, %v11963_v59  ;;  %v8104_v26 = vrot.slane %v8075_v60, 4  ;;  %vm15965_vm13 = vmmov %vm15953_vm5 }
 0x597   : > { %v8467_v34 = vsel %vm15428_vm8, %v8452_v44, %v8466_v23  ;;  %v8105_v23 = vrot.slane %v8075_v60, 6  ;;  %v8066_v44 = vpop.f32.mrf.mxu3 }
 0x598   : > { %8468 = vst [vmem:[#allocation4 + $0xc] sm:$0x7] %v8467_v34  ;;  %v11964_v34 = vrot.slane %v8776_v45, 9 }
 0x599   : > { %v8268_v19 = vsel %vm5175_vm1, %v8105_v23, -inf }
 0x59f   : > { %v8496_v9 = vld [vmem:[#allocation4 + $0xc] sm:$0x7] }
 0x5a0   : > { %v8504_v62 = vrot.slane %v8496_v9, 2  ;;  %v8758_v39 = vld [vmem:[#allocation4 + $0xc] sm:$0x6] }
 0x5a1   : > { %v8766_v31 = vrot.slane %v8758_v39, 2  ;;  %v8475_v58 = vld [vmem:[#allocation4 + $0xc] sm:$0x3] }
 0x5a2   : > { %v8526_v43 = vsel %vm5175_vm1, %v8496_v9, %v8504_v62  ;;  %v8527_v50 = vsel %vm15953_vm5, %v8496_v9, %v8504_v62  ;;  %v11965_v9 = vrot.slane %v8778_v1, 9  ;;  %v11966_v62 = vrot.slane %v8783_v16, 9  ;;  %v8911_v56 = vld [vmem:[#allocation4 + $0xc] sm:$0x3] }
 0x5a3   : > { %v8529_v10 = vrot.slane %v8527_v50, 2  ;;  %v8576_v42 = vshrl.u32 %v8526_v43, 16  ;;  %v8579_v37 = vshll.u32 %v8526_v43, 16  ;;  %v8790_v63 = vsel %vm5175_vm1, %v8758_v39, %v8766_v31 }
 0x5a4   : > { %v8792_v53 = vsel %vm15962_vm10, %v8758_v39, %v8766_v31  ;;  %v8076_v43 = vadd.f32 %v8066_v44, %v7903_v28  ;;  %v11967_v50 = vrot.slane %v8785_v36, 9  ;;  %v8807_v47 = vsel %vm15514_vm12, %v11964_v34, %v11965_v9  ;;  %v8909_v36 = vld [vmem:[#allocation4 + $0x4] sm:$0x3]  ;;  %vm15967_vm10 = vmmov %vm15953_vm5 }
 0x5a5   : > { %v8578_v22 = vrot.slane %v8576_v42, 6  ;;  %v8581_v3 = vrot.slane %v8579_v37, 7  ;;  %v8585_v30 = vshll.u32 %v8529_v10, 16  ;;  %v11968_v10 = vrot.slane %v8790_v63, 9  ;;  %v8910_v63 = vld [vmem:[#allocation4 + $0x8] sm:$0x3] }
 0x5a6   : > { %v11969_v42 = vrot.slane %v8792_v53, 9  ;;  %v8241_v37 = vsel %vm5175_vm1, %v8075_v60, -inf  ;;  %v8811_v0 = vsel %vm15514_vm12, %v11966_v62, %v11967_v50 }
 0x5a7   : > { %v8582_v33 = vor.u32 %v8581_v3, %v8578_v22  ;;  %v8587_v12 = vrot.slane %v8585_v30, 7  ;;  %v8106_v22 = vrot.slane %v8076_v43, 2  ;;  %v8107_v3 = vrot.slane %v8076_v43, 4 }
 0x5a8   : > { %v8108_v30 = vrot.slane %v8076_v43, 6  ;;  %v8815_v39 = vsel %vm15514_vm12, %v11968_v10, %v11969_v42 }
 0x5a9   : > { %v8583_v6 = vrot.slane %v8582_v33, 2  ;;  %v8242_v33 = vsel %vm5175_vm1, %v8076_v43, -inf  ;;  %v8251_v8 = vsel %vm5175_vm1, %v8106_v22, -inf  ;;  %v8260_v15 = vsel %vm5175_vm1, %v8107_v3, -inf }
 0x5aa   : > { %v8269_v38 = vsel %vm5175_vm1, %v8108_v30, -inf }
 0x5ab   : > { %v8588_v41 = vsel %vm14722_vm11, %v8583_v6, %v8587_v12  ;;  %v8250_v6 = vsel %vm5175_vm1, %v8103_v4, -inf  ;;  %v8259_v12 = vsel %vm5175_vm1, %v8104_v26, -inf }
 0x5ac   : > { %8615 = vst [vmem:[#allocation1 + $0x3] ss:$4 sm:$0xff] %v8588_v41  ;;  %v8243_v41 = vmax.f32 %v8241_v37, %v8242_v33  ;;  %v8252_v49 = vmax.f32 %v8250_v6, %v8251_v8  ;;  %v8261_v7 = vmax.f32 %v8259_v12, %v8260_v15  ;;  %v9006_v37 = vld [vmem:[#allocation4 + $0x4] sm:$0x7]  ;;  %v9007_v33 = vld [vmem:[#allocation4 + $0x8] sm:$0x7] }
 0x5ae   : > { %v8244_v35 = vrot.slane %v8243_v41, 4  ;;  %v8253_v18 = vrot.slane %v8252_v49, 4  ;;  %v8262_v13 = vrot.slane %v8261_v7, 4 }
 0x5b0   : > { %v8245_v11 = vmax.f32 %v8243_v41, %v8244_v35  ;;  %v8254_v61 = vmax.f32 %v8252_v49, %v8253_v18  ;;  %v8263_v5 = vmax.f32 %v8261_v7, %v8262_v13 }
 0x5b2   : > { %v8246_v52 = vrot.slane %v8245_v11, 2  ;;  %v8255_v17 = vrot.slane %v8254_v61, 2  ;;  %v8264_v55 = vrot.slane %v8263_v5, 2 }
 0x5b3   : > { %v15496_v20 = vld.sshfl [vmem:[#allocation1] sm:$0xff pattern:$0x73625140] }
 0x5b4   : > { %8681 = vst [vmem:[#allocation1] ss:$4 sm:$0xff] %v8472_v32  ;;  %v8270_v32 = vmax.f32 %v8268_v19, %v8269_v38  ;;  %v8247_v31 = vmax.f32 %v8245_v11, %v8246_v52  ;;  %v8256_v60 = vmax.f32 %v8254_v61, %v8255_v17  ;;  %v8265_v51 = vmax.f32 %v8263_v5, %v8264_v55  ;;  %v8469_v52 = vld [vmem:[#allocation4 + $0x10] sm:$0x7] }
 0x5b5   : > { %8684 = vst [vmem:[#allocation1 + $0x1] ss:$4 sm:$0xff] %v8473_v48  ;;  %v9015_v38 = vrot.slane %v9007_v33, 2 }
 0x5b6   : > { %8687 = vst [vmem:[#allocation1 + $0x2] ss:$4 sm:$0xff] %v8474_v14  ;;  %v8271_v54 = vrot.slane %v8270_v32, 4  ;;  %v8248_v14 = vrot.slane %v8247_v31, 1  ;;  %v8257_v1 = vrot.slane %v8256_v60, 1  ;;  %v8266_v16 = vrot.slane %v8265_v51, 1 }
 0x5b7   : > { %8690 = vst [vmem:[#allocation1 + $0x3] ss:$4 sm:$0xff] %v8475_v58  ;;  %v9026_v13 = vsel %vm5175_vm1, %v9007_v33, %v9015_v38  ;;  %v9027_v2 = vsel %vm15953_vm5, %v9007_v33, %v9015_v38 }
 0x5b8   : > { %v8272_v48 = vmax.f32 %v8270_v32, %v8271_v54  ;;  %v8249_v45 = vmax.f32 %v8247_v31, %v8248_v14  ;;  %v8258_v53 = vmax.f32 %v8256_v60, %v8257_v1  ;;  %v8267_v28 = vmax.f32 %v8265_v51, %v8266_v16  ;;  %v12718_v14 = vld [vmem:[#allocation9 + $0x4b8] sm:$0xff]  ;;  %v12725_v1 = vld [vmem:[#allocation9 + $0x4f0] sm:$0xff] }
 0x5b9   : > { %v9055_v17 = vshrl.u32 %v9026_v13, 16  ;;  %v9058_v51 = vshll.u32 %v9026_v13, 16  ;;  %8741 = vmatpush.bf16.msrb.mxu2 %v12718_v14  ;;  %v12717_v16 = vld [vmem:[#allocation9 + $0x4b0] sm:$0xff] }
 0x5ba   : > { %v8273_v59 = vrot.slane %v8272_v48, 2  ;;  %v8291_v4 = vadd.f32 %v15417_v27, %v8249_v45  ;;  %v8292_v26 = vadd.f32 %v15417_v27, %v8258_v53  ;;  %v8293_v23 = vadd.f32 %v15417_v27, %v8267_v28  ;;  %v12761_v45 = vld [vmem:[#allocation9 + $0x610] sm:$0xff] }
 0x5bb   : > { %9423 = vmatpush.bf16.msrb.mxu0 %v12761_v45  ;;  %v9057_v28 = vrot.slane %v9055_v17, 6 }
 0x5bc   : > { %v8274_v58 = vmax.f32 %v8272_v48, %v8273_v59  ;;  %vm8307_vm0 = vcmp.gt.f32.partialorder %v8291_v4, 0.0  ;;  %v8323_v34 = vmul.f32 0.01, %v8291_v4  ;;  %vm8308_vm9 = vcmp.gt.f32.partialorder %v8292_v26, 0.0  ;;  %v12726_v59 = vld [vmem:[#allocation9 + $0x4f8] sm:$0xff] }
 0x5bd   : > { %vm8309_vm6 = vcmp.gt.f32.partialorder %v8293_v23, 0.0  ;;  %v8324_v9 = vmul.f32 0.01, %v8292_v26  ;;  %v8325_v62 = vmul.f32 0.01, %v8293_v23  ;;  %8666 = vmatpush.bf16.msrb.mxu1 %v12726_v59  ;;  %8742 = vmatpush.bf16.msrb.mxu2 %v12717_v16 }
 0x5be   : > { %v15530_v21 = vld.sshfl [vmem:[#allocation1] sm:$0xff pattern:$0x73625140]  ;;  %v8275_v40 = vrot.slane %v8274_v58, 1  ;;  %v8339_v50 = vsel %vm8307_vm0, %v8291_v4, %v8323_v34  ;;  %v9060_v4 = vrot.slane %v9058_v51, 7  ;;  %v12724_v34 = vld [vmem:[#allocation9 + $0x4e8] sm:$0xff]  ;;  %vm15968_vm0 = vmmov %vm15953_vm5 }
 0x5bf   : > { %8833 = vst [vmem:[#allocation1] ss:$4 sm:$0xff] %v8803_v46  ;;  %v8340_v10 = vsel %vm8308_vm9, %v8292_v26, %v8324_v9  ;;  %v8386_v42 = vpack.c.bf16 %v8339_v50, %v8339_v50  ;;  %v8341_v22 = vsel %vm8309_vm6, %v8293_v23, %v8325_v62  ;;  %v12716_v9 = vld [vmem:[#allocation9 + $0x4a8] sm:$0xff]  ;;  %vm15969_vm9 = vmmov %vm15968_vm0 }
 0x5c0   : > { %8836 = vst [vmem:[#allocation1 + $0x1] ss:$4 sm:$0xff] %v8807_v47  ;;  %v8276_v46 = vmax.f32 %v8274_v58, %v8275_v40  ;;  %v8387_v30 = vpack.c.bf16 %v8340_v10, %v8340_v10  ;;  %v8388_v6 = vpack.c.bf16 %v8341_v22, %v8341_v22  ;;  %v9014_v47 = vrot.slane %v9006_v37, 2  ;;  %v12734_v40 = vld [vmem:[#allocation9 + $0x538] sm:$0xff]  ;;  %vm15970_vm6 = vmmov %vm15968_vm0 }
 0x5c1   : > { %8839 = vst [vmem:[#allocation1 + $0x2] ss:$4 sm:$0xff] %v8811_v0  ;;  %v8418_v19 = vunpack.c.l.b16 %v8386_v42  ;;  %8893 = vmatpush.bf16.msrb.mxu3 %v12734_v40  ;;  %8667 = vmatpush.bf16.msrb.mxu1 %v12725_v1 }
 0x5c2   : > { %8842 = vst [vmem:[#allocation1 + $0x3] ss:$4 sm:$0xff] %v8815_v39  ;;  %v8294_v44 = vadd.f32 %v15417_v27, %v8276_v46  ;;  %v9008_v27 = vld [vmem:[#allocation4 + $0xc] sm:$0x7]  ;;  %v8419_v41 = vunpack.c.l.b16 %v8387_v30  ;;  %v8420_v8 = vunpack.c.l.b16 %v8388_v6  ;;  %v9020_v11 = vsel %vm5175_vm1, %v9006_v37, %v9014_v47  ;;  %v12733_v46 = vld [vmem:[#allocation9 + $0x530] sm:$0xff]  ;;  %v12723_v6 = vld [vmem:[#allocation9 + $0x4e0] sm:$0xff]  ;;  %8743 = vmatpush.bf16.msrb.mxu2 %v12716_v9 }
 0x5c3   : > { %v8443_v35 = vrot.slane %v8418_v19, 7  ;;  %v9016_v7 = vrot.slane %v9008_v27, 2  ;;  %v9042_v48 = vshrl.u32 %v9020_v11, 16  ;;  %v9045_v31 = vshll.u32 %v9020_v11, 16  ;;  %v12712_v9 = vld [vmem:[#allocation9 + $0x488] sm:$0xff] }
 0x5c4   : > { %vm8310_vm4 = vcmp.gt.f32.partialorder %v8294_v44, 0.0  ;;  %v8326_v43 = vmul.f32 0.01, %v8294_v44  ;;  %v8444_v49 = vrot.slane %v8419_v41, 6  ;;  %v8446_v32 = vrot.slane %v8420_v8, 5  ;;  %v12760_v8 = vld [vmem:[#allocation9 + $0x608] sm:$0xff] }
 0x5c5   : > { %v9032_v61 = vsel %vm5175_vm1, %v9008_v27, %v9016_v7  ;;  %v9021_v60 = vsel %vm15965_vm13, %v9006_v37, %v9014_v47  ;;  %8894 = vmatpush.bf16.msrb.mxu3 %v12733_v46  ;;  %v12732_v37 = vld [vmem:[#allocation9 + $0x528] sm:$0xff]  ;;  %8668 = vmatpush.bf16.msrb.mxu1 %v12724_v34  ;;  %v12729_v46 = vld [vmem:[#allocation9 + $0x510] sm:$0xff]  ;;  %vm15974_vm13 = vmmov %vm15968_vm0 }
 0x5c6   : > { %v8342_v3 = vsel %vm8310_vm4, %v8294_v44, %v8326_v43  ;;  %v8445_v0 = vsel %vm6258_vm2, %v8444_v49, %v8443_v35  ;;  %v9068_v58 = vshrl.u32 %v9032_v61, 16  ;;  %v9023_v53 = vrot.slane %v9021_v60, 2  ;;  %9424 = vmatpush.bf16.msrb.mxu0 %v12760_v8  ;;  %v12730_v60 = vld [vmem:[#allocation9 + $0x518] sm:$0xff]  ;;  %v12720_v34 = vld [vmem:[#allocation9 + $0x4c8] sm:$0xff]  ;;  %vm15971_vm4 = vmmov %vm15968_vm0 }
 0x5c7   : > { %v8389_v12 = vpack.c.bf16 %v8342_v3, %v8342_v3  ;;  %v8447_v18 = vsel %vm15963_vm14, %v8446_v32, %v8445_v0  ;;  %v9029_v43 = vrot.slane %v9027_v2, 2  ;;  %v9061_v3 = vor.u32 %v9060_v4, %v9057_v28  ;;  %v9187_v0 = vld [vmem:[#allocation4 + $0x4] sm:$0x6]  ;;  %v12750_v8 = vld [vmem:[#allocation9 + $0x5b8] sm:$0xff]  ;;  %vm15972_vm14 = vmmov %vm15968_vm0 }
 0x5c8   : > { %v9070_v23 = vrot.slane %v9068_v58, 6  ;;  %v9051_v22 = vshll.u32 %v9023_v53, 16  ;;  %v9195_v51 = vrot.slane %v9187_v0, 2 }
 0x5c9   : > { %v15539_v29 = vld.sshfl [vmem:[#allocation1] sm:$0xff pattern:$0x73625140]  ;;  %v8421_v15 = vunpack.c.l.b16 %v8389_v12  ;;  %v12715_v12 = vld [vmem:[#allocation9 + $0x4a0] sm:$0xff]  ;;  %8895 = vmatpush.bf16.msrb.mxu3 %v12732_v37  ;;  %8669 = vmatpush.bf16.msrb.mxu1 %v12723_v6 }
 0x5ca   : > { %8936 = vst [vmem:[#allocation1 + $0x2] ss:$4 sm:$0xff] %v8911_v56  ;;  %v9071_v56 = vshll.u32 %v9032_v61, 16  ;;  %v9053_v32 = vrot.slane %v9051_v22, 7  ;;  %8744 = vmatpush.bf16.msrb.mxu2 %v12715_v12  ;;  %v12728_v22 = vld [vmem:[#allocation9 + $0x508] sm:$0xff]  ;;  %v12719_v12 = vld [vmem:[#allocation9 + $0x4c0] sm:$0xff] }
 0x5cb   : > { %8930 = vst [vmem:[#allocation1] ss:$4 sm:$0xff] %v8909_v36  ;;  %v8448_v39 = vrot.slane %v8421_v15, 4  ;;  %v9044_v36 = vrot.slane %v9042_v48, 6 }
 0x5cc   : > { %8933 = vst [vmem:[#allocation1 + $0x1] ss:$4 sm:$0xff] %v8910_v63  ;;  %v9047_v63 = vrot.slane %v9045_v31, 7  ;;  %v9073_v44 = vrot.slane %v9071_v56, 7  ;;  %v9188_v31 = vld [vmem:[#allocation4 + $0x8] sm:$0x6] }
 0x5cd   : > { %v8449_v54 = vsel %vm15964_vm3, %v8448_v39, %v8447_v18  ;;  %v9062_v39 = vrot.slane %v9061_v3, 2  ;;  %v12722_v18 = vld [vmem:[#allocation9 + $0x4d8] sm:$0xff]  ;;  %v9189_v56 = vld [vmem:[#allocation4 + $0xc] sm:$0x6]  ;;  %v9196_v53 = vrot.slane %v9188_v31, 2  ;;  %vm15973_vm3 = vmmov %vm15968_vm0 }
 0x5ce   : > { %v8453_v5 = vpack.c.b16 %v8449_v54, %v8449_v54  ;;  %v9048_v62 = vor.u32 %v9047_v63, %v9044_v36  ;;  %v9074_v30 = vor.u32 %v9073_v44, %v9070_v23  ;;  %8670 = vmatpush.bf16.msrb.mxu1 %v12722_v18  ;;  %v12721_v36 = vld [vmem:[#allocation9 + $0x4d0] sm:$0xff]  ;;  %v9197_v2 = vrot.slane %v9189_v56, 2 }
 0x5cf   : > { %v12713_v63 = vld [vmem:[#allocation9 + $0x490] sm:$0xff]  ;;  %v9201_v23 = vsel %vm5175_vm1, %v9187_v0, %v9195_v51  ;;  %v9203_v44 = vsel %vm15969_vm9, %v9187_v0, %v9195_v51  ;;  %v12758_v0 = vld [vmem:[#allocation9 + $0x5f8] sm:$0xff]  ;;  %v12756_v51 = vld [vmem:[#allocation9 + $0x5e8] sm:$0xff] }
 0x5d0   : > { %v8470_v55 = vsel %vm15428_vm8, %v8453_v5, %v8469_v52  ;;  %vm15966_vm8 = vmmov %vm15953_vm5  ;;  %v9049_v19 = vrot.slane %v9048_v62, 2  ;;  %v9075_v11 = vrot.slane %v9074_v30, 2  ;;  %v12714_v5 = vld [vmem:[#allocation9 + $0x498] sm:$0xff]  ;;  %v9208_v62 = vsel %vm5175_vm1, %v9188_v31, %v9196_v53  ;;  %v12741_v18 = vld [vmem:[#allocation9 + $0x570] sm:$0xff] }
 0x5d1   : > { %8471 = vst [vmem:[#allocation4 + $0x10] sm:$0x7] %v8470_v55  ;;  %v9033_v26 = vsel %vm15966_vm8, %v9008_v27, %v9016_v7  ;;  %v9064_v27 = vshll.u32 %v9029_v43, 16  ;;  %v12731_v7 = vld [vmem:[#allocation9 + $0x520] sm:$0xff]  ;;  %8745 = vmatpush.bf16.msrb.mxu2 %v12714_v5  ;;  %v9210_v43 = vsel %vm15970_vm6, %v9188_v31, %v9196_v53  ;;  %v12066_v3 = vrot.slane %v9201_v23, 9  ;;  %v12757_v5 = vld [vmem:[#allocation9 + $0x5f0] sm:$0xff]  ;;  %vm15975_vm5 = vmmov %vm15968_vm0 }
 0x5d2   : > { %v9035_v50 = vrot.slane %v9033_v26, 2  ;;  %v9054_v17 = vsel %vm14722_vm11, %v9049_v19, %v9053_v32  ;;  %8896 = vmatpush.bf16.msrb.mxu3 %v12731_v7  ;;  %8671 = vmatpush.bf16.msrb.mxu1 %v12721_v36  ;;  %v12067_v30 = vrot.slane %v9203_v44, 9  ;;  %v12069_v6 = vrot.slane %v9210_v43, 9  ;;  %v12711_v19 = vld [vmem:[#allocation9 + $0x480] sm:$0xff]  ;;  %v9434_v7 = vld [vmem:[#allocation4 + $0x8] sm:$0x7]  ;;  %vm15976_vm8 = vmmov %vm15968_vm0 }
 0x5d3   : > { %v9066_v48 = vrot.slane %v9064_v27, 7  ;;  %v12740_v31 = vld [vmem:[#allocation9 + $0x568] sm:$0xff]  ;;  %vm15978_vm9 = vmmov %vm15968_vm0 }
 0x5d4   : > { %v9077_v15 = vshll.u32 %v9035_v50, 16  ;;  %v9215_v50 = vsel %vm5175_vm1, %v9189_v56, %v9197_v2 }
 0x5d5   : > { %v9067_v58 = vsel %vm14722_vm11, %v9062_v39, %v9066_v48  ;;  %8746 = vmatpush.bf16.msrb.mxu2 %v12713_v63  ;;  %v12070_v27 = vrot.slane %v9215_v50, 9 }
 0x5d6   : > { %v9079_v55 = vrot.slane %v9077_v15, 7  ;;  %8897 = vmatpush.bf16.msrb.mxu3 %v12730_v60  ;;  %8672 = vmatpush.bf16.msrb.mxu1 %v12720_v34 }
 0x5d8   : > { %v8912_v10 = vld [vmem:[#allocation4 + $0x10] sm:$0x3]  ;;  %v9080_v1 = vsel %vm14722_vm11, %v9075_v11, %v9079_v55  ;;  %v9435_v11 = vld [vmem:[#allocation4 + $0xc] sm:$0x7] }
 0x5d9   : > { %v9009_v42 = vld [vmem:[#allocation4 + $0x10] sm:$0x7]  ;;  %8939 = vst [vmem:[#allocation1 + $0x3] ss:$4 sm:$0xff] %v8912_v10  ;;  %v9217_v10 = vsel %vm15971_vm4, %v9189_v56, %v9197_v2  ;;  %8747 = vmatpush.bf16.msrb.mxu2 %v12712_v9  ;;  %v12739_v56 = vld [vmem:[#allocation9 + $0x560] sm:$0xff] }
 0x5da   : > { %v9017_v33 = vrot.slane %v9009_v42, 2  ;;  %v9190_v61 = vld [vmem:[#allocation4 + $0x10] sm:$0x6]  ;;  %8898 = vmatpush.bf16.msrb.mxu3 %v12729_v46  ;;  %8673 = vmatpush.bf16.msrb.mxu1 %v12719_v12  ;;  %v9340_v12 = vld [vmem:[#allocation4 + $0x14] sm:$0x3] }
 0x5db   : > { %v9198_v45 = vrot.slane %v9190_v61, 2  ;;  %v9339_v63 = vld [vmem:[#allocation4 + $0x10] sm:$0x3] }
 0x5dc   : > { %v9038_v41 = vsel %vm5175_vm1, %v9009_v42, %v9017_v33  ;;  %v9039_v47 = vsel %vm15967_vm10, %v9009_v42, %v9017_v33  ;;  %v12068_v33 = vrot.slane %v9208_v62, 9  ;;  %vm15977_vm10 = vmmov %vm15968_vm0 }
 0x5dd   : > { %v9041_v38 = vrot.slane %v9039_v47, 2  ;;  %v9081_v35 = vshrl.u32 %v9038_v41, 16  ;;  %v9084_v49 = vshll.u32 %v9038_v41, 16  ;;  %v9222_v4 = vsel %vm5175_vm1, %v9190_v61, %v9198_v45  ;;  %v12742_v47 = vld [vmem:[#allocation9 + $0x578] sm:$0xff]  ;;  %8748 = vmatpush.bf16.msrb.mxu2 %v12711_v19  ;;  %8674 = vmatmul.bf16.vlgmr.msrb.gmra.mxu1 %v15496_v20  ;;  %v9337_v20 = vld [vmem:[#allocation4 + $0x8] sm:$0x3] }
 0x5de   : > { %v9224_v26 = vsel %vm15968_vm0, %v9190_v61, %v9198_v45  ;;  %v12072_v42 = vrot.slane %v9222_v4, 9  ;;  %v12071_v41 = vrot.slane %v9217_v10, 9  ;;  %8899 = vmatpush.bf16.msrb.mxu3 %v12728_v22  ;;  %v9234_v32 = vsel %vm15514_vm12, %v12068_v33, %v12069_v6  ;;  %8990 = vmatpush.bf16.msra.mxu1 %v12742_v47  ;;  %v12747_v45 = vld [vmem:[#allocation9 + $0x5a0] sm:$0xff]  ;;  %v12738_v4 = vld [vmem:[#allocation9 + $0x558] sm:$0xff]  ;;  %v12745_v33 = vld [vmem:[#allocation9 + $0x590] sm:$0xff] }
 0x5df   : > { %v9083_v13 = vrot.slane %v9081_v35, 6  ;;  %v9086_v54 = vrot.slane %v9084_v49, 7  ;;  %v9090_v52 = vshll.u32 %v9041_v38, 16  ;;  %v12073_v37 = vrot.slane %v9224_v26, 9  ;;  %v12727_v35 = vld [vmem:[#allocation9 + $0x500] sm:$0xff]  ;;  %v12746_v26 = vld [vmem:[#allocation9 + $0x598] sm:$0xff] }
 0x5e0   : > { %v15560_v59 = vld.sshfl [vmem:[#allocation1] sm:$0xff pattern:$0x73625140]  ;;  %v9230_v49 = vsel %vm15514_vm12, %v12066_v3, %v12067_v30  ;;  %v9238_v39 = vsel %vm15514_vm12, %v12070_v27, %v12071_v41  ;;  %8749 = vmatmul.bf16.vlgmr.msrb.gmra.mxu2 %v15530_v21  ;;  %v9443_v61 = vrot.slane %v9435_v11, 2 }
 0x5e1   : > { %v9087_v14 = vor.u32 %v9086_v54, %v9083_v13  ;;  %9111 = vst [vmem:[#allocation1] ss:$4 sm:$0xff] %v9054_v17  ;;  %v9092_v40 = vrot.slane %v9090_v52, 7  ;;  %v9242_v38 = vsel %vm15514_vm12, %v12072_v42, %v12073_v37  ;;  %9171 = vmatpush.bf16.msra.mxu2 %v12750_v8  ;;  %v12749_v13 = vld [vmem:[#allocation9 + $0x5b0] sm:$0xff]  ;;  %v9442_v54 = vrot.slane %v9434_v7, 2  ;;  %v12748_v17 = vld [vmem:[#allocation9 + $0x5a8] sm:$0xff] }
 0x5e2   : > { %9114 = vst [vmem:[#allocation1 + $0x1] ss:$4 sm:$0xff] %v9067_v58  ;;  %v9436_v52 = vld [vmem:[#allocation4 + $0x10] sm:$0x7]  ;;  %8900 = vmatpush.bf16.msrb.mxu3 %v12727_v35  ;;  %8991 = vmatpush.bf16.msra.mxu1 %v12741_v18  ;;  %v9454_v60 = vsel %vm5175_vm1, %v9435_v11, %v9443_v61  ;;  %v9455_v34 = vsel %vm15973_vm3, %v9435_v11, %v9443_v61  ;;  %v12754_v37 = vld [vmem:[#allocation9 + $0x5d8] sm:$0xff]  ;;  %v12736_v35 = vld [vmem:[#allocation9 + $0x548] sm:$0xff] }
 0x5e3   : > { %v9088_v16 = vrot.slane %v9087_v14, 2  ;;  %9117 = vst [vmem:[#allocation1 + $0x2] ss:$4 sm:$0xff] %v9080_v1  ;;  %v9444_v48 = vrot.slane %v9436_v52, 2  ;;  %v9448_v55 = vsel %vm5175_vm1, %v9434_v7, %v9442_v54  ;;  %v12759_v14 = vld [vmem:[#allocation9 + $0x600] sm:$0xff]  ;;  %v9483_v36 = vshrl.u32 %v9454_v60, 16 }
 0x5e4   : > { %9425 = vmatpush.bf16.msrb.mxu0 %v12759_v14  ;;  %v9470_v21 = vshrl.u32 %v9448_v55, 16  ;;  %v9473_v1 = vshll.u32 %v9448_v55, 16  ;;  %v9449_v46 = vsel %vm15972_vm14, %v9434_v7, %v9442_v54  ;;  %v9457_v22 = vrot.slane %v9455_v34, 2  ;;  %v12737_v30 = vld [vmem:[#allocation9 + $0x550] sm:$0xff]  ;;  %v12752_v11 = vld [vmem:[#allocation9 + $0x5c8] sm:$0xff]  ;;  %v12735_v54 = vld [vmem:[#allocation9 + $0x540] sm:$0xff] }
 0x5e5   : > { %v9093_v28 = vsel %vm14722_vm11, %v9088_v16, %v9092_v40  ;;  %9172 = vmatpush.bf16.msra.mxu2 %v12749_v13  ;;  %8901 = vmatmul.bf16.vlgmr.msrb.gmra.mxu3 %v15539_v29  ;;  %v9460_v58 = vsel %vm5175_vm1, %v9436_v52, %v9444_v48  ;;  %v9338_v16 = vld [vmem:[#allocation4 + $0xc] sm:$0x3]  ;;  %v9486_v29 = vshll.u32 %v9454_v60, 16  ;;  %v9461_v9 = vsel %vm15974_vm13, %v9436_v52, %v9444_v48  ;;  %v12753_v47 = vld [vmem:[#allocation9 + $0x5d0] sm:$0xff]  ;;  %v12774_v52 = vld [vmem:[#allocation9 + $0x678] sm:$0xff] }
 0x5e6   : > { %9120 = vst [vmem:[#allocation1 + $0x3] ss:$4 sm:$0xff] %v9093_v28  ;;  %9320 = vmatpush.bf16.msra.mxu3 %v12758_v0  ;;  %8992 = vmatpush.bf16.msra.mxu1 %v12740_v31  ;;  %v9496_v53 = vshrl.u32 %v9460_v58, 16  ;;  %v9499_v2 = vshll.u32 %v9460_v58, 16  ;;  %v12755_v28 = vld [vmem:[#allocation9 + $0x5e0] sm:$0xff]  ;;  %v9472_v23 = vrot.slane %v9470_v21, 6 }
 0x5e7   : > { %v9475_v44 = vrot.slane %v9473_v1, 7  ;;  %v9485_v62 = vrot.slane %v9483_v36, 6  ;;  %v9488_v43 = vrot.slane %v9486_v29, 7  ;;  %v9451_v50 = vrot.slane %v9449_v46, 2  ;;  %v12743_v61 = vld [vmem:[#allocation9 + $0x580] sm:$0xff]  ;;  %v12773_v58 = vld [vmem:[#allocation9 + $0x670] sm:$0xff] }
 0x5e8   : > { %v9498_v10 = vrot.slane %v9496_v53, 6  ;;  %v9501_v42 = vrot.slane %v9499_v2, 7  ;;  %v9463_v3 = vrot.slane %v9461_v9, 2  ;;  %v9492_v8 = vshll.u32 %v9457_v22, 16  ;;  %v9437_v31 = vld [vmem:[#allocation4 + $0x14] sm:$0x7] }
 0x5e9   : > { %9173 = vmatpush.bf16.msra.mxu2 %v12748_v17  ;;  %v9476_v6 = vor.u32 %v9475_v44, %v9472_v23  ;;  %v9489_v19 = vor.u32 %v9488_v43, %v9485_v62  ;;  %v9479_v27 = vshll.u32 %v9451_v50, 16  ;;  %v9445_v55 = vrot.slane %v9437_v31, 2  ;;  %v9615_v36 = vld [vmem:[#allocation4 + $0x8] sm:$0x6]  ;;  %v9616_v2 = vld [vmem:[#allocation4 + $0xc] sm:$0x6] }
 0x5ea   : > { %9321 = vmatpush.bf16.msra.mxu3 %v12757_v5  ;;  %8993 = vmatpush.bf16.msra.mxu1 %v12739_v56  ;;  %v9502_v41 = vor.u32 %v9501_v42, %v9498_v10  ;;  %v9494_v18 = vrot.slane %v9492_v8, 7  ;;  %v12782_v5 = vld [vmem:[#allocation9 + $0x6b8] sm:$0xff]  ;;  %v12781_v56 = vld [vmem:[#allocation9 + $0x6b0] sm:$0xff]  ;;  %v9623_v34 = vrot.slane %v9615_v36, 2  ;;  %v9624_v9 = vrot.slane %v9616_v2, 2  ;;  %v12771_v43 = vld [vmem:[#allocation9 + $0x660] sm:$0xff] }
 0x5eb   : > { %v9477_v7 = vrot.slane %v9476_v6, 2  ;;  %v9481_v0 = vrot.slane %v9479_v27, 7  ;;  %v9467_v21 = vsel %vm15975_vm5, %v9437_v31, %v9445_v55  ;;  %v9617_v46 = vld [vmem:[#allocation4 + $0x10] sm:$0x6]  ;;  %v12779_v50 = vld [vmem:[#allocation9 + $0x6a0] sm:$0xff]  ;;  %vm9961_vm3 = vcmask 1042433  }
 0x5ec   : > { %v9629_v42 = vsel %vm5175_vm1, %v9615_v36, %v9623_v34  ;;  %v9636_v22 = vsel %vm5175_vm1, %v9616_v2, %v9624_v9  ;;  %vm15981_vm13 = vcmask 1043459  }
 0x5ed   : > { %v15576_v15 = vld.sshfl [vmem:[#allocation1] sm:$0xff pattern:$0x73625140]  ;;  %9174 = vmatpush.bf16.msra.mxu2 %v12747_v45  ;;  %v9482_v17 = vsel %vm14722_vm11, %v9477_v7, %v9481_v0  ;;  %v9469_v45 = vrot.slane %v9467_v21, 2 }
 0x5ee   : > { %9269 = vst [vmem:[#allocation1 + $0x3] ss:$4 sm:$0xff] %v9242_v38  ;;  %9322 = vmatpush.bf16.msra.mxu3 %v12756_v51  ;;  %8994 = vmatpush.bf16.msra.mxu1 %v12738_v4  ;;  %v9505_v38 = vshll.u32 %v9463_v3, 16  ;;  %v12751_v51 = vld [vmem:[#allocation9 + $0x5c0] sm:$0xff]  ;;  %v12772_v4 = vld [vmem:[#allocation9 + $0x668] sm:$0xff]  ;;  %v9638_v3 = vsel %vm15977_vm10, %v9616_v2, %v9624_v9  ;;  %v12769_v7 = vld [vmem:[#allocation9 + $0x650] sm:$0xff] }
 0x5ef   : > { %9260 = vst [vmem:[#allocation1] ss:$4 sm:$0xff] %v9230_v49  ;;  %v12744_v49 = vld [vmem:[#allocation9 + $0x588] sm:$0xff]  ;;  %v9518_v53 = vshll.u32 %v9469_v45, 16  ;;  %vm9984_vm10 = vsmask.f32 5396 }
 0x5f0   : > { %9263 = vst [vmem:[#allocation1 + $0x1] ss:$4 sm:$0xff] %v9234_v32  ;;  %v9490_v32 = vrot.slane %v9489_v19, 2  ;;  %v9507_v13 = vrot.slane %v9505_v38, 7  ;;  %v12170_v19 = vrot.slane %v9629_v42, 9 }
 0x5f1   : > { %9266 = vst [vmem:[#allocation1 + $0x2] ss:$4 sm:$0xff] %v9238_v39  ;;  %9175 = vmatpush.bf16.msra.mxu2 %v12746_v26  ;;  %v9503_v39 = vrot.slane %v9502_v41, 2  ;;  %v12780_v26 = vld [vmem:[#allocation9 + $0x6a8] sm:$0xff]  ;;  %v9520_v44 = vrot.slane %v9518_v53, 7  ;;  %v12172_v41 = vrot.slane %v9636_v22, 9 }
 0x5f2   : > { %9323 = vmatpush.bf16.msra.mxu3 %v12755_v28  ;;  %8995 = vmatpush.bf16.msra.mxu1 %v12737_v30  ;;  %v9495_v14 = vsel %vm14722_vm11, %v9490_v32, %v9494_v18  ;;  %v9618_v28 = vld [vmem:[#allocation4 + $0x14] sm:$0x6] }
 0x5f3   : > { %v9508_v60 = vsel %vm14722_vm11, %v9503_v39, %v9507_v13  ;;  %v9626_v62 = vrot.slane %v9618_v28, 2  ;;  %v12777_v32 = vld [vmem:[#allocation9 + $0x690] sm:$0xff] }
 0x5f5   : > { %9176 = vmatpush.bf16.msra.mxu2 %v12745_v33  ;;  %v9652_v30 = vsel %vm15968_vm0, %v9618_v28, %v9626_v62  ;;  %vm15982_vm0 = vcmask 1040384  }
 0x5f6   : > { %9324 = vmatpush.bf16.msra.mxu3 %v12754_v37  ;;  %8996 = vmatpush.bf16.msra.mxu1 %v12736_v35  ;;  %v9631_v37 = vsel %vm15976_vm8, %v9615_v36, %v9623_v34  ;;  %v12177_v38 = vrot.slane %v9652_v30, 9 }
 0x5f7   : > { %v12171_v27 = vrot.slane %v9631_v37, 9 }
 0x5f8   : > { %v15592_v40 = vld.sshfl [vmem:[#allocation1] sm:$0xff pattern:$0x73625140] }
 0x5f9   : > { %9358 = vst [vmem:[#allocation1] ss:$4 sm:$0xff] %v9337_v20  ;;  %9177 = vmatpush.bf16.msra.mxu2 %v12744_v49  ;;  %v9466_v20 = vsel %vm5175_vm1, %v9437_v31, %v9445_v55  ;;  %v9658_v39 = vsel %vm15514_vm12, %v12170_v19, %v12171_v27 }
 0x5fa   : > { %9361 = vst [vmem:[#allocation1 + $0x1] ss:$4 sm:$0xff] %v9338_v16  ;;  %9325 = vmatpush.bf16.msra.mxu3 %v12753_v47  ;;  %8997 = vmatpush.bf16.msra.mxu1 %v12735_v54  ;;  %v9509_v1 = vshrl.u32 %v9466_v20, 16  ;;  %v9512_v16 = vshll.u32 %v9466_v20, 16  ;;  %v12173_v47 = vrot.slane %v9638_v3, 9  ;;  %v12768_v54 = vld [vmem:[#allocation9 + $0x648] sm:$0xff] }
 0x5fb   : > { %9364 = vst [vmem:[#allocation1 + $0x2] ss:$4 sm:$0xff] %v9339_v63 }
 0x5fc   : > { %9367 = vst [vmem:[#allocation1 + $0x3] ss:$4 sm:$0xff] %v9340_v12  ;;  %v9511_v29 = vrot.slane %v9509_v1, 6  ;;  %v9514_v63 = vrot.slane %v9512_v16, 7  ;;  %v12778_v12 = vld [vmem:[#allocation9 + $0x698] sm:$0xff] }
 0x5fd   : > { %9178 = vmatpush.bf16.msra.mxu2 %v12743_v61  ;;  %8998 = vmatmul.bf16.vlgmr.msra.gmra.mxu1 %v15560_v59  ;;  %v12767_v61 = vld [vmem:[#allocation9 + $0x640] sm:$0xff] }
 0x5fe   : > { %9326 = vmatpush.bf16.msra.mxu3 %v12752_v11  ;;  %9599 = vmatpush.bf16.msrb.mxu1 %v12774_v52  ;;  %v9515_v23 = vor.u32 %v9514_v63, %v9511_v29  ;;  %v9662_v11 = vsel %vm15514_vm12, %v12172_v41, %v12173_v47  ;;  %v12776_v52 = vld [vmem:[#allocation9 + $0x688] sm:$0xff] }
 0x600   : > { %9179 = vmatmul.bf16.vlgmr.msra.gmra.mxu2 %v15576_v15  ;;  %v9516_v59 = vrot.slane %v9515_v23, 2  ;;  %v9625_v15 = vrot.slane %v9617_v46, 2 }
 0x601   : > { %9748 = vmatpush.bf16.msrb.mxu2 %v12782_v5  ;;  %v12775_v5 = vld [vmem:[#allocation9 + $0x680] sm:$0xff] }
 0x602   : > { %9327 = vmatpush.bf16.msra.mxu3 %v12751_v51  ;;  %9600 = vmatpush.bf16.msrb.mxu1 %v12773_v58  ;;  %v9521_v10 = vsel %vm14722_vm11, %v9516_v59, %v9520_v44  ;;  %v9643_v33 = vsel %vm5175_vm1, %v9617_v46, %v9625_v15  ;;  %v9645_v6 = vsel %vm15978_vm9, %v9617_v46, %v9625_v15  ;;  %vm9842_vm11 = vcmask 1041409   ;;  %vm9985_vm9 = vmor %vm13287_vm15, %vm9984_vm10 }
 0x603   : > { %v9368_v48 = vld.sshfl [vmem:[#allocation1] sm:$0xff pattern:$0x73625140]  ;;  %v12174_v35 = vrot.slane %v9643_v33, 9  ;;  %v12175_v49 = vrot.slane %v9645_v6, 9  ;;  %vm15989_vm10 = vcmask 1043459  }
 0x604   : > { %9426 = vmatmul.bf16.vlgmr.msrb.gmra.mxu0 %v9368_v48  ;;  %9539 = vst [vmem:[#allocation1] ss:$4 sm:$0xff] %v9482_v17 }
 0x605   : > { %9542 = vst [vmem:[#allocation1 + $0x1] ss:$4 sm:$0xff] %v9495_v14  ;;  %9749 = vmatpush.bf16.msrb.mxu2 %v12781_v56  ;;  %9328 = vmatmul.bf16.vlgmr.msra.gmra.mxu3 %v15592_v40  ;;  %v9650_v40 = vsel %vm5175_vm1, %v9618_v28, %v9626_v62  ;;  %v9666_v13 = vsel %vm15514_vm12, %v12174_v35, %v12175_v49 }
 0x606   : > { %9545 = vst [vmem:[#allocation1 + $0x2] ss:$4 sm:$0xff] %v9508_v60  ;;  %9601 = vmatpush.bf16.msrb.mxu1 %v12772_v4  ;;  %v12176_v8 = vrot.slane %v9650_v40, 9 }
 0x607   : > { %9548 = vst [vmem:[#allocation1 + $0x3] ss:$4 sm:$0xff] %v9521_v10 }
 0x608   : > { %v9670_v18 = vsel %vm15514_vm12, %v12176_v8, %v12177_v38  ;;  %vm9843_vm12 = vsmask.f32 7942 }
 0x609   : > { %9750 = vmatpush.bf16.msrb.mxu2 %v12780_v26  ;;  %vm15639_vm6 = vmand %vm9842_vm11, %vm9843_vm12  ;;  %vm9986_vm12 = vsmask.f32 6424 }
 0x60a   : > { %9602 = vmatpush.bf16.msrb.mxu1 %v12771_v43 }
 0x60d   : > { %9751 = vmatpush.bf16.msrb.mxu2 %v12779_v50 }
 0x60e   : > { %9603 = vmatpush.bf16.msrb.mxu1 %v12770_v25  ;;  %v9549_v0 = vld.sshfl [vmem:[#allocation1] sm:$0xff pattern:$0x73625140] }
 0x60f   : > { %9688 = vst [vmem:[#allocation1] ss:$4 sm:$0xff] %v9658_v39 }
 0x610   : > { %9691 = vst [vmem:[#allocation1 + $0x1] ss:$4 sm:$0xff] %v9662_v11 }
 0x611   : > { %9752 = vmatpush.bf16.msrb.mxu2 %v12778_v12  ;;  %9694 = vst [vmem:[#allocation1 + $0x2] ss:$4 sm:$0xff] %v9666_v13 }
 0x612   : > { %9604 = vmatpush.bf16.msrb.mxu1 %v12769_v7  ;;  %9697 = vst [vmem:[#allocation1 + $0x3] ss:$4 sm:$0xff] %v9670_v18 }
 0x615   : > { %9753 = vmatpush.bf16.msrb.mxu2 %v12777_v32 }
 0x616   : > { %9605 = vmatpush.bf16.msrb.mxu1 %v12768_v54 }
 0x619   : > { %9754 = vmatpush.bf16.msrb.mxu2 %v12776_v52  ;;  %v9698_v48 = vld.sshfl [vmem:[#allocation1] sm:$0xff pattern:$0x73625140] }
 0x61a   : > { %9606 = vmatpush.bf16.msrb.mxu1 %v12767_v61  ;;  %v15634_v61 = vld [vmem:[#allocation11 + $0x2] ss:$0 sm:$0xff] }
 0x61d   : > { %9755 = vmatpush.bf16.msrb.mxu2 %v12775_v5  ;;  %9607 = vmatmul.bf16.vlgmr.msrb.gmra.mxu1 %v9549_v0  ;;  %v12798_v5 = vld [vmem:[#allocation9 + $0x738] sm:$0xff] }
 0x61e   : > { %10077 = vmatpush.bf16.msrb.mxu3 %v12798_v5 }
 0x620   : > { %9756 = vmatmul.bf16.vlgmr.msrb.gmra.mxu2 %v9698_v48 }
 0x65a   : > { %v8675_v31 = vpop.f32.mrf.mxu1 }
 0x662   : > { %v8677_v24 = vpop.f32.mrf.mxu1 }
 0x663   : > { %v8750_v17 = vpop.f32.mrf.mxu2 }
 0x664   : > { %v8751_v21 = vadd.f32 %v8750_v17, %v8675_v31 }
 0x668   : > { %v8902_v55 = vpop.f32.mrf.mxu3 }
 0x669   : > { %v8907_v58 = vadd.f32 %v8902_v55, %v8751_v21  ;;  %v12790_v55 = vld [vmem:[#allocation9 + $0x6f8] sm:$0xff] }
 0x66a   : > { %10145 = vmatpush.bf16.msra.mxu0 %v12790_v55 }
 0x66b   : > { %v8752_v14 = vpop.f32.mrf.mxu2 }
 0x66c   : > { %v8753_v16 = vadd.f32 %v8752_v14, %v8677_v24  ;;  %v12797_v14 = vld [vmem:[#allocation9 + $0x730] sm:$0xff] }
 0x66d   : > { %10078 = vmatpush.bf16.msrb.mxu3 %v12797_v14  ;;  %v12792_v14 = vld [vmem:[#allocation9 + $0x708] sm:$0xff] }
 0x670   : > { %v8904_v51 = vpop.f32.mrf.mxu3 }
 0x671   : > { %v8908_v63 = vadd.f32 %v8904_v51, %v8753_v16 }
 0x67a   : > { %v8999_v60 = vpop.f32.mrf.mxu1 }
 0x67b   : > { %v9004_v1 = vadd.f32 %v8999_v60, %v8907_v58  ;;  %v12789_v58 = vld [vmem:[#allocation9 + $0x6f0] sm:$0xff] }
 0x67c   : > { %10146 = vmatpush.bf16.msra.mxu0 %v12789_v58 }
 0x681   : > { %v9427_v29 = vpop.f32.mrf.mxu0 }
 0x682   : > { %v9001_v56 = vpop.f32.mrf.mxu1 }
 0x683   : > { %v9180_v20 = vpop.f32.mrf.mxu2  ;;  %v9005_v46 = vadd.f32 %v9001_v56, %v8908_v63  ;;  %v12806_v56 = vld [vmem:[#allocation9 + $0x778] sm:$0xff] }
 0x684   : > { %v9185_v36 = vadd.f32 %v9180_v20, %v9004_v1  ;;  %v9836_v63 = vld [vmem:[#allocation5 + $0x2] sm:$0x1]  ;;  %10237 = vmatpush.bf16.msra.mxu1 %v12806_v56 }
 0x688   : > { %v9329_v45 = vpop.f32.mrf.mxu3 }
 0x689   : > { %v9334_v2 = vadd.f32 %v9329_v45, %v9185_v36  ;;  %v9429_v59 = vpop.f32.mrf.mxu0 }
 0x68b   : > { %v9182_v53 = vpop.f32.mrf.mxu2  ;;  %v9432_v4 = vadd.f32 %v9427_v29, %v9334_v2  ;;  %v12796_v29 = vld [vmem:[#allocation9 + $0x728] sm:$0xff] }
 0x68c   : > { %v9186_v23 = vadd.f32 %v9182_v53, %v9005_v46  ;;  %v12788_v2 = vld [vmem:[#allocation9 + $0x6e8] sm:$0xff]  ;;  %v9837_v46 = vsel %vm13268_vm7, 0, %v9836_v63  ;;  %10079 = vmatpush.bf16.msrb.mxu3 %v12796_v29  ;;  %v12819_v53 = vld [vmem:[#allocation9 + $0x7e0] sm:$0xff] }
 0x68d   : > { %9838 = vst [vmem:[#allocation5 + $0x2] sm:$0x1] %v9837_v46  ;;  %10147 = vmatpush.bf16.msra.mxu0 %v12788_v2  ;;  %v12804_v46 = vld [vmem:[#allocation9 + $0x768] sm:$0xff] }
 0x690   : > { %v9331_v26 = vpop.f32.mrf.mxu3 }
 0x691   : > { %v9335_v34 = vadd.f32 %v9331_v26, %v9186_v23 }
 0x693   : > { %v9433_v10 = vadd.f32 %v9429_v59, %v9335_v34 }
 0x69a   : > { %v9608_v28 = vpop.f32.mrf.mxu1 }
 0x69b   : > { %v9613_v44 = vadd.f32 %v9608_v28, %v9432_v4  ;;  %v12805_v28 = vld [vmem:[#allocation9 + $0x770] sm:$0xff]  ;;  %v9845_v4 = vld [vmem:[#allocation5 + $0x2] sm:$0x2] }
 0x69c   : > { %v9846_v59 = vsel %vm15639_vm6, 0, %v9845_v4  ;;  %10238 = vmatpush.bf16.msra.mxu1 %v12805_v28  ;;  %v12784_v28 = vld [vmem:[#allocation9 + $0x6c8] sm:$0xff]  ;;  %v12814_v4 = vld [vmem:[#allocation9 + $0x7b8] sm:$0xff] }
 0x69d   : > { %9847 = vst [vmem:[#allocation5 + $0x2] sm:$0x2] %v9846_v59  ;;  %10324 = vmatpush.bf16.msra.mxu2 %v12814_v4  ;;  %v12817_v4 = vld [vmem:[#allocation9 + $0x7d0] sm:$0xff] }
 0x6a0   : > { %10239 = vmatpush.bf16.msra.mxu1 %v12804_v46  ;;  %v10158_v46 = vld [vmem:[#allocation5] sm:$0x2] }
 0x6a2   : > { %v9610_v42 = vpop.f32.mrf.mxu1 }
 0x6a3   : > { %v9757_v9 = vpop.f32.mrf.mxu2  ;;  %v9614_v6 = vadd.f32 %v9610_v42, %v9433_v10 }
 0x6a4   : > { %v9762_v62 = vadd.f32 %v9757_v9, %v9613_v44  ;;  %v9940_v44 = vld [vmem:[#allocation5] sm:$0x3]  ;;  %v9915_v59 = vld [vmem:[#allocation5 + $0x2] sm:$0x3] }
 0x6a6   : > { %v9766_v15 = vrot.slane %v9762_v62, 2  ;;  %v9767_v43 = vrot.slane %v9762_v62, 4  ;;  %v9768_v50 = vrot.slane %v9762_v62, 6  ;;  %v9778_v37 = vsel %vm5175_vm1, %v9762_v62, -inf }
 0x6a8   : > { %v9779_v22 = vsel %vm5175_vm1, %v9767_v43, -inf  ;;  %v9787_v3 = vsel %vm5175_vm1, %v9766_v15, -inf  ;;  %v9788_v40 = vsel %vm5175_vm1, %v9768_v50, -inf }
 0x6a9   : > { %v9780_v30 = vmax.f32 %v9778_v37, %v9779_v22  ;;  %v9789_v33 = vmax.f32 %v9787_v3, %v9788_v40  ;;  %v12795_v37 = vld [vmem:[#allocation9 + $0x720] sm:$0xff]  ;;  %v9944_v22 = vrot.slane %v9940_v44, 1  ;;  %v9945_v3 = vrot.slane %v9940_v44, 2 }
 0x6aa   : > { %v9946_v40 = vrot.slane %v9940_v44, 3  ;;  %10080 = vmatpush.bf16.msrb.mxu3 %v12795_v37 }
 0x6ab   : > { %v9781_v25 = vrot.slane %v9780_v30, 4  ;;  %v9790_v12 = vrot.slane %v9789_v33, 4  ;;  %v9759_v19 = vpop.f32.mrf.mxu2 }
 0x6ac   : > { %v9763_v27 = vadd.f32 %v9759_v19, %v9614_v6 }
 0x6ad   : > { %v9782_v41 = vmax.f32 %v9780_v30, %v9781_v25  ;;  %v9791_v47 = vmax.f32 %v9789_v33, %v9790_v12  ;;  %v12787_v30 = vld [vmem:[#allocation9 + $0x6e0] sm:$0xff] }
 0x6ae   : > { %v9769_v8 = vrot.slane %v9763_v27, 2  ;;  %v9770_v38 = vrot.slane %v9763_v27, 4  ;;  %v9771_v35 = vrot.slane %v9763_v27, 6  ;;  %v9796_v32 = vsel %vm5175_vm1, %v9763_v27, -inf  ;;  %10148 = vmatpush.bf16.msra.mxu0 %v12787_v30 }
 0x6af   : > { %v9783_v49 = vrot.slane %v9782_v41, 2  ;;  %v9792_v7 = vrot.slane %v9791_v47, 2 }
 0x6b0   : > { %v9797_v0 = vsel %vm5175_vm1, %v9770_v38, -inf  ;;  %v9805_v39 = vsel %vm5175_vm1, %v9769_v8, -inf  ;;  %v9806_v11 = vsel %vm5175_vm1, %v9771_v35, -inf  ;;  %v12794_v8 = vld [vmem:[#allocation9 + $0x718] sm:$0xff]  ;;  %v9959_v38 = vsel %vm9842_vm11, %v9940_v44, %v9944_v22 }
 0x6b1   : > { %v9784_v18 = vmax.f32 %v9782_v41, %v9783_v49  ;;  %v9793_v13 = vmax.f32 %v9791_v47, %v9792_v7  ;;  %v9798_v54 = vmax.f32 %v9796_v32, %v9797_v0  ;;  %v9807_v52 = vmax.f32 %v9805_v39, %v9806_v11  ;;  %v12786_v35 = vld [vmem:[#allocation9 + $0x6d8] sm:$0xff]  ;;  %10081 = vmatpush.bf16.msrb.mxu3 %v12794_v8  ;;  %v12793_v39 = vld [vmem:[#allocation9 + $0x710] sm:$0xff] }
 0x6b2   : > { %v9960_v49 = vsel %vm15981_vm13, %v9945_v3, %v9946_v40  ;;  %10149 = vmatpush.bf16.msra.mxu0 %v12786_v35  ;;  %vm9913_vm13 = vsmask.f32 1282 }
 0x6b3   : > { %v9785_v48 = vrot.slane %v9784_v18, 1  ;;  %v9794_v31 = vrot.slane %v9793_v13, 1  ;;  %v9799_v17 = vrot.slane %v9798_v54, 4  ;;  %v9808_v24 = vrot.slane %v9807_v52, 4 }
 0x6b4   : > { %v9962_v11 = vsel %vm9961_vm3, %v9959_v38, %v9960_v49  ;;  %v12801_v49 = vld [vmem:[#allocation9 + $0x750] sm:$0xff] }
 0x6b5   : > { %v9786_v60 = vmax.f32 %v9784_v18, %v9785_v48  ;;  %v9795_v51 = vmax.f32 %v9793_v13, %v9794_v31  ;;  %v9800_v20 = vmax.f32 %v9798_v54, %v9799_v17  ;;  %v9809_v21 = vmax.f32 %v9807_v52, %v9808_v24  ;;  %v12785_v54 = vld [vmem:[#allocation9 + $0x6d0] sm:$0xff]  ;;  %10082 = vmatpush.bf16.msrb.mxu3 %v12793_v39 }
 0x6b6   : > { %v9953_v52 = vsel %vm15982_vm0, %v9940_v44, %v9944_v22  ;;  %v9964_v17 = vrot.slane %v9962_v11, 1  ;;  %10150 = vmatpush.bf16.msra.mxu0 %v12785_v54  ;;  %v9848_v54 = vld [vmem:[#allocation5 + $0x4] sm:$0x2]  ;;  %v12815_v44 = vld [vmem:[#allocation9 + $0x7c0] sm:$0xff] }
 0x6b7   : > { %v9816_v45 = vadd.f32 %v15634_v61, %v9786_v60  ;;  %v9817_v1 = vadd.f32 %v15634_v61, %v9795_v51  ;;  %v9801_v16 = vrot.slane %v9800_v20, 2  ;;  %v9810_v36 = vrot.slane %v9809_v21, 2 }
 0x6b8   : > { %v9849_v48 = vsel %vm15639_vm6, 0, %v9848_v54 }
 0x6b9   : > { %vm9820_vm4 = vcmp.gt.f32.partialorder %v9816_v45, 0.0  ;;  %vm9821_vm14 = vcmp.gt.f32.partialorder %v9817_v1, 0.0  ;;  %v9824_v26 = vmul.f32 0.01, %v9816_v45  ;;  %v9825_v23 = vmul.f32 0.01, %v9817_v1  ;;  %10083 = vmatpush.bf16.msrb.mxu3 %v12792_v14 }
 0x6ba   : > { %v9802_v34 = vmax.f32 %v9800_v20, %v9801_v16  ;;  %v9811_v9 = vmax.f32 %v9809_v21, %v9810_v36  ;;  %v9995_v16 = vshll.u32 %v9964_v17, 16  ;;  %v12791_v36 = vld [vmem:[#allocation9 + $0x700] sm:$0xff]  ;;  %10151 = vmatpush.bf16.msra.mxu0 %v12784_v28  ;;  %v12800_v17 = vld [vmem:[#allocation9 + $0x748] sm:$0xff]  ;;  %9850 = vst [vmem:[#allocation5 + $0x4] sm:$0x2] %v9849_v48 }
 0x6bb   : > { %v9828_v62 = vsel %vm9820_vm4, %v9816_v45, %v9824_v26  ;;  %v9829_v15 = vsel %vm9821_vm14, %v9817_v1, %v9825_v23  ;;  %vm9987_vm4 = vmor %vm9985_vm9, %vm9986_vm12  ;;  %vm9988_vm14 = vsmask.f32 7452  ;;  %v12807_v28 = vld [vmem:[#allocation9 + $0x780] sm:$0xff]  ;;  %v12844_v48 = vld [vmem:[#allocation9 + $0x8a8] sm:$0xff] }
 0x6bc   : > { %v9851_v43 = vpack.c.bf16 %v9828_v62, %v9828_v62  ;;  %v9852_v50 = vpack.c.bf16 %v9829_v15, %v9829_v15  ;;  %v9803_v10 = vrot.slane %v9802_v34, 1  ;;  %v9812_v42 = vrot.slane %v9811_v9, 1  ;;  %vm15661_vm15 = vmor %vm9987_vm4, %vm9988_vm14  ;;  %v12803_v62 = vld [vmem:[#allocation9 + $0x760] sm:$0xff]  ;;  %v12813_v15 = vld [vmem:[#allocation9 + $0x7b0] sm:$0xff] }
 0x6bd   : > { %10084 = vmatpush.bf16.msrb.mxu3 %v12791_v36  ;;  %10240 = vmatpush.bf16.msra.mxu1 %v12803_v62  ;;  %v12808_v36 = vld [vmem:[#allocation9 + $0x788] sm:$0xff]  ;;  %vm15992_vm9 = vmmov %vm15982_vm0 }
 0x6be   : > { %v9859_v33 = vrot.slane %v9851_v43, 2  ;;  %v9860_v6 = vrot.slane %v9852_v50, 2  ;;  %v9804_v25 = vmax.f32 %v9802_v34, %v9803_v10  ;;  %v9813_v12 = vmax.f32 %v9811_v9, %v9812_v42  ;;  %v12783_v34 = vld [vmem:[#allocation9 + $0x6c0] sm:$0xff]  ;;  %10325 = vmatpush.bf16.msra.mxu2 %v12813_v15  ;;  %vm15995_vm14 = vmmov %vm15982_vm0 }
 0x6bf   : > { %10152 = vmatpush.bf16.msra.mxu0 %v12783_v34  ;;  %v12816_v34 = vld [vmem:[#allocation9 + $0x7c8] sm:$0xff]  ;;  %v12827_v15 = vld [vmem:[#allocation9 + $0x820] sm:$0xff] }
 0x6c0   : > { %v9865_v19 = vsel %vm5175_vm1, %v9851_v43, %v9859_v33  ;;  %v9868_v27 = vsel %vm5175_vm1, %v9852_v50, %v9860_v6  ;;  %v9818_v41 = vadd.f32 %v15634_v61, %v9804_v25  ;;  %v9819_v47 = vadd.f32 %v15634_v61, %v9813_v12 }
 0x6c1   : > { %9879 = vst [vmem:[#allocation1 + $0x10] ss:$2 sm:$0xff] %v9868_v27  ;;  %v9956_v61 = vsel %vm6258_vm2, %v9945_v3, %v9946_v40  ;;  %v12802_v27 = vld [vmem:[#allocation9 + $0x758] sm:$0xff] }
 0x6c2   : > { %9875 = vst [vmem:[#allocation1] ss:$2 sm:$0xff] %v9865_v19  ;;  %vm9822_vm5 = vcmp.gt.f32.partialorder %v9818_v41, 0.0  ;;  %vm9823_vm8 = vcmp.gt.f32.partialorder %v9819_v47, 0.0  ;;  %v9826_v7 = vmul.f32 0.01, %v9818_v41  ;;  %v9957_v60 = vsel %vm5175_vm1, %v9953_v52, %v9956_v61  ;;  %10241 = vmatpush.bf16.msra.mxu1 %v12802_v27 }
 0x6c3   : > { %v9827_v32 = vmul.f32 0.01, %v9819_v47  ;;  %v9990_v1 = vshrl.u32 %v9957_v60, 16  ;;  %v12830_v60 = vld [vmem:[#allocation9 + $0x838] sm:$0xff]  ;;  %v12836_v27 = vld [vmem:[#allocation9 + $0x868] sm:$0xff] }
 0x6c4   : > { %v9830_v0 = vsel %vm9822_vm5, %v9818_v41, %v9826_v7  ;;  %vm15669_vm5 = vmand %vm5175_vm1, %vm9913_vm13  ;;  %v12812_v41 = vld [vmem:[#allocation9 + $0x7a8] sm:$0xff]  ;;  %v12811_v7 = vld [vmem:[#allocation9 + $0x7a0] sm:$0xff]  ;;  %10552 = vmatpush.bf16.msrb.mxu0 %v12830_v60 }
 0x6c5   : > { %v9831_v18 = vsel %vm9823_vm8, %v9819_v47, %v9827_v32  ;;  %v9853_v13 = vpack.c.bf16 %v9830_v0, %v9830_v0  ;;  %v9997_v23 = vsel %vm15661_vm15, %v9990_v1, %v9995_v16  ;;  %vm15988_vm8 = vmmov %vm15982_vm0  ;;  %v12822_v47 = vld [vmem:[#allocation9 + $0x7f8] sm:$0xff]  ;;  %10326 = vmatpush.bf16.msra.mxu2 %v12812_v41  ;;  %v12823_v60 = vld [vmem:[#allocation9 + $0x800] sm:$0xff] }
 0x6c6   : > { %v9854_v5 = vpack.c.bf16 %v9831_v18, %v9831_v18  ;;  %10459 = vmatpush.bf16.msra.mxu3 %v12822_v47  ;;  %v12821_v18 = vld [vmem:[#allocation9 + $0x7f0] sm:$0xff]  ;;  %10242 = vmatpush.bf16.msra.mxu1 %v12801_v49  ;;  %v12846_v41 = vld [vmem:[#allocation9 + $0x8b8] sm:$0xff] }
 0x6c7   : > { %v9861_v31 = vrot.slane %v9853_v13, 2  ;;  %v12845_v49 = vld [vmem:[#allocation9 + $0x8b0] sm:$0xff] }
 0x6c8   : > { %v9880_v24 = vld.sshfl [vmem:[#allocation1 + $0x10] sm:$0xff pattern:$0x75643120]  ;;  %v9862_v55 = vrot.slane %v9854_v5, 2 }
 0x6c9   : > { %v9891_v51 = vunpack.c.l.b16 %v9880_v24  ;;  %v9871_v20 = vsel %vm5175_vm1, %v9853_v13, %v9861_v31  ;;  %v9876_v21 = vld.sshfl [vmem:[#allocation1] sm:$0xff pattern:$0x75643120]  ;;  %v9839_v13 = vld [vmem:[#allocation5 + $0x4] sm:$0x1]  ;;  %10327 = vmatpush.bf16.msra.mxu2 %v12811_v7 }
 0x6ca   : > { %v9874_v58 = vsel %vm5175_vm1, %v9854_v5, %v9862_v55  ;;  %9883 = vst [vmem:[#allocation1 + $0x20] ss:$2 sm:$0xff] %v9871_v20  ;;  %v9890_v56 = vunpack.c.l.b16 %v9876_v21  ;;  %v9840_v5 = vsel %vm13268_vm7, 0, %v9839_v13  ;;  %v12810_v24 = vld [vmem:[#allocation9 + $0x798] sm:$0xff]  ;;  %10460 = vmatpush.bf16.msra.mxu3 %v12821_v18  ;;  %v12820_v55 = vld [vmem:[#allocation9 + $0x7e8] sm:$0xff]  ;;  %10243 = vmatpush.bf16.msra.mxu1 %v12800_v17  ;;  %v12809_v20 = vld [vmem:[#allocation9 + $0x790] sm:$0xff] }
 0x6cb   : > { %v9895_v45 = vrot.slane %v9891_v51, 6  ;;  %9887 = vst [vmem:[#allocation1 + $0x30] ss:$2 sm:$0xff] %v9874_v58  ;;  %v12799_v51 = vld [vmem:[#allocation9 + $0x740] sm:$0xff]  ;;  %v12829_v21 = vld [vmem:[#allocation9 + $0x830] sm:$0xff]  ;;  %vm15990_vm7 = vmmov %vm15989_vm10 }
 0x6cc   : > { %v9894_v29 = vrot.slane %v9890_v56, 7  ;;  %9841 = vst [vmem:[#allocation5 + $0x4] sm:$0x1] %v9840_v5  ;;  %10553 = vmatpush.bf16.msrb.mxu0 %v12829_v21  ;;  %vm15991_vm6 = vmmov %vm15990_vm7  ;;  %v12834_v5 = vld [vmem:[#allocation9 + $0x858] sm:$0xff]  ;;  %v12853_v21 = vld [vmem:[#allocation9 + $0x8f0] sm:$0xff] }
 0x6cd   : > { %10328 = vmatpush.bf16.msra.mxu2 %v12810_v24  ;;  %vm15993_vm12 = vmmov %vm15991_vm6 }
 0x6ce   : > { %v9896_v2 = vsel %vm6258_vm2, %v9895_v45, %v9894_v29  ;;  %10461 = vmatpush.bf16.msra.mxu3 %v12820_v55  ;;  %10244 = vmatpush.bf16.msra.mxu1 %v12799_v51  ;;  %v12818_v29 = vld [vmem:[#allocation9 + $0x7d8] sm:$0xff]  ;;  %vm15994_vm4 = vmmov %vm15991_vm6 }
 0x6cf   : > { %v9900_v26 = vpack.c.b16 %v9896_v2, %v9896_v2  ;;  %v12854_v55 = vld [vmem:[#allocation9 + $0x8f8] sm:$0xff] }
 0x6d1   : > { %v9902_v9 = vrot.slane %v9900_v26, 2  ;;  %v9884_v43 = vld.sshfl [vmem:[#allocation1 + $0x20] sm:$0xff pattern:$0x75643120]  ;;  %10329 = vmatpush.bf16.msra.mxu2 %v12809_v20  ;;  %v12843_v20 = vld [vmem:[#allocation9 + $0x8a0] sm:$0xff] }
 0x6d2   : > { %v9888_v50 = vld.sshfl [vmem:[#allocation1 + $0x30] sm:$0xff pattern:$0x75643120]  ;;  %v9892_v8 = vunpack.c.l.b16 %v9884_v43  ;;  %10462 = vmatpush.bf16.msra.mxu3 %v12819_v53 }
 0x6d3   : > { %v9906_v10 = vsel %vm5175_vm1, %v9900_v26, %v9902_v9  ;;  %10023 = vst [vmem:[#allocation1] ss:$9 sm:$0xff] %v9997_v23  ;;  %v9893_v38 = vunpack.c.l.b16 %v9888_v50  ;;  %v9918_v16 = vld [vmem:[#allocation5 + $0x4] sm:$0x3]  ;;  %v12828_v9 = vld [vmem:[#allocation9 + $0x828] sm:$0xff]  ;;  %v12837_v50 = vld [vmem:[#allocation9 + $0x870] sm:$0xff] }
 0x6d4   : > { %v9916_v42 = vsel %vm15669_vm5, %v9906_v10, %v9915_v59  ;;  %v9897_v32 = vrot.slane %v9892_v8, 7  ;;  %v12838_v59 = vld [vmem:[#allocation9 + $0x878] sm:$0xff]  ;;  %10554 = vmatpush.bf16.msrb.mxu0 %v12828_v9  ;;  %v12825_v8 = vld [vmem:[#allocation9 + $0x810] sm:$0xff]  ;;  %v12839_v9 = vld [vmem:[#allocation9 + $0x880] sm:$0xff] }
 0x6d5   : > { %9917 = vst [vmem:[#allocation5 + $0x2] sm:$0x3] %v9916_v42  ;;  %v9898_v0 = vrot.slane %v9893_v38, 6  ;;  %10330 = vmatpush.bf16.msra.mxu2 %v12808_v36  ;;  %10640 = vmatpush.bf16.msrb.mxu1 %v12838_v59  ;;  %v12835_v38 = vld [vmem:[#allocation9 + $0x860] sm:$0xff]  ;;  %v12842_v36 = vld [vmem:[#allocation9 + $0x898] sm:$0xff] }
 0x6d6   : > { %10463 = vmatpush.bf16.msra.mxu3 %v12818_v29  ;;  %v12831_v29 = vld [vmem:[#allocation9 + $0x840] sm:$0xff] }
 0x6d7   : > { %v9899_v52 = vsel %vm6258_vm2, %v9898_v0, %v9897_v32  ;;  %v12851_v59 = vld [vmem:[#allocation9 + $0x8e0] sm:$0xff] }
 0x6d8   : > { %v9901_v31 = vpack.c.b16 %v9899_v52, %v9899_v52  ;;  %10555 = vmatpush.bf16.msrb.mxu0 %v12827_v15 }
 0x6d9   : > { %10331 = vmatpush.bf16.msra.mxu2 %v12807_v28  ;;  %10641 = vmatpush.bf16.msrb.mxu1 %v12837_v50 }
 0x6da   : > { %v9903_v14 = vrot.slane %v9901_v31, 2  ;;  %10464 = vmatpush.bf16.msra.mxu3 %v12817_v4 }
 0x6dc   : > { %v9941_v37 = vld [vmem:[#allocation5 + $0x2] sm:$0x3]  ;;  %v9909_v56 = vsel %vm5175_vm1, %v9901_v31, %v9903_v14 }
 0x6dd   : > { %v9947_v22 = vrot.slane %v9941_v37, 1  ;;  %v9948_v3 = vrot.slane %v9941_v37, 2  ;;  %v9949_v40 = vrot.slane %v9941_v37, 3  ;;  %v9922_v45 = vld [vmem:[#allocation5 + $0x2] sm:$0x1]  ;;  %v9919_v2 = vsel %vm15669_vm5, %v9909_v56, %v9918_v16  ;;  %10642 = vmatpush.bf16.msrb.mxu1 %v12836_v27  ;;  %10775 = vmatpush.bf16.msrb.mxu2 %v12846_v41  ;;  %v12832_v16 = vld [vmem:[#allocation9 + $0x848] sm:$0xff] }
 0x6de   : > { %v10159_v1 = vld [vmem:[#allocation5 + $0x2] sm:$0x2]  ;;  %9920 = vst [vmem:[#allocation5 + $0x4] sm:$0x3] %v9919_v2  ;;  %10465 = vmatpush.bf16.msra.mxu3 %v12816_v34  ;;  %v10251_v32 = vld [vmem:[#allocation5 + $0x2] sm:$0x1] }
 0x6df   : > { %v9967_v30 = vsel %vm15988_vm8, %v9941_v37, %v9947_v22  ;;  %v9970_v33 = vsel %vm6258_vm2, %v9948_v3, %v9949_v40  ;;  %v9972_v6 = vsel %vm9842_vm11, %v9941_v37, %v9947_v22  ;;  %v9973_v25 = vsel %vm15989_vm10, %v9948_v3, %v9949_v40  ;;  %v10338_v23 = vld [vmem:[#allocation5 + $0x2] sm:$0x3]  ;;  %v12841_v2 = vld [vmem:[#allocation9 + $0x890] sm:$0xff]  ;;  %v12852_v34 = vld [vmem:[#allocation9 + $0x8e8] sm:$0xff] }
 0x6e0   : > { %v9971_v12 = vsel %vm5175_vm1, %v9967_v30, %v9970_v33  ;;  %v9974_v19 = vsel %vm9961_vm3, %v9972_v6, %v9973_v25  ;;  %v10342_v43 = vrot.slane %v10338_v23, 1  ;;  %v10343_v37 = vrot.slane %v10338_v23, 2  ;;  %v12849_v27 = vld [vmem:[#allocation9 + $0x8d0] sm:$0xff]  ;;  %v10568_v41 = vld [vmem:[#allocation5 + $0x6] sm:$0x1] }
 0x6e1   : > { %v9976_v35 = vrot.slane %v9974_v19, 1  ;;  %v9998_v39 = vshrl.u32 %v9971_v12, 16  ;;  %v10344_v22 = vrot.slane %v10338_v23, 3  ;;  %v12826_v19 = vld [vmem:[#allocation9 + $0x818] sm:$0xff]  ;;  %10643 = vmatpush.bf16.msrb.mxu1 %v12835_v38  ;;  %10776 = vmatpush.bf16.msrb.mxu2 %v12845_v49 }
 0x6e2   : > { %10466 = vmatpush.bf16.msra.mxu3 %v12815_v44  ;;  %v10355_v33 = vsel %vm9842_vm11, %v10338_v23, %v10342_v43  ;;  %10556 = vmatpush.bf16.msrb.mxu0 %v12826_v19 }
 0x6e3   : > { %v10003_v11 = vshll.u32 %v9976_v35, 16  ;;  %v10356_v6 = vsel %vm15990_vm7, %v10343_v37, %v10344_v22 }
 0x6e4   : > { %v10357_v47 = vsel %vm9961_vm3, %v10355_v33, %v10356_v6  ;;  %v12850_v33 = vld [vmem:[#allocation9 + $0x8d8] sm:$0xff] }
 0x6e5   : > { %v10005_v61 = vsel %vm15661_vm15, %v9998_v39, %v10003_v11  ;;  %v10339_v62 = vld [vmem:[#allocation5 + $0x4] sm:$0x3]  ;;  %v10350_v39 = vsel %vm15982_vm0, %v10338_v23, %v10342_v43  ;;  %v10353_v11 = vsel %vm6258_vm2, %v10343_v37, %v10344_v22  ;;  %v10359_v18 = vrot.slane %v10357_v47, 1  ;;  %10644 = vmatpush.bf16.msrb.mxu1 %v12834_v5  ;;  %10777 = vmatpush.bf16.msrb.mxu2 %v12844_v48  ;;  %v12840_v23 = vld [vmem:[#allocation9 + $0x888] sm:$0xff] }
 0x6e6   : > { %10026 = vst [vmem:[#allocation1 + $0x1] ss:$9 sm:$0xff] %v10005_v61  ;;  %v10345_v3 = vrot.slane %v10339_v62, 1  ;;  %v10346_v40 = vrot.slane %v10339_v62, 2  ;;  %v10347_v30 = vrot.slane %v10339_v62, 3  ;;  %10557 = vmatpush.bf16.msrb.mxu0 %v12825_v8  ;;  %v12824_v61 = vld [vmem:[#allocation9 + $0x808] sm:$0xff]  ;;  %v10354_v31 = vsel %vm5175_vm1, %v10350_v39, %v10353_v11 }
 0x6e7   : > { %v10252_v0 = vld [vmem:[#allocation5 + $0x4] sm:$0x1]  ;;  %v10377_v24 = vshll.u32 %v10359_v18, 16  ;;  %v10372_v51 = vshrl.u32 %v10354_v31, 16  ;;  %v10790_v31 = vld [vmem:[#allocation5 + $0x6] sm:$0x2] }
 0x6e8   : > { %v10367_v25 = vsel %vm9842_vm11, %v10339_v62, %v10345_v3  ;;  %v10368_v12 = vsel %vm15991_vm6, %v10346_v40, %v10347_v30  ;;  %v10362_v13 = vsel %vm15992_vm9, %v10339_v62, %v10345_v3  ;;  %v10365_v54 = vsel %vm6258_vm2, %v10346_v40, %v10347_v30  ;;  %v10654_v4 = vld [vmem:[#allocation5 + $0x4] sm:$0x3] }
 0x6e9   : > { %v10369_v35 = vsel %vm9961_vm3, %v10367_v25, %v10368_v12  ;;  %v10366_v17 = vsel %vm5175_vm1, %v10362_v13, %v10365_v54  ;;  %v10379_v56 = vsel %vm15661_vm15, %v10372_v51, %v10377_v24  ;;  %10778 = vmatpush.bf16.msrb.mxu2 %v12843_v20  ;;  %v10658_v62 = vrot.slane %v10654_v4, 1  ;;  %v10567_v8 = vld [vmem:[#allocation5 + $0x4] sm:$0x1]  ;;  %v12847_v54 = vld [vmem:[#allocation9 + $0x8c0] sm:$0xff]  ;;  %v10789_v24 = vld [vmem:[#allocation5 + $0x4] sm:$0x2] }
 0x6ea   : > { %v10371_v52 = vrot.slane %v10369_v35, 1  ;;  %10558 = vmatpush.bf16.msrb.mxu0 %v12824_v61  ;;  %v10380_v53 = vshrl.u32 %v10366_v17, 16  ;;  %v10660_v37 = vrot.slane %v10654_v4, 3 }
 0x6eb   : > { %v10671_v40 = vsel %vm9842_vm11, %v10654_v4, %v10658_v62 }
 0x6ec   : > { %v10385_v14 = vshll.u32 %v10371_v52, 16 }
 0x6ed   : > { %v10027_v58 = vld [vmem:[#allocation1] sm:$0xff]  ;;  %10779 = vmatpush.bf16.msrb.mxu2 %v12842_v36 }
 0x6ee   : > { %10085 = vmatmul.bf16.vlgmr.msrb.gmra.mxu3 %v10027_v58  ;;  %10091 = vst [vmem:[#allocation1] ss:$9 sm:$0xff] %v9921_v57  ;;  %v12833_v57 = vld [vmem:[#allocation9 + $0x850] sm:$0xff]  ;;  %10559 = vmatpush.bf16.msrb.mxu0 %v12823_v60 }
 0x6ef   : > { %10094 = vst [vmem:[#allocation1 + $0x1] ss:$9 sm:$0xff] %v9922_v45  ;;  %10868 = vmatpush.bf16.msrb.mxu3 %v12854_v55  ;;  %v10387_v45 = vsel %vm15661_vm15, %v10380_v53, %v10385_v14  ;;  %10645 = vmatpush.bf16.msrb.mxu1 %v12833_v57 }
 0x6f0   : > { %10165 = vst [vmem:[#allocation1 + $0x10] sm:$0xff] %v10159_v1  ;;  %v10474_v1 = vld [vmem:[#allocation5 + $0x4] sm:$0x2] }
 0x6f1   : > { %10780 = vmatpush.bf16.msrb.mxu2 %v12841_v2 }
 0x6f3   : > { %10869 = vmatpush.bf16.msrb.mxu3 %v12853_v21  ;;  %10646 = vmatpush.bf16.msrb.mxu1 %v12832_v16 }
 0x6f5   : > { %10781 = vmatpush.bf16.msrb.mxu2 %v12840_v23 }
 0x6f6   : > { %v10095_v26 = vld [vmem:[#allocation1] sm:$0xff] }
 0x6f7   : > { %10153 = vmatmul.bf16.vlgmr.msra.gmra.mxu0 %v10095_v26  ;;  %10161 = vst [vmem:[#allocation1] sm:$0xff] %v10158_v46  ;;  %v10167_v42 = vld [vmem:[#allocation1 + $0x11] ss:$2 sm:$0xff]  ;;  %v10473_v46 = vld [vmem:[#allocation5 + $0x2] sm:$0x2]  ;;  %10647 = vmatpush.bf16.msrb.mxu1 %v12831_v29 }
 0x6f8   : > { %v10655_v26 = vld [vmem:[#allocation5 + $0x6] sm:$0x3]  ;;  %10870 = vmatpush.bf16.msrb.mxu3 %v12852_v34 }
 0x6f9   : > { %v10661_v44 = vrot.slane %v10655_v26, 1  ;;  %v10662_v15 = vrot.slane %v10655_v26, 2  ;;  %v10663_v43 = vrot.slane %v10655_v26, 3  ;;  %10782 = vmatpush.bf16.msrb.mxu2 %v12839_v9 }
 0x6fb   : > { %v10683_v22 = vsel %vm9842_vm11, %v10655_v26, %v10661_v44  ;;  %v10684_v3 = vsel %vm15993_vm12, %v10662_v15, %v10663_v43  ;;  %v10678_v12 = vsel %vm15995_vm14, %v10655_v26, %v10661_v44  ;;  %v10681_v19 = vsel %vm6258_vm2, %v10662_v15, %v10663_v43  ;;  %vm15996_vm11 = vmmov %vm15982_vm0 }
 0x6fc   : > { %10871 = vmatpush.bf16.msrb.mxu3 %v12851_v59  ;;  %v10685_v6 = vsel %vm9961_vm3, %v10683_v22, %v10684_v3  ;;  %v10666_v35 = vsel %vm15996_vm11, %v10654_v4, %v10658_v62 }
 0x6fd   : > { %v10687_v38 = vrot.slane %v10685_v6, 1  ;;  %v10894_v6 = vld [vmem:[#allocation11 + $0x3] sm:$0x1] }
 0x6fe   : > { %v10163_v10 = vld [vmem:[#allocation1 + $0x1] ss:$2 sm:$0xff] }
 0x6ff   : > { %10184 = vst [vmem:[#allocation1] ss:$9 sm:$0xff] %v10163_v10  ;;  %v10701_v18 = vshll.u32 %v10687_v38, 16 }
 0x700   : > { %10186 = vst [vmem:[#allocation1 + $0x1] ss:$9 sm:$0xff] %v10167_v42  ;;  %v10659_v42 = vrot.slane %v10654_v4, 2  ;;  %10872 = vmatpush.bf16.msrb.mxu3 %v12850_v33 }
 0x702   : > { %v10672_v30 = vsel %vm15994_vm4, %v10659_v42, %v10660_v37  ;;  %v10669_v49 = vsel %vm6258_vm2, %v10659_v42, %v10660_v37 }
 0x703   : > { %v10673_v25 = vsel %vm9961_vm3, %v10671_v40, %v10672_v30  ;;  %v10670_v39 = vsel %vm5175_vm1, %v10666_v35, %v10669_v49 }
 0x704   : > { %10873 = vmatpush.bf16.msrb.mxu3 %v12849_v27  ;;  %v10688_v52 = vshrl.u32 %v10670_v39, 16 }
 0x707   : > { %v10187_v7 = vld [vmem:[#allocation1] sm:$0xff] }
 0x708   : > { %10245 = vmatmul.bf16.vlgmr.msra.gmra.mxu1 %v10187_v7  ;;  %10270 = vst [vmem:[#allocation1] ss:$9 sm:$0xff] %v10251_v32  ;;  %v10675_v7 = vrot.slane %v10673_v25, 1  ;;  %v10682_v32 = vsel %vm5175_vm1, %v10678_v12, %v10681_v19 }
 0x709   : > { %10273 = vst [vmem:[#allocation1 + $0x1] ss:$9 sm:$0xff] %v10252_v0  ;;  %v12848_v0 = vld [vmem:[#allocation9 + $0x8c8] sm:$0xff]  ;;  %v10696_v11 = vshrl.u32 %v10682_v32, 16 }
 0x70a   : > { %v10693_v13 = vshll.u32 %v10675_v7, 16  ;;  %10874 = vmatpush.bf16.msrb.mxu3 %v12848_v0 }
 0x70b   : > { %v10703_v61 = vsel %vm15661_vm15, %v10696_v11, %v10701_v18 }
 0x70c   : > { %v10695_v48 = vsel %vm15661_vm15, %v10688_v52, %v10693_v13 }
 0x70e   : > { %10875 = vmatpush.bf16.msrb.mxu3 %v12847_v54 }
 0x710   : > { %v10274_v58 = vld [vmem:[#allocation1] sm:$0xff] }
 0x711   : > { %10332 = vmatmul.bf16.vlgmr.msra.gmra.mxu2 %v10274_v58  ;;  %10405 = vst [vmem:[#allocation1] ss:$9 sm:$0xff] %v10379_v56 }
 0x712   : > { %10408 = vst [vmem:[#allocation1 + $0x1] ss:$9 sm:$0xff] %v10387_v45 }
 0x713   : > { %10480 = vst [vmem:[#allocation1 + $0x10] sm:$0xff] %v10474_v1 }
 0x719   : > { %v10409_v28 = vld [vmem:[#allocation1] sm:$0xff] }
 0x71a   : > { %10467 = vmatmul.bf16.vlgmr.msra.gmra.mxu3 %v10409_v28  ;;  %10476 = vst [vmem:[#allocation1] sm:$0xff] %v10473_v46  ;;  %v10482_v50 = vld [vmem:[#allocation1 + $0x11] ss:$2 sm:$0xff] }
 0x721   : > { %v10478_v10 = vld [vmem:[#allocation1 + $0x1] ss:$2 sm:$0xff] }
 0x722   : > { %10499 = vst [vmem:[#allocation1] ss:$9 sm:$0xff] %v10478_v10 }
 0x723   : > { %10501 = vst [vmem:[#allocation1 + $0x1] ss:$9 sm:$0xff] %v10482_v50 }
 0x72a   : > { %v10502_v47 = vld [vmem:[#allocation1] sm:$0xff] }
 0x72b   : > { %10560 = vmatmul.bf16.vlgmr.msrb.gmra.mxu0 %v10502_v47  ;;  %10586 = vst [vmem:[#allocation1] ss:$9 sm:$0xff] %v10567_v8 }
 0x72c   : > { %10589 = vst [vmem:[#allocation1 + $0x1] ss:$9 sm:$0xff] %v10568_v41 }
 0x733   : > { %v10590_v5 = vld [vmem:[#allocation1] sm:$0xff] }
 0x734   : > { %10648 = vmatmul.bf16.vlgmr.msrb.gmra.mxu1 %v10590_v5  ;;  %10721 = vst [vmem:[#allocation1] ss:$9 sm:$0xff] %v10695_v48 }
 0x735   : > { %10724 = vst [vmem:[#allocation1 + $0x1] ss:$9 sm:$0xff] %v10703_v61 }
 0x736   : > { %10796 = vst [vmem:[#allocation1 + $0x10] sm:$0xff] %v10790_v31 }
 0x73c   : > { %v10725_v17 = vld [vmem:[#allocation1] sm:$0xff] }
 0x73d   : > { %10783 = vmatmul.bf16.vlgmr.msrb.gmra.mxu2 %v10725_v17  ;;  %10792 = vst [vmem:[#allocation1] sm:$0xff] %v10789_v24  ;;  %v10798_v55 = vld [vmem:[#allocation1 + $0x11] ss:$2 sm:$0xff] }
 0x744   : > { %v10794_v14 = vld [vmem:[#allocation1 + $0x1] ss:$2 sm:$0xff] }
 0x745   : > { %10815 = vst [vmem:[#allocation1] ss:$9 sm:$0xff] %v10794_v14 }
 0x746   : > { %10817 = vst [vmem:[#allocation1 + $0x1] ss:$9 sm:$0xff] %v10798_v55 }
 0x74d   : > { %v10818_v60 = vld [vmem:[#allocation1] sm:$0xff] }
 0x74e   : > { %10876 = vmatmul.bf16.vlgmr.msrb.gmra.mxu3 %v10818_v60 }
 0x771   : > { %v10086_v51 = vpop.f32.mrf.mxu3 }
 0x774   : > { %v10154_v57 = vpop.f32.mrf.mxu0 }
 0x775   : > { %v10155_v63 = vadd.f32 %v10154_v57, %v10086_v51 }
 0x779   : > { %v10088_v20 = vpop.f32.mrf.mxu3 }
 0x77c   : > { %v10156_v53 = vpop.f32.mrf.mxu0 }
 0x785   : > { %v10246_v21 = vpop.f32.mrf.mxu1 }
 0x786   : > { %v10250_v58 = vadd.f32 %v10246_v21, %v10155_v63 }
 0x78d   : > { %v10248_v56 = vpop.f32.mrf.mxu1 }
 0x794   : > { %v10333_v45 = vpop.f32.mrf.mxu2 }
 0x795   : > { %v10337_v26 = vadd.f32 %v10333_v45, %v10250_v58 }
 0x79c   : > { %v10335_v1 = vpop.f32.mrf.mxu2 }
 0x79d   : > { %v10468_v16 = vpop.f32.mrf.mxu3 }
 0x79e   : > { %v10472_v34 = vadd.f32 %v10468_v16, %v10337_v26 }
 0x7a5   : > { %v10470_v36 = vpop.f32.mrf.mxu3 }
 0x7a8   : > { %v10561_v29 = vpop.f32.mrf.mxu0 }
 0x7a9   : > { %v10565_v9 = vadd.f32 %v10561_v29, %v10472_v34 }
 0x7b0   : > { %v10563_v2 = vpop.f32.mrf.mxu0 }
 0x7b1   : > { %v10649_v28 = vpop.f32.mrf.mxu1 }
 0x7b2   : > { %v10653_v59 = vadd.f32 %v10649_v28, %v10565_v9 }
 0x7b9   : > { %v10651_v46 = vpop.f32.mrf.mxu1 }
 0x7c0   : > { %v10784_v4 = vpop.f32.mrf.mxu2 }
 0x7c1   : > { %v10788_v62 = vadd.f32 %v10784_v4, %v10653_v59 }
 0x7c8   : > { %v10786_v23 = vpop.f32.mrf.mxu2 }
 0x7d1   : > { %v10877_v44 = vpop.f32.mrf.mxu3 }
 0x7d2   : > { %v10881_v15 = vadd.f32 %v10877_v44, %v10788_v62 }
 0x7d4   : > { %v10883_v43 = vrot.slane %v10881_v15, 2  ;;  %v10885_v50 = vsel %vm5175_vm1, %v10881_v15, -inf }
 0x7d6   : > { %v10886_v10 = vsel %vm5175_vm1, %v10883_v43, -inf }
 0x7d7   : > { %v10887_v42 = vmax.f32 %v10885_v50, %v10886_v10 }
 0x7d9   : > { %v10888_v37 = vrot.slane %v10887_v42, 4  ;;  %v10879_v22 = vpop.f32.mrf.mxu3 }
 0x7db   : > { %v10889_v3 = vmax.f32 %v10887_v42, %v10888_v37 }
 0x7dd   : > { %v10890_v40 = vrot.slane %v10889_v3, 2 }
 0x7df   : > { %v10891_v30 = vmax.f32 %v10889_v3, %v10890_v40 }
 0x7e1   : > { %v10892_v33 = vrot.slane %v10891_v30, 1 }
 0x7e3   : > { %v10893_v25 = vmax.f32 %v10891_v30, %v10892_v33 }
 0x7e5   : > { %v10895_v12 = vadd.f32 %v10894_v6, %v10893_v25 }
 0x7e7   : > { %vm10896_vm1 = vcmp.gt.f32.partialorder %v10895_v12, 0.0  ;;  %v10897_v19 = vmul.f32 0.01, %v10895_v12 }
 0x7e9   : > { %v10898_v27 = vsel %vm10896_vm1, %v10895_v12, %v10897_v19 }
 0x7ea   : > { %10899 = vst [vmem:[%s220_s30] sm:$0x1] %v10898_v27 }
 0x7eb   : > { %13080 = shalt.err (!%p13077_p10)
}
 0x7ec   : > { %12865 = dma.vmem_to_hbm [thread:$0]  (%p13219_p3), %s10912_s26, 16, %s10914_s27, %s10901_s28  }
 0x7ed PF: > { %s10925_s22 = sand.u32 1, %s13111_s12   ;;  %p15997_p12 = scmp.ge.s32.totalorder %s13123_s15, 2 }
 0x7ee   : > { %s10926_s11 = scalar_lea.sflag [#allocation8], %s10925_s22 }
 0x7ef   : > { %p12879_p13 = pnand %p15997_p12, %p13185_p6 }
 0x7f1   : > { %p12880_p0 = pneg %p12879_p13 }
 0x7f3   : > { %13106 = dma.done.wait (%p12880_p0), %s10926_s11, 16  }
 0x7f4   : > { %13108 = vsyncadd (%p12880_p0), %s10926_s11, 4294967280  ;;  %p17_p5 = scmp.ge.s32.totalorder %s13209_s6, 4   ;;  %s15998_s12 = smov %s13115_s13 }
 0x7f5   : > { %s15999_s13 = smov %s13119_s14  ;;  %s16000_s14 = smov %s13225_s10 }
 0x7f6   : > { %s16001_s15 = smov %s13209_s6  ;;  %19 = sbr.rel (!%p17_p5) target bundleno = 6 (0x6), region = 145 }
 0x7fb   :  { %10931 = vsyncpa [#allocation7], 1 }
 0x7fc   :  { %10933 = vsyncpa [#allocation7 + $0x1], 1 }
 0x7fd   :  { %10934 = vsyncpa [#allocation10], 1 }
 0x7fe   :  { %10935 = vsyncpa [#allocation8], 1 }
 0x7ff   :  { %10937 = vsyncpa [#allocation8 + $0x1], 1 }

</bundles_post_ra>
